<compile_context>
chip_gen: v7x
topology: tpu7x:2x2x1
jax: 0.10.0
libtpu: 0.0.40
codegen_flags: <defaults>
</compile_context>

<pallas_src>
import functools

import jax
import jax.numpy as jnp
from jax import lax
from jax.experimental import pallas as pl
from jax.experimental.pallas import tpu as pltpu

INPUT_SIZE = 64
HIDDEN = 300
NUM_LAYERS = 3
NUM_CLASSES = 40

H_PAD = 384            # hidden 300 -> 384 (3 lane tiles)
C_PAD = 128            # classes 40 -> 128 (1 lane tile)
_BATCH_ALIGN = 16      # bf16 packed-sublane alignment
_MAX_BATCH_TILE = 128
_FULL_UNROLL_T_MAX = 32
_PARTIAL_UNROLL = 8
_PROJ_ROWS_TARGET = 512   # target M rows per hoisted-projection chunk


def _round_up(n, m):
    return ((n + m - 1) // m) * m


def _pad_axis(a, axis, target):
    pad = target - a.shape[axis]
    if pad <= 0:
        return a
    widths = [(0, 0)] * a.ndim
    widths[axis] = (0, pad)
    return jnp.pad(a, widths)


def _vmem_limit_bytes(T, TB, chunk_t):
    bf, f = 2, 4
    seq = T * TB * H_PAD * bf                       # seq_scr (bf16)
    h = TB * H_PAD * f                              # h_scr
    x_stream = 2 * T * TB * INPUT_SIZE * bf         # double-buffered x tile
    w = ((INPUT_SIZE * H_PAD + 5 * H_PAD * H_PAD + H_PAD * C_PAD) * bf
         + (3 * H_PAD + C_PAD) * f)
    w = 2 * w                                       # double-buffered weights
    out = 2 * TB * C_PAD * f
    transient = 3 * chunk_t * TB * H_PAD * f        # projection temporaries
    total = seq + h + x_stream + w + out + transient
    total = int(total * 1.5) + (8 << 20)            # margin
    return max(32 << 20, min(total, 100 << 20))


# ---------------------------------------------------------------------------
# Fused kernel: 3 tanh-RNN layers + Linear, one batch tile per grid step.
# ---------------------------------------------------------------------------
def _fused_rnn_classifier_kernel(x_ref, wih0_ref, wih12_ref, whh_ref, b_ref,
                                 wlin_ref, blin_ref, out_ref,
                                 seq_scr, h_scr, *, chunk_t):
    """
    x_ref:     (T, TB, 64)         time-major bf16 input (unpadded K)
    wih0_ref:  (64, H_PAD)         layer-0 W_ih^T                     (bf16)
    wih12_ref: (2, H_PAD, H_PAD)   layer-1/2 W_ih^T                   (bf16)
    whh_ref:   (3, H_PAD, H_PAD)   W_hh^T, all layers                 (bf16)
    b_ref:     (3, 1, H_PAD)       b_ih + b_hh, all layers            (f32)
    wlin_ref:  (H_PAD, C_PAD)      classifier W^T                     (bf16)
    blin_ref:  (1, C_PAD)          classifier bias                    (f32)
    out_ref:   (TB, C_PAD)         logits                             (f32)
    seq_scr:   (T, TB, H_PAD)      per-timestep activations, bf16 scratch
    h_scr:     (TB, H_PAD)         running hidden state, f32 scratch
    """
    T, TB, _ = x_ref.shape
    Hp = seq_scr.shape[-1]
    use_carry = TB <= 32
    unroll = True if T <= _FULL_UNROLL_T_MAX else _PARTIAL_UNROLL

    for layer in range(NUM_LAYERS):
        last = layer == NUM_LAYERS - 1
        bias = b_ref[layer]                                  # (1, Hp) f32

        # ---- Hoisted input projection, chunked over T (bounded transients). --
        for t0 in range(0, T, chunk_t):
            tc = min(chunk_t, T - t0)
            if layer == 0:
                inp = x_ref[pl.ds(t0, tc)].reshape(tc * TB, INPUT_SIZE)
                w = wih0_ref[...]
            else:
                inp = seq_scr[pl.ds(t0, tc)].reshape(tc * TB, Hp)
                w = wih12_ref[layer - 1]
            pre = jnp.dot(inp, w, preferred_element_type=jnp.float32) + bias
            seq_scr[pl.ds(t0, tc)] = pre.reshape(tc, TB, Hp).astype(jnp.bfloat16)

        # ---- Serial recurrence: only h @ W_hh sits on the critical path. ----
        if use_carry:
            # Small tile: keep h in vregs as the loop carry (no VMEM round-trip).
            def step(t, h, _layer=layer, _last=last):
                z = seq_scr[t].astype(jnp.float32) + jnp.dot(
                    h.astype(jnp.bfloat16), whh_ref[_layer],
                    preferred_element_type=jnp.float32)
                h_new = jnp.tanh(z)
                if not _last:                 # last layer only needs lh[-1]
                    seq_scr[t] = h_new.astype(jnp.bfloat16)
                return h_new

            h_final = lax.fori_loop(0, T, step,
                                    jnp.zeros((TB, Hp), jnp.float32),
                                    unroll=unroll)
            if last:
                h_scr[...] = h_final
        else:
            # Large tile: two independent half-tiles per step so the tanh /
            # store tail of one half hides under the other's MXU matmul.
            h_scr[...] = jnp.zeros_like(h_scr)
            h0 = _round_up(TB // 2, _BATCH_ALIGN)
            halves = ((0, h0), (h0, TB - h0))

            def step(t, carry, _layer=layer, _last=last):
                for off, sz in halves:
                    z = (seq_scr[t, pl.ds(off, sz), :].astype(jnp.float32)
                         + jnp.dot(h_scr[pl.ds(off, sz), :].astype(jnp.bfloat16),
                                   whh_ref[_layer],
                                   preferred_element_type=jnp.float32))
                    h_new = jnp.tanh(z)
                    h_scr[pl.ds(off, sz), :] = h_new
                    if not _last:
                        seq_scr[t, pl.ds(off, sz), :] = h_new.astype(jnp.bfloat16)
                return carry

            lax.fori_loop(0, T, step, 0, unroll=unroll)

    # ---- Classifier on lh[-1] (hidden state after the last layer). ----
    out_ref[...] = (
        jnp.dot(h_scr[...].astype(jnp.bfloat16), wlin_ref[...],
                preferred_element_type=jnp.float32)
        + blin_ref[...])


# ---------------------------------------------------------------------------
# Wrappers
# ---------------------------------------------------------------------------
def _prep_params(params):
    """Transpose, zero-pad to lane-aligned shapes, cast MXU operands to bf16."""
    layers = params["layers"]
    wih0 = _pad_axis(layers[0]["w_ih"].T, 1, H_PAD)                  # (64, 384)
    wih12 = jnp.stack([
        _pad_axis(_pad_axis(layers[l]["w_ih"].T, 0, H_PAD), 1, H_PAD)
        for l in (1, 2)])                                            # (2, 384, 384)
    whh = jnp.stack([
        _pad_axis(_pad_axis(lp["w_hh"].T, 0, H_PAD), 1, H_PAD)
        for lp in layers])                                           # (3, 384, 384)
    b = jnp.stack([
        _pad_axis((lp["b_ih"] + lp["b_hh"]).reshape(1, HIDDEN), 1, H_PAD)
        for lp in layers])                                           # (3, 1, 384)
    wlin = _pad_axis(_pad_axis(params["linear"]["w"].T, 0, H_PAD), 1, C_PAD)
    blin = _pad_axis(params["linear"]["b"].reshape(1, NUM_CLASSES), 1, C_PAD)
    return (wih0.astype(jnp.bfloat16), wih12.astype(jnp.bfloat16),
            whh.astype(jnp.bfloat16), b.astype(jnp.float32),
            wlin.astype(jnp.bfloat16), blin.astype(jnp.float32))


def rnn_classifier_forward(x_btd, params):
    """x_btd: (B, T, 64) batch-first, like the PyTorch module.  Returns (B, 40)."""
    B, T, D = x_btd.shape
    assert D == INPUT_SIZE, (D, INPUT_SIZE)

    # Batch tiling: 16-aligned (bf16 packed sublanes); prefer >=2 grid steps
    # so the parallel axis can use v7x's second TensorCore.
    Bp0 = _round_up(max(B, _BATCH_ALIGN), _BATCH_ALIGN)
    TB = min(_MAX_BATCH_TILE,
             _round_up(max(pl.cdiv(Bp0, 2), _BATCH_ALIGN), _BATCH_ALIGN))
    Bp = _round_up(Bp0, TB)

    # Time-major, bf16, batch-padded; input_size stays at 64 (no lane padding).
    seq = jnp.transpose(x_btd.astype(jnp.bfloat16), (1, 0, 2))
    seq = _pad_axis(seq, 1, Bp)

    wih0, wih12, whh, b, wlin, blin = _prep_params(params)

    chunk_t = max(1, min(T, _PROJ_ROWS_TARGET // TB))
    kernel = functools.partial(_fused_rnn_classifier_kernel, chunk_t=chunk_t)

    out_padded = pl.pallas_call(
        kernel,
        out_shape=jax.ShapeDtypeStruct((Bp, C_PAD), jnp.float32),
        grid=(Bp // TB,),
        in_specs=[
            pl.BlockSpec((T, TB, INPUT_SIZE), lambda i: (0, i, 0)),
            pl.BlockSpec((INPUT_SIZE, H_PAD), lambda i: (0, 0)),
            pl.BlockSpec((2, H_PAD, H_PAD), lambda i: (0, 0, 0)),
            pl.BlockSpec((3, H_PAD, H_PAD), lambda i: (0, 0, 0)),
            pl.BlockSpec((3, 1, H_PAD), lambda i: (0, 0, 0)),
            pl.BlockSpec((H_PAD, C_PAD), lambda i: (0, 0)),
            pl.BlockSpec((1, C_PAD), lambda i: (0, 0)),
        ],
        out_specs=pl.BlockSpec((TB, C_PAD), lambda i: (i, 0)),
        scratch_shapes=[
            pltpu.VMEM((T, TB, H_PAD), jnp.bfloat16),   # per-timestep activations
            pltpu.VMEM((TB, H_PAD), jnp.float32),       # running hidden state
        ],
        compiler_params=pltpu.CompilerParams(
            dimension_semantics=("parallel",),
            vmem_limit_bytes=_vmem_limit_bytes(T, TB, chunk_t)),
    )(seq, wih0, wih12, whh, b, wlin, blin)

    return out_padded[:B, :NUM_CLASSES]


def rnn_classifier_reference(x_btd, params):
    """Pure-JAX f32 reference matching torch.nn.RNN(tanh) + Linear."""
    h_in = jnp.transpose(x_btd.astype(jnp.float32), (1, 0, 2))   # (T, B, D)
    h = None
    for lp in params["layers"]:
        T = h_in.shape[0]
        h = jnp.zeros((h_in.shape[1], HIDDEN), jnp.float32)
        outs = []
        for t in range(T):
            h = jnp.tanh(h_in[t] @ lp["w_ih"].T + lp["b_ih"]
                         + h @ lp["w_hh"].T + lp["b_hh"])
            outs.append(h)
        h_in = jnp.stack(outs)
    return h @ params["linear"]["w"].T + params["linear"]["b"]


def init_params(key):
    """Deterministic PyTorch-style init: U(-1/sqrt(H), 1/sqrt(H))."""
    bound = 1.0 / jnp.sqrt(jnp.float32(HIDDEN))
    params = {"layers": [], "linear": {}}
    for l in range(NUM_LAYERS):
        d_in = INPUT_SIZE if l == 0 else HIDDEN
        key, k1, k2, k3, k4 = jax.random.split(key, 5)
        params["layers"].append({
            "w_ih": jax.random.uniform(k1, (HIDDEN, d_in), jnp.float32, -bound, bound),
            "w_hh": jax.random.uniform(k2, (HIDDEN, HIDDEN), jnp.float32, -bound, bound),
            "b_ih": jax.random.uniform(k3, (HIDDEN,), jnp.float32, -bound, bound),
            "b_hh": jax.random.uniform(k4, (HIDDEN,), jnp.float32, -bound, bound),
        })
    key, k1, k2 = jax.random.split(key, 3)
    params["linear"]["w"] = jax.random.uniform(
        k1, (NUM_CLASSES, HIDDEN), jnp.float32, -bound, bound)
    params["linear"]["b"] = jax.random.uniform(
        k2, (NUM_CLASSES,), jnp.float32, -bound, bound)
    return params


if __name__ == "__main__":
    key = jax.random.PRNGKey(0)
    key, xk, pk = jax.random.split(key, 3)

    B, T = 2, 8
    x = jax.random.normal(xk, (B, T, INPUT_SIZE), jnp.float32)
    params = init_params(pk)

    fwd = jax.jit(rnn_classifier_forward)
    out = jax.block_until_ready(fwd(x, params))

    assert out.shape == (B, NUM_CLASSES), out.shape
    assert bool(jnp.all(jnp.isfinite(out)))

    # bf16 MXU operands vs. f32 reference -> loose tolerance.
    ref = rnn_classifier_reference(x, params)
    err = float(jnp.max(jnp.abs(out - ref)))
    assert err < 1e-1, f"max abs err {err}"

    print("KERNEL_OK")
</pallas_src>

<mosaic_0001>
module attributes {stable_mosaic.version = 11 : i64} {
  func.func @_fused_rnn_classifier_kernel(%arg0: i32, %arg1: memref<8x16x64xbf16, #tpu.memory_space<vmem>>, %arg2: memref<64x384xbf16, #tpu.memory_space<vmem>>, %arg3: memref<2x384x384xbf16, #tpu.memory_space<vmem>>, %arg4: memref<3x384x384xbf16, #tpu.memory_space<vmem>>, %arg5: memref<3x1x384xf32, #tpu.memory_space<vmem>>, %arg6: memref<384x128xbf16, #tpu.memory_space<vmem>>, %arg7: memref<1x128xf32, #tpu.memory_space<vmem>>, %arg8: memref<16x128xf32, #tpu.memory_space<vmem>>, %arg9: memref<8x16x384xbf16, #tpu.memory_space<vmem>>, %arg10: memref<16x384xf32, #tpu.memory_space<vmem>>) attributes {dimension_semantics = [#tpu.dimension_semantics<parallel>], iteration_bounds = array<i64: 1>, scalar_prefetch = 0 : i64, scratch_operands = 2 : i64, tpu.core_type = #tpu.core_type<tc>, window_params = [{transform_indices = @transform_0, window_bounds = array<i64: 8, 16, 64>}, {pipeline_mode = #tpu.pipeline_mode<synchronous>, transform_indices = @transform_1, window_bounds = array<i64: 64, 384>}, {pipeline_mode = #tpu.pipeline_mode<synchronous>, transform_indices = @transform_2, window_bounds = array<i64: 2, 384, 384>}, {pipeline_mode = #tpu.pipeline_mode<synchronous>, transform_indices = @transform_3, window_bounds = array<i64: 3, 384, 384>}, {pipeline_mode = #tpu.pipeline_mode<synchronous>, transform_indices = @transform_4, window_bounds = array<i64: 3, 1, 384>}, {pipeline_mode = #tpu.pipeline_mode<synchronous>, transform_indices = @transform_5, window_bounds = array<i64: 384, 128>}, {pipeline_mode = #tpu.pipeline_mode<synchronous>, transform_indices = @transform_6, window_bounds = array<i64: 1, 128>}, {transform_indices = @transform_7, window_bounds = array<i64: 16, 128>}]} {
    %c0 = arith.constant 0 : index
    %c0_0 = arith.constant 0 : index
    %c0_1 = arith.constant 0 : index
    %0 = vector.load %arg5[%c0, %c0_0, %c0_1] : memref<3x1x384xf32, #tpu.memory_space<vmem>>, vector<1x1x384xf32>
    %1 = vector.shape_cast %0 : vector<1x1x384xf32> to vector<1x384xf32>
    %c0_2 = arith.constant 0 : index
    %c0_3 = arith.constant 0 : index
    %c0_4 = arith.constant 0 : index
    %2 = vector.load %arg1[%c0_2, %c0_3, %c0_4] : memref<8x16x64xbf16, #tpu.memory_space<vmem>>, vector<8x16x64xbf16>
    %3 = vector.shape_cast %2 : vector<8x16x64xbf16> to vector<128x64xbf16>
    %c0_5 = arith.constant 0 : index
    %c0_6 = arith.constant 0 : index
    %4 = vector.load %arg2[%c0_5, %c0_6] : memref<64x384xbf16, #tpu.memory_space<vmem>>, vector<64x384xbf16>
    %cst = arith.constant dense<0.000000e+00> : vector<128x384xf32>
    %5 = tpu.matmul %3, %4, %cst {dimension_numbers = #tpu.dot_dimension_numbers<[1], [0], [0], [1], [0, 0, 1, 1], [], []>} : vector<128x64xbf16>, vector<64x384xbf16>, vector<128x384xf32> -> vector<128x384xf32>
    %6 = vector.broadcast %1 : vector<1x384xf32> to vector<128x384xf32>
    %7 = arith.addf %5, %6 : vector<128x384xf32>
    %8 = vector.shape_cast %7 : vector<128x384xf32> to vector<8x16x384xf32>
    %9 = arith.truncf %8 : vector<8x16x384xf32> to vector<8x16x384xbf16>
    %c0_7 = arith.constant 0 : index
    %c0_8 = arith.constant 0 : index
    %c0_9 = arith.constant 0 : index
    %10 = vector.load %arg9[%c0_7, %c0_8, %c0_9] : memref<8x16x384xbf16, #tpu.memory_space<vmem>>, vector<8x16x384xbf16>
    tpu.vector_store %arg9[%c0_7, %c0_8, %c0_9], %9 {strides = array<i32>} : memref<8x16x384xbf16, #tpu.memory_space<vmem>>, vector<8x16x384xbf16>,
    %cst_10 = arith.constant 0.000000e+00 : f32
    %11 = vector.broadcast %cst_10 : f32 to vector<16x384xf32>
    %c0_i32 = arith.constant 0 : i32
    %12 = arith.index_cast %c0_i32 : i32 to index
    %c0_11 = arith.constant 0 : index
    %c0_12 = arith.constant 0 : index
    %13 = vector.load %arg9[%12, %c0_11, %c0_12] : memref<8x16x384xbf16, #tpu.memory_space<vmem>>, vector<1x16x384xbf16>
    %14 = vector.shape_cast %13 : vector<1x16x384xbf16> to vector<16x384xbf16>
    %15 = arith.extf %14 : vector<16x384xbf16> to vector<16x384xf32>
    %16 = arith.truncf %11 : vector<16x384xf32> to vector<16x384xbf16>
    %c0_13 = arith.constant 0 : index
    %c0_14 = arith.constant 0 : index
    %c0_15 = arith.constant 0 : index
    %17 = vector.load %arg4[%c0_13, %c0_14, %c0_15] : memref<3x384x384xbf16, #tpu.memory_space<vmem>>, vector<1x384x384xbf16>
    %18 = vector.shape_cast %17 : vector<1x384x384xbf16> to vector<384x384xbf16>
    %cst_16 = arith.constant dense<0.000000e+00> : vector<16x384xf32>
    %19 = tpu.matmul %16, %18, %cst_16 {dimension_numbers = #tpu.dot_dimension_numbers<[1], [0], [0], [1], [0, 0, 1, 1], [], []>} : vector<16x384xbf16>, vector<384x384xbf16>, vector<16x384xf32> -> vector<16x384xf32>
    %20 = arith.addf %15, %19 : vector<16x384xf32>
    %21 = math.tanh %20 : vector<16x384xf32>
    %22 = arith.truncf %21 : vector<16x384xf32> to vector<16x384xbf16>
    %23 = arith.index_cast %c0_i32 : i32 to index
    %c0_17 = arith.constant 0 : index
    %c0_18 = arith.constant 0 : index
    %24 = vector.load %arg9[%23, %c0_17, %c0_18] : memref<8x16x384xbf16, #tpu.memory_space<vmem>>, vector<1x16x384xbf16>
    %25 = vector.shape_cast %24 : vector<1x16x384xbf16> to vector<16x384xbf16>
    %26 = vector.shape_cast %22 : vector<16x384xbf16> to vector<1x16x384xbf16>
    tpu.vector_store %arg9[%23, %c0_17, %c0_18], %26 {strides = array<i32>} : memref<8x16x384xbf16, #tpu.memory_space<vmem>>, vector<1x16x384xbf16>,
    %c1_i32 = arith.constant 1 : i32
    %27 = arith.index_cast %c1_i32 : i32 to index
    %c0_19 = arith.constant 0 : index
    %c0_20 = arith.constant 0 : index
    %28 = vector.load %arg9[%27, %c0_19, %c0_20] : memref<8x16x384xbf16, #tpu.memory_space<vmem>>, vector<1x16x384xbf16>
    %29 = vector.shape_cast %28 : vector<1x16x384xbf16> to vector<16x384xbf16>
    %30 = arith.extf %29 : vector<16x384xbf16> to vector<16x384xf32>
    %31 = arith.truncf %21 : vector<16x384xf32> to vector<16x384xbf16>
    %c0_21 = arith.constant 0 : index
    %c0_22 = arith.constant 0 : index
    %c0_23 = arith.constant 0 : index
    %32 = vector.load %arg4[%c0_21, %c0_22, %c0_23] : memref<3x384x384xbf16, #tpu.memory_space<vmem>>, vector<1x384x384xbf16>
    %33 = vector.shape_cast %32 : vector<1x384x384xbf16> to vector<384x384xbf16>
    %cst_24 = arith.constant dense<0.000000e+00> : vector<16x384xf32>
    %34 = tpu.matmul %31, %33, %cst_24 {dimension_numbers = #tpu.dot_dimension_numbers<[1], [0], [0], [1], [0, 0, 1, 1], [], []>} : vector<16x384xbf16>, vector<384x384xbf16>, vector<16x384xf32> -> vector<16x384xf32>
    %35 = arith.addf %30, %34 : vector<16x384xf32>
    %36 = math.tanh %35 : vector<16x384xf32>
    %37 = arith.truncf %36 : vector<16x384xf32> to vector<16x384xbf16>
    %38 = arith.index_cast %c1_i32 : i32 to index
    %c0_25 = arith.constant 0 : index
    %c0_26 = arith.constant 0 : index
    %39 = vector.load %arg9[%38, %c0_25, %c0_26] : memref<8x16x384xbf16, #tpu.memory_space<vmem>>, vector<1x16x384xbf16>
    %40 = vector.shape_cast %39 : vector<1x16x384xbf16> to vector<16x384xbf16>
    %41 = vector.shape_cast %37 : vector<16x384xbf16> to vector<1x16x384xbf16>
    tpu.vector_store %arg9[%38, %c0_25, %c0_26], %41 {strides = array<i32>} : memref<8x16x384xbf16, #tpu.memory_space<vmem>>, vector<1x16x384xbf16>,
    %c2_i32 = arith.constant 2 : i32
    %42 = arith.index_cast %c2_i32 : i32 to index
    %c0_27 = arith.constant 0 : index
    %c0_28 = arith.constant 0 : index
    %43 = vector.load %arg9[%42, %c0_27, %c0_28] : memref<8x16x384xbf16, #tpu.memory_space<vmem>>, vector<1x16x384xbf16>
    %44 = vector.shape_cast %43 : vector<1x16x384xbf16> to vector<16x384xbf16>
    %45 = arith.extf %44 : vector<16x384xbf16> to vector<16x384xf32>
    %46 = arith.truncf %36 : vector<16x384xf32> to vector<16x384xbf16>
    %c0_29 = arith.constant 0 : index
    %c0_30 = arith.constant 0 : index
    %c0_31 = arith.constant 0 : index
    %47 = vector.load %arg4[%c0_29, %c0_30, %c0_31] : memref<3x384x384xbf16, #tpu.memory_space<vmem>>, vector<1x384x384xbf16>
    %48 = vector.shape_cast %47 : vector<1x384x384xbf16> to vector<384x384xbf16>
    %cst_32 = arith.constant dense<0.000000e+00> : vector<16x384xf32>
    %49 = tpu.matmul %46, %48, %cst_32 {dimension_numbers = #tpu.dot_dimension_numbers<[1], [0], [0], [1], [0, 0, 1, 1], [], []>} : vector<16x384xbf16>, vector<384x384xbf16>, vector<16x384xf32> -> vector<16x384xf32>
    %50 = arith.addf %45, %49 : vector<16x384xf32>
    %51 = math.tanh %50 : vector<16x384xf32>
    %52 = arith.truncf %51 : vector<16x384xf32> to vector<16x384xbf16>
    %53 = arith.index_cast %c2_i32 : i32 to index
    %c0_33 = arith.constant 0 : index
    %c0_34 = arith.constant 0 : index
    %54 = vector.load %arg9[%53, %c0_33, %c0_34] : memref<8x16x384xbf16, #tpu.memory_space<vmem>>, vector<1x16x384xbf16>
    %55 = vector.shape_cast %54 : vector<1x16x384xbf16> to vector<16x384xbf16>
    %56 = vector.shape_cast %52 : vector<16x384xbf16> to vector<1x16x384xbf16>
    tpu.vector_store %arg9[%53, %c0_33, %c0_34], %56 {strides = array<i32>} : memref<8x16x384xbf16, #tpu.memory_space<vmem>>, vector<1x16x384xbf16>,
    %c3_i32 = arith.constant 3 : i32
    %57 = arith.index_cast %c3_i32 : i32 to index
    %c0_35 = arith.constant 0 : index
    %c0_36 = arith.constant 0 : index
    %58 = vector.load %arg9[%57, %c0_35, %c0_36] : memref<8x16x384xbf16, #tpu.memory_space<vmem>>, vector<1x16x384xbf16>
    %59 = vector.shape_cast %58 : vector<1x16x384xbf16> to vector<16x384xbf16>
    %60 = arith.extf %59 : vector<16x384xbf16> to vector<16x384xf32>
    %61 = arith.truncf %51 : vector<16x384xf32> to vector<16x384xbf16>
    %c0_37 = arith.constant 0 : index
    %c0_38 = arith.constant 0 : index
    %c0_39 = arith.constant 0 : index
    %62 = vector.load %arg4[%c0_37, %c0_38, %c0_39] : memref<3x384x384xbf16, #tpu.memory_space<vmem>>, vector<1x384x384xbf16>
    %63 = vector.shape_cast %62 : vector<1x384x384xbf16> to vector<384x384xbf16>
    %cst_40 = arith.constant dense<0.000000e+00> : vector<16x384xf32>
    %64 = tpu.matmul %61, %63, %cst_40 {dimension_numbers = #tpu.dot_dimension_numbers<[1], [0], [0], [1], [0, 0, 1, 1], [], []>} : vector<16x384xbf16>, vector<384x384xbf16>, vector<16x384xf32> -> vector<16x384xf32>
    %65 = arith.addf %60, %64 : vector<16x384xf32>
    %66 = math.tanh %65 : vector<16x384xf32>
    %67 = arith.truncf %66 : vector<16x384xf32> to vector<16x384xbf16>
    %68 = arith.index_cast %c3_i32 : i32 to index
    %c0_41 = arith.constant 0 : index
    %c0_42 = arith.constant 0 : index
    %69 = vector.load %arg9[%68, %c0_41, %c0_42] : memref<8x16x384xbf16, #tpu.memory_space<vmem>>, vector<1x16x384xbf16>
    %70 = vector.shape_cast %69 : vector<1x16x384xbf16> to vector<16x384xbf16>
    %71 = vector.shape_cast %67 : vector<16x384xbf16> to vector<1x16x384xbf16>
    tpu.vector_store %arg9[%68, %c0_41, %c0_42], %71 {strides = array<i32>} : memref<8x16x384xbf16, #tpu.memory_space<vmem>>, vector<1x16x384xbf16>,
    %c4_i32 = arith.constant 4 : i32
    %72 = arith.index_cast %c4_i32 : i32 to index
    %c0_43 = arith.constant 0 : index
    %c0_44 = arith.constant 0 : index
    %73 = vector.load %arg9[%72, %c0_43, %c0_44] : memref<8x16x384xbf16, #tpu.memory_space<vmem>>, vector<1x16x384xbf16>
    %74 = vector.shape_cast %73 : vector<1x16x384xbf16> to vector<16x384xbf16>
    %75 = arith.extf %74 : vector<16x384xbf16> to vector<16x384xf32>
    %76 = arith.truncf %66 : vector<16x384xf32> to vector<16x384xbf16>
    %c0_45 = arith.constant 0 : index
    %c0_46 = arith.constant 0 : index
    %c0_47 = arith.constant 0 : index
    %77 = vector.load %arg4[%c0_45, %c0_46, %c0_47] : memref<3x384x384xbf16, #tpu.memory_space<vmem>>, vector<1x384x384xbf16>
    %78 = vector.shape_cast %77 : vector<1x384x384xbf16> to vector<384x384xbf16>
    %cst_48 = arith.constant dense<0.000000e+00> : vector<16x384xf32>
    %79 = tpu.matmul %76, %78, %cst_48 {dimension_numbers = #tpu.dot_dimension_numbers<[1], [0], [0], [1], [0, 0, 1, 1], [], []>} : vector<16x384xbf16>, vector<384x384xbf16>, vector<16x384xf32> -> vector<16x384xf32>
    %80 = arith.addf %75, %79 : vector<16x384xf32>
    %81 = math.tanh %80 : vector<16x384xf32>
    %82 = arith.truncf %81 : vector<16x384xf32> to vector<16x384xbf16>
    %83 = arith.index_cast %c4_i32 : i32 to index
    %c0_49 = arith.constant 0 : index
    %c0_50 = arith.constant 0 : index
    %84 = vector.load %arg9[%83, %c0_49, %c0_50] : memref<8x16x384xbf16, #tpu.memory_space<vmem>>, vector<1x16x384xbf16>
    %85 = vector.shape_cast %84 : vector<1x16x384xbf16> to vector<16x384xbf16>
    %86 = vector.shape_cast %82 : vector<16x384xbf16> to vector<1x16x384xbf16>
    tpu.vector_store %arg9[%83, %c0_49, %c0_50], %86 {strides = array<i32>} : memref<8x16x384xbf16, #tpu.memory_space<vmem>>, vector<1x16x384xbf16>,
    %c5_i32 = arith.constant 5 : i32
    %87 = arith.index_cast %c5_i32 : i32 to index
    %c0_51 = arith.constant 0 : index
    %c0_52 = arith.constant 0 : index
    %88 = vector.load %arg9[%87, %c0_51, %c0_52] : memref<8x16x384xbf16, #tpu.memory_space<vmem>>, vector<1x16x384xbf16>
    %89 = vector.shape_cast %88 : vector<1x16x384xbf16> to vector<16x384xbf16>
    %90 = arith.extf %89 : vector<16x384xbf16> to vector<16x384xf32>
    %91 = arith.truncf %81 : vector<16x384xf32> to vector<16x384xbf16>
    %c0_53 = arith.constant 0 : index
    %c0_54 = arith.constant 0 : index
    %c0_55 = arith.constant 0 : index
    %92 = vector.load %arg4[%c0_53, %c0_54, %c0_55] : memref<3x384x384xbf16, #tpu.memory_space<vmem>>, vector<1x384x384xbf16>
    %93 = vector.shape_cast %92 : vector<1x384x384xbf16> to vector<384x384xbf16>
    %cst_56 = arith.constant dense<0.000000e+00> : vector<16x384xf32>
    %94 = tpu.matmul %91, %93, %cst_56 {dimension_numbers = #tpu.dot_dimension_numbers<[1], [0], [0], [1], [0, 0, 1, 1], [], []>} : vector<16x384xbf16>, vector<384x384xbf16>, vector<16x384xf32> -> vector<16x384xf32>
    %95 = arith.addf %90, %94 : vector<16x384xf32>
    %96 = math.tanh %95 : vector<16x384xf32>
    %97 = arith.truncf %96 : vector<16x384xf32> to vector<16x384xbf16>
    %98 = arith.index_cast %c5_i32 : i32 to index
    %c0_57 = arith.constant 0 : index
    %c0_58 = arith.constant 0 : index
    %99 = vector.load %arg9[%98, %c0_57, %c0_58] : memref<8x16x384xbf16, #tpu.memory_space<vmem>>, vector<1x16x384xbf16>
    %100 = vector.shape_cast %99 : vector<1x16x384xbf16> to vector<16x384xbf16>
    %101 = vector.shape_cast %97 : vector<16x384xbf16> to vector<1x16x384xbf16>
    tpu.vector_store %arg9[%98, %c0_57, %c0_58], %101 {strides = array<i32>} : memref<8x16x384xbf16, #tpu.memory_space<vmem>>, vector<1x16x384xbf16>,
    %c6_i32 = arith.constant 6 : i32
    %102 = arith.index_cast %c6_i32 : i32 to index
    %c0_59 = arith.constant 0 : index
    %c0_60 = arith.constant 0 : index
    %103 = vector.load %arg9[%102, %c0_59, %c0_60] : memref<8x16x384xbf16, #tpu.memory_space<vmem>>, vector<1x16x384xbf16>
    %104 = vector.shape_cast %103 : vector<1x16x384xbf16> to vector<16x384xbf16>
    %105 = arith.extf %104 : vector<16x384xbf16> to vector<16x384xf32>
    %106 = arith.truncf %96 : vector<16x384xf32> to vector<16x384xbf16>
    %c0_61 = arith.constant 0 : index
    %c0_62 = arith.constant 0 : index
    %c0_63 = arith.constant 0 : index
    %107 = vector.load %arg4[%c0_61, %c0_62, %c0_63] : memref<3x384x384xbf16, #tpu.memory_space<vmem>>, vector<1x384x384xbf16>
    %108 = vector.shape_cast %107 : vector<1x384x384xbf16> to vector<384x384xbf16>
    %cst_64 = arith.constant dense<0.000000e+00> : vector<16x384xf32>
    %109 = tpu.matmul %106, %108, %cst_64 {dimension_numbers = #tpu.dot_dimension_numbers<[1], [0], [0], [1], [0, 0, 1, 1], [], []>} : vector<16x384xbf16>, vector<384x384xbf16>, vector<16x384xf32> -> vector<16x384xf32>
    %110 = arith.addf %105, %109 : vector<16x384xf32>
    %111 = math.tanh %110 : vector<16x384xf32>
    %112 = arith.truncf %111 : vector<16x384xf32> to vector<16x384xbf16>
    %113 = arith.index_cast %c6_i32 : i32 to index
    %c0_65 = arith.constant 0 : index
    %c0_66 = arith.constant 0 : index
    %114 = vector.load %arg9[%113, %c0_65, %c0_66] : memref<8x16x384xbf16, #tpu.memory_space<vmem>>, vector<1x16x384xbf16>
    %115 = vector.shape_cast %114 : vector<1x16x384xbf16> to vector<16x384xbf16>
    %116 = vector.shape_cast %112 : vector<16x384xbf16> to vector<1x16x384xbf16>
    tpu.vector_store %arg9[%113, %c0_65, %c0_66], %116 {strides = array<i32>} : memref<8x16x384xbf16, #tpu.memory_space<vmem>>, vector<1x16x384xbf16>,
    %c7_i32 = arith.constant 7 : i32
    %117 = arith.index_cast %c7_i32 : i32 to index
    %c0_67 = arith.constant 0 : index
    %c0_68 = arith.constant 0 : index
    %118 = vector.load %arg9[%117, %c0_67, %c0_68] : memref<8x16x384xbf16, #tpu.memory_space<vmem>>, vector<1x16x384xbf16>
    %119 = vector.shape_cast %118 : vector<1x16x384xbf16> to vector<16x384xbf16>
    %120 = arith.extf %119 : vector<16x384xbf16> to vector<16x384xf32>
    %121 = arith.truncf %111 : vector<16x384xf32> to vector<16x384xbf16>
    %c0_69 = arith.constant 0 : index
    %c0_70 = arith.constant 0 : index
    %c0_71 = arith.constant 0 : index
    %122 = vector.load %arg4[%c0_69, %c0_70, %c0_71] : memref<3x384x384xbf16, #tpu.memory_space<vmem>>, vector<1x384x384xbf16>
    %123 = vector.shape_cast %122 : vector<1x384x384xbf16> to vector<384x384xbf16>
    %cst_72 = arith.constant dense<0.000000e+00> : vector<16x384xf32>
    %124 = tpu.matmul %121, %123, %cst_72 {dimension_numbers = #tpu.dot_dimension_numbers<[1], [0], [0], [1], [0, 0, 1, 1], [], []>} : vector<16x384xbf16>, vector<384x384xbf16>, vector<16x384xf32> -> vector<16x384xf32>
    %125 = arith.addf %120, %124 : vector<16x384xf32>
    %126 = math.tanh %125 : vector<16x384xf32>
    %127 = arith.truncf %126 : vector<16x384xf32> to vector<16x384xbf16>
    %128 = arith.index_cast %c7_i32 : i32 to index
    %c0_73 = arith.constant 0 : index
    %c0_74 = arith.constant 0 : index
    %129 = vector.load %arg9[%128, %c0_73, %c0_74] : memref<8x16x384xbf16, #tpu.memory_space<vmem>>, vector<1x16x384xbf16>
    %130 = vector.shape_cast %129 : vector<1x16x384xbf16> to vector<16x384xbf16>
    %131 = vector.shape_cast %127 : vector<16x384xbf16> to vector<1x16x384xbf16>
    tpu.vector_store %arg9[%128, %c0_73, %c0_74], %131 {strides = array<i32>} : memref<8x16x384xbf16, #tpu.memory_space<vmem>>, vector<1x16x384xbf16>,
    %c8_i32 = arith.constant 8 : i32
    %c1 = arith.constant 1 : index
    %c0_75 = arith.constant 0 : index
    %c0_76 = arith.constant 0 : index
    %132 = vector.load %arg5[%c1, %c0_75, %c0_76] : memref<3x1x384xf32, #tpu.memory_space<vmem>>, vector<1x1x384xf32>
    %133 = vector.shape_cast %132 : vector<1x1x384xf32> to vector<1x384xf32>
    %c0_77 = arith.constant 0 : index
    %c0_78 = arith.constant 0 : index
    %c0_79 = arith.constant 0 : index
    %134 = vector.load %arg9[%c0_77, %c0_78, %c0_79] : memref<8x16x384xbf16, #tpu.memory_space<vmem>>, vector<8x16x384xbf16>
    %135 = vector.shape_cast %134 : vector<8x16x384xbf16> to vector<128x384xbf16>
    %c0_80 = arith.constant 0 : index
    %c0_81 = arith.constant 0 : index
    %c0_82 = arith.constant 0 : index
    %136 = vector.load %arg3[%c0_80, %c0_81, %c0_82] : memref<2x384x384xbf16, #tpu.memory_space<vmem>>, vector<1x384x384xbf16>
    %137 = vector.shape_cast %136 : vector<1x384x384xbf16> to vector<384x384xbf16>
    %cst_83 = arith.constant dense<0.000000e+00> : vector<128x384xf32>
    %138 = tpu.matmul %135, %137, %cst_83 {dimension_numbers = #tpu.dot_dimension_numbers<[1], [0], [0], [1], [0, 0, 1, 1], [], []>} : vector<128x384xbf16>, vector<384x384xbf16>, vector<128x384xf32> -> vector<128x384xf32>
    %139 = vector.broadcast %133 : vector<1x384xf32> to vector<128x384xf32>
    %140 = arith.addf %138, %139 : vector<128x384xf32>
    %141 = vector.shape_cast %140 : vector<128x384xf32> to vector<8x16x384xf32>
    %142 = arith.truncf %141 : vector<8x16x384xf32> to vector<8x16x384xbf16>
    %c0_84 = arith.constant 0 : index
    %c0_85 = arith.constant 0 : index
    %c0_86 = arith.constant 0 : index
    %143 = vector.load %arg9[%c0_84, %c0_85, %c0_86] : memref<8x16x384xbf16, #tpu.memory_space<vmem>>, vector<8x16x384xbf16>
    tpu.vector_store %arg9[%c0_84, %c0_85, %c0_86], %142 {strides = array<i32>} : memref<8x16x384xbf16, #tpu.memory_space<vmem>>, vector<8x16x384xbf16>,
    %cst_87 = arith.constant 0.000000e+00 : f32
    %144 = vector.broadcast %cst_87 : f32 to vector<16x384xf32>
    %c0_i32_88 = arith.constant 0 : i32
    %145 = arith.index_cast %c0_i32_88 : i32 to index
    %c0_89 = arith.constant 0 : index
    %c0_90 = arith.constant 0 : index
    %146 = vector.load %arg9[%145, %c0_89, %c0_90] : memref<8x16x384xbf16, #tpu.memory_space<vmem>>, vector<1x16x384xbf16>
    %147 = vector.shape_cast %146 : vector<1x16x384xbf16> to vector<16x384xbf16>
    %148 = arith.extf %147 : vector<16x384xbf16> to vector<16x384xf32>
    %149 = arith.truncf %144 : vector<16x384xf32> to vector<16x384xbf16>
    %c1_91 = arith.constant 1 : index
    %c0_92 = arith.constant 0 : index
    %c0_93 = arith.constant 0 : index
    %150 = vector.load %arg4[%c1_91, %c0_92, %c0_93] : memref<3x384x384xbf16, #tpu.memory_space<vmem>>, vector<1x384x384xbf16>
    %151 = vector.shape_cast %150 : vector<1x384x384xbf16> to vector<384x384xbf16>
    %cst_94 = arith.constant dense<0.000000e+00> : vector<16x384xf32>
    %152 = tpu.matmul %149, %151, %cst_94 {dimension_numbers = #tpu.dot_dimension_numbers<[1], [0], [0], [1], [0, 0, 1, 1], [], []>} : vector<16x384xbf16>, vector<384x384xbf16>, vector<16x384xf32> -> vector<16x384xf32>
    %153 = arith.addf %148, %152 : vector<16x384xf32>
    %154 = math.tanh %153 : vector<16x384xf32>
    %155 = arith.truncf %154 : vector<16x384xf32> to vector<16x384xbf16>
    %156 = arith.index_cast %c0_i32_88 : i32 to index
    %c0_95 = arith.constant 0 : index
    %c0_96 = arith.constant 0 : index
    %157 = vector.load %arg9[%156, %c0_95, %c0_96] : memref<8x16x384xbf16, #tpu.memory_space<vmem>>, vector<1x16x384xbf16>
    %158 = vector.shape_cast %157 : vector<1x16x384xbf16> to vector<16x384xbf16>
    %159 = vector.shape_cast %155 : vector<16x384xbf16> to vector<1x16x384xbf16>
    tpu.vector_store %arg9[%156, %c0_95, %c0_96], %159 {strides = array<i32>} : memref<8x16x384xbf16, #tpu.memory_space<vmem>>, vector<1x16x384xbf16>,
    %c1_i32_97 = arith.constant 1 : i32
    %160 = arith.index_cast %c1_i32_97 : i32 to index
    %c0_98 = arith.constant 0 : index
    %c0_99 = arith.constant 0 : index
    %161 = vector.load %arg9[%160, %c0_98, %c0_99] : memref<8x16x384xbf16, #tpu.memory_space<vmem>>, vector<1x16x384xbf16>
    %162 = vector.shape_cast %161 : vector<1x16x384xbf16> to vector<16x384xbf16>
    %163 = arith.extf %162 : vector<16x384xbf16> to vector<16x384xf32>
    %164 = arith.truncf %154 : vector<16x384xf32> to vector<16x384xbf16>
    %c1_100 = arith.constant 1 : index
    %c0_101 = arith.constant 0 : index
    %c0_102 = arith.constant 0 : index
    %165 = vector.load %arg4[%c1_100, %c0_101, %c0_102] : memref<3x384x384xbf16, #tpu.memory_space<vmem>>, vector<1x384x384xbf16>
    %166 = vector.shape_cast %165 : vector<1x384x384xbf16> to vector<384x384xbf16>
    %cst_103 = arith.constant dense<0.000000e+00> : vector<16x384xf32>
    %167 = tpu.matmul %164, %166, %cst_103 {dimension_numbers = #tpu.dot_dimension_numbers<[1], [0], [0], [1], [0, 0, 1, 1], [], []>} : vector<16x384xbf16>, vector<384x384xbf16>, vector<16x384xf32> -> vector<16x384xf32>
    %168 = arith.addf %163, %167 : vector<16x384xf32>
    %169 = math.tanh %168 : vector<16x384xf32>
    %170 = arith.truncf %169 : vector<16x384xf32> to vector<16x384xbf16>
    %171 = arith.index_cast %c1_i32_97 : i32 to index
    %c0_104 = arith.constant 0 : index
    %c0_105 = arith.constant 0 : index
    %172 = vector.load %arg9[%171, %c0_104, %c0_105] : memref<8x16x384xbf16, #tpu.memory_space<vmem>>, vector<1x16x384xbf16>
    %173 = vector.shape_cast %172 : vector<1x16x384xbf16> to vector<16x384xbf16>
    %174 = vector.shape_cast %170 : vector<16x384xbf16> to vector<1x16x384xbf16>
    tpu.vector_store %arg9[%171, %c0_104, %c0_105], %174 {strides = array<i32>} : memref<8x16x384xbf16, #tpu.memory_space<vmem>>, vector<1x16x384xbf16>,
    %c2_i32_106 = arith.constant 2 : i32
    %175 = arith.index_cast %c2_i32_106 : i32 to index
    %c0_107 = arith.constant 0 : index
    %c0_108 = arith.constant 0 : index
    %176 = vector.load %arg9[%175, %c0_107, %c0_108] : memref<8x16x384xbf16, #tpu.memory_space<vmem>>, vector<1x16x384xbf16>
    %177 = vector.shape_cast %176 : vector<1x16x384xbf16> to vector<16x384xbf16>
    %178 = arith.extf %177 : vector<16x384xbf16> to vector<16x384xf32>
    %179 = arith.truncf %169 : vector<16x384xf32> to vector<16x384xbf16>
    %c1_109 = arith.constant 1 : index
    %c0_110 = arith.constant 0 : index
    %c0_111 = arith.constant 0 : index
    %180 = vector.load %arg4[%c1_109, %c0_110, %c0_111] : memref<3x384x384xbf16, #tpu.memory_space<vmem>>, vector<1x384x384xbf16>
    %181 = vector.shape_cast %180 : vector<1x384x384xbf16> to vector<384x384xbf16>
    %cst_112 = arith.constant dense<0.000000e+00> : vector<16x384xf32>
    %182 = tpu.matmul %179, %181, %cst_112 {dimension_numbers = #tpu.dot_dimension_numbers<[1], [0], [0], [1], [0, 0, 1, 1], [], []>} : vector<16x384xbf16>, vector<384x384xbf16>, vector<16x384xf32> -> vector<16x384xf32>
    %183 = arith.addf %178, %182 : vector<16x384xf32>
    %184 = math.tanh %183 : vector<16x384xf32>
    %185 = arith.truncf %184 : vector<16x384xf32> to vector<16x384xbf16>
    %186 = arith.index_cast %c2_i32_106 : i32 to index
    %c0_113 = arith.constant 0 : index
    %c0_114 = arith.constant 0 : index
    %187 = vector.load %arg9[%186, %c0_113, %c0_114] : memref<8x16x384xbf16, #tpu.memory_space<vmem>>, vector<1x16x384xbf16>
    %188 = vector.shape_cast %187 : vector<1x16x384xbf16> to vector<16x384xbf16>
    %189 = vector.shape_cast %185 : vector<16x384xbf16> to vector<1x16x384xbf16>
    tpu.vector_store %arg9[%186, %c0_113, %c0_114], %189 {strides = array<i32>} : memref<8x16x384xbf16, #tpu.memory_space<vmem>>, vector<1x16x384xbf16>,
    %c3_i32_115 = arith.constant 3 : i32
    %190 = arith.index_cast %c3_i32_115 : i32 to index
    %c0_116 = arith.constant 0 : index
    %c0_117 = arith.constant 0 : index
    %191 = vector.load %arg9[%190, %c0_116, %c0_117] : memref<8x16x384xbf16, #tpu.memory_space<vmem>>, vector<1x16x384xbf16>
    %192 = vector.shape_cast %191 : vector<1x16x384xbf16> to vector<16x384xbf16>
    %193 = arith.extf %192 : vector<16x384xbf16> to vector<16x384xf32>
    %194 = arith.truncf %184 : vector<16x384xf32> to vector<16x384xbf16>
    %c1_118 = arith.constant 1 : index
    %c0_119 = arith.constant 0 : index
    %c0_120 = arith.constant 0 : index
    %195 = vector.load %arg4[%c1_118, %c0_119, %c0_120] : memref<3x384x384xbf16, #tpu.memory_space<vmem>>, vector<1x384x384xbf16>
    %196 = vector.shape_cast %195 : vector<1x384x384xbf16> to vector<384x384xbf16>
    %cst_121 = arith.constant dense<0.000000e+00> : vector<16x384xf32>
    %197 = tpu.matmul %194, %196, %cst_121 {dimension_numbers = #tpu.dot_dimension_numbers<[1], [0], [0], [1], [0, 0, 1, 1], [], []>} : vector<16x384xbf16>, vector<384x384xbf16>, vector<16x384xf32> -> vector<16x384xf32>
    %198 = arith.addf %193, %197 : vector<16x384xf32>
    %199 = math.tanh %198 : vector<16x384xf32>
    %200 = arith.truncf %199 : vector<16x384xf32> to vector<16x384xbf16>
    %201 = arith.index_cast %c3_i32_115 : i32 to index
    %c0_122 = arith.constant 0 : index
    %c0_123 = arith.constant 0 : index
    %202 = vector.load %arg9[%201, %c0_122, %c0_123] : memref<8x16x384xbf16, #tpu.memory_space<vmem>>, vector<1x16x384xbf16>
    %203 = vector.shape_cast %202 : vector<1x16x384xbf16> to vector<16x384xbf16>
    %204 = vector.shape_cast %200 : vector<16x384xbf16> to vector<1x16x384xbf16>
    tpu.vector_store %arg9[%201, %c0_122, %c0_123], %204 {strides = array<i32>} : memref<8x16x384xbf16, #tpu.memory_space<vmem>>, vector<1x16x384xbf16>,
    %c4_i32_124 = arith.constant 4 : i32
    %205 = arith.index_cast %c4_i32_124 : i32 to index
    %c0_125 = arith.constant 0 : index
    %c0_126 = arith.constant 0 : index
    %206 = vector.load %arg9[%205, %c0_125, %c0_126] : memref<8x16x384xbf16, #tpu.memory_space<vmem>>, vector<1x16x384xbf16>
    %207 = vector.shape_cast %206 : vector<1x16x384xbf16> to vector<16x384xbf16>
    %208 = arith.extf %207 : vector<16x384xbf16> to vector<16x384xf32>
    %209 = arith.truncf %199 : vector<16x384xf32> to vector<16x384xbf16>
    %c1_127 = arith.constant 1 : index
    %c0_128 = arith.constant 0 : index
    %c0_129 = arith.constant 0 : index
    %210 = vector.load %arg4[%c1_127, %c0_128, %c0_129] : memref<3x384x384xbf16, #tpu.memory_space<vmem>>, vector<1x384x384xbf16>
    %211 = vector.shape_cast %210 : vector<1x384x384xbf16> to vector<384x384xbf16>
    %cst_130 = arith.constant dense<0.000000e+00> : vector<16x384xf32>
    %212 = tpu.matmul %209, %211, %cst_130 {dimension_numbers = #tpu.dot_dimension_numbers<[1], [0], [0], [1], [0, 0, 1, 1], [], []>} : vector<16x384xbf16>, vector<384x384xbf16>, vector<16x384xf32> -> vector<16x384xf32>
    %213 = arith.addf %208, %212 : vector<16x384xf32>
    %214 = math.tanh %213 : vector<16x384xf32>
    %215 = arith.truncf %214 : vector<16x384xf32> to vector<16x384xbf16>
    %216 = arith.index_cast %c4_i32_124 : i32 to index
    %c0_131 = arith.constant 0 : index
    %c0_132 = arith.constant 0 : index
    %217 = vector.load %arg9[%216, %c0_131, %c0_132] : memref<8x16x384xbf16, #tpu.memory_space<vmem>>, vector<1x16x384xbf16>
    %218 = vector.shape_cast %217 : vector<1x16x384xbf16> to vector<16x384xbf16>
    %219 = vector.shape_cast %215 : vector<16x384xbf16> to vector<1x16x384xbf16>
    tpu.vector_store %arg9[%216, %c0_131, %c0_132], %219 {strides = array<i32>} : memref<8x16x384xbf16, #tpu.memory_space<vmem>>, vector<1x16x384xbf16>,
    %c5_i32_133 = arith.constant 5 : i32
    %220 = arith.index_cast %c5_i32_133 : i32 to index
    %c0_134 = arith.constant 0 : index
    %c0_135 = arith.constant 0 : index
    %221 = vector.load %arg9[%220, %c0_134, %c0_135] : memref<8x16x384xbf16, #tpu.memory_space<vmem>>, vector<1x16x384xbf16>
    %222 = vector.shape_cast %221 : vector<1x16x384xbf16> to vector<16x384xbf16>
    %223 = arith.extf %222 : vector<16x384xbf16> to vector<16x384xf32>
    %224 = arith.truncf %214 : vector<16x384xf32> to vector<16x384xbf16>
    %c1_136 = arith.constant 1 : index
    %c0_137 = arith.constant 0 : index
    %c0_138 = arith.constant 0 : index
    %225 = vector.load %arg4[%c1_136, %c0_137, %c0_138] : memref<3x384x384xbf16, #tpu.memory_space<vmem>>, vector<1x384x384xbf16>
    %226 = vector.shape_cast %225 : vector<1x384x384xbf16> to vector<384x384xbf16>
    %cst_139 = arith.constant dense<0.000000e+00> : vector<16x384xf32>
    %227 = tpu.matmul %224, %226, %cst_139 {dimension_numbers = #tpu.dot_dimension_numbers<[1], [0], [0], [1], [0, 0, 1, 1], [], []>} : vector<16x384xbf16>, vector<384x384xbf16>, vector<16x384xf32> -> vector<16x384xf32>
    %228 = arith.addf %223, %227 : vector<16x384xf32>
    %229 = math.tanh %228 : vector<16x384xf32>
    %230 = arith.truncf %229 : vector<16x384xf32> to vector<16x384xbf16>
    %231 = arith.index_cast %c5_i32_133 : i32 to index
    %c0_140 = arith.constant 0 : index
    %c0_141 = arith.constant 0 : index
    %232 = vector.load %arg9[%231, %c0_140, %c0_141] : memref<8x16x384xbf16, #tpu.memory_space<vmem>>, vector<1x16x384xbf16>
    %233 = vector.shape_cast %232 : vector<1x16x384xbf16> to vector<16x384xbf16>
    %234 = vector.shape_cast %230 : vector<16x384xbf16> to vector<1x16x384xbf16>
    tpu.vector_store %arg9[%231, %c0_140, %c0_141], %234 {strides = array<i32>} : memref<8x16x384xbf16, #tpu.memory_space<vmem>>, vector<1x16x384xbf16>,
    %c6_i32_142 = arith.constant 6 : i32
    %235 = arith.index_cast %c6_i32_142 : i32 to index
    %c0_143 = arith.constant 0 : index
    %c0_144 = arith.constant 0 : index
    %236 = vector.load %arg9[%235, %c0_143, %c0_144] : memref<8x16x384xbf16, #tpu.memory_space<vmem>>, vector<1x16x384xbf16>
    %237 = vector.shape_cast %236 : vector<1x16x384xbf16> to vector<16x384xbf16>
    %238 = arith.extf %237 : vector<16x384xbf16> to vector<16x384xf32>
    %239 = arith.truncf %229 : vector<16x384xf32> to vector<16x384xbf16>
    %c1_145 = arith.constant 1 : index
    %c0_146 = arith.constant 0 : index
    %c0_147 = arith.constant 0 : index
    %240 = vector.load %arg4[%c1_145, %c0_146, %c0_147] : memref<3x384x384xbf16, #tpu.memory_space<vmem>>, vector<1x384x384xbf16>
    %241 = vector.shape_cast %240 : vector<1x384x384xbf16> to vector<384x384xbf16>
    %cst_148 = arith.constant dense<0.000000e+00> : vector<16x384xf32>
    %242 = tpu.matmul %239, %241, %cst_148 {dimension_numbers = #tpu.dot_dimension_numbers<[1], [0], [0], [1], [0, 0, 1, 1], [], []>} : vector<16x384xbf16>, vector<384x384xbf16>, vector<16x384xf32> -> vector<16x384xf32>
    %243 = arith.addf %238, %242 : vector<16x384xf32>
    %244 = math.tanh %243 : vector<16x384xf32>
    %245 = arith.truncf %244 : vector<16x384xf32> to vector<16x384xbf16>
    %246 = arith.index_cast %c6_i32_142 : i32 to index
    %c0_149 = arith.constant 0 : index
    %c0_150 = arith.constant 0 : index
    %247 = vector.load %arg9[%246, %c0_149, %c0_150] : memref<8x16x384xbf16, #tpu.memory_space<vmem>>, vector<1x16x384xbf16>
    %248 = vector.shape_cast %247 : vector<1x16x384xbf16> to vector<16x384xbf16>
    %249 = vector.shape_cast %245 : vector<16x384xbf16> to vector<1x16x384xbf16>
    tpu.vector_store %arg9[%246, %c0_149, %c0_150], %249 {strides = array<i32>} : memref<8x16x384xbf16, #tpu.memory_space<vmem>>, vector<1x16x384xbf16>,
    %c7_i32_151 = arith.constant 7 : i32
    %250 = arith.index_cast %c7_i32_151 : i32 to index
    %c0_152 = arith.constant 0 : index
    %c0_153 = arith.constant 0 : index
    %251 = vector.load %arg9[%250, %c0_152, %c0_153] : memref<8x16x384xbf16, #tpu.memory_space<vmem>>, vector<1x16x384xbf16>
    %252 = vector.shape_cast %251 : vector<1x16x384xbf16> to vector<16x384xbf16>
    %253 = arith.extf %252 : vector<16x384xbf16> to vector<16x384xf32>
    %254 = arith.truncf %244 : vector<16x384xf32> to vector<16x384xbf16>
    %c1_154 = arith.constant 1 : index
    %c0_155 = arith.constant 0 : index
    %c0_156 = arith.constant 0 : index
    %255 = vector.load %arg4[%c1_154, %c0_155, %c0_156] : memref<3x384x384xbf16, #tpu.memory_space<vmem>>, vector<1x384x384xbf16>
    %256 = vector.shape_cast %255 : vector<1x384x384xbf16> to vector<384x384xbf16>
    %cst_157 = arith.constant dense<0.000000e+00> : vector<16x384xf32>
    %257 = tpu.matmul %254, %256, %cst_157 {dimension_numbers = #tpu.dot_dimension_numbers<[1], [0], [0], [1], [0, 0, 1, 1], [], []>} : vector<16x384xbf16>, vector<384x384xbf16>, vector<16x384xf32> -> vector<16x384xf32>
    %258 = arith.addf %253, %257 : vector<16x384xf32>
    %259 = math.tanh %258 : vector<16x384xf32>
    %260 = arith.truncf %259 : vector<16x384xf32> to vector<16x384xbf16>
    %261 = arith.index_cast %c7_i32_151 : i32 to index
    %c0_158 = arith.constant 0 : index
    %c0_159 = arith.constant 0 : index
    %262 = vector.load %arg9[%261, %c0_158, %c0_159] : memref<8x16x384xbf16, #tpu.memory_space<vmem>>, vector<1x16x384xbf16>
    %263 = vector.shape_cast %262 : vector<1x16x384xbf16> to vector<16x384xbf16>
    %264 = vector.shape_cast %260 : vector<16x384xbf16> to vector<1x16x384xbf16>
    tpu.vector_store %arg9[%261, %c0_158, %c0_159], %264 {strides = array<i32>} : memref<8x16x384xbf16, #tpu.memory_space<vmem>>, vector<1x16x384xbf16>,
    %c8_i32_160 = arith.constant 8 : i32
    %c2 = arith.constant 2 : index
    %c0_161 = arith.constant 0 : index
    %c0_162 = arith.constant 0 : index
    %265 = vector.load %arg5[%c2, %c0_161, %c0_162] : memref<3x1x384xf32, #tpu.memory_space<vmem>>, vector<1x1x384xf32>
    %266 = vector.shape_cast %265 : vector<1x1x384xf32> to vector<1x384xf32>
    %c0_163 = arith.constant 0 : index
    %c0_164 = arith.constant 0 : index
    %c0_165 = arith.constant 0 : index
    %267 = vector.load %arg9[%c0_163, %c0_164, %c0_165] : memref<8x16x384xbf16, #tpu.memory_space<vmem>>, vector<8x16x384xbf16>
    %268 = vector.shape_cast %267 : vector<8x16x384xbf16> to vector<128x384xbf16>
    %c1_166 = arith.constant 1 : index
    %c0_167 = arith.constant 0 : index
    %c0_168 = arith.constant 0 : index
    %269 = vector.load %arg3[%c1_166, %c0_167, %c0_168] : memref<2x384x384xbf16, #tpu.memory_space<vmem>>, vector<1x384x384xbf16>
    %270 = vector.shape_cast %269 : vector<1x384x384xbf16> to vector<384x384xbf16>
    %cst_169 = arith.constant dense<0.000000e+00> : vector<128x384xf32>
    %271 = tpu.matmul %268, %270, %cst_169 {dimension_numbers = #tpu.dot_dimension_numbers<[1], [0], [0], [1], [0, 0, 1, 1], [], []>} : vector<128x384xbf16>, vector<384x384xbf16>, vector<128x384xf32> -> vector<128x384xf32>
    %272 = vector.broadcast %266 : vector<1x384xf32> to vector<128x384xf32>
    %273 = arith.addf %271, %272 : vector<128x384xf32>
    %274 = vector.shape_cast %273 : vector<128x384xf32> to vector<8x16x384xf32>
    %275 = arith.truncf %274 : vector<8x16x384xf32> to vector<8x16x384xbf16>
    %c0_170 = arith.constant 0 : index
    %c0_171 = arith.constant 0 : index
    %c0_172 = arith.constant 0 : index
    %276 = vector.load %arg9[%c0_170, %c0_171, %c0_172] : memref<8x16x384xbf16, #tpu.memory_space<vmem>>, vector<8x16x384xbf16>
    tpu.vector_store %arg9[%c0_170, %c0_171, %c0_172], %275 {strides = array<i32>} : memref<8x16x384xbf16, #tpu.memory_space<vmem>>, vector<8x16x384xbf16>,
    %cst_173 = arith.constant 0.000000e+00 : f32
    %277 = vector.broadcast %cst_173 : f32 to vector<16x384xf32>
    %c0_i32_174 = arith.constant 0 : i32
    %278 = arith.index_cast %c0_i32_174 : i32 to index
    %c0_175 = arith.constant 0 : index
    %c0_176 = arith.constant 0 : index
    %279 = vector.load %arg9[%278, %c0_175, %c0_176] : memref<8x16x384xbf16, #tpu.memory_space<vmem>>, vector<1x16x384xbf16>
    %280 = vector.shape_cast %279 : vector<1x16x384xbf16> to vector<16x384xbf16>
    %281 = arith.extf %280 : vector<16x384xbf16> to vector<16x384xf32>
    %282 = arith.truncf %277 : vector<16x384xf32> to vector<16x384xbf16>
    %c2_177 = arith.constant 2 : index
    %c0_178 = arith.constant 0 : index
    %c0_179 = arith.constant 0 : index
    %283 = vector.load %arg4[%c2_177, %c0_178, %c0_179] : memref<3x384x384xbf16, #tpu.memory_space<vmem>>, vector<1x384x384xbf16>
    %284 = vector.shape_cast %283 : vector<1x384x384xbf16> to vector<384x384xbf16>
    %cst_180 = arith.constant dense<0.000000e+00> : vector<16x384xf32>
    %285 = tpu.matmul %282, %284, %cst_180 {dimension_numbers = #tpu.dot_dimension_numbers<[1], [0], [0], [1], [0, 0, 1, 1], [], []>} : vector<16x384xbf16>, vector<384x384xbf16>, vector<16x384xf32> -> vector<16x384xf32>
    %286 = arith.addf %281, %285 : vector<16x384xf32>
    %287 = math.tanh %286 : vector<16x384xf32>
    %c1_i32_181 = arith.constant 1 : i32
    %288 = arith.index_cast %c1_i32_181 : i32 to index
    %c0_182 = arith.constant 0 : index
    %c0_183 = arith.constant 0 : index
    %289 = vector.load %arg9[%288, %c0_182, %c0_183] : memref<8x16x384xbf16, #tpu.memory_space<vmem>>, vector<1x16x384xbf16>
    %290 = vector.shape_cast %289 : vector<1x16x384xbf16> to vector<16x384xbf16>
    %291 = arith.extf %290 : vector<16x384xbf16> to vector<16x384xf32>
    %292 = arith.truncf %287 : vector<16x384xf32> to vector<16x384xbf16>
    %c2_184 = arith.constant 2 : index
    %c0_185 = arith.constant 0 : index
    %c0_186 = arith.constant 0 : index
    %293 = vector.load %arg4[%c2_184, %c0_185, %c0_186] : memref<3x384x384xbf16, #tpu.memory_space<vmem>>, vector<1x384x384xbf16>
    %294 = vector.shape_cast %293 : vector<1x384x384xbf16> to vector<384x384xbf16>
    %cst_187 = arith.constant dense<0.000000e+00> : vector<16x384xf32>
    %295 = tpu.matmul %292, %294, %cst_187 {dimension_numbers = #tpu.dot_dimension_numbers<[1], [0], [0], [1], [0, 0, 1, 1], [], []>} : vector<16x384xbf16>, vector<384x384xbf16>, vector<16x384xf32> -> vector<16x384xf32>
    %296 = arith.addf %291, %295 : vector<16x384xf32>
    %297 = math.tanh %296 : vector<16x384xf32>
    %c2_i32_188 = arith.constant 2 : i32
    %298 = arith.index_cast %c2_i32_188 : i32 to index
    %c0_189 = arith.constant 0 : index
    %c0_190 = arith.constant 0 : index
    %299 = vector.load %arg9[%298, %c0_189, %c0_190] : memref<8x16x384xbf16, #tpu.memory_space<vmem>>, vector<1x16x384xbf16>
    %300 = vector.shape_cast %299 : vector<1x16x384xbf16> to vector<16x384xbf16>
    %301 = arith.extf %300 : vector<16x384xbf16> to vector<16x384xf32>
    %302 = arith.truncf %297 : vector<16x384xf32> to vector<16x384xbf16>
    %c2_191 = arith.constant 2 : index
    %c0_192 = arith.constant 0 : index
    %c0_193 = arith.constant 0 : index
    %303 = vector.load %arg4[%c2_191, %c0_192, %c0_193] : memref<3x384x384xbf16, #tpu.memory_space<vmem>>, vector<1x384x384xbf16>
    %304 = vector.shape_cast %303 : vector<1x384x384xbf16> to vector<384x384xbf16>
    %cst_194 = arith.constant dense<0.000000e+00> : vector<16x384xf32>
    %305 = tpu.matmul %302, %304, %cst_194 {dimension_numbers = #tpu.dot_dimension_numbers<[1], [0], [0], [1], [0, 0, 1, 1], [], []>} : vector<16x384xbf16>, vector<384x384xbf16>, vector<16x384xf32> -> vector<16x384xf32>
    %306 = arith.addf %301, %305 : vector<16x384xf32>
    %307 = math.tanh %306 : vector<16x384xf32>
    %c3_i32_195 = arith.constant 3 : i32
    %308 = arith.index_cast %c3_i32_195 : i32 to index
    %c0_196 = arith.constant 0 : index
    %c0_197 = arith.constant 0 : index
    %309 = vector.load %arg9[%308, %c0_196, %c0_197] : memref<8x16x384xbf16, #tpu.memory_space<vmem>>, vector<1x16x384xbf16>
    %310 = vector.shape_cast %309 : vector<1x16x384xbf16> to vector<16x384xbf16>
    %311 = arith.extf %310 : vector<16x384xbf16> to vector<16x384xf32>
    %312 = arith.truncf %307 : vector<16x384xf32> to vector<16x384xbf16>
    %c2_198 = arith.constant 2 : index
    %c0_199 = arith.constant 0 : index
    %c0_200 = arith.constant 0 : index
    %313 = vector.load %arg4[%c2_198, %c0_199, %c0_200] : memref<3x384x384xbf16, #tpu.memory_space<vmem>>, vector<1x384x384xbf16>
    %314 = vector.shape_cast %313 : vector<1x384x384xbf16> to vector<384x384xbf16>
    %cst_201 = arith.constant dense<0.000000e+00> : vector<16x384xf32>
    %315 = tpu.matmul %312, %314, %cst_201 {dimension_numbers = #tpu.dot_dimension_numbers<[1], [0], [0], [1], [0, 0, 1, 1], [], []>} : vector<16x384xbf16>, vector<384x384xbf16>, vector<16x384xf32> -> vector<16x384xf32>
    %316 = arith.addf %311, %315 : vector<16x384xf32>
    %317 = math.tanh %316 : vector<16x384xf32>
    %c4_i32_202 = arith.constant 4 : i32
    %318 = arith.index_cast %c4_i32_202 : i32 to index
    %c0_203 = arith.constant 0 : index
    %c0_204 = arith.constant 0 : index
    %319 = vector.load %arg9[%318, %c0_203, %c0_204] : memref<8x16x384xbf16, #tpu.memory_space<vmem>>, vector<1x16x384xbf16>
    %320 = vector.shape_cast %319 : vector<1x16x384xbf16> to vector<16x384xbf16>
    %321 = arith.extf %320 : vector<16x384xbf16> to vector<16x384xf32>
    %322 = arith.truncf %317 : vector<16x384xf32> to vector<16x384xbf16>
    %c2_205 = arith.constant 2 : index
    %c0_206 = arith.constant 0 : index
    %c0_207 = arith.constant 0 : index
    %323 = vector.load %arg4[%c2_205, %c0_206, %c0_207] : memref<3x384x384xbf16, #tpu.memory_space<vmem>>, vector<1x384x384xbf16>
    %324 = vector.shape_cast %323 : vector<1x384x384xbf16> to vector<384x384xbf16>
    %cst_208 = arith.constant dense<0.000000e+00> : vector<16x384xf32>
    %325 = tpu.matmul %322, %324, %cst_208 {dimension_numbers = #tpu.dot_dimension_numbers<[1], [0], [0], [1], [0, 0, 1, 1], [], []>} : vector<16x384xbf16>, vector<384x384xbf16>, vector<16x384xf32> -> vector<16x384xf32>
    %326 = arith.addf %321, %325 : vector<16x384xf32>
    %327 = math.tanh %326 : vector<16x384xf32>
    %c5_i32_209 = arith.constant 5 : i32
    %328 = arith.index_cast %c5_i32_209 : i32 to index
    %c0_210 = arith.constant 0 : index
    %c0_211 = arith.constant 0 : index
    %329 = vector.load %arg9[%328, %c0_210, %c0_211] : memref<8x16x384xbf16, #tpu.memory_space<vmem>>, vector<1x16x384xbf16>
    %330 = vector.shape_cast %329 : vector<1x16x384xbf16> to vector<16x384xbf16>
    %331 = arith.extf %330 : vector<16x384xbf16> to vector<16x384xf32>
    %332 = arith.truncf %327 : vector<16x384xf32> to vector<16x384xbf16>
    %c2_212 = arith.constant 2 : index
    %c0_213 = arith.constant 0 : index
    %c0_214 = arith.constant 0 : index
    %333 = vector.load %arg4[%c2_212, %c0_213, %c0_214] : memref<3x384x384xbf16, #tpu.memory_space<vmem>>, vector<1x384x384xbf16>
    %334 = vector.shape_cast %333 : vector<1x384x384xbf16> to vector<384x384xbf16>
    %cst_215 = arith.constant dense<0.000000e+00> : vector<16x384xf32>
    %335 = tpu.matmul %332, %334, %cst_215 {dimension_numbers = #tpu.dot_dimension_numbers<[1], [0], [0], [1], [0, 0, 1, 1], [], []>} : vector<16x384xbf16>, vector<384x384xbf16>, vector<16x384xf32> -> vector<16x384xf32>
    %336 = arith.addf %331, %335 : vector<16x384xf32>
    %337 = math.tanh %336 : vector<16x384xf32>
    %c6_i32_216 = arith.constant 6 : i32
    %338 = arith.index_cast %c6_i32_216 : i32 to index
    %c0_217 = arith.constant 0 : index
    %c0_218 = arith.constant 0 : index
    %339 = vector.load %arg9[%338, %c0_217, %c0_218] : memref<8x16x384xbf16, #tpu.memory_space<vmem>>, vector<1x16x384xbf16>
    %340 = vector.shape_cast %339 : vector<1x16x384xbf16> to vector<16x384xbf16>
    %341 = arith.extf %340 : vector<16x384xbf16> to vector<16x384xf32>
    %342 = arith.truncf %337 : vector<16x384xf32> to vector<16x384xbf16>
    %c2_219 = arith.constant 2 : index
    %c0_220 = arith.constant 0 : index
    %c0_221 = arith.constant 0 : index
    %343 = vector.load %arg4[%c2_219, %c0_220, %c0_221] : memref<3x384x384xbf16, #tpu.memory_space<vmem>>, vector<1x384x384xbf16>
    %344 = vector.shape_cast %343 : vector<1x384x384xbf16> to vector<384x384xbf16>
    %cst_222 = arith.constant dense<0.000000e+00> : vector<16x384xf32>
    %345 = tpu.matmul %342, %344, %cst_222 {dimension_numbers = #tpu.dot_dimension_numbers<[1], [0], [0], [1], [0, 0, 1, 1], [], []>} : vector<16x384xbf16>, vector<384x384xbf16>, vector<16x384xf32> -> vector<16x384xf32>
    %346 = arith.addf %341, %345 : vector<16x384xf32>
    %347 = math.tanh %346 : vector<16x384xf32>
    %c7_i32_223 = arith.constant 7 : i32
    %348 = arith.index_cast %c7_i32_223 : i32 to index
    %c0_224 = arith.constant 0 : index
    %c0_225 = arith.constant 0 : index
    %349 = vector.load %arg9[%348, %c0_224, %c0_225] : memref<8x16x384xbf16, #tpu.memory_space<vmem>>, vector<1x16x384xbf16>
    %350 = vector.shape_cast %349 : vector<1x16x384xbf16> to vector<16x384xbf16>
    %351 = arith.extf %350 : vector<16x384xbf16> to vector<16x384xf32>
    %352 = arith.truncf %347 : vector<16x384xf32> to vector<16x384xbf16>
    %c2_226 = arith.constant 2 : index
    %c0_227 = arith.constant 0 : index
    %c0_228 = arith.constant 0 : index
    %353 = vector.load %arg4[%c2_226, %c0_227, %c0_228] : memref<3x384x384xbf16, #tpu.memory_space<vmem>>, vector<1x384x384xbf16>
    %354 = vector.shape_cast %353 : vector<1x384x384xbf16> to vector<384x384xbf16>
    %cst_229 = arith.constant dense<0.000000e+00> : vector<16x384xf32>
    %355 = tpu.matmul %352, %354, %cst_229 {dimension_numbers = #tpu.dot_dimension_numbers<[1], [0], [0], [1], [0, 0, 1, 1], [], []>} : vector<16x384xbf16>, vector<384x384xbf16>, vector<16x384xf32> -> vector<16x384xf32>
    %356 = arith.addf %351, %355 : vector<16x384xf32>
    %357 = math.tanh %356 : vector<16x384xf32>
    %c8_i32_230 = arith.constant 8 : i32
    %c0_231 = arith.constant 0 : index
    %c0_232 = arith.constant 0 : index
    %358 = vector.load %arg10[%c0_231, %c0_232] : memref<16x384xf32, #tpu.memory_space<vmem>>, vector<16x384xf32>
    tpu.vector_store %arg10[%c0_231, %c0_232], %357 {strides = array<i32>} : memref<16x384xf32, #tpu.memory_space<vmem>>, vector<16x384xf32>,
    %c0_233 = arith.constant 0 : index
    %c0_234 = arith.constant 0 : index
    %359 = vector.load %arg10[%c0_233, %c0_234] : memref<16x384xf32, #tpu.memory_space<vmem>>, vector<16x384xf32>
    %360 = arith.truncf %359 : vector<16x384xf32> to vector<16x384xbf16>
    %c0_235 = arith.constant 0 : index
    %c0_236 = arith.constant 0 : index
    %361 = vector.load %arg6[%c0_235, %c0_236] : memref<384x128xbf16, #tpu.memory_space<vmem>>, vector<384x128xbf16>
    %cst_237 = arith.constant dense<0.000000e+00> : vector<16x128xf32>
    %362 = tpu.matmul %360, %361, %cst_237 {dimension_numbers = #tpu.dot_dimension_numbers<[1], [0], [0], [1], [0, 0, 1, 1], [], []>} : vector<16x384xbf16>, vector<384x128xbf16>, vector<16x128xf32> -> vector<16x128xf32>
    %c0_238 = arith.constant 0 : index
    %c0_239 = arith.constant 0 : index
    %363 = vector.load %arg7[%c0_238, %c0_239] : memref<1x128xf32, #tpu.memory_space<vmem>>, vector<1x128xf32>
    %364 = vector.broadcast %363 : vector<1x128xf32> to vector<16x128xf32>
    %365 = arith.addf %362, %364 : vector<16x128xf32>
    %c0_240 = arith.constant 0 : index
    %c0_241 = arith.constant 0 : index
    %366 = vector.load %arg8[%c0_240, %c0_241] : memref<16x128xf32, #tpu.memory_space<vmem>>, vector<16x128xf32>
    tpu.vector_store %arg8[%c0_240, %c0_241], %365 {strides = array<i32>} : memref<16x128xf32, #tpu.memory_space<vmem>>, vector<16x128xf32>,
    return
  }
  func.func @transform_0(%arg0: i32) -> (i32, i32, i32) {
    %c0_i32 = arith.constant 0 : i32
    %c0_i32_0 = arith.constant 0 : i32
    %c0_i32_1 = arith.constant 0 : i32
    return %c0_i32, %arg0, %c0_i32_0 : i32, i32, i32
  }
  func.func @transform_1(%arg0: i32) -> (i32, i32) {
    %c0_i32 = arith.constant 0 : i32
    %c0_i32_0 = arith.constant 0 : i32
    %c0_i32_1 = arith.constant 0 : i32
    return %c0_i32, %c0_i32_0 : i32, i32
  }
  func.func @transform_2(%arg0: i32) -> (i32, i32, i32) {
    %c0_i32 = arith.constant 0 : i32
    %c0_i32_0 = arith.constant 0 : i32
    %c0_i32_1 = arith.constant 0 : i32
    %c0_i32_2 = arith.constant 0 : i32
    return %c0_i32, %c0_i32_0, %c0_i32_1 : i32, i32, i32
  }
  func.func @transform_3(%arg0: i32) -> (i32, i32, i32) {
    %c0_i32 = arith.constant 0 : i32
    %c0_i32_0 = arith.constant 0 : i32
    %c0_i32_1 = arith.constant 0 : i32
    %c0_i32_2 = arith.constant 0 : i32
    return %c0_i32, %c0_i32_0, %c0_i32_1 : i32, i32, i32
  }
  func.func @transform_4(%arg0: i32) -> (i32, i32, i32) {
    %c0_i32 = arith.constant 0 : i32
    %c0_i32_0 = arith.constant 0 : i32
    %c0_i32_1 = arith.constant 0 : i32
    %c0_i32_2 = arith.constant 0 : i32
    return %c0_i32, %c0_i32_0, %c0_i32_1 : i32, i32, i32
  }
  func.func @transform_5(%arg0: i32) -> (i32, i32) {
    %c0_i32 = arith.constant 0 : i32
    %c0_i32_0 = arith.constant 0 : i32
    %c0_i32_1 = arith.constant 0 : i32
    return %c0_i32, %c0_i32_0 : i32, i32
  }
  func.func @transform_6(%arg0: i32) -> (i32, i32) {
    %c0_i32 = arith.constant 0 : i32
    %c0_i32_0 = arith.constant 0 : i32
    %c0_i32_1 = arith.constant 0 : i32
    return %c0_i32, %c0_i32_0 : i32, i32
  }
  func.func @transform_7(%arg0: i32) -> (i32, i32) {
    %c0_i32 = arith.constant 0 : i32
    %c0_i32_0 = arith.constant 0 : i32
    return %arg0, %c0_i32 : i32, i32
  }
}

</mosaic_0001>

<bundles_post_ra>
// kernel: rnn_classifier_forward.1
= control target key start
LH: loop header
LB: loop body
LE: loop exit
PB: predicated region body
PF: predicated region fallthrough
CT: control target
= control target key end

     0   :  { %v28537_v1 = vmov 0   ;;  %vm180_vm0 = vcmask 523264   ;;  %v28555_v57 = vmov 0.0   ;;  %vm21467_vm1 = vmmov 0   ;;  %s28529_s1 = inlined_call_operand.vmem [shape: bf16[64,384], index: 1, kind: input, shape index: {}]   ;;  %s28530_s0 = inlined_call_operand.vmem [shape: bf16[8,16,64], index: 0, kind: input, shape index: {}]   ;;  %s28531_s3 = inlined_call_operand.vmem [shape: bf16[3,384,384], index: 3, kind: input, shape index: {}]   ;;  %s28532_s4 = inlined_call_operand.vmem [shape: f32[3,1,384], index: 4, kind: input, shape index: {}]   ;;  %s28533_s2 = inlined_call_operand.vmem [shape: bf16[2,384,384], index: 2, kind: input, shape index: {}]   ;;  %s28534_s5 = inlined_call_operand.vmem [shape: bf16[384,128], index: 5, kind: input, shape index: {}]   ;;  %s28535_s6 = inlined_call_operand.vmem [shape: f32[1,128], index: 6, kind: input, shape index: {}]   ;;  %s28536_s7 = inlined_call_operand.vmem [shape: f32[16,128], index: 7, kind: output, shape index: {}]  }
   0x1   :  { %v19721_v0 = vld [vmem:[%s28529_s1 + $0x4] ss:$12 sps:$4 sm:$0xff]   ;;  %237 = vmatprep.mubr.bf16.mxu0 %v28537_v1  ;;  %v19723_v2 = vld [vmem:[%s28529_s1] ss:$12 sps:$4 sm:$0xff]   ;;  %v19724_v3 = vld [vmem:[%s28529_s1 + $0x8] ss:$12 sps:$4 sm:$0xff]  }
   0x2   :  { %205 = vmatprep.subr.bf16.mxu0 %v19721_v0  ;;  %v19725_v4 = vld [vmem:[%s28529_s1 + $0x1c] ss:$12 sps:$4 sm:$0xff]   ;;  %v19727_v5 = vld [vmem:[%s28529_s1 + $0x18] ss:$12 sps:$4 sm:$0xff]   ;;  %18906 = vmatprep.subr.bf16.mxu1 %v19724_v3  ;;  %v19728_v6 = vld [vmem:[%s28529_s1 + $0x20] ss:$12 sps:$4 sm:$0xff]  }
   0x3   :  { %206 = vmatpush1.bf16.msra.mxu0 %v19723_v2  ;;  %18907 = vmatpush3.bf16.msra.mxu1 %v19724_v3  ;;  %v19729_v7 = vld [vmem:[%s28529_s1 + $0x34] ss:$12 sps:$4 sm:$0xff]   ;;  %v19732_v8 = vld [vmem:[%s28529_s1 + $0x38] ss:$12 sps:$4 sm:$0xff]   ;;  %v19731_v9 = vld [vmem:[%s28529_s1 + $0x30] ss:$12 sps:$4 sm:$0xff]  }
   0x4   :  { %207 = vmatprep.subr.bf16.mxu0 %v19725_v4  ;;  %18908 = vmatprep.subr.bf16.mxu1 %v19728_v6  ;;  %v19733_v10 = vld [vmem:[%s28529_s1 + $0x4c] ss:$12 sps:$4 sm:$0xff]   ;;  %v19736_v11 = vld [vmem:[%s28529_s1 + $0x50] ss:$12 sps:$4 sm:$0xff]   ;;  %v19737_v12 = vld [vmem:[%s28530_s0] sm:$0xff]  }
   0x5   :  { %v19735_v13 = vld [vmem:[%s28529_s1 + $0x48] ss:$12 sps:$4 sm:$0xff]   ;;  %v21551_v14 = vld [vmem:[%s28531_s3 + $0x4] ss:$12 sps:$4 sm:$0xff]   ;;  %18914 = vmatprep.mubr.msk.bf16.mxu1 %vm180_vm0, %v19737_v12  ;;  %v21557_v15 = vld [vmem:[%s28531_s3] ss:$12 sps:$4 sm:$0xff]  }
   0x6   :  { %v19741_v16 = vld [vmem:[%s28531_s3 + $0xc8] ss:$12 sps:$4 sm:$0xff]   ;;  %v21577_v20 = vld [vmem:[%s28531_s3 + $0x18] ss:$12 sps:$4 sm:$0xff]   ;;  %v19747_v21 = vld [vmem:[%s28531_s3 + $0xe0] ss:$12 sps:$4 sm:$0xff]  }
   0x7   :  { %208 = vmatpush1.bf16.msra.mxu0 %v19727_v5  ;;  %18909 = vmatpush3.bf16.msra.mxu1 %v19728_v6  ;;  %v19742_v17 = vld [vmem:[%s28530_s0 + $0x8] sm:$0xff]   ;;  %v21591_v23 = vld [vmem:[%s28531_s3 + $0x34] ss:$12 sps:$4 sm:$0xff]   ;;  %v21601_v25 = vld [vmem:[%s28531_s3 + $0x30] ss:$12 sps:$4 sm:$0xff]  }
   0x8   :  { %209 = vmatprep.subr.bf16.mxu0 %v19729_v7  ;;  %18910 = vmatprep.subr.bf16.mxu1 %v19732_v8  ;;  %v19743_v18 = vld [vmem:[%s28531_s3 + $0x8] ss:$12 sps:$4 sm:$0xff]   ;;  %v19748_v22 = vld [vmem:[%s28531_s3 + $0x20] ss:$12 sps:$4 sm:$0xff]   ;;  %v19753_v26 = vld [vmem:[%s28531_s3 + $0xf8] ss:$12 sps:$4 sm:$0xff]  }
   0x9   :  { %v21572_v19 = vld [vmem:[%s28531_s3 + $0x1c] ss:$12 sps:$4 sm:$0xff]   ;;  %v19752_v24 = vld [vmem:[%s28530_s0 + $0x10] sm:$0xff]   ;;  %v19755_v28 = vld [vmem:[%s28531_s3 + $0x38] ss:$12 sps:$4 sm:$0xff]  }
   0xa   :  { %v19754_v27 = vld [vmem:[%s28530_s0 + $0x18] sm:$0xff]   ;;  %v21623_v30 = vld [vmem:[%s28531_s3 + $0x48] ss:$12 sps:$4 sm:$0xff]   ;;  %v21637_v33 = vld [vmem:[%s28531_s3 + $0x64] ss:$12 sps:$4 sm:$0xff]  }
   0xb   :  { %210 = vmatpush1.bf16.msra.mxu0 %v19731_v9  ;;  %18911 = vmatpush3.bf16.msra.mxu1 %v19732_v8  ;;  %v21618_v29 = vld [vmem:[%s28531_s3 + $0x4c] ss:$12 sps:$4 sm:$0xff]   ;;  %v19759_v31 = vld [vmem:[%s28531_s3 + $0x110] ss:$12 sps:$4 sm:$0xff]   ;;  %v19764_v34 = vld [vmem:[%s28530_s0 + $0x20] sm:$0xff]  }
   0xc   :  { %211 = vmatprep.subr.bf16.mxu0 %v19733_v10  ;;  %18912 = vmatprep.subr.bf16.mxu1 %v19736_v11  ;;  %v19760_v32 = vld [vmem:[%s28531_s3 + $0x50] ss:$12 sps:$4 sm:$0xff]   ;;  %v21647_v35 = vld [vmem:[%s28531_s3 + $0x60] ss:$12 sps:$4 sm:$0xff]   ;;  %v19765_v36 = vld [vmem:[%s28531_s3 + $0x128] ss:$12 sps:$4 sm:$0xff]  }
   0xd   :  { %v21657_v37 = vld [vmem:[%s28530_s0 + $0x28] sm:$0xff]   ;;  %v21676_v41 = vld [vmem:[%s28531_s3 + $0x78] ss:$12 sps:$4 sm:$0xff]   ;;  %v21688_v43 = vld [vmem:[%s28531_s3 + $0x94] ss:$12 sps:$4 sm:$0xff]  }
   0xe   :  { %v19767_v38 = vld [vmem:[%s28531_s3 + $0x68] ss:$12 sps:$4 sm:$0xff]   ;;  %v19771_v40 = vld [vmem:[%s28531_s3 + $0x140] ss:$12 sps:$4 sm:$0xff]   ;;  %v19777_v45 = vld [vmem:[%s28531_s3 + $0x158] ss:$12 sps:$4 sm:$0xff]  }
   0xf   :  { %212 = vmatpush1.bf16.msra.mxu0 %v19735_v13  ;;  %18913 = vmatpush3.bf16.msra.mxu1 %v19736_v11  ;;  %v21666_v39 = vld [vmem:[%s28531_s3 + $0x7c] ss:$12 sps:$4 sm:$0xff]   ;;  %v19772_v42 = vld [vmem:[%s28531_s3 + $0x80] ss:$12 sps:$4 sm:$0xff]   ;;  %v21693_v44 = vld [vmem:[%s28530_s0 + $0x30] sm:$0xff]  }
  0x10   :  { %952 = vmatprep.subr.bf16.mxu0 %v21551_v14  ;;  %17971 = vmatprep.subr.bf16.mxu1 %v19741_v16  ;;  %v21702_v46 = vld [vmem:[%s28531_s3 + $0x90] ss:$12 sps:$4 sm:$0xff]   ;;  %v19779_v48 = vld [vmem:[%s28531_s3 + $0x98] ss:$12 sps:$4 sm:$0xff]   ;;  %v21728_v51 = vld [vmem:[%s28531_s3 + $0xa8] ss:$12 sps:$4 sm:$0xff]  }
  0x11   :  { %v21710_v47 = vld [vmem:[%s28530_s0 + $0x38] sm:$0xff]   ;;  %v21740_v53 = vld [vmem:[%s28531_s3 + $0xc4] ss:$12 sps:$4 sm:$0xff]   ;;  %v21747_v54 = vld [vmem:[%s28531_s3 + $0xc0] ss:$12 sps:$4 sm:$0xff]  }
  0x12   :  { %15588 = vmatmul.mubr.msk.bf16.vlgmr.msra.gmra.mrb[0].mxu0 %vm180_vm0, %v19737_v12  ;;  %18915 = vmatmul.mubr.msk.bf16.vlgmr.msra.gmra.mrb[0].mxu1 %vm180_vm0, %v19742_v17  ;;  %v21718_v49 = vld [vmem:[%s28531_s3 + $0xac] ss:$12 sps:$4 sm:$0xff]   ;;  %v19783_v50 = vld [vmem:[%s28531_s3 + $0x170] ss:$12 sps:$4 sm:$0xff]   ;;  %v19788_v56 = vld [vmem:[%s28531_s3 + $0x188] ss:$12 sps:$4 sm:$0xff]  }
  0x13   :  { %953 = vmatpush1.bf16.msra.mxu0 %v21557_v15  ;;  %247 = vmatprep.mubr.bf16.mxu0 %v28537_v1  ;;  %v19784_v52 = vld [vmem:[%s28531_s3 + $0xb0] ss:$12 sps:$4 sm:$0xff]   ;;  %v21764_v58 = vld [vmem:[%s28531_s3 + $0xd8] ss:$12 sps:$4 sm:$0xff]   ;;  %v21772_v59 = vld [vmem:[%s28531_s3 + $0xf4] ss:$12 sps:$4 sm:$0xff]  }
  0x14   :  { %954 = vmatprep.subr.bf16.mxu0 %v21572_v19  ;;  %17972 = vmatpush3.bf16.msra.mxu1 %v19743_v18  ;;  %v21753_v55 = vld [vmem:[%s28531_s3 + $0xdc] ss:$12 sps:$4 sm:$0xff]   ;;  %v19792_v60 = vld [vmem:[%s28531_s3 + $0x1a0] ss:$12 sps:$4 sm:$0xff]   ;;  %v19796_v63 = vld [vmem:[%s28531_s3 + $0x1b8] ss:$12 sps:$4 sm:$0xff]  }
  0x15   :  { %17973 = vmatprep.subr.bf16.mxu1 %v19747_v21  ;;  %18918 = vmatprep.mubr.msk.bf16.mxu1 %vm180_vm0, %v19752_v24  ;;  %v21784_v61 = vld [vmem:[%s28531_s3 + $0xf0] ss:$12 sps:$4 sm:$0xff]   ;;  %v21790_v62 = vld [vmem:[%s28531_s3 + $0x10c] ss:$12 sps:$4 sm:$0xff]   ;;  %v21802_v0 = vld [vmem:[%s28531_s3 + $0x108] ss:$12 sps:$4 sm:$0xff]  }
  0x16   :  { %v21809_v2 = vld [vmem:[%s28531_s3 + $0x124] ss:$12 sps:$4 sm:$0xff]   ;;  %v21819_v4 = vld [vmem:[%s28531_s3 + $0x120] ss:$12 sps:$4 sm:$0xff]   ;;  %v21825_v5 = vld [vmem:[%s28531_s3 + $0x13c] ss:$12 sps:$4 sm:$0xff]  }
  0x17   :  { %955 = vmatpush1.bf16.msra.mxu0 %v21577_v20  ;;  %v19800_v3 = vld [vmem:[%s28531_s3 + $0x1d0] ss:$12 sps:$4 sm:$0xff]   ;;  %v19804_v6 = vld [vmem:[%s28531_s3 + $0x1e8] ss:$12 sps:$4 sm:$0xff]   ;;  %v21837_v7 = vld [vmem:[%s28531_s3 + $0x138] ss:$12 sps:$4 sm:$0xff]  }
  0x18   :  { %956 = vmatprep.subr.bf16.mxu0 %v21591_v23  ;;  %17974 = vmatpush3.bf16.msra.mxu1 %v19748_v22  ;;  %v21844_v8 = vld [vmem:[%s28531_s3 + $0x154] ss:$12 sps:$4 sm:$0xff]   ;;  %v21854_v10 = vld [vmem:[%s28531_s3 + $0x150] ss:$12 sps:$4 sm:$0xff]   ;;  %v21860_v11 = vld [vmem:[%s28531_s3 + $0x16c] ss:$12 sps:$4 sm:$0xff]  }
  0x19   :  { %17975 = vmatprep.subr.bf16.mxu1 %v19753_v26  ;;  %v19808_v9 = vld [vmem:[%s28531_s3 + $0x200] ss:$12 sps:$4 sm:$0xff]   ;;  %v19812_v12 = vld [vmem:[%s28531_s3 + $0x218] ss:$12 sps:$4 sm:$0xff]   ;;  %v21868_v13 = vld [vmem:[%s28531_s3 + $0x168] ss:$12 sps:$4 sm:$0xff]  }
  0x1a   :  { %15589 = vmatmul.mubr.msk.bf16.gmra.mrb[4].mxu0 %vm180_vm0, %v19742_v17  ;;  %18919 = vmatmul.mubr.msk.bf16.gmra.mrb[4].mxu1 %vm180_vm0, %v19754_v27  ;;  %v21876_v16 = vld [vmem:[%s28531_s3 + $0x184] ss:$12 sps:$4 sm:$0xff]   ;;  %v19817_v18 = vld [vmem:[%s28531_s3 + $0x180] ss:$12 sps:$4 sm:$0xff]   ;;  %v19822_v21 = vld [vmem:[%s28531_s3 + $0x19c] ss:$12 sps:$4 sm:$0xff]  }
  0x1b   :  { %957 = vmatpush1.bf16.msra.mxu0 %v21601_v25  ;;  %257 = vmatprep.mubr.bf16.mxu0 %v28537_v1  ;;  %v19816_v17 = vld [vmem:[%s28531_s3 + $0x230] ss:$12 sps:$4 sm:$0xff]   ;;  %v19820_v22 = vld [vmem:[%s28531_s3 + $0x198] ss:$12 sps:$4 sm:$0xff]  }
  0x1c   :  { %958 = vmatprep.subr.bf16.mxu0 %v21618_v29  ;;  %17976 = vmatpush3.bf16.msra.mxu1 %v19755_v28  ;;  %v19823_v26 = vld [vmem:[%s28531_s3 + $0x1b0] ss:$12 sps:$4 sm:$0xff]  }
  0x1d   :  { %17977 = vmatprep.subr.bf16.mxu1 %v19759_v31  ;;  %18922 = vmatprep.mubr.msk.bf16.mxu1 %vm180_vm0, %v19764_v34  ;;  %v19831_v28 = vld [vmem:[%s28531_s3 + $0x1e4] ss:$12 sps:$4 sm:$0xff]   ;;  %v19841_v31 = vld [vmem:[%s28531_s3 + $0xc8] ss:$12 sps:$4 sm:$0xff]  }
  0x1f   :  { %959 = vmatpush1.bf16.msra.mxu0 %v21623_v30 }
  0x20   :  { %960 = vmatprep.subr.bf16.mxu0 %v21637_v33  ;;  %17978 = vmatpush3.bf16.msra.mxu1 %v19760_v32  ;;  %v19842_v32 = vld [vmem:[%s28531_s3 + $0x8] ss:$12 sps:$4 sm:$0xff]  }
  0x21   :  { %17979 = vmatprep.subr.bf16.mxu1 %v19765_v36  ;;  %v19846_v36 = vld [vmem:[%s28531_s3 + $0x38] ss:$12 sps:$4 sm:$0xff]  }
  0x22   :  { %15590 = vmatmul.mubr.msk.bf16.gmra.mrb[8].mxu0 %vm180_vm0, %v19752_v24  ;;  %18923 = vmatmul.mubr.msk.bf16.gmra.mrb[8].mxu1 %vm180_vm0, %v21657_v37  ;;  %v19825_v24 = vld [vmem:[%s28531_s3 + $0x1b4] ss:$12 sps:$4 sm:$0xff]  }
  0x23   :  { %961 = vmatpush1.bf16.msra.mxu0 %v21647_v35  ;;  %267 = vmatprep.mubr.bf16.mxu0 %v28537_v1 }
  0x24   :  { %962 = vmatprep.subr.bf16.mxu0 %v21666_v39  ;;  %17980 = vmatpush3.bf16.msra.mxu1 %v19767_v38  ;;  %v19848_v38 = vld [vmem:[%s28531_s3 + $0x50] ss:$12 sps:$4 sm:$0xff]  }
  0x25   :  { %17981 = vmatprep.subr.bf16.mxu1 %v19771_v40  ;;  %18926 = vmatprep.mubr.msk.bf16.mxu1 %vm180_vm0, %v21693_v44  ;;  %v19850_v40 = vld [vmem:[%s28531_s3 + $0x68] ss:$12 sps:$4 sm:$0xff]  }
  0x27   :  { %963 = vmatpush1.bf16.msra.mxu0 %v21676_v41 }
  0x28   :  { %964 = vmatprep.subr.bf16.mxu0 %v21688_v43  ;;  %17982 = vmatpush3.bf16.msra.mxu1 %v19772_v42  ;;  %v19852_v42 = vld [vmem:[%s28531_s3 + $0x80] ss:$12 sps:$4 sm:$0xff]  }
  0x29   :  { %17983 = vmatprep.subr.bf16.mxu1 %v19777_v45  ;;  %v19855_v45 = vld [vmem:[%s28531_s3 + $0x170] ss:$12 sps:$4 sm:$0xff]  }
  0x2a   :  { %15591 = vmatmul.mubr.msk.bf16.gmra.mrb[12].mxu0 %vm180_vm0, %v19754_v27  ;;  %18927 = vmatmul.mubr.msk.bf16.gmra.mrb[12].mxu1 %vm180_vm0, %v21710_v47  ;;  %v19828_v27 = vld [vmem:[%s28531_s3 + $0x1cc] ss:$12 sps:$4 sm:$0xff]  }
  0x2b   :  { %965 = vmatpush1.bf16.msra.mxu0 %v21702_v46  ;;  %277 = vmatprep.mubr.bf16.mxu0 %v28537_v1 }
  0x2c   :  { %966 = vmatprep.subr.bf16.mxu0 %v21718_v49  ;;  %17984 = vmatpush3.bf16.msra.mxu1 %v19779_v48 }
  0x2d   :  { %1070 = vmatprep.mubr.bf16.mxu1 %v28537_v1  ;;  %17985 = vmatprep.subr.bf16.mxu1 %v19783_v50 }
  0x2f   :  { %967 = vmatpush1.bf16.msra.mxu0 %v21728_v51 }
  0x30   :  { %968 = vmatprep.subr.bf16.mxu0 %v21740_v53  ;;  %17986 = vmatpush3.bf16.msra.mxu1 %v19784_v52 }
  0x31   :  { %18930 = vmatprep.subr.bf16.mxu1 %v28555_v57 }
  0x32   :  { %15592 = vmatmul.mubr.msk.bf16.gmra.mrb[16].mxu0 %vm180_vm0, %v19764_v34  ;;  %v19844_v34 = vld [vmem:[%s28531_s3 + $0x20] ss:$12 sps:$4 sm:$0xff]  }
  0x33   :  { %969 = vmatpush1.bf16.msra.mxu0 %v21747_v54  ;;  %287 = vmatprep.mubr.bf16.mxu0 %v28537_v1 }
  0x34   :  { %1071 = vmatmul.mubr.bf16.vlgmr.msra.gmra.mrb[16].mxu1 %v28537_v1  ;;  %970 = vmatprep.subr.bf16.mxu0 %v21753_v55 }
  0x35   :  { %18931 = vmatpush3.bf16.msra.mxu1 %v19788_v56  ;;  %18946 = vmatprep.mubr.msk.bf16.mxu1 %vm21467_vm1, %v28555_v57 }
  0x36   :  { %18932 = vmatprep.subr.bf16.mxu1 %v28555_v57 }
  0x37   :  { %971 = vmatpush1.bf16.msra.mxu0 %v21764_v58 }
  0x38   :  { %972 = vmatprep.subr.bf16.mxu0 %v21772_v59 }
  0x39   :  { %18933 = vmatpush3.bf16.msra.mxu1 %v19792_v60 }
  0x3a   :  { %15593 = vmatmul.mubr.msk.bf16.gmra.mrb[20].mxu0 %vm180_vm0, %v21657_v37  ;;  %18934 = vmatprep.subr.bf16.mxu1 %v28555_v57  ;;  %v19847_v37 = vld [vmem:[%s28531_s3 + $0x110] ss:$12 sps:$4 sm:$0xff]  }
  0x3b   :  { %973 = vmatpush1.bf16.msra.mxu0 %v21784_v61  ;;  %297 = vmatprep.mubr.bf16.mxu0 %v28537_v1 }
  0x3c   :  { %974 = vmatprep.subr.bf16.mxu0 %v21790_v62 }
  0x3d   :  { %18935 = vmatpush3.bf16.msra.mxu1 %v19796_v63 }
  0x3e   :  { %18936 = vmatprep.subr.bf16.mxu1 %v28555_v57 }
  0x3f   :  { %975 = vmatpush1.bf16.msra.mxu0 %v21802_v0 }
  0x40   :  { %976 = vmatprep.subr.bf16.mxu0 %v21809_v2 }
  0x41   :  { %18937 = vmatpush3.bf16.msra.mxu1 %v19800_v3 }
  0x42   :  { %15594 = vmatmul.mubr.msk.bf16.gmra.mrb[24].mxu0 %vm180_vm0, %v21693_v44  ;;  %18938 = vmatprep.subr.bf16.mxu1 %v28555_v57  ;;  %v19854_v44 = vld [vmem:[%s28531_s3 + $0x98] ss:$12 sps:$4 sm:$0xff]  }
  0x43   :  { %977 = vmatpush1.bf16.msra.mxu0 %v21819_v4  ;;  %307 = vmatprep.mubr.bf16.mxu0 %v28537_v1 }
  0x44   :  { %978 = vmatprep.subr.bf16.mxu0 %v21825_v5 }
  0x45   :  { %18939 = vmatpush3.bf16.msra.mxu1 %v19804_v6 }
  0x46   :  { %18940 = vmatprep.subr.bf16.mxu1 %v28555_v57 }
  0x47   :  { %979 = vmatpush1.bf16.msra.mxu0 %v21837_v7 }
  0x48   :  { %980 = vmatprep.subr.bf16.mxu0 %v21844_v8 }
  0x49   :  { %18941 = vmatpush3.bf16.msra.mxu1 %v19808_v9 }
  0x4a   :  { %15595 = vmatmul.mubr.msk.bf16.gmra.mrb[28].mxu0 %vm180_vm0, %v21710_v47  ;;  %18942 = vmatprep.subr.bf16.mxu1 %v28555_v57  ;;  %v61_v47 = vlaneseq }
  0x4b   :  { %981 = vmatpush1.bf16.msra.mxu0 %v21854_v10  ;;  %984 = vmatprep.mubr.bf16.mxu0 %v28537_v1 }
  0x4c   :  { %982 = vmatprep.subr.bf16.mxu0 %v21860_v11  ;;  %v62_v48 = vshrl.u32 %v61_v47, 7 }
  0x4d   :  { %18943 = vmatpush3.bf16.msra.mxu1 %v19812_v12 }
  0x4e   :  { %18944 = vmatprep.subr.bf16.mxu1 %v28555_v57  ;;  %v22021_v50 = vsub.s32 0, %v62_v48  ;;  %v22025_v52 = vsub.s32 2, %v62_v48 }
  0x4f   :  { %983 = vmatpush1.bf16.msra.mxu0 %v21868_v13 }
  0x50   :  { %995 = vmatprep.subr.bf16.mxu0 %v21876_v16  ;;  %28754 = vst [vmem:[#allocation4_spill] sm:$0xff] %v22021_v50  ;;  %28756 = vst [vmem:[#allocation6_spill] sm:$0xff] %v22025_v52 }
  0x51   :  { %18945 = vmatpush3.bf16.msra.mxu1 %v19816_v17 }
  0x52   :  { %985 = vmatmul.mubr.bf16.vlgmr.msra.gmra.mrb[32].mxu0 %v28537_v1  ;;  %1628 = vmatprep.subr.bf16.mxu1 %v21551_v14  ;;  %v19826_v14 = vld [vmem:[%s28531_s3 + $0x1c8] ss:$12 sps:$4 sm:$0xff]  }
  0x53   :  { %996 = vmatpush1.bf16.msra.mxu0 %v19817_v18  ;;  %1027 = vmatprep.mubr.bf16.mxu0 %v28537_v1 }
  0x54   :  { %18947 = vmatmul.mubr.bf16.vlgmr.msra.gmra.mrb[20].mxu1 %v28537_v1  ;;  %997 = vmatprep.subr.bf16.mxu0 %v19822_v21 }
  0x55   :  { %1629 = vmatpush1.bf16.msra.mxu1 %v21557_v15  ;;  %v19829_v15 = vld [vmem:[%s28531_s3 + $0x1e0] ss:$12 sps:$4 sm:$0xff]  }
  0x56   :  { %1630 = vmatprep.subr.bf16.mxu1 %v21572_v19  ;;  %v19834_v19 = vld [vmem:[%s28531_s3 + $0x1fc] ss:$12 sps:$4 sm:$0xff]  }
  0x57   :  { %998 = vmatpush1.bf16.msra.mxu0 %v19820_v22 }
  0x58   :  { %999 = vmatprep.subr.bf16.mxu0 %v19825_v24 }
  0x59   :  { %1631 = vmatpush1.bf16.msra.mxu1 %v21577_v20  ;;  %v19832_v20 = vld [vmem:[%s28531_s3 + $0x1f8] ss:$12 sps:$4 sm:$0xff]  }
  0x5a   :  { %1632 = vmatprep.subr.bf16.mxu1 %v21591_v23  ;;  %v19837_v23 = vld [vmem:[%s28531_s3 + $0x214] ss:$12 sps:$4 sm:$0xff]  }
  0x5b   :  { %1000 = vmatpush1.bf16.msra.mxu0 %v19823_v26 }
  0x5c   :  { %1001 = vmatprep.subr.bf16.mxu0 %v19828_v27 }
  0x5d   :  { %1633 = vmatpush1.bf16.msra.mxu1 %v21601_v25  ;;  %v19835_v25 = vld [vmem:[%s28531_s3 + $0x210] ss:$12 sps:$4 sm:$0xff]  }
  0x5e   :  { %1634 = vmatprep.subr.bf16.mxu1 %v21618_v29  ;;  %v19840_v29 = vld [vmem:[%s28531_s3 + $0x22c] ss:$12 sps:$4 sm:$0xff]  }
  0x5f   :  { %1002 = vmatpush1.bf16.msra.mxu0 %v19826_v14 }
  0x60   :  { %1003 = vmatprep.subr.bf16.mxu0 %v19831_v28 }
  0x61   :  { %1635 = vmatpush1.bf16.msra.mxu1 %v21623_v30  ;;  %v19838_v30 = vld [vmem:[%s28531_s3 + $0x228] ss:$12 sps:$4 sm:$0xff]  }
  0x62   :  { %1636 = vmatprep.subr.bf16.mxu1 %v21637_v33  ;;  %v19843_v33 = vld [vmem:[%s28531_s3 + $0xe0] ss:$12 sps:$4 sm:$0xff]  }
  0x63   :  { %1004 = vmatpush1.bf16.msra.mxu0 %v19829_v15 }
  0x64   :  { %1005 = vmatprep.subr.bf16.mxu0 %v19834_v19 }
  0x65   :  { %1637 = vmatpush1.bf16.msra.mxu1 %v21647_v35  ;;  %v19845_v35 = vld [vmem:[%s28531_s3 + $0xf8] ss:$12 sps:$4 sm:$0xff]  }
  0x66   :  { %1638 = vmatprep.subr.bf16.mxu1 %v21666_v39  ;;  %v19849_v39 = vld [vmem:[%s28531_s3 + $0x128] ss:$12 sps:$4 sm:$0xff]  }
  0x67   :  { %1006 = vmatpush1.bf16.msra.mxu0 %v19832_v20 }
  0x68   :  { %1007 = vmatprep.subr.bf16.mxu0 %v19837_v23 }
  0x69   :  { %1639 = vmatpush1.bf16.msra.mxu1 %v21676_v41  ;;  %v19851_v41 = vld [vmem:[%s28531_s3 + $0x140] ss:$12 sps:$4 sm:$0xff]  }
  0x6a   :  { %1640 = vmatprep.subr.bf16.mxu1 %v21688_v43  ;;  %v19853_v43 = vld [vmem:[%s28531_s3 + $0x158] ss:$12 sps:$4 sm:$0xff]  }
  0x6b   :  { %1008 = vmatpush1.bf16.msra.mxu0 %v19835_v25 }
  0x6c   :  { %1009 = vmatprep.subr.bf16.mxu0 %v19840_v29 }
  0x6d   :  { %1641 = vmatpush1.bf16.msra.mxu1 %v21702_v46  ;;  %v19856_v46 = vld [vmem:[%s28531_s3 + $0xb0] ss:$12 sps:$4 sm:$0xff]  }
  0x6e   :  { %1642 = vmatprep.subr.bf16.mxu1 %v21718_v49  ;;  %v27_v49 = vld [vmem:[%s28532_s4] sm:$0x7] }
  0x6f   :  { %1010 = vmatpush1.bf16.msra.mxu0 %v19838_v30 }
  0x70   :  { %18002 = vmatprep.subr.bf16.mxu0 %v19841_v31 }
  0x71   :  { %1643 = vmatpush1.bf16.msra.mxu1 %v21728_v51  ;;  %v22023_v51 = vsub.s32 1, %v62_v48 }
  0x72   :  { %1028 = vmatmul.mubr.bf16.vlgmr.msra.gmra.mrb[32].mxu0 %v28537_v1  ;;  %1644 = vmatprep.subr.bf16.mxu1 %v21740_v53  ;;  %v22028_v53 = vrot.slane %v27_v49, %v22021_v50 }
  0x73   :  { %18003 = vmatpush3.bf16.msra.mxu0 %v19842_v32  ;;  %28755 = vst [vmem:[#allocation5_spill] sm:$0xff] %v22023_v51  ;;  %v22034_v56 = vrot.slane %v27_v49, %v22023_v51 }
  0x74   :  { %18004 = vmatprep.subr.bf16.mxu0 %v19843_v33 }
  0x75   :  { %1645 = vmatpush1.bf16.msra.mxu1 %v21747_v54  ;;  %v22031_v54 = vrot.slane %v27_v49, %v22025_v52 }
  0x76   :  { %1646 = vmatprep.subr.bf16.mxu1 %v21753_v55 }
  0x77   :  { %18005 = vmatpush3.bf16.msra.mxu0 %v19844_v34 }
  0x78   :  { %18006 = vmatprep.subr.bf16.mxu0 %v19845_v35 }
  0x79   :  { %1647 = vmatpush1.bf16.msra.mxu1 %v21764_v58 }
  0x7a   :  { %1648 = vmatprep.subr.bf16.mxu1 %v21772_v59 }
  0x7b   :  { %18007 = vmatpush3.bf16.msra.mxu0 %v19846_v36 }
  0x7c   :  { %18008 = vmatprep.subr.bf16.mxu0 %v19847_v37 }
  0x7d   :  { %1649 = vmatpush1.bf16.msra.mxu1 %v21784_v61 }
  0x7e   :  { %1650 = vmatprep.subr.bf16.mxu1 %v21790_v62 }
  0x7f   :  { %18009 = vmatpush3.bf16.msra.mxu0 %v19848_v38 }
  0x80   :  { %18010 = vmatprep.subr.bf16.mxu0 %v19849_v39 }
  0x81   :  { %1651 = vmatpush1.bf16.msra.mxu1 %v21802_v0 }
  0x82   :  { %1652 = vmatprep.subr.bf16.mxu1 %v21809_v2 }
  0x83   :  { %18011 = vmatpush3.bf16.msra.mxu0 %v19850_v40 }
  0x84   :  { %18012 = vmatprep.subr.bf16.mxu0 %v19851_v41 }
  0x85   :  { %1653 = vmatpush1.bf16.msra.mxu1 %v21819_v4 }
  0x86   :  { %1654 = vmatprep.subr.bf16.mxu1 %v21825_v5 }
  0x87   :  { %18013 = vmatpush3.bf16.msra.mxu0 %v19852_v42 }
  0x88   :  { %18014 = vmatprep.subr.bf16.mxu0 %v19853_v43 }
  0x89   :  { %1655 = vmatpush1.bf16.msra.mxu1 %v21837_v7 }
  0x8a   :  { %1656 = vmatprep.subr.bf16.mxu1 %v21844_v8 }
  0x8b   :  { %18015 = vmatpush3.bf16.msra.mxu0 %v19854_v44 }
  0x8c   :  { %18016 = vmatprep.subr.bf16.mxu0 %v19855_v45 }
  0x8d   :  { %1657 = vmatpush1.bf16.msra.mxu1 %v21854_v10 }
  0x8e   :  { %1658 = vmatprep.subr.bf16.mxu1 %v21860_v11 }
  0x8f   :  { %18017 = vmatpush3.bf16.msra.mxu0 %v19856_v46 }
  0x90   :  { %18950 = vmatprep.subr.bf16.mxu0 %v28555_v57 }
  0x91   :  { %1659 = vmatpush1.bf16.msra.mxu1 %v21868_v13 }
  0x92   :  { %1671 = vmatprep.subr.bf16.mxu1 %v21876_v16 }
  0xe5   :  { %v239_v55 = vpop.f32.mrb[0].mxu0  ;;  %v18916_v61 = vpop.f32.mrb[0].mxu1 }
  0xe6   :  { %v240_v58 = vadd.f32 %v239_v55, %v22028_v53  ;;  %v241_v59 = vpop.f32.mrb[1].mxu0  ;;  %v361_v0 = vadd.f32 %v18916_v61, %v22031_v54  ;;  %v352_v2 = vpop.f32.mrb[1].mxu1 }
  0xe7   :  { %v243_v60 = vpop.f32.mrb[2].mxu0  ;;  %v242_v3 = vadd.f32 %v241_v59, %v22034_v56  ;;  %v353_v5 = vadd.f32 %v352_v2, %v22031_v54  ;;  %v18917_v6 = vpop.f32.mrb[2].mxu1 }
  0xe8   :  { %v244_v62 = vadd.f32 %v243_v60, %v22028_v53  ;;  %v245_v63 = vpop.f32.mrb[3].mxu0  ;;  %v364_v8 = vadd.f32 %v18917_v6, %v22031_v54  ;;  %v355_v9 = vpop.f32.mrb[3].mxu1 }
  0xe9   :  { %v246_v4 = vadd.f32 %v245_v63, %v22034_v56  ;;  %v356_v11 = vadd.f32 %v355_v9, %v22031_v54 }
  0xea   :  { %v22042_v7 = vpack.c.bf16 %v244_v62, %v240_v58  ;;  %v22048_v12 = vpack.c.bf16 %v364_v8, %v361_v0 }
  0xeb   :  { %v22045_v10 = vpack.c.bf16 %v246_v4, %v242_v3  ;;  %v22050_v16 = vpack.c.bf16 %v356_v11, %v353_v5 }
  0xed   :  { %v249_v13 = vpop.f32.mrb[4].mxu0  ;;  %v18920_v24 = vpop.f32.mrb[4].mxu1 }
  0xee   :  { %v250_v17 = vadd.f32 %v249_v13, %v22028_v53  ;;  %v251_v18 = vpop.f32.mrb[5].mxu0  ;;  %v377_v14 = vadd.f32 %v18920_v24, %v22031_v54  ;;  %v368_v28 = vpop.f32.mrb[5].mxu1 }
  0xef   :  { %v252_v21 = vadd.f32 %v251_v18, %v22034_v56  ;;  %v253_v22 = vpop.f32.mrb[6].mxu0  ;;  %v369_v19 = vadd.f32 %v368_v28, %v22031_v54  ;;  %v18921_v20 = vpop.f32.mrb[6].mxu1 }
  0xf0   :  { %v254_v26 = vadd.f32 %v253_v22, %v22028_v53  ;;  %v255_v27 = vpop.f32.mrb[7].mxu0  ;;  %v380_v25 = vadd.f32 %v18921_v20, %v22031_v54  ;;  %v371_v29 = vpop.f32.mrb[7].mxu1 }
  0xf1   :  { %v256_v15 = vadd.f32 %v255_v27, %v22034_v56  ;;  %v372_v31 = vadd.f32 %v371_v29, %v22031_v54 }
  0xf2   :  { %v22058_v23 = vpack.c.bf16 %v254_v26, %v250_v17  ;;  %v22064_v32 = vpack.c.bf16 %v380_v25, %v377_v14 }
  0xf3   :  { %v22061_v30 = vpack.c.bf16 %v256_v15, %v252_v21  ;;  %v22066_v34 = vpack.c.bf16 %v372_v31, %v369_v19 }
  0xf5   :  { %v259_v33 = vpop.f32.mrb[8].mxu0  ;;  %v18924_v39 = vpop.f32.mrb[8].mxu1 }
  0xf6   :  { %v260_v35 = vadd.f32 %v259_v33, %v22028_v53  ;;  %v261_v36 = vpop.f32.mrb[9].mxu0  ;;  %v393_v42 = vadd.f32 %v18924_v39, %v22031_v54  ;;  %v384_v43 = vpop.f32.mrb[9].mxu1 }
  0xf7   :  { %v262_v37 = vadd.f32 %v261_v36, %v22034_v56  ;;  %v263_v38 = vpop.f32.mrb[10].mxu0  ;;  %v385_v45 = vadd.f32 %v384_v43, %v22031_v54  ;;  %v18925_v46 = vpop.f32.mrb[10].mxu1 }
  0xf8   :  { %v264_v40 = vadd.f32 %v263_v38, %v22028_v53  ;;  %v265_v41 = vpop.f32.mrb[11].mxu0  ;;  %v396_v48 = vadd.f32 %v18925_v46, %v22031_v54  ;;  %v387_v49 = vpop.f32.mrb[11].mxu1 }
  0xf9   :  { %v266_v44 = vadd.f32 %v265_v41, %v22034_v56  ;;  %v388_v58 = vadd.f32 %v387_v49, %v22031_v54 }
  0xfa   :  { %v22074_v47 = vpack.c.bf16 %v264_v40, %v260_v35  ;;  %v22080_v59 = vpack.c.bf16 %v396_v48, %v393_v42 }
  0xfb   :  { %v22077_v55 = vpack.c.bf16 %v266_v44, %v262_v37  ;;  %v22082_v61 = vpack.c.bf16 %v388_v58, %v385_v45 }
  0xfc   :  { %28757 = vst [vmem:[#allocation7_spill] sm:$0xff] %v22080_v59 }
  0xfd   :  { %v269_v60 = vpop.f32.mrb[12].mxu0  ;;  %28758 = vst [vmem:[#allocation8_spill] sm:$0xff] %v22082_v61  ;;  %v18928_v3 = vpop.f32.mrb[12].mxu1 }
  0xfe   :  { %v270_v62 = vadd.f32 %v269_v60, %v22028_v53  ;;  %v271_v63 = vpop.f32.mrb[13].mxu0  ;;  %v409_v6 = vadd.f32 %v18928_v3, %v22031_v54  ;;  %v400_v8 = vpop.f32.mrb[13].mxu1 }
  0xff   :  { %v272_v0 = vadd.f32 %v271_v63, %v22034_v56  ;;  %v273_v2 = vpop.f32.mrb[14].mxu0  ;;  %v401_v11 = vadd.f32 %v400_v8, %v22031_v54  ;;  %v18929_v13 = vpop.f32.mrb[14].mxu1 }
 0x100   :  { %v274_v4 = vadd.f32 %v273_v2, %v22028_v53  ;;  %v275_v5 = vpop.f32.mrb[15].mxu0  ;;  %v412_v18 = vadd.f32 %v18929_v13, %v22031_v54  ;;  %v403_v21 = vpop.f32.mrb[15].mxu1 }
 0x101   :  { %v276_v9 = vadd.f32 %v275_v5, %v22034_v56  ;;  %v404_v24 = vadd.f32 %v403_v21, %v22031_v54 }
 0x102   :  { %v22090_v17 = vpack.c.bf16 %v274_v4, %v270_v62  ;;  %v22096_v26 = vpack.c.bf16 %v412_v18, %v409_v6 }
 0x103   :  { %v22093_v22 = vpack.c.bf16 %v276_v9, %v272_v0  ;;  %v22098_v14 = vpack.c.bf16 %v404_v24, %v401_v11 }
 0x104   :  { %28759 = vst [vmem:[#allocation9_spill] sm:$0xff] %v22096_v26 }
 0x105   :  { %v279_v27 = vpop.f32.mrb[16].mxu0  ;;  %28760 = vst [vmem:[#allocation10_spill] sm:$0xff] %v22098_v14 }
 0x106   :  { %v280_v28 = vadd.f32 %v279_v27, %v22028_v53  ;;  %v281_v15 = vpop.f32.mrb[17].mxu0 }
 0x107   :  { %v282_v19 = vadd.f32 %v281_v15, %v22034_v56  ;;  %v283_v20 = vpop.f32.mrb[18].mxu0  ;;  %v17987_v25 = vpop.f32.mrb[16].mxu1 }
 0x108   :  { %v284_v29 = vadd.f32 %v283_v20, %v22028_v53  ;;  %v285_v31 = vpop.f32.mrb[19].mxu0  ;;  %v17988_v33 = vpop.f32.mrb[17].mxu1 }
 0x109   :  { %v286_v35 = vadd.f32 %v285_v31, %v22034_v56  ;;  %v17989_v36 = vadd.f32 %v17988_v33, %v17987_v25  ;;  %v17990_v54 = vpop.f32.mrb[18].mxu1  ;;  %v468_v25 = vunpack.c.l.bf16 %v22050_v16 }
 0x10a   :  { %v22104_v37 = vpack.c.bf16 %v284_v29, %v280_v28  ;;  %v17991_v38 = vpop.f32.mrb[19].mxu1 }
 0x10b   :  { %v22106_v39 = vpack.c.bf16 %v286_v35, %v282_v19  ;;  %v17992_v40 = vadd.f32 %v17991_v38, %v17990_v54  ;;  %v471_v35 = vunpack.c.h.bf16 %v22050_v16  ;;  %v469_v16 = vunpack.c.h.bf16 %v22042_v7 }
 0x10d   :  { %v289_v41 = vpop.f32.mrb[20].mxu0 }
 0x10e   :  { %v290_v42 = vadd.f32 %v289_v41, %v22028_v53  ;;  %v291_v43 = vpop.f32.mrb[21].mxu0 }
 0x10f   :  { %v292_v44 = vadd.f32 %v291_v43, %v22034_v56  ;;  %v293_v45 = vpop.f32.mrb[22].mxu0 }
 0x110   :  { %v294_v46 = vadd.f32 %v293_v45, %v22028_v53  ;;  %v295_v48 = vpop.f32.mrb[23].mxu0  ;;  %v466_v45 = vunpack.c.l.bf16 %v22042_v7 }
 0x111   :  { %v296_v49 = vadd.f32 %v295_v48, %v22034_v56  ;;  %v467_v48 = vunpack.c.l.bf16 %v22045_v10 }
 0x112   :  { %v22112_v58 = vpack.c.bf16 %v294_v46, %v290_v42 }
 0x113   :  { %v22114_v60 = vpack.c.bf16 %v296_v49, %v292_v44 }
 0x114   :  { %28761 = vst [vmem:[#allocation11_spill] sm:$0xff] %v22112_v58 }
 0x115   :  { %28762 = vst [vmem:[#allocation12_spill] sm:$0xff] %v22114_v60  ;;  %v299_v62 = vpop.f32.mrb[24].mxu0 }
 0x116   :  { %v300_v63 = vadd.f32 %v299_v62, %v22028_v53  ;;  %v301_v0 = vpop.f32.mrb[25].mxu0 }
 0x117   :  { %v302_v2 = vadd.f32 %v301_v0, %v22034_v56  ;;  %v303_v3 = vpop.f32.mrb[26].mxu0 }
 0x118   :  { %v304_v4 = vadd.f32 %v303_v3, %v22028_v53  ;;  %v305_v5 = vpop.f32.mrb[27].mxu0 }
 0x119   :  { %v306_v6 = vadd.f32 %v305_v5, %v22034_v56 }
 0x11a   :  { %v22120_v8 = vpack.c.bf16 %v304_v4, %v300_v63 }
 0x11b   :  { %v22122_v9 = vpack.c.bf16 %v306_v6, %v302_v2 }
 0x11c   :  { %28763 = vst [vmem:[#allocation13_spill] sm:$0xff] %v22120_v8 }
 0x11d   :  { %28764 = vst [vmem:[#allocation14_spill] sm:$0xff] %v22122_v9  ;;  %v309_v11 = vpop.f32.mrb[28].mxu0  ;;  %v1145_v9 = vunpack.c.h.bf16 %v22058_v23 }
 0x11e   :  { %v310_v13 = vadd.f32 %v309_v11, %v22028_v53  ;;  %v311_v18 = vpop.f32.mrb[29].mxu0  ;;  %v19857_v11 = vld [vmem:[%s28531_s3 + $0x188] ss:$12 sps:$4 sm:$0xff]  }
 0x11f   :  { %v312_v21 = vadd.f32 %v311_v18, %v22034_v56  ;;  %v313_v24 = vpop.f32.mrb[30].mxu0 }
 0x120   :  { %v314_v27 = vadd.f32 %v313_v24, %v22028_v53  ;;  %v315_v28 = vpop.f32.mrb[31].mxu0  ;;  %v21306_v24 = vld [vmem:[%s28531_s3 + $0x19c] ss:$12 sps:$4 sm:$0xff]  }
 0x121   :  { %v316_v15 = vadd.f32 %v315_v28, %v22034_v56  ;;  %v21307_v28 = vld [vmem:[%s28531_s3 + $0x198] ss:$12 sps:$4 sm:$0xff]  }
 0x122   :  { %v22128_v19 = vpack.c.bf16 %v314_v27, %v310_v13  ;;  %v19859_v27 = vld [vmem:[%s28531_s3 + $0x1b8] ss:$12 sps:$4 sm:$0xff]  }
 0x123   :  { %v22130_v20 = vpack.c.bf16 %v316_v15, %v312_v21  ;;  %v21305_v21 = vld [vmem:[%s28531_s3 + $0x180] ss:$12 sps:$4 sm:$0xff]  }
 0x124   :  { %28765 = vst [vmem:[#allocation15_spill] sm:$0xff] %v22128_v19  ;;  %v21308_v15 = vld [vmem:[%s28531_s3 + $0x1b4] ss:$12 sps:$4 sm:$0xff]  }
 0x125   :  { %28766 = vst [vmem:[#allocation16_spill] sm:$0xff] %v22130_v20 }
 0x127   :  { %v1113_v29 = vpop.f32.mrb[20].mxu1 }
 0x128   :  { %v1114_v31 = vadd.f32 %v17989_v36, %v1113_v29  ;;  %v18948_v33 = vpop.f32.mrb[21].mxu1  ;;  %v21309_v29 = vld [vmem:[%s28531_s3 + $0x1b0] ss:$12 sps:$4 sm:$0xff]  }
 0x129   :  { %v1116_v54 = vpop.f32.mrb[22].mxu1  ;;  %v19861_v33 = vld [vmem:[%s28531_s3 + $0x1e8] ss:$12 sps:$4 sm:$0xff]  }
 0x12a   :  { %v1122_v38 = vadd.f32 %v1114_v31, %v468_v25  ;;  %v1117_v41 = vadd.f32 %v17992_v40, %v1116_v54  ;;  %v18949_v42 = vpop.f32.mrb[23].mxu1  ;;  %v470_v40 = vunpack.c.h.bf16 %v22045_v10  ;;  %v19858_v10 = vld [vmem:[%s28531_s3 + $0x1a0] ss:$12 sps:$4 sm:$0xff]   ;;  %v19860_v25 = vld [vmem:[%s28531_s3 + $0x1d0] ss:$12 sps:$4 sm:$0xff]  }
 0x12b   :  { %v21310_v31 = vld [vmem:[%s28531_s3 + $0x1cc] ss:$12 sps:$4 sm:$0xff]   ;;  %v21312_v54 = vld [vmem:[%s28531_s3 + $0x1e4] ss:$12 sps:$4 sm:$0xff]   ;;  %v21314_v42 = vld [vmem:[%s28531_s3 + $0x1fc] ss:$12 sps:$4 sm:$0xff]  }
 0x12c   :  { %21017 = vtanh.f32 %v1122_v38  ;;  %v1125_v53 = vadd.f32 %v1117_v41, %v471_v35  ;;  %v21311_v35 = vld [vmem:[%s28531_s3 + $0x1c8] ss:$12 sps:$4 sm:$0xff]   ;;  %v19862_v38 = vld [vmem:[%s28531_s3 + $0x200] ss:$12 sps:$4 sm:$0xff]  }
 0x12d   :  { %v21313_v41 = vld [vmem:[%s28531_s3 + $0x1e0] ss:$12 sps:$4 sm:$0xff]  }
 0x12e   :  { %21019 = vtanh.f32 %v1125_v53  ;;  %v19863_v53 = vld [vmem:[%s28531_s3 + $0x218] ss:$12 sps:$4 sm:$0xff]  }
 0x136   :  { %v21018_v43 = vpop.eup %21017 }
 0x138   :  { %v21020_v56 = vpop.eup %21019 }
 0x139   :  { %v22134_v44 = vpack.c.bf16 %v21020_v56, %v21018_v43  ;;  %v21315_v43 = vld [vmem:[%s28531_s3 + $0x1f8] ss:$12 sps:$4 sm:$0xff]   ;;  %v21316_v56 = vld [vmem:[%s28531_s3 + $0x214] ss:$12 sps:$4 sm:$0xff]  }
 0x13b   :  { %28767 = vst [vmem:[#allocation17_spill] sm:$0xff] %v22134_v44 }
 0x145   :  { %v1029_v46 = vpop.f32.mrb[32].mxu0 }
 0x146   :  { %v1120_v36 = vadd.f32 %v1029_v46, %v466_v45  ;;  %v1031_v49 = vpop.f32.mrb[33].mxu0  ;;  %v19864_v45 = vld [vmem:[%s28531_s3 + $0x230] ss:$12 sps:$4 sm:$0xff]  }
 0x147   :  { %v1121_v62 = vadd.f32 %v1031_v49, %v467_v48  ;;  %v1033_v63 = vpop.f32.mrb[34].mxu0  ;;  %v19867_v46 = vld [vmem:[%s28531_s3 + $0x4] ss:$12 sps:$4 sm:$0xff]   ;;  %v22230_v49 = vld [vmem:[%s28531_s3] ss:$12 sps:$4 sm:$0xff]  }
 0x148   :  { %21021 = vtanh.f32 %v1120_v36  ;;  %v1123_v0 = vadd.f32 %v1033_v63, %v469_v16  ;;  %v1035_v2 = vpop.f32.mrb[35].mxu0  ;;  %v21317_v48 = vld [vmem:[%s28531_s3 + $0x210] ss:$12 sps:$4 sm:$0xff]   ;;  %v21318_v36 = vld [vmem:[%s28531_s3 + $0x22c] ss:$12 sps:$4 sm:$0xff]  }
 0x149   :  { %21023 = vtanh.f32 %v1121_v62  ;;  %v1124_v3 = vadd.f32 %v1035_v2, %v470_v40  ;;  %v22235_v16 = vld [vmem:[%s28531_s3 + $0x1c] ss:$12 sps:$4 sm:$0xff]   ;;  %v22243_v63 = vld [vmem:[%s28531_s3 + $0x18] ss:$12 sps:$4 sm:$0xff]   ;;  %v22250_v40 = vld [vmem:[%s28531_s3 + $0x34] ss:$12 sps:$4 sm:$0xff]  }
 0x14a   :  { %21025 = vtanh.f32 %v1123_v0  ;;  %v21319_v62 = vld [vmem:[%s28531_s3 + $0x228] ss:$12 sps:$4 sm:$0xff]   ;;  %v22257_v0 = vld [vmem:[%s28531_s3 + $0x30] ss:$12 sps:$4 sm:$0xff]   ;;  %v22262_v2 = vld [vmem:[%s28531_s3 + $0x4c] ss:$12 sps:$4 sm:$0xff]  }
 0x14b   :  { %21027 = vtanh.f32 %v1124_v3  ;;  %v22269_v3 = vld [vmem:[%s28531_s3 + $0x48] ss:$12 sps:$4 sm:$0xff]  }
 0x152   :  { %v21022_v4 = vpop.eup %21021 }
 0x153   :  { %v21024_v5 = vpop.eup %21023 }
 0x154   :  { %v21026_v6 = vpop.eup %21025 }
 0x155   :  { %v21028_v13 = vpop.eup %21027  ;;  %v22143_v7 = vpack.c.bf16 %v21026_v6, %v21022_v4  ;;  %v22277_v4 = vld [vmem:[%s28531_s3 + $0x64] ss:$12 sps:$4 sm:$0xff]  }
 0x156   :  { %v22145_v18 = vpack.c.bf16 %v21028_v13, %v21024_v5  ;;  %v22282_v5 = vld [vmem:[%s28531_s3 + $0x60] ss:$12 sps:$4 sm:$0xff]   ;;  %v22289_v6 = vld [vmem:[%s28531_s3 + $0x78] ss:$12 sps:$4 sm:$0xff]  }
 0x157   :  { %28768 = vst [vmem:[#allocation18_spill] sm:$0xff] %v22143_v7  ;;  %v22299_v13 = vld [vmem:[%s28531_s3 + $0x94] ss:$12 sps:$4 sm:$0xff]  }
 0x158   :  { %28769 = vst [vmem:[#allocation19_spill] sm:$0xff] %v22145_v18  ;;  %1660 = vmatprep.mubr.bf16.mxu1 %v22145_v18  ;;  %1746 = vmatprep.mubr.bf16.mxu0 %v22145_v18 }
 0x159   :  { %1661 = vmatmul.mubr.bf16.vlgmr.msra.gmra.mrb[24].mxu1 %v22143_v7  ;;  %1747 = vmatmul.mubr.bf16.vlgmr.msra.gmra.mrb[36].mxu0 %v22143_v7  ;;  %v1144_v7 = vunpack.c.l.bf16 %v22048_v12 }
 0x15a   :  { %1672 = vmatpush1.bf16.msra.mxu1 %v21305_v21  ;;  %18951 = vmatpush3.bf16.msra.mxu0 %v19857_v11  ;;  %v22294_v11 = vld [vmem:[%s28531_s3 + $0x7c] ss:$12 sps:$4 sm:$0xff]  }
 0x15b   :  { %1673 = vmatprep.subr.bf16.mxu1 %v21306_v24  ;;  %18952 = vmatprep.subr.bf16.mxu0 %v28555_v57  ;;  %v19893_v21 = vld [vmem:[%s28531_s3 + $0x8] ss:$12 sps:$4 sm:$0xff]   ;;  %v22312_v24 = vld [vmem:[%s28531_s3 + $0x90] ss:$12 sps:$4 sm:$0xff]  }
 0x15c   :  { %1703 = vmatprep.mubr.bf16.mxu1 %v28537_v1  ;;  %18966 = vmatprep.mubr.msk.bf16.mxu0 %vm21467_vm1, %v28555_v57 }
 0x15e   :  { %1674 = vmatpush1.bf16.msra.mxu1 %v21307_v28  ;;  %18953 = vmatpush3.bf16.msra.mxu0 %v19858_v10  ;;  %v19892_v10 = vld [vmem:[%s28531_s3 + $0xc8] ss:$12 sps:$4 sm:$0xff]   ;;  %v22321_v28 = vld [vmem:[%s28531_s3 + $0xac] ss:$12 sps:$4 sm:$0xff]  }
 0x15f   :  { %1675 = vmatprep.subr.bf16.mxu1 %v21308_v15  ;;  %18954 = vmatprep.subr.bf16.mxu0 %v28555_v57  ;;  %v19898_v15 = vld [vmem:[%s28531_s3 + $0x20] ss:$12 sps:$4 sm:$0xff]  }
 0x162   :  { %1676 = vmatpush1.bf16.msra.mxu1 %v21309_v29  ;;  %18955 = vmatpush3.bf16.msra.mxu0 %v19859_v27  ;;  %v19897_v27 = vld [vmem:[%s28531_s3 + $0xe0] ss:$12 sps:$4 sm:$0xff]   ;;  %v19902_v29 = vld [vmem:[%s28531_s3 + $0xf8] ss:$12 sps:$4 sm:$0xff]  }
 0x163   :  { %1677 = vmatprep.subr.bf16.mxu1 %v21310_v31  ;;  %18956 = vmatprep.subr.bf16.mxu0 %v28555_v57  ;;  %v22337_v31 = vld [vmem:[%s28531_s3 + $0xc4] ss:$12 sps:$4 sm:$0xff]  }
 0x166   :  { %1678 = vmatpush1.bf16.msra.mxu1 %v21311_v35  ;;  %18957 = vmatpush3.bf16.msra.mxu0 %v19860_v25  ;;  %v22329_v25 = vld [vmem:[%s28531_s3 + $0xa8] ss:$12 sps:$4 sm:$0xff]   ;;  %v19907_v35 = vld [vmem:[%s28531_s3 + $0x110] ss:$12 sps:$4 sm:$0xff]  }
 0x167   :  { %1679 = vmatprep.subr.bf16.mxu1 %v21312_v54  ;;  %18958 = vmatprep.subr.bf16.mxu0 %v28555_v57  ;;  %v22350_v54 = vld [vmem:[%s28531_s3 + $0xc0] ss:$12 sps:$4 sm:$0xff]  }
 0x16a   :  { %1680 = vmatpush1.bf16.msra.mxu1 %v21313_v41  ;;  %18959 = vmatpush3.bf16.msra.mxu0 %v19861_v33  ;;  %v19903_v33 = vld [vmem:[%s28531_s3 + $0x38] ss:$12 sps:$4 sm:$0xff]  }
 0x16b   :  { %1681 = vmatprep.subr.bf16.mxu1 %v21314_v42  ;;  %18960 = vmatprep.subr.bf16.mxu0 %v28555_v57  ;;  %v22362_v41 = vld [vmem:[%s28531_s3 + $0xd8] ss:$12 sps:$4 sm:$0xff]   ;;  %v22367_v42 = vld [vmem:[%s28531_s3 + $0xf4] ss:$12 sps:$4 sm:$0xff]  }
 0x16e   :  { %1682 = vmatpush1.bf16.msra.mxu1 %v21315_v43  ;;  %18961 = vmatpush3.bf16.msra.mxu0 %v19862_v38  ;;  %v22355_v38 = vld [vmem:[%s28531_s3 + $0xdc] ss:$12 sps:$4 sm:$0xff]   ;;  %v22379_v43 = vld [vmem:[%s28531_s3 + $0x10c] ss:$12 sps:$4 sm:$0xff]  }
 0x16f   :  { %1683 = vmatprep.subr.bf16.mxu1 %v21316_v56  ;;  %18962 = vmatprep.subr.bf16.mxu0 %v28555_v57  ;;  %v22386_v56 = vld [vmem:[%s28531_s3 + $0x108] ss:$12 sps:$4 sm:$0xff]  }
 0x172   :  { %1684 = vmatpush1.bf16.msra.mxu1 %v21317_v48  ;;  %18963 = vmatpush3.bf16.msra.mxu0 %v19863_v53  ;;  %v22374_v53 = vld [vmem:[%s28531_s3 + $0xf0] ss:$12 sps:$4 sm:$0xff]   ;;  %v19912_v48 = vld [vmem:[%s28531_s3 + $0x128] ss:$12 sps:$4 sm:$0xff]  }
 0x173   :  { %1685 = vmatprep.subr.bf16.mxu1 %v21318_v36  ;;  %18964 = vmatprep.subr.bf16.mxu0 %v28555_v57  ;;  %v22405_v36 = vld [vmem:[%s28531_s3 + $0x120] ss:$12 sps:$4 sm:$0xff]  }
 0x176   :  { %1686 = vmatpush1.bf16.msra.mxu1 %v21319_v62  ;;  %18965 = vmatpush3.bf16.msra.mxu0 %v19864_v45  ;;  %v19908_v45 = vld [vmem:[%s28531_s3 + $0x50] ss:$12 sps:$4 sm:$0xff]   ;;  %v19913_v62 = vld [vmem:[%s28531_s3 + $0x68] ss:$12 sps:$4 sm:$0xff]  }
 0x177   :  { %2304 = vmatprep.subr.bf16.mxu0 %v19867_v46  ;;  %18033 = vmatprep.subr.bf16.mxu1 %v19892_v10  ;;  %v22397_v46 = vld [vmem:[%s28531_s3 + $0x124] ss:$12 sps:$4 sm:$0xff]   ;;  %v22415_v10 = vld [vmem:[%s28531_s3 + $0x13c] ss:$12 sps:$4 sm:$0xff]  }
 0x179   :  { %1704 = vmatmul.mubr.bf16.vlgmr.msra.gmra.mrb[24].mxu1 %v22134_v44  ;;  %18967 = vmatmul.mubr.bf16.vlgmr.msra.gmra.mrb[40].mxu0 %v22134_v44 }
 0x17a   :  { %2305 = vmatpush1.bf16.msra.mxu0 %v22230_v49  ;;  %18034 = vmatpush3.bf16.msra.mxu1 %v19893_v21  ;;  %v19917_v21 = vld [vmem:[%s28531_s3 + $0x140] ss:$12 sps:$4 sm:$0xff]  }
 0x17b   :  { %2306 = vmatprep.subr.bf16.mxu0 %v22235_v16  ;;  %18035 = vmatprep.subr.bf16.mxu1 %v19897_v27  ;;  %v22423_v27 = vld [vmem:[%s28531_s3 + $0x138] ss:$12 sps:$4 sm:$0xff]  }
 0x17e   :  { %2307 = vmatpush1.bf16.msra.mxu0 %v22243_v63  ;;  %18036 = vmatpush3.bf16.msra.mxu1 %v19898_v15  ;;  %v19918_v15 = vld [vmem:[%s28531_s3 + $0x80] ss:$12 sps:$4 sm:$0xff]  }
 0x17f   :  { %2308 = vmatprep.subr.bf16.mxu0 %v22250_v40  ;;  %18037 = vmatprep.subr.bf16.mxu1 %v19902_v29  ;;  %v22432_v29 = vld [vmem:[%s28531_s3 + $0x154] ss:$12 sps:$4 sm:$0xff]  }
 0x182   :  { %2309 = vmatpush1.bf16.msra.mxu0 %v22257_v0  ;;  %18038 = vmatpush3.bf16.msra.mxu1 %v19903_v33  ;;  %v19922_v33 = vld [vmem:[%s28531_s3 + $0x158] ss:$12 sps:$4 sm:$0xff]  }
 0x183   :  { %2310 = vmatprep.subr.bf16.mxu0 %v22262_v2  ;;  %18039 = vmatprep.subr.bf16.mxu1 %v19907_v35  ;;  %v22441_v35 = vld [vmem:[%s28531_s3 + $0x150] ss:$12 sps:$4 sm:$0xff]  }
 0x186   :  { %2311 = vmatpush1.bf16.msra.mxu0 %v22269_v3  ;;  %18040 = vmatpush3.bf16.msra.mxu1 %v19908_v45  ;;  %v19923_v45 = vld [vmem:[%s28531_s3 + $0x98] ss:$12 sps:$4 sm:$0xff]  }
 0x187   :  { %2312 = vmatprep.subr.bf16.mxu0 %v22277_v4  ;;  %18041 = vmatprep.subr.bf16.mxu1 %v19912_v48  ;;  %v22449_v48 = vld [vmem:[%s28531_s3 + $0x16c] ss:$12 sps:$4 sm:$0xff]  }
 0x18a   :  { %2313 = vmatpush1.bf16.msra.mxu0 %v22282_v5  ;;  %18042 = vmatpush3.bf16.msra.mxu1 %v19913_v62  ;;  %v19927_v62 = vld [vmem:[%s28531_s3 + $0x170] ss:$12 sps:$4 sm:$0xff]  }
 0x18b   :  { %2314 = vmatprep.subr.bf16.mxu0 %v22294_v11  ;;  %18043 = vmatprep.subr.bf16.mxu1 %v19917_v21  ;;  %v22458_v21 = vld [vmem:[%s28531_s3 + $0x168] ss:$12 sps:$4 sm:$0xff]  }
 0x18e   :  { %2315 = vmatpush1.bf16.msra.mxu0 %v22289_v6  ;;  %18044 = vmatpush3.bf16.msra.mxu1 %v19918_v15  ;;  %v19928_v15 = vld [vmem:[%s28531_s3 + $0xb0] ss:$12 sps:$4 sm:$0xff]  }
 0x18f   :  { %2316 = vmatprep.subr.bf16.mxu0 %v22299_v13  ;;  %18045 = vmatprep.subr.bf16.mxu1 %v19922_v33  ;;  %v22469_v33 = vld [vmem:[%s28531_s3 + $0x184] ss:$12 sps:$4 sm:$0xff]  }
 0x192   :  { %2317 = vmatpush1.bf16.msra.mxu0 %v22312_v24  ;;  %18046 = vmatpush3.bf16.msra.mxu1 %v19923_v45 }
 0x193   :  { %2318 = vmatprep.subr.bf16.mxu0 %v22321_v28  ;;  %18047 = vmatprep.subr.bf16.mxu1 %v19927_v62  ;;  %v1142_v62 = vunpack.c.l.bf16 %v22058_v23 }
 0x196   :  { %2319 = vmatpush1.bf16.msra.mxu0 %v22329_v25  ;;  %18048 = vmatpush3.bf16.msra.mxu1 %v19928_v15  ;;  %v1143_v15 = vunpack.c.l.bf16 %v22061_v30 }
 0x197   :  { %2320 = vmatprep.subr.bf16.mxu0 %v22337_v31  ;;  %18970 = vmatprep.subr.bf16.mxu1 %v28555_v57 }
 0x19a   :  { %2321 = vmatpush1.bf16.msra.mxu0 %v22350_v54 }
 0x19b   :  { %2322 = vmatprep.subr.bf16.mxu0 %v22355_v38 }
 0x19e   :  { %2323 = vmatpush1.bf16.msra.mxu0 %v22362_v41 }
 0x19f   :  { %2324 = vmatprep.subr.bf16.mxu0 %v22367_v42 }
 0x1a2   :  { %2325 = vmatpush1.bf16.msra.mxu0 %v22374_v53 }
 0x1a3   :  { %2326 = vmatprep.subr.bf16.mxu0 %v22379_v43 }
 0x1a6   :  { %2327 = vmatpush1.bf16.msra.mxu0 %v22386_v56 }
 0x1a7   :  { %2328 = vmatprep.subr.bf16.mxu0 %v22397_v46 }
 0x1aa   :  { %2329 = vmatpush1.bf16.msra.mxu0 %v22405_v36 }
 0x1ab   :  { %2330 = vmatprep.subr.bf16.mxu0 %v22415_v10 }
 0x1ae   :  { %2331 = vmatpush1.bf16.msra.mxu0 %v22423_v27 }
 0x1af   :  { %2332 = vmatprep.subr.bf16.mxu0 %v22432_v29 }
 0x1b2   :  { %2333 = vmatpush1.bf16.msra.mxu0 %v22441_v35 }
 0x1b3   :  { %2334 = vmatprep.subr.bf16.mxu0 %v22449_v48 }
 0x1b6   :  { %2335 = vmatpush1.bf16.msra.mxu0 %v22458_v21 }
 0x1b7   :  { %2347 = vmatprep.subr.bf16.mxu0 %v22469_v33 }
 0x22c   :  { %v18018_v1 = vpop.f32.mrb[36].mxu0 }
 0x22d   :  { %v18019_v51 = vpop.f32.mrb[37].mxu0 }
 0x22e   :  { %v18020_v50 = vadd.f32 %v18019_v51, %v18018_v1  ;;  %v18021_v52 = vpop.f32.mrb[38].mxu0  ;;  %v1147_v1 = vunpack.c.h.bf16 %v22048_v12 }
 0x22f   :  { %v18022_v45 = vpop.f32.mrb[39].mxu0 }
 0x230   :  { %v18023_v44 = vadd.f32 %v18022_v45, %v18021_v52  ;;  %v1146_v52 = vunpack.c.h.bf16 %v22061_v30 }
 0x24c   :  { %v1705_v26 = vpop.f32.mrb[24].mxu1  ;;  %v1789_v20 = vpop.f32.mrb[40].mxu0 }
 0x24d   :  { %v1796_v19 = vadd.f32 %v1705_v26, %v1142_v62  ;;  %v1790_v18 = vadd.f32 %v18020_v50, %v1789_v20  ;;  %v1707_v14 = vpop.f32.mrb[25].mxu1  ;;  %v18968_v57 = vpop.f32.mrb[41].mxu0 }
 0x24e   :  { %v1797_v8 = vadd.f32 %v1707_v14, %v1143_v15  ;;  %v1709_v59 = vpop.f32.mrb[26].mxu1  ;;  %v1792_v51 = vpop.f32.mrb[42].mxu0 }
 0x24f   :  { %21029 = vtanh.f32 %v1796_v19  ;;  %v1798_v45 = vadd.f32 %v1790_v18, %v1144_v7  ;;  %v1799_v60 = vadd.f32 %v1709_v59, %v1145_v9  ;;  %v1793_v58 = vadd.f32 %v18023_v44, %v1792_v51  ;;  %v1711_v61 = vpop.f32.mrb[27].mxu1  ;;  %v18969_v26 = vpop.f32.mrb[43].mxu0  ;;  %v19936_v9 = vld [vmem:[%s28531_s3 + $0x1a0] ss:$12 sps:$4 sm:$0xff]   ;;  %v19940_v51 = vld [vmem:[%s28531_s3 + $0x1b8] ss:$12 sps:$4 sm:$0xff]  }
 0x250   :  { %21031 = vtanh.f32 %v1797_v8  ;;  %v1800_v62 = vadd.f32 %v1711_v61, %v1146_v52  ;;  %v22488_v61 = vld [vmem:[%s28531_s3 + $0x180] ss:$12 sps:$4 sm:$0xff]   ;;  %v22506_v8 = vld [vmem:[%s28531_s3 + $0x198] ss:$12 sps:$4 sm:$0xff]   ;;  %v28771_v44 = vmov 0.0   ;;  %v28772_v18 = vmov 0  }
 0x251   :  { %21033 = vtanh.f32 %v1798_v45  ;;  %v1801_v50 = vadd.f32 %v1793_v58, %v1147_v1  ;;  %v19932_v58 = vld [vmem:[%s28531_s3 + $0x188] ss:$12 sps:$4 sm:$0xff]   ;;  %v22525_v1 = vld [vmem:[%s28531_s3 + $0x1b0] ss:$12 sps:$4 sm:$0xff]   ;;  %v22535_v52 = vld [vmem:[%s28531_s3 + $0x1cc] ss:$12 sps:$4 sm:$0xff]  }
 0x252   :  { %21035 = vtanh.f32 %v1799_v60  ;;  %v22496_v60 = vld [vmem:[%s28531_s3 + $0x19c] ss:$12 sps:$4 sm:$0xff]   ;;  %v22516_v7 = vld [vmem:[%s28531_s3 + $0x1b4] ss:$12 sps:$4 sm:$0xff]  }
 0x253   :  { %21037 = vtanh.f32 %v1801_v50  ;;  %v22541_v45 = vld [vmem:[%s28531_s3 + $0x1c8] ss:$12 sps:$4 sm:$0xff]   ;;  %v19944_v26 = vld [vmem:[%s28531_s3 + $0x1d0] ss:$12 sps:$4 sm:$0xff]   ;;  %v22557_v50 = vld [vmem:[%s28531_s3 + $0x1e0] ss:$12 sps:$4 sm:$0xff]  }
 0x254   :  { %21039 = vtanh.f32 %v1800_v62  ;;  %v22551_v62 = vld [vmem:[%s28531_s3 + $0x1e4] ss:$12 sps:$4 sm:$0xff]  }
 0x259   :  { %v21030_v57 = vpop.eup %21029 }
 0x25a   :  { %v21032_v23 = vpop.eup %21031 }
 0x25b   :  { %v21034_v14 = vpop.eup %21033 }
 0x25c   :  { %v21036_v12 = vpop.eup %21035 }
 0x25d   :  { %v21038_v20 = vpop.eup %21037  ;;  %v22479_v15 = vpack.c.bf16 %v21036_v12, %v21030_v57  ;;  %v19948_v57 = vld [vmem:[%s28531_s3 + $0x1e8] ss:$12 sps:$4 sm:$0xff]   ;;  %v19952_v12 = vld [vmem:[%s28531_s3 + $0x200] ss:$12 sps:$4 sm:$0xff]  }
 0x25e   :  { %v21040_v30 = vpop.eup %21039  ;;  %v22481_v19 = vpack.c.bf16 %v21038_v20, %v21034_v14  ;;  %v22573_v14 = vld [vmem:[%s28531_s3 + $0x1f8] ss:$12 sps:$4 sm:$0xff]   ;;  %v22583_v20 = vld [vmem:[%s28531_s3 + $0x214] ss:$12 sps:$4 sm:$0xff]  }
 0x25f   :  { %v22483_v59 = vpack.c.bf16 %v21040_v30, %v21032_v23  ;;  %v22567_v23 = vld [vmem:[%s28531_s3 + $0x1fc] ss:$12 sps:$4 sm:$0xff]  }
 0x260   :  { %28770 = vst [vmem:[#allocation20_spill] sm:$0xff] %v22481_v19  ;;  %v22589_v30 = vld [vmem:[%s28531_s3 + $0x210] ss:$12 sps:$4 sm:$0xff]  }
 0x261   :  { %2336 = vmatprep.mubr.bf16.mxu0 %v22483_v59  ;;  %2422 = vmatprep.mubr.bf16.mxu1 %v22483_v59 }
 0x262   :  { %2337 = vmatmul.mubr.bf16.vlgmr.msra.gmra.mrb[44].mxu0 %v22479_v15  ;;  %2423 = vmatmul.mubr.bf16.vlgmr.msra.gmra.mrb[28].mxu1 %v22479_v15 }
 0x263   :  { %2348 = vmatpush1.bf16.msra.mxu0 %v22488_v61  ;;  %18971 = vmatpush3.bf16.msra.mxu1 %v19932_v58  ;;  %v19956_v58 = vld [vmem:[%s28531_s3 + $0x218] ss:$12 sps:$4 sm:$0xff]  }
 0x264   :  { %2349 = vmatprep.subr.bf16.mxu0 %v22496_v60  ;;  %18972 = vmatprep.subr.bf16.mxu1 %v28771_v44 }
 0x265   :  { %2379 = vmatprep.mubr.bf16.mxu0 %v28772_v18  ;;  %18986 = vmatprep.mubr.msk.bf16.mxu1 %vm21467_vm1, %v28771_v44 }
 0x267   :  { %2350 = vmatpush1.bf16.msra.mxu0 %v22506_v8  ;;  %18973 = vmatpush3.bf16.msra.mxu1 %v19936_v9  ;;  %v22599_v9 = vld [vmem:[%s28531_s3 + $0x22c] ss:$12 sps:$4 sm:$0xff]  }
 0x268   :  { %2351 = vmatprep.subr.bf16.mxu0 %v22516_v7  ;;  %18974 = vmatprep.subr.bf16.mxu1 %v28771_v44 }
 0x26b   :  { %2352 = vmatpush1.bf16.msra.mxu0 %v22525_v1  ;;  %18975 = vmatpush3.bf16.msra.mxu1 %v19940_v51  ;;  %v22605_v51 = vld [vmem:[%s28531_s3 + $0x228] ss:$12 sps:$4 sm:$0xff]  }
 0x26c   :  { %2353 = vmatprep.subr.bf16.mxu0 %v22535_v52  ;;  %18976 = vmatprep.subr.bf16.mxu1 %v28771_v44 }
 0x26f   :  { %2354 = vmatpush1.bf16.msra.mxu0 %v22541_v45  ;;  %18977 = vmatpush3.bf16.msra.mxu1 %v19944_v26  ;;  %v19960_v26 = vld [vmem:[%s28531_s3 + $0x230] ss:$12 sps:$4 sm:$0xff]  }
 0x270   :  { %2355 = vmatprep.subr.bf16.mxu0 %v22551_v62  ;;  %18978 = vmatprep.subr.bf16.mxu1 %v28771_v44 }
 0x273   :  { %2356 = vmatpush1.bf16.msra.mxu0 %v22557_v50  ;;  %18979 = vmatpush3.bf16.msra.mxu1 %v19948_v57  ;;  %v21320_v57 = vld [vmem:[%s28531_s3 + $0x4] ss:$12 sps:$4 sm:$0xff]  }
 0x274   :  { %2357 = vmatprep.subr.bf16.mxu0 %v22567_v23  ;;  %18980 = vmatprep.subr.bf16.mxu1 %v28771_v44 }
 0x277   :  { %2358 = vmatpush1.bf16.msra.mxu0 %v22573_v14  ;;  %18981 = vmatpush3.bf16.msra.mxu1 %v19952_v12 }
 0x278   :  { %2359 = vmatprep.subr.bf16.mxu0 %v22583_v20  ;;  %18982 = vmatprep.subr.bf16.mxu1 %v28771_v44 }
 0x27b   :  { %2360 = vmatpush1.bf16.msra.mxu0 %v22589_v30  ;;  %18983 = vmatpush3.bf16.msra.mxu1 %v19956_v58 }
 0x27c   :  { %2361 = vmatprep.subr.bf16.mxu0 %v22599_v9  ;;  %18984 = vmatprep.subr.bf16.mxu1 %v28771_v44 }
 0x27f   :  { %2362 = vmatpush1.bf16.msra.mxu0 %v22605_v51  ;;  %18985 = vmatpush3.bf16.msra.mxu1 %v19960_v26  ;;  %v1823_v26 = vunpack.c.h.bf16 %v22066_v34 }
 0x280   :  { %2980 = vmatprep.subr.bf16.mxu1 %v21320_v57 }
 0x282   :  { %2380 = vmatmul.mubr.bf16.vlgmr.msra.gmra.mrb[44].mxu0 %v22481_v19  ;;  %18987 = vmatmul.mubr.bf16.vlgmr.msra.gmra.mrb[32].mxu1 %v22481_v19 }
 0x283   :  { %2981 = vmatpush1.bf16.msra.mxu1 %v22230_v49  ;;  %v19961_v49 = vld [vmem:[%s28531_s3 + $0xc8] ss:$12 sps:$4 sm:$0xff]  }
 0x284   :  { %2982 = vmatprep.subr.bf16.mxu1 %v22235_v16  ;;  %v19962_v16 = vld [vmem:[%s28531_s3 + $0x8] ss:$12 sps:$4 sm:$0xff]   ;;  %18064 = vmatprep.subr.bf16.mxu0 %v19961_v49  ;;  %v1822_v49 = vunpack.c.h.bf16 %v22077_v55 }
 0x285   :  { %18065 = vmatpush3.bf16.msra.mxu0 %v19962_v16 }
 0x287   :  { %2983 = vmatpush1.bf16.msra.mxu1 %v22243_v63  ;;  %v19963_v63 = vld [vmem:[%s28531_s3 + $0xe0] ss:$12 sps:$4 sm:$0xff]  }
 0x288   :  { %2984 = vmatprep.subr.bf16.mxu1 %v22250_v40  ;;  %v19964_v40 = vld [vmem:[%s28531_s3 + $0x20] ss:$12 sps:$4 sm:$0xff]   ;;  %18066 = vmatprep.subr.bf16.mxu0 %v19963_v63 }
 0x289   :  { %18067 = vmatpush3.bf16.msra.mxu0 %v19964_v40 }
 0x28b   :  { %2985 = vmatpush1.bf16.msra.mxu1 %v22257_v0  ;;  %v19965_v0 = vld [vmem:[%s28531_s3 + $0xf8] ss:$12 sps:$4 sm:$0xff]  }
 0x28c   :  { %2986 = vmatprep.subr.bf16.mxu1 %v22262_v2  ;;  %v19966_v2 = vld [vmem:[%s28531_s3 + $0x38] ss:$12 sps:$4 sm:$0xff]   ;;  %18068 = vmatprep.subr.bf16.mxu0 %v19965_v0 }
 0x28d   :  { %18069 = vmatpush3.bf16.msra.mxu0 %v19966_v2 }
 0x28f   :  { %2987 = vmatpush1.bf16.msra.mxu1 %v22269_v3  ;;  %v19967_v3 = vld [vmem:[%s28531_s3 + $0x110] ss:$12 sps:$4 sm:$0xff]  }
 0x290   :  { %2988 = vmatprep.subr.bf16.mxu1 %v22277_v4  ;;  %18070 = vmatprep.subr.bf16.mxu0 %v19967_v3  ;;  %v19968_v4 = vld [vmem:[%s28531_s3 + $0x50] ss:$12 sps:$4 sm:$0xff]  }
 0x291   :  { %18071 = vmatpush3.bf16.msra.mxu0 %v19968_v4 }
 0x293   :  { %2989 = vmatpush1.bf16.msra.mxu1 %v22282_v5  ;;  %v19969_v5 = vld [vmem:[%s28531_s3 + $0x128] ss:$12 sps:$4 sm:$0xff]  }
 0x294   :  { %2990 = vmatprep.subr.bf16.mxu1 %v22294_v11  ;;  %18072 = vmatprep.subr.bf16.mxu0 %v19969_v5  ;;  %v19971_v11 = vld [vmem:[%s28531_s3 + $0x140] ss:$12 sps:$4 sm:$0xff]  }
 0x297   :  { %2991 = vmatpush1.bf16.msra.mxu1 %v22289_v6  ;;  %v19970_v6 = vld [vmem:[%s28531_s3 + $0x68] ss:$12 sps:$4 sm:$0xff]  }
 0x298   :  { %2992 = vmatprep.subr.bf16.mxu1 %v22299_v13  ;;  %18073 = vmatpush3.bf16.msra.mxu0 %v19970_v6  ;;  %v19972_v13 = vld [vmem:[%s28531_s3 + $0x80] ss:$12 sps:$4 sm:$0xff]  }
 0x299   :  { %18074 = vmatprep.subr.bf16.mxu0 %v19971_v11 }
 0x29b   :  { %2993 = vmatpush1.bf16.msra.mxu1 %v22312_v24  ;;  %v19973_v24 = vld [vmem:[%s28531_s3 + $0x158] ss:$12 sps:$4 sm:$0xff]  }
 0x29c   :  { %2994 = vmatprep.subr.bf16.mxu1 %v22321_v28  ;;  %18075 = vmatpush3.bf16.msra.mxu0 %v19972_v13  ;;  %v19974_v28 = vld [vmem:[%s28531_s3 + $0x98] ss:$12 sps:$4 sm:$0xff]  }
 0x29d   :  { %18076 = vmatprep.subr.bf16.mxu0 %v19973_v24 }
 0x29f   :  { %2995 = vmatpush1.bf16.msra.mxu1 %v22329_v25  ;;  %v19975_v25 = vld [vmem:[%s28531_s3 + $0x170] ss:$12 sps:$4 sm:$0xff]  }
 0x2a0   :  { %2996 = vmatprep.subr.bf16.mxu1 %v22337_v31  ;;  %18077 = vmatpush3.bf16.msra.mxu0 %v19974_v28  ;;  %v19976_v31 = vld [vmem:[%s28531_s3 + $0xb0] ss:$12 sps:$4 sm:$0xff]  }
 0x2a1   :  { %18078 = vmatprep.subr.bf16.mxu0 %v19975_v25  ;;  %v19977_v25 = vld [vmem:[%s28531_s3 + $0x188] ss:$12 sps:$4 sm:$0xff]  }
 0x2a3   :  { %2997 = vmatpush1.bf16.msra.mxu1 %v22350_v54 }
 0x2a4   :  { %2998 = vmatprep.subr.bf16.mxu1 %v22355_v38  ;;  %18079 = vmatpush3.bf16.msra.mxu0 %v19976_v31  ;;  %v19978_v31 = vld [vmem:[%s28531_s3 + $0x1a0] ss:$12 sps:$4 sm:$0xff]  }
 0x2a5   :  { %18990 = vmatprep.subr.bf16.mxu0 %v28771_v44 }
 0x2a7   :  { %2999 = vmatpush1.bf16.msra.mxu1 %v22362_v41 }
 0x2a8   :  { %3000 = vmatprep.subr.bf16.mxu1 %v22367_v42 }
 0x2ab   :  { %3001 = vmatpush1.bf16.msra.mxu1 %v22374_v53 }
 0x2ac   :  { %3002 = vmatprep.subr.bf16.mxu1 %v22379_v43 }
 0x2af   :  { %3003 = vmatpush1.bf16.msra.mxu1 %v22386_v56  ;;  %v1818_v56 = vunpack.c.l.bf16 %v22074_v47 }
 0x2b0   :  { %3004 = vmatprep.subr.bf16.mxu1 %v22397_v46 }
 0x2b3   :  { %3005 = vmatpush1.bf16.msra.mxu1 %v22405_v36 }
 0x2b4   :  { %3006 = vmatprep.subr.bf16.mxu1 %v22415_v10  ;;  %v1819_v10 = vunpack.c.l.bf16 %v22077_v55 }
 0x2b7   :  { %3007 = vmatpush1.bf16.msra.mxu1 %v22423_v27 }
 0x2b8   :  { %3008 = vmatprep.subr.bf16.mxu1 %v22432_v29  ;;  %v1820_v29 = vunpack.c.l.bf16 %v22066_v34 }
 0x2bb   :  { %3009 = vmatpush1.bf16.msra.mxu1 %v22441_v35 }
 0x2bc   :  { %3010 = vmatprep.subr.bf16.mxu1 %v22449_v48 }
 0x2bf   :  { %3011 = vmatpush1.bf16.msra.mxu1 %v22458_v21 }
 0x2c0   :  { %3023 = vmatprep.subr.bf16.mxu1 %v22469_v33  ;;  %v1821_v33 = vunpack.c.h.bf16 %v22074_v47 }
 0x335   :  { %v18049_v54 = vpop.f32.mrb[28].mxu1 }
 0x336   :  { %v18050_v38 = vpop.f32.mrb[29].mxu1 }
 0x337   :  { %v18051_v41 = vadd.f32 %v18050_v38, %v18049_v54  ;;  %v18052_v42 = vpop.f32.mrb[30].mxu1  ;;  %v22822_v54 = vld [vmem:[%s28531_s3 + $0x60] ss:$12 sps:$4 sm:$0xff]   ;;  %v22829_v38 = vld [vmem:[%s28531_s3 + $0x78] ss:$12 sps:$4 sm:$0xff]  }
 0x338   :  { %v18053_v53 = vpop.f32.mrb[31].mxu1 }
 0x339   :  { %v18054_v43 = vadd.f32 %v18053_v53, %v18052_v42  ;;  %v22839_v42 = vld [vmem:[%s28531_s3 + $0x94] ss:$12 sps:$4 sm:$0xff]  }
 0x33a   :  { %v20012_v53 = vld [vmem:[%s28531_s3 + $0xc8] ss:$12 sps:$4 sm:$0xff]  }
 0x355   :  { %v2381_v46 = vpop.f32.mrb[44].mxu0  ;;  %v2465_v36 = vpop.f32.mrb[32].mxu1 }
 0x356   :  { %v2472_v27 = vadd.f32 %v2381_v46, %v1818_v56  ;;  %v2466_v35 = vadd.f32 %v18051_v41, %v2465_v36  ;;  %v2383_v48 = vpop.f32.mrb[45].mxu0  ;;  %v18988_v21 = vpop.f32.mrb[33].mxu1  ;;  %v22834_v41 = vld [vmem:[%s28531_s3 + $0x7c] ss:$12 sps:$4 sm:$0xff]   ;;  %v20017_v46 = vld [vmem:[%s28531_s3 + $0xe0] ss:$12 sps:$4 sm:$0xff]  }
 0x357   :  { %v2473_v12 = vadd.f32 %v2383_v48, %v1819_v10  ;;  %v2385_v58 = vpop.f32.mrb[46].mxu0  ;;  %v2468_v57 = vpop.f32.mrb[34].mxu1  ;;  %v22852_v56 = vld [vmem:[%s28531_s3 + $0x90] ss:$12 sps:$4 sm:$0xff]   ;;  %v22861_v36 = vld [vmem:[%s28531_s3 + $0xac] ss:$12 sps:$4 sm:$0xff]  }
 0x358   :  { %21041 = vtanh.f32 %v2472_v27  ;;  %v2474_v16 = vadd.f32 %v2466_v35, %v1820_v29  ;;  %v2475_v63 = vadd.f32 %v2385_v58, %v1821_v33  ;;  %v2469_v40 = vadd.f32 %v18054_v43, %v2468_v57  ;;  %v2387_v0 = vpop.f32.mrb[47].mxu0  ;;  %v18989_v2 = vpop.f32.mrb[35].mxu1  ;;  %v20013_v43 = vld [vmem:[%s28531_s3 + $0x8] ss:$12 sps:$4 sm:$0xff]   ;;  %v20018_v10 = vld [vmem:[%s28531_s3 + $0x20] ss:$12 sps:$4 sm:$0xff]  }
 0x359   :  { %21043 = vtanh.f32 %v2473_v12  ;;  %v2476_v3 = vadd.f32 %v2387_v0, %v1822_v49  ;;  %v20022_v27 = vld [vmem:[%s28531_s3 + $0xf8] ss:$12 sps:$4 sm:$0xff]   ;;  %v22873_v29 = vld [vmem:[%s28531_s3 + $0xa8] ss:$12 sps:$4 sm:$0xff]   ;;  %v20027_v21 = vld [vmem:[%s28531_s3 + $0x110] ss:$12 sps:$4 sm:$0xff]  }
 0x35a   :  { %21045 = vtanh.f32 %v2474_v16  ;;  %v2477_v4 = vadd.f32 %v2469_v40, %v1823_v26  ;;  %v22879_v35 = vld [vmem:[%s28531_s3 + $0xc4] ss:$12 sps:$4 sm:$0xff]   ;;  %v22891_v33 = vld [vmem:[%s28531_s3 + $0xc0] ss:$12 sps:$4 sm:$0xff]   ;;  %v22897_v12 = vld [vmem:[%s28531_s3 + $0xdc] ss:$12 sps:$4 sm:$0xff]  }
 0x35b   :  { %21047 = vtanh.f32 %v2475_v63  ;;  %v20023_v48 = vld [vmem:[%s28531_s3 + $0x38] ss:$12 sps:$4 sm:$0xff]   ;;  %v22909_v26 = vld [vmem:[%s28531_s3 + $0xf4] ss:$12 sps:$4 sm:$0xff]   ;;  %v22915_v57 = vld [vmem:[%s28531_s3 + $0xf0] ss:$12 sps:$4 sm:$0xff]  }
 0x35c   :  { %21049 = vtanh.f32 %v2477_v4  ;;  %v22903_v58 = vld [vmem:[%s28531_s3 + $0xd8] ss:$12 sps:$4 sm:$0xff]   ;;  %v22927_v16 = vld [vmem:[%s28531_s3 + $0x108] ss:$12 sps:$4 sm:$0xff]   ;;  %v20028_v63 = vld [vmem:[%s28531_s3 + $0x50] ss:$12 sps:$4 sm:$0xff]  }
 0x35d   :  { %21051 = vtanh.f32 %v2476_v3  ;;  %v22921_v49 = vld [vmem:[%s28531_s3 + $0x10c] ss:$12 sps:$4 sm:$0xff]   ;;  %v22937_v40 = vld [vmem:[%s28531_s3 + $0x124] ss:$12 sps:$4 sm:$0xff]   ;;  %v20032_v0 = vld [vmem:[%s28531_s3 + $0x128] ss:$12 sps:$4 sm:$0xff]  }
 0x35e   :  { %v22945_v2 = vld [vmem:[%s28531_s3 + $0x120] ss:$12 sps:$4 sm:$0xff]   ;;  %v20033_v3 = vld [vmem:[%s28531_s3 + $0x68] ss:$12 sps:$4 sm:$0xff]  }
 0x35f   :  { %v22955_v4 = vld [vmem:[%s28531_s3 + $0x13c] ss:$12 sps:$4 sm:$0xff]  }
 0x362   :  { %v21042_v47 = vpop.eup %21041 }
 0x363   :  { %v21044_v5 = vpop.eup %21043 }
 0x364   :  { %v21046_v6 = vpop.eup %21045 }
 0x365   :  { %v21048_v34 = vpop.eup %21047 }
 0x366   :  { %v21050_v11 = vpop.eup %21049  ;;  %v22705_v13 = vpack.c.bf16 %v21048_v34, %v21042_v47  ;;  %v20037_v47 = vld [vmem:[%s28531_s3 + $0x140] ss:$12 sps:$4 sm:$0xff]  }
 0x367   :  { %v21052_v55 = vpop.eup %21051  ;;  %v22707_v24 = vpack.c.bf16 %v21050_v11, %v21046_v6  ;;  %v20038_v6 = vld [vmem:[%s28531_s3 + $0x80] ss:$12 sps:$4 sm:$0xff]   ;;  %v20042_v11 = vld [vmem:[%s28531_s3 + $0x158] ss:$12 sps:$4 sm:$0xff]  }
 0x368   :  { %28773 = vst [vmem:[#allocation21_spill] sm:$0xff] %v22705_v13  ;;  %v22709_v28 = vpack.c.bf16 %v21052_v55, %v21044_v5  ;;  %v22963_v5 = vld [vmem:[%s28531_s3 + $0x138] ss:$12 sps:$4 sm:$0xff]   ;;  %v22972_v34 = vld [vmem:[%s28531_s3 + $0x154] ss:$12 sps:$4 sm:$0xff]  }
 0x369   :  { %28774 = vst [vmem:[#allocation22_spill] sm:$0xff] %v22707_v24  ;;  %v22981_v55 = vld [vmem:[%s28531_s3 + $0x150] ss:$12 sps:$4 sm:$0xff]  }
 0x36a   :  { %3012 = vmatprep.mubr.bf16.mxu1 %v22709_v28  ;;  %3098 = vmatprep.mubr.bf16.mxu0 %v22709_v28 }
 0x36b   :  { %3013 = vmatmul.mubr.bf16.vlgmr.msra.gmra.mrb[36].mxu1 %v22705_v13  ;;  %3099 = vmatmul.mubr.bf16.vlgmr.msra.gmra.mrb[48].mxu0 %v22705_v13 }
 0x36c   :  { %3024 = vmatpush1.bf16.msra.mxu1 %v22488_v61  ;;  %18991 = vmatpush3.bf16.msra.mxu0 %v19977_v25  ;;  %v19979_v61 = vld [vmem:[%s28531_s3 + $0x1b8] ss:$12 sps:$4 sm:$0xff]  }
 0x36d   :  { %3025 = vmatprep.subr.bf16.mxu1 %v22496_v60  ;;  %18992 = vmatprep.subr.bf16.mxu0 %v28771_v44  ;;  %v19980_v60 = vld [vmem:[%s28531_s3 + $0x1d0] ss:$12 sps:$4 sm:$0xff]   ;;  %v20043_v25 = vld [vmem:[%s28531_s3 + $0x98] ss:$12 sps:$4 sm:$0xff]  }
 0x36e   :  { %3055 = vmatprep.mubr.bf16.mxu1 %v28772_v18  ;;  %19006 = vmatprep.mubr.msk.bf16.mxu0 %vm21467_vm1, %v28771_v44 }
 0x370   :  { %3026 = vmatpush1.bf16.msra.mxu1 %v22506_v8  ;;  %18993 = vmatpush3.bf16.msra.mxu0 %v19978_v31  ;;  %v19981_v8 = vld [vmem:[%s28531_s3 + $0x1e8] ss:$12 sps:$4 sm:$0xff]   ;;  %v22990_v31 = vld [vmem:[%s28531_s3 + $0x16c] ss:$12 sps:$4 sm:$0xff]  }
 0x371   :  { %3027 = vmatprep.subr.bf16.mxu1 %v22516_v7  ;;  %18994 = vmatprep.subr.bf16.mxu0 %v28771_v44  ;;  %v19982_v7 = vld [vmem:[%s28531_s3 + $0x200] ss:$12 sps:$4 sm:$0xff]  }
 0x374   :  { %3028 = vmatpush1.bf16.msra.mxu1 %v22525_v1  ;;  %18995 = vmatpush3.bf16.msra.mxu0 %v19979_v61  ;;  %v19983_v1 = vld [vmem:[%s28531_s3 + $0x218] ss:$12 sps:$4 sm:$0xff]   ;;  %v20047_v61 = vld [vmem:[%s28531_s3 + $0x170] ss:$12 sps:$4 sm:$0xff]  }
 0x375   :  { %3029 = vmatprep.subr.bf16.mxu1 %v22535_v52  ;;  %18996 = vmatprep.subr.bf16.mxu0 %v28771_v44  ;;  %v19984_v52 = vld [vmem:[%s28531_s3 + $0x230] ss:$12 sps:$4 sm:$0xff]  }
 0x378   :  { %3030 = vmatpush1.bf16.msra.mxu1 %v22541_v45  ;;  %18997 = vmatpush3.bf16.msra.mxu0 %v19980_v60  ;;  %v22766_v45 = vld [vmem:[%s28531_s3 + $0x4] ss:$12 sps:$4 sm:$0xff]   ;;  %v22999_v60 = vld [vmem:[%s28531_s3 + $0x168] ss:$12 sps:$4 sm:$0xff]  }
 0x379   :  { %3031 = vmatprep.subr.bf16.mxu1 %v22551_v62  ;;  %18998 = vmatprep.subr.bf16.mxu0 %v28771_v44  ;;  %v22772_v62 = vld [vmem:[%s28531_s3] ss:$12 sps:$4 sm:$0xff]  }
 0x37c   :  { %3032 = vmatpush1.bf16.msra.mxu1 %v22557_v50  ;;  %18999 = vmatpush3.bf16.msra.mxu0 %v19981_v8  ;;  %v22778_v50 = vld [vmem:[%s28531_s3 + $0x1c] ss:$12 sps:$4 sm:$0xff]  }
 0x37d   :  { %3033 = vmatprep.subr.bf16.mxu1 %v22567_v23  ;;  %19000 = vmatprep.subr.bf16.mxu0 %v28771_v44  ;;  %v22786_v23 = vld [vmem:[%s28531_s3 + $0x18] ss:$12 sps:$4 sm:$0xff]   ;;  %v20048_v8 = vld [vmem:[%s28531_s3 + $0xb0] ss:$12 sps:$4 sm:$0xff]  }
 0x380   :  { %3034 = vmatpush1.bf16.msra.mxu1 %v22573_v14  ;;  %19001 = vmatpush3.bf16.msra.mxu0 %v19982_v7  ;;  %v22792_v14 = vld [vmem:[%s28531_s3 + $0x34] ss:$12 sps:$4 sm:$0xff]   ;;  %v23009_v7 = vld [vmem:[%s28531_s3 + $0x184] ss:$12 sps:$4 sm:$0xff]  }
 0x381   :  { %3035 = vmatprep.subr.bf16.mxu1 %v22583_v20  ;;  %19002 = vmatprep.subr.bf16.mxu0 %v28771_v44  ;;  %v22798_v20 = vld [vmem:[%s28531_s3 + $0x30] ss:$12 sps:$4 sm:$0xff]  }
 0x384   :  { %3036 = vmatpush1.bf16.msra.mxu1 %v22589_v30  ;;  %19003 = vmatpush3.bf16.msra.mxu0 %v19983_v1  ;;  %v22804_v30 = vld [vmem:[%s28531_s3 + $0x4c] ss:$12 sps:$4 sm:$0xff]  }
 0x385   :  { %3037 = vmatprep.subr.bf16.mxu1 %v22599_v9  ;;  %19004 = vmatprep.subr.bf16.mxu0 %v28771_v44  ;;  %v22810_v9 = vld [vmem:[%s28531_s3 + $0x48] ss:$12 sps:$4 sm:$0xff]  }
 0x388   :  { %3038 = vmatpush1.bf16.msra.mxu1 %v22605_v51  ;;  %19005 = vmatpush3.bf16.msra.mxu0 %v19984_v52  ;;  %v22817_v51 = vld [vmem:[%s28531_s3 + $0x64] ss:$12 sps:$4 sm:$0xff]  }
 0x389   :  { %3656 = vmatprep.subr.bf16.mxu0 %v22766_v45  ;;  %18095 = vmatprep.subr.bf16.mxu1 %v20012_v53 }
 0x38b   :  { %3056 = vmatmul.mubr.bf16.vlgmr.msra.gmra.mrb[36].mxu1 %v22707_v24  ;;  %19007 = vmatmul.mubr.bf16.vlgmr.msra.gmra.mrb[52].mxu0 %v22707_v24 }
 0x38c   :  { %3657 = vmatpush1.bf16.msra.mxu0 %v22772_v62  ;;  %18096 = vmatpush3.bf16.msra.mxu1 %v20013_v43 }
 0x38d   :  { %3658 = vmatprep.subr.bf16.mxu0 %v22778_v50  ;;  %18097 = vmatprep.subr.bf16.mxu1 %v20017_v46 }
 0x390   :  { %3659 = vmatpush1.bf16.msra.mxu0 %v22786_v23  ;;  %18098 = vmatpush3.bf16.msra.mxu1 %v20018_v10 }
 0x391   :  { %3660 = vmatprep.subr.bf16.mxu0 %v22792_v14  ;;  %18099 = vmatprep.subr.bf16.mxu1 %v20022_v27  ;;  %v2494_v27 = vunpack.c.l.bf16 %v22090_v17 }
 0x394   :  { %3661 = vmatpush1.bf16.msra.mxu0 %v22798_v20  ;;  %18100 = vmatpush3.bf16.msra.mxu1 %v20023_v48 }
 0x395   :  { %3662 = vmatprep.subr.bf16.mxu0 %v22804_v30  ;;  %18101 = vmatprep.subr.bf16.mxu1 %v20027_v21 }
 0x398   :  { %3663 = vmatpush1.bf16.msra.mxu0 %v22810_v9  ;;  %18102 = vmatpush3.bf16.msra.mxu1 %v20028_v63  ;;  %v2495_v63 = vunpack.c.l.bf16 %v22093_v22 }
 0x399   :  { %3664 = vmatprep.subr.bf16.mxu0 %v22817_v51  ;;  %18103 = vmatprep.subr.bf16.mxu1 %v20032_v0 }
 0x39c   :  { %3665 = vmatpush1.bf16.msra.mxu0 %v22822_v54  ;;  %18104 = vmatpush3.bf16.msra.mxu1 %v20033_v3  ;;  %v2496_v3 = vunpack.c.l.bf16 %v22064_v32 }
 0x39d   :  { %3666 = vmatprep.subr.bf16.mxu0 %v22834_v41  ;;  %18105 = vmatprep.subr.bf16.mxu1 %v20037_v47 }
 0x3a0   :  { %3667 = vmatpush1.bf16.msra.mxu0 %v22829_v38  ;;  %18106 = vmatpush3.bf16.msra.mxu1 %v20038_v6 }
 0x3a1   :  { %3668 = vmatprep.subr.bf16.mxu0 %v22839_v42  ;;  %18107 = vmatprep.subr.bf16.mxu1 %v20042_v11 }
 0x3a4   :  { %3669 = vmatpush1.bf16.msra.mxu0 %v22852_v56  ;;  %18108 = vmatpush3.bf16.msra.mxu1 %v20043_v25  ;;  %v2497_v25 = vunpack.c.h.bf16 %v22090_v17 }
 0x3a5   :  { %3670 = vmatprep.subr.bf16.mxu0 %v22861_v36  ;;  %18109 = vmatprep.subr.bf16.mxu1 %v20047_v61 }
 0x3a8   :  { %3671 = vmatpush1.bf16.msra.mxu0 %v22873_v29  ;;  %18110 = vmatpush3.bf16.msra.mxu1 %v20048_v8 }
 0x3a9   :  { %3672 = vmatprep.subr.bf16.mxu0 %v22879_v35  ;;  %19010 = vmatprep.subr.bf16.mxu1 %v28771_v44 }
 0x3ac   :  { %3673 = vmatpush1.bf16.msra.mxu0 %v22891_v33 }
 0x3ad   :  { %3674 = vmatprep.subr.bf16.mxu0 %v22897_v12 }
 0x3b0   :  { %3675 = vmatpush1.bf16.msra.mxu0 %v22903_v58 }
 0x3b1   :  { %3676 = vmatprep.subr.bf16.mxu0 %v22909_v26 }
 0x3b4   :  { %3677 = vmatpush1.bf16.msra.mxu0 %v22915_v57 }
 0x3b5   :  { %3678 = vmatprep.subr.bf16.mxu0 %v22921_v49 }
 0x3b8   :  { %3679 = vmatpush1.bf16.msra.mxu0 %v22927_v16 }
 0x3b9   :  { %3680 = vmatprep.subr.bf16.mxu0 %v22937_v40 }
 0x3bc   :  { %3681 = vmatpush1.bf16.msra.mxu0 %v22945_v2 }
 0x3bd   :  { %3682 = vmatprep.subr.bf16.mxu0 %v22955_v4 }
 0x3c0   :  { %3683 = vmatpush1.bf16.msra.mxu0 %v22963_v5 }
 0x3c1   :  { %3684 = vmatprep.subr.bf16.mxu0 %v22972_v34 }
 0x3c4   :  { %3685 = vmatpush1.bf16.msra.mxu0 %v22981_v55 }
 0x3c5   :  { %3686 = vmatprep.subr.bf16.mxu0 %v22990_v31 }
 0x3c8   :  { %3687 = vmatpush1.bf16.msra.mxu0 %v22999_v60 }
 0x3c9   :  { %3699 = vmatprep.subr.bf16.mxu0 %v23009_v7 }
 0x43e   :  { %v18080_v1 = vpop.f32.mrb[48].mxu0 }
 0x43f   :  { %v18081_v52 = vpop.f32.mrb[49].mxu0 }
 0x440   :  { %v18082_v53 = vadd.f32 %v18081_v52, %v18080_v1  ;;  %v18083_v43 = vpop.f32.mrb[50].mxu0  ;;  %v2499_v1 = vunpack.c.h.bf16 %v22064_v32 }
 0x441   :  { %v18084_v46 = vpop.f32.mrb[51].mxu0 }
 0x442   :  { %v18085_v10 = vadd.f32 %v18084_v46, %v18083_v43  ;;  %v2498_v43 = vunpack.c.h.bf16 %v22093_v22 }
 0x45e   :  { %v3057_v48 = vpop.f32.mrb[36].mxu1  ;;  %v3141_v21 = vpop.f32.mrb[52].mxu0 }
 0x45f   :  { %v3148_v0 = vadd.f32 %v3057_v48, %v2494_v27  ;;  %v3142_v47 = vadd.f32 %v18082_v53, %v3141_v21  ;;  %v3059_v6 = vpop.f32.mrb[37].mxu1  ;;  %v19008_v11 = vpop.f32.mrb[53].mxu0 }
 0x460   :  { %v3149_v61 = vadd.f32 %v3059_v6, %v2495_v63  ;;  %v3061_v8 = vpop.f32.mrb[38].mxu1  ;;  %v3144_v52 = vpop.f32.mrb[54].mxu0 }
 0x461   :  { %21053 = vtanh.f32 %v3148_v0  ;;  %v3150_v46 = vadd.f32 %v3142_v47, %v2496_v3  ;;  %v3151_v24 = vadd.f32 %v3061_v8, %v2497_v25  ;;  %v3145_v19 = vadd.f32 %v18085_v10, %v3144_v52  ;;  %v3063_v13 = vpop.f32.mrb[39].mxu1  ;;  %v19009_v27 = vpop.f32.mrb[55].mxu0  ;;  %v23046_v3 = vld [vmem:[%s28531_s3 + $0x198] ss:$12 sps:$4 sm:$0xff]   ;;  %v20056_v47 = vld [vmem:[%s28531_s3 + $0x1a0] ss:$12 sps:$4 sm:$0xff]  }
 0x462   :  { %21055 = vtanh.f32 %v3149_v61  ;;  %v3152_v48 = vadd.f32 %v3063_v13, %v2498_v43  ;;  %v23028_v13 = vld [vmem:[%s28531_s3 + $0x180] ss:$12 sps:$4 sm:$0xff]   ;;  %v23065_v61 = vld [vmem:[%s28531_s3 + $0x1b0] ss:$12 sps:$4 sm:$0xff]   ;;  %v20060_v8 = vld [vmem:[%s28531_s3 + $0x1b8] ss:$12 sps:$4 sm:$0xff]  }
 0x463   :  { %21057 = vtanh.f32 %v3150_v46  ;;  %v3153_v53 = vadd.f32 %v3145_v19, %v2499_v1  ;;  %v20052_v19 = vld [vmem:[%s28531_s3 + $0x188] ss:$12 sps:$4 sm:$0xff]   ;;  %v23075_v1 = vld [vmem:[%s28531_s3 + $0x1cc] ss:$12 sps:$4 sm:$0xff]   ;;  %v20064_v43 = vld [vmem:[%s28531_s3 + $0x1d0] ss:$12 sps:$4 sm:$0xff]  }
 0x464   :  { %21059 = vtanh.f32 %v3151_v24  ;;  %v23036_v24 = vld [vmem:[%s28531_s3 + $0x19c] ss:$12 sps:$4 sm:$0xff]   ;;  %v23056_v25 = vld [vmem:[%s28531_s3 + $0x1b4] ss:$12 sps:$4 sm:$0xff]   ;;  %v23091_v46 = vld [vmem:[%s28531_s3 + $0x1e4] ss:$12 sps:$4 sm:$0xff]  }
 0x465   :  { %21061 = vtanh.f32 %v3153_v53  ;;  %v23081_v52 = vld [vmem:[%s28531_s3 + $0x1c8] ss:$12 sps:$4 sm:$0xff]   ;;  %v23097_v27 = vld [vmem:[%s28531_s3 + $0x1e0] ss:$12 sps:$4 sm:$0xff]  }
 0x466   :  { %21063 = vtanh.f32 %v3152_v48  ;;  %v20068_v48 = vld [vmem:[%s28531_s3 + $0x1e8] ss:$12 sps:$4 sm:$0xff]  }
 0x467   :  { %v23107_v53 = vld [vmem:[%s28531_s3 + $0x1fc] ss:$12 sps:$4 sm:$0xff]  }
 0x46b   :  { %v21054_v17 = vpop.eup %21053 }
 0x46c   :  { %v21056_v21 = vpop.eup %21055 }
 0x46d   :  { %v21058_v63 = vpop.eup %21057 }
 0x46e   :  { %v21060_v32 = vpop.eup %21059 }
 0x46f   :  { %v21062_v6 = vpop.eup %21061  ;;  %v23019_v11 = vpack.c.bf16 %v21060_v32, %v21054_v17  ;;  %v23113_v17 = vld [vmem:[%s28531_s3 + $0x1f8] ss:$12 sps:$4 sm:$0xff]   ;;  %v23129_v32 = vld [vmem:[%s28531_s3 + $0x210] ss:$12 sps:$4 sm:$0xff]  }
 0x470   :  { %v21064_v22 = vpop.eup %21063  ;;  %v23021_v0 = vpack.c.bf16 %v21062_v6, %v21058_v63  ;;  %v23123_v63 = vld [vmem:[%s28531_s3 + $0x214] ss:$12 sps:$4 sm:$0xff]   ;;  %v20076_v6 = vld [vmem:[%s28531_s3 + $0x218] ss:$12 sps:$4 sm:$0xff]  }
 0x471   :  { %v23023_v10 = vpack.c.bf16 %v21064_v22, %v21056_v21  ;;  %v20072_v21 = vld [vmem:[%s28531_s3 + $0x200] ss:$12 sps:$4 sm:$0xff]  }
 0x472   :  { %28775 = vst [vmem:[#allocation23_spill] sm:$0xff] %v23021_v0  ;;  %v23139_v22 = vld [vmem:[%s28531_s3 + $0x22c] ss:$12 sps:$4 sm:$0xff]  }
 0x473   :  { %3688 = vmatprep.mubr.bf16.mxu0 %v23023_v10  ;;  %3774 = vmatprep.mubr.bf16.mxu1 %v23023_v10 }
 0x474   :  { %3689 = vmatmul.mubr.bf16.vlgmr.msra.gmra.mrb[56].mxu0 %v23019_v11  ;;  %3775 = vmatmul.mubr.bf16.vlgmr.msra.gmra.mrb[40].mxu1 %v23019_v11 }
 0x475   :  { %3700 = vmatpush1.bf16.msra.mxu0 %v23028_v13  ;;  %19011 = vmatpush3.bf16.msra.mxu1 %v20052_v19  ;;  %v23145_v19 = vld [vmem:[%s28531_s3 + $0x228] ss:$12 sps:$4 sm:$0xff]  }
 0x476   :  { %3701 = vmatprep.subr.bf16.mxu0 %v23036_v24  ;;  %19012 = vmatprep.subr.bf16.mxu1 %v28771_v44 }
 0x477   :  { %3731 = vmatprep.mubr.bf16.mxu0 %v28772_v18  ;;  %19026 = vmatprep.mubr.msk.bf16.mxu1 %vm21467_vm1, %v28771_v44 }
 0x479   :  { %3702 = vmatpush1.bf16.msra.mxu0 %v23046_v3  ;;  %19013 = vmatpush3.bf16.msra.mxu1 %v20056_v47  ;;  %v20080_v47 = vld [vmem:[%s28531_s3 + $0x230] ss:$12 sps:$4 sm:$0xff]  }
 0x47a   :  { %3703 = vmatprep.subr.bf16.mxu0 %v23056_v25  ;;  %19014 = vmatprep.subr.bf16.mxu1 %v28771_v44 }
 0x47d   :  { %3704 = vmatpush1.bf16.msra.mxu0 %v23065_v61  ;;  %19015 = vmatpush3.bf16.msra.mxu1 %v20060_v8 }
 0x47e   :  { %3705 = vmatprep.subr.bf16.mxu0 %v23075_v1  ;;  %19016 = vmatprep.subr.bf16.mxu1 %v28771_v44 }
 0x481   :  { %3706 = vmatpush1.bf16.msra.mxu0 %v23081_v52  ;;  %19017 = vmatpush3.bf16.msra.mxu1 %v20064_v43 }
 0x482   :  { %3707 = vmatprep.subr.bf16.mxu0 %v23091_v46  ;;  %19018 = vmatprep.subr.bf16.mxu1 %v28771_v44 }
 0x485   :  { %3708 = vmatpush1.bf16.msra.mxu0 %v23097_v27  ;;  %19019 = vmatpush3.bf16.msra.mxu1 %v20068_v48 }
 0x486   :  { %3709 = vmatprep.subr.bf16.mxu0 %v23107_v53  ;;  %19020 = vmatprep.subr.bf16.mxu1 %v28771_v44 }
 0x489   :  { %3710 = vmatpush1.bf16.msra.mxu0 %v23113_v17  ;;  %19021 = vmatpush3.bf16.msra.mxu1 %v20072_v21 }
 0x48a   :  { %3711 = vmatprep.subr.bf16.mxu0 %v23123_v63  ;;  %19022 = vmatprep.subr.bf16.mxu1 %v28771_v44 }
 0x48d   :  { %3712 = vmatpush1.bf16.msra.mxu0 %v23129_v32  ;;  %19023 = vmatpush3.bf16.msra.mxu1 %v20076_v6  ;;  %v3174_v6 = vunpack.c.h.bf16 %v22106_v39 }
 0x48e   :  { %3713 = vmatprep.subr.bf16.mxu0 %v23139_v22  ;;  %19024 = vmatprep.subr.bf16.mxu1 %v28771_v44 }
 0x491   :  { %3714 = vmatpush1.bf16.msra.mxu0 %v23145_v19  ;;  %19025 = vmatpush3.bf16.msra.mxu1 %v20080_v47 }
 0x492   :  { %4332 = vmatprep.subr.bf16.mxu1 %v22766_v45  ;;  %v20081_v45 = vld [vmem:[%s28531_s3 + $0xc8] ss:$12 sps:$4 sm:$0xff]  }
 0x493   :  { %18126 = vmatprep.subr.bf16.mxu0 %v20081_v45 }
 0x494   :  { %3732 = vmatmul.mubr.bf16.vlgmr.msra.gmra.mrb[56].mxu0 %v23021_v0  ;;  %19027 = vmatmul.mubr.bf16.vlgmr.msra.gmra.mrb[44].mxu1 %v23021_v0 }
 0x495   :  { %4333 = vmatpush1.bf16.msra.mxu1 %v22772_v62  ;;  %v20082_v62 = vld [vmem:[%s28531_s3 + $0x8] ss:$12 sps:$4 sm:$0xff]  }
 0x496   :  { %4334 = vmatprep.subr.bf16.mxu1 %v22778_v50  ;;  %v20083_v50 = vld [vmem:[%s28531_s3 + $0xe0] ss:$12 sps:$4 sm:$0xff]   ;;  %18127 = vmatpush3.bf16.msra.mxu0 %v20082_v62 }
 0x497   :  { %18128 = vmatprep.subr.bf16.mxu0 %v20083_v50 }
 0x499   :  { %4335 = vmatpush1.bf16.msra.mxu1 %v22786_v23  ;;  %v20084_v23 = vld [vmem:[%s28531_s3 + $0x20] ss:$12 sps:$4 sm:$0xff]  }
 0x49a   :  { %4336 = vmatprep.subr.bf16.mxu1 %v22792_v14  ;;  %v20085_v14 = vld [vmem:[%s28531_s3 + $0xf8] ss:$12 sps:$4 sm:$0xff]   ;;  %18129 = vmatpush3.bf16.msra.mxu0 %v20084_v23 }
 0x49b   :  { %18130 = vmatprep.subr.bf16.mxu0 %v20085_v14 }
 0x49d   :  { %4337 = vmatpush1.bf16.msra.mxu1 %v22798_v20  ;;  %v20086_v20 = vld [vmem:[%s28531_s3 + $0x38] ss:$12 sps:$4 sm:$0xff]  }
 0x49e   :  { %4338 = vmatprep.subr.bf16.mxu1 %v22804_v30  ;;  %v20087_v30 = vld [vmem:[%s28531_s3 + $0x110] ss:$12 sps:$4 sm:$0xff]   ;;  %18131 = vmatpush3.bf16.msra.mxu0 %v20086_v20 }
 0x49f   :  { %18132 = vmatprep.subr.bf16.mxu0 %v20087_v30 }
 0x4a1   :  { %4339 = vmatpush1.bf16.msra.mxu1 %v22810_v9  ;;  %v20088_v9 = vld [vmem:[%s28531_s3 + $0x50] ss:$12 sps:$4 sm:$0xff]  }
 0x4a2   :  { %4340 = vmatprep.subr.bf16.mxu1 %v22817_v51  ;;  %18133 = vmatpush3.bf16.msra.mxu0 %v20088_v9  ;;  %v20089_v51 = vld [vmem:[%s28531_s3 + $0x128] ss:$12 sps:$4 sm:$0xff]  }
 0x4a3   :  { %18134 = vmatprep.subr.bf16.mxu0 %v20089_v51 }
 0x4a5   :  { %4341 = vmatpush1.bf16.msra.mxu1 %v22822_v54  ;;  %v20090_v54 = vld [vmem:[%s28531_s3 + $0x68] ss:$12 sps:$4 sm:$0xff]  }
 0x4a6   :  { %4342 = vmatprep.subr.bf16.mxu1 %v22834_v41  ;;  %18135 = vmatpush3.bf16.msra.mxu0 %v20090_v54  ;;  %v20092_v41 = vld [vmem:[%s28531_s3 + $0x80] ss:$12 sps:$4 sm:$0xff]  }
 0x4a9   :  { %4343 = vmatpush1.bf16.msra.mxu1 %v22829_v38  ;;  %v20091_v38 = vld [vmem:[%s28531_s3 + $0x140] ss:$12 sps:$4 sm:$0xff]  }
 0x4aa   :  { %4344 = vmatprep.subr.bf16.mxu1 %v22839_v42  ;;  %v20093_v42 = vld [vmem:[%s28531_s3 + $0x158] ss:$12 sps:$4 sm:$0xff]   ;;  %18136 = vmatprep.subr.bf16.mxu0 %v20091_v38 }
 0x4ab   :  { %18137 = vmatpush3.bf16.msra.mxu0 %v20092_v41 }
 0x4ac   :  { %18138 = vmatprep.subr.bf16.mxu0 %v20093_v42 }
 0x4ad   :  { %4345 = vmatpush1.bf16.msra.mxu1 %v22852_v56  ;;  %v20094_v56 = vld [vmem:[%s28531_s3 + $0x98] ss:$12 sps:$4 sm:$0xff]  }
 0x4ae   :  { %4346 = vmatprep.subr.bf16.mxu1 %v22861_v36  ;;  %v20095_v36 = vld [vmem:[%s28531_s3 + $0x170] ss:$12 sps:$4 sm:$0xff]  }
 0x4af   :  { %18139 = vmatpush3.bf16.msra.mxu0 %v20094_v56  ;;  %v20097_v56 = vld [vmem:[%s28531_s3 + $0x188] ss:$12 sps:$4 sm:$0xff]  }
 0x4b0   :  { %18140 = vmatprep.subr.bf16.mxu0 %v20095_v36  ;;  %v20098_v36 = vld [vmem:[%s28531_s3 + $0x1a0] ss:$12 sps:$4 sm:$0xff]  }
 0x4b1   :  { %4347 = vmatpush1.bf16.msra.mxu1 %v22873_v29  ;;  %v20096_v29 = vld [vmem:[%s28531_s3 + $0xb0] ss:$12 sps:$4 sm:$0xff]  }
 0x4b2   :  { %4348 = vmatprep.subr.bf16.mxu1 %v22879_v35 }
 0x4b3   :  { %18141 = vmatpush3.bf16.msra.mxu0 %v20096_v29  ;;  %v23360_v29 = vld [vmem:[%s28531_s3 + $0x60] ss:$12 sps:$4 sm:$0xff]  }
 0x4b4   :  { %19030 = vmatprep.subr.bf16.mxu0 %v28771_v44 }
 0x4b5   :  { %4349 = vmatpush1.bf16.msra.mxu1 %v22891_v33 }
 0x4b6   :  { %4350 = vmatprep.subr.bf16.mxu1 %v22897_v12 }
 0x4b9   :  { %4351 = vmatpush1.bf16.msra.mxu1 %v22903_v58 }
 0x4ba   :  { %4352 = vmatprep.subr.bf16.mxu1 %v22909_v26 }
 0x4bd   :  { %4353 = vmatpush1.bf16.msra.mxu1 %v22915_v57 }
 0x4be   :  { %4354 = vmatprep.subr.bf16.mxu1 %v22921_v49  ;;  %v3170_v49 = vunpack.c.l.bf16 %v22104_v37 }
 0x4c1   :  { %4355 = vmatpush1.bf16.msra.mxu1 %v22927_v16 }
 0x4c2   :  { %4356 = vmatprep.subr.bf16.mxu1 %v22937_v40 }
 0x4c5   :  { %4357 = vmatpush1.bf16.msra.mxu1 %v22945_v2  ;;  %v3171_v2 = vunpack.c.l.bf16 %v22106_v39 }
 0x4c6   :  { %4358 = vmatprep.subr.bf16.mxu1 %v22955_v4 }
 0x4c9   :  { %4359 = vmatpush1.bf16.msra.mxu1 %v22963_v5  ;;  %v28776_v5 = vld [vmem:[#allocation8_spill] sm:$0xff] }
 0x4ca   :  { %4360 = vmatprep.subr.bf16.mxu1 %v22972_v34  ;;  %v3172_v34 = vunpack.c.l.bf16 %v28776_v5  ;;  %v3175_v48 = vunpack.c.h.bf16 %v28776_v5  ;;  %v23417_v5 = vld [vmem:[%s28531_s3 + $0xc4] ss:$12 sps:$4 sm:$0xff]  }
 0x4cd   :  { %4361 = vmatpush1.bf16.msra.mxu1 %v22981_v55 }
 0x4ce   :  { %4362 = vmatprep.subr.bf16.mxu1 %v22990_v31 }
 0x4d1   :  { %4363 = vmatpush1.bf16.msra.mxu1 %v22999_v60 }
 0x4d2   :  { %4375 = vmatprep.subr.bf16.mxu1 %v23009_v7  ;;  %v3173_v7 = vunpack.c.h.bf16 %v22104_v37 }
 0x547   :  { %v18111_v35 = vpop.f32.mrb[40].mxu1 }
 0x548   :  { %v18112_v33 = vpop.f32.mrb[41].mxu1 }
 0x549   :  { %v18113_v12 = vadd.f32 %v18112_v33, %v18111_v35  ;;  %v18114_v58 = vpop.f32.mrb[42].mxu1  ;;  %v23367_v35 = vld [vmem:[%s28531_s3 + $0x78] ss:$12 sps:$4 sm:$0xff]   ;;  %v23372_v33 = vld [vmem:[%s28531_s3 + $0x7c] ss:$12 sps:$4 sm:$0xff]  }
 0x54a   :  { %v18115_v26 = vpop.f32.mrb[43].mxu1 }
 0x54b   :  { %v18116_v57 = vadd.f32 %v18115_v26, %v18114_v58  ;;  %v20132_v58 = vld [vmem:[%s28531_s3 + $0xc8] ss:$12 sps:$4 sm:$0xff]  }
 0x54c   :  { %v20133_v26 = vld [vmem:[%s28531_s3 + $0x8] ss:$12 sps:$4 sm:$0xff]  }
 0x567   :  { %v3733_v16 = vpop.f32.mrb[56].mxu0  ;;  %v3817_v40 = vpop.f32.mrb[44].mxu1 }
 0x568   :  { %v3824_v4 = vadd.f32 %v3733_v16, %v3170_v49  ;;  %v3818_v55 = vadd.f32 %v18113_v12, %v3817_v40  ;;  %v3735_v31 = vpop.f32.mrb[57].mxu0  ;;  %v19028_v60 = vpop.f32.mrb[45].mxu1  ;;  %v23377_v12 = vld [vmem:[%s28531_s3 + $0x94] ss:$12 sps:$4 sm:$0xff]   ;;  %v23399_v16 = vld [vmem:[%s28531_s3 + $0xac] ss:$12 sps:$4 sm:$0xff]  }
 0x569   :  { %v3825_v8 = vadd.f32 %v3735_v31, %v3171_v2  ;;  %v3737_v43 = vpop.f32.mrb[58].mxu0  ;;  %v3820_v21 = vpop.f32.mrb[46].mxu1  ;;  %v20137_v49 = vld [vmem:[%s28531_s3 + $0xe0] ss:$12 sps:$4 sm:$0xff]   ;;  %v20142_v2 = vld [vmem:[%s28531_s3 + $0xf8] ss:$12 sps:$4 sm:$0xff]  }
 0x56a   :  { %21065 = vtanh.f32 %v3824_v4  ;;  %v3826_v47 = vadd.f32 %v3818_v55, %v3172_v34  ;;  %v3827_v45 = vadd.f32 %v3737_v43, %v3173_v7  ;;  %v3821_v62 = vadd.f32 %v18116_v57, %v3820_v21  ;;  %v3739_v50 = vpop.f32.mrb[59].mxu0  ;;  %v19029_v23 = vpop.f32.mrb[47].mxu1  ;;  %v23390_v57 = vld [vmem:[%s28531_s3 + $0x90] ss:$12 sps:$4 sm:$0xff]   ;;  %v20138_v40 = vld [vmem:[%s28531_s3 + $0x20] ss:$12 sps:$4 sm:$0xff]  }
 0x56b   :  { %21067 = vtanh.f32 %v3825_v8  ;;  %v3828_v14 = vadd.f32 %v3739_v50, %v3174_v6  ;;  %v23411_v4 = vld [vmem:[%s28531_s3 + $0xa8] ss:$12 sps:$4 sm:$0xff]   ;;  %v20143_v34 = vld [vmem:[%s28531_s3 + $0x38] ss:$12 sps:$4 sm:$0xff]   ;;  %v20147_v55 = vld [vmem:[%s28531_s3 + $0x110] ss:$12 sps:$4 sm:$0xff]  }
 0x56c   :  { %21069 = vtanh.f32 %v3826_v47  ;;  %v3829_v20 = vadd.f32 %v3821_v62, %v3175_v48  ;;  %v23429_v31 = vld [vmem:[%s28531_s3 + $0xc0] ss:$12 sps:$4 sm:$0xff]   ;;  %v23435_v60 = vld [vmem:[%s28531_s3 + $0xdc] ss:$12 sps:$4 sm:$0xff]   ;;  %v23441_v7 = vld [vmem:[%s28531_s3 + $0xd8] ss:$12 sps:$4 sm:$0xff]  }
 0x56d   :  { %21071 = vtanh.f32 %v3827_v45  ;;  %v23447_v8 = vld [vmem:[%s28531_s3 + $0xf4] ss:$12 sps:$4 sm:$0xff]   ;;  %v23453_v43 = vld [vmem:[%s28531_s3 + $0xf0] ss:$12 sps:$4 sm:$0xff]   ;;  %v23459_v48 = vld [vmem:[%s28531_s3 + $0x10c] ss:$12 sps:$4 sm:$0xff]  }
 0x56e   :  { %21073 = vtanh.f32 %v3829_v20  ;;  %v23465_v21 = vld [vmem:[%s28531_s3 + $0x108] ss:$12 sps:$4 sm:$0xff]   ;;  %v20148_v6 = vld [vmem:[%s28531_s3 + $0x50] ss:$12 sps:$4 sm:$0xff]   ;;  %v23483_v62 = vld [vmem:[%s28531_s3 + $0x120] ss:$12 sps:$4 sm:$0xff]  }
 0x56f   :  { %21075 = vtanh.f32 %v3828_v14  ;;  %v23475_v47 = vld [vmem:[%s28531_s3 + $0x124] ss:$12 sps:$4 sm:$0xff]   ;;  %v20152_v45 = vld [vmem:[%s28531_s3 + $0x128] ss:$12 sps:$4 sm:$0xff]   ;;  %v20157_v14 = vld [vmem:[%s28531_s3 + $0x140] ss:$12 sps:$4 sm:$0xff]  }
 0x570   :  { %v20153_v50 = vld [vmem:[%s28531_s3 + $0x68] ss:$12 sps:$4 sm:$0xff]   ;;  %v23501_v20 = vld [vmem:[%s28531_s3 + $0x138] ss:$12 sps:$4 sm:$0xff]  }
 0x571   :  { %v23493_v23 = vld [vmem:[%s28531_s3 + $0x13c] ss:$12 sps:$4 sm:$0xff]  }
 0x574   :  { %v21066_v37 = vpop.eup %21065 }
 0x575   :  { %v21068_v30 = vpop.eup %21067 }
 0x576   :  { %v21070_v9 = vpop.eup %21069 }
 0x577   :  { %v21072_v51 = vpop.eup %21071 }
 0x578   :  { %v21074_v54 = vpop.eup %21073  ;;  %v23243_v38 = vpack.c.bf16 %v21072_v51, %v21066_v37  ;;  %v20158_v37 = vld [vmem:[%s28531_s3 + $0x80] ss:$12 sps:$4 sm:$0xff]   ;;  %v23519_v51 = vld [vmem:[%s28531_s3 + $0x150] ss:$12 sps:$4 sm:$0xff]  }
 0x579   :  { %v21076_v39 = vpop.eup %21075  ;;  %v23245_v41 = vpack.c.bf16 %v21074_v54, %v21070_v9  ;;  %v20162_v9 = vld [vmem:[%s28531_s3 + $0x158] ss:$12 sps:$4 sm:$0xff]  }
 0x57a   :  { %28777 = vst [vmem:[#allocation8_spill] sm:$0xff] %v23243_v38  ;;  %v23247_v42 = vpack.c.bf16 %v21076_v39, %v21068_v30  ;;  %v23510_v30 = vld [vmem:[%s28531_s3 + $0x154] ss:$12 sps:$4 sm:$0xff]   ;;  %v20163_v54 = vld [vmem:[%s28531_s3 + $0x98] ss:$12 sps:$4 sm:$0xff]  }
 0x57b   :  { %28778 = vst [vmem:[#allocation24_spill] sm:$0xff] %v23245_v41  ;;  %v23528_v39 = vld [vmem:[%s28531_s3 + $0x16c] ss:$12 sps:$4 sm:$0xff]  }
 0x57c   :  { %28779 = vst [vmem:[#allocation25_spill] sm:$0xff] %v23247_v42  ;;  %4364 = vmatprep.mubr.bf16.mxu1 %v23247_v42  ;;  %4450 = vmatprep.mubr.bf16.mxu0 %v23247_v42 }
 0x57d   :  { %4365 = vmatmul.mubr.bf16.vlgmr.msra.gmra.mrb[48].mxu1 %v23243_v38  ;;  %4451 = vmatmul.mubr.bf16.vlgmr.msra.gmra.mrb[60].mxu0 %v23243_v38 }
 0x57e   :  { %4376 = vmatpush1.bf16.msra.mxu1 %v23028_v13  ;;  %19031 = vmatpush3.bf16.msra.mxu0 %v20097_v56  ;;  %v20099_v13 = vld [vmem:[%s28531_s3 + $0x1b8] ss:$12 sps:$4 sm:$0xff]   ;;  %v20167_v56 = vld [vmem:[%s28531_s3 + $0x170] ss:$12 sps:$4 sm:$0xff]  }
 0x57f   :  { %4377 = vmatprep.subr.bf16.mxu1 %v23036_v24  ;;  %19032 = vmatprep.subr.bf16.mxu0 %v28771_v44  ;;  %v20100_v24 = vld [vmem:[%s28531_s3 + $0x1d0] ss:$12 sps:$4 sm:$0xff]  }
 0x580   :  { %4407 = vmatprep.mubr.bf16.mxu1 %v28772_v18  ;;  %19046 = vmatprep.mubr.msk.bf16.mxu0 %vm21467_vm1, %v28771_v44 }
 0x582   :  { %4378 = vmatpush1.bf16.msra.mxu1 %v23046_v3  ;;  %19033 = vmatpush3.bf16.msra.mxu0 %v20098_v36  ;;  %v20101_v3 = vld [vmem:[%s28531_s3 + $0x1e8] ss:$12 sps:$4 sm:$0xff]  }
 0x583   :  { %4379 = vmatprep.subr.bf16.mxu1 %v23056_v25  ;;  %19034 = vmatprep.subr.bf16.mxu0 %v28771_v44  ;;  %v20102_v25 = vld [vmem:[%s28531_s3 + $0x200] ss:$12 sps:$4 sm:$0xff]   ;;  %v23537_v36 = vld [vmem:[%s28531_s3 + $0x168] ss:$12 sps:$4 sm:$0xff]  }
 0x586   :  { %4380 = vmatpush1.bf16.msra.mxu1 %v23065_v61  ;;  %19035 = vmatpush3.bf16.msra.mxu0 %v20099_v13  ;;  %v20103_v61 = vld [vmem:[%s28531_s3 + $0x218] ss:$12 sps:$4 sm:$0xff]   ;;  %v20168_v13 = vld [vmem:[%s28531_s3 + $0xb0] ss:$12 sps:$4 sm:$0xff]  }
 0x587   :  { %4381 = vmatprep.subr.bf16.mxu1 %v23075_v1  ;;  %19036 = vmatprep.subr.bf16.mxu0 %v28771_v44  ;;  %v20104_v1 = vld [vmem:[%s28531_s3 + $0x230] ss:$12 sps:$4 sm:$0xff]  }
 0x58a   :  { %4382 = vmatpush1.bf16.msra.mxu1 %v23081_v52  ;;  %19037 = vmatpush3.bf16.msra.mxu0 %v20100_v24  ;;  %v23304_v52 = vld [vmem:[%s28531_s3 + $0x4] ss:$12 sps:$4 sm:$0xff]  }
 0x58b   :  { %4383 = vmatprep.subr.bf16.mxu1 %v23091_v46  ;;  %19038 = vmatprep.subr.bf16.mxu0 %v28771_v44  ;;  %v23310_v46 = vld [vmem:[%s28531_s3] ss:$12 sps:$4 sm:$0xff]   ;;  %v23547_v24 = vld [vmem:[%s28531_s3 + $0x184] ss:$12 sps:$4 sm:$0xff]  }
 0x58e   :  { %4384 = vmatpush1.bf16.msra.mxu1 %v23097_v27  ;;  %19039 = vmatpush3.bf16.msra.mxu0 %v20101_v3  ;;  %v23316_v27 = vld [vmem:[%s28531_s3 + $0x1c] ss:$12 sps:$4 sm:$0xff]  }
 0x58f   :  { %4385 = vmatprep.subr.bf16.mxu1 %v23107_v53  ;;  %19040 = vmatprep.subr.bf16.mxu0 %v28771_v44  ;;  %v23324_v53 = vld [vmem:[%s28531_s3 + $0x18] ss:$12 sps:$4 sm:$0xff]  }
 0x592   :  { %4386 = vmatpush1.bf16.msra.mxu1 %v23113_v17  ;;  %19041 = vmatpush3.bf16.msra.mxu0 %v20102_v25  ;;  %v23330_v17 = vld [vmem:[%s28531_s3 + $0x34] ss:$12 sps:$4 sm:$0xff]  }
 0x593   :  { %4387 = vmatprep.subr.bf16.mxu1 %v23123_v63  ;;  %19042 = vmatprep.subr.bf16.mxu0 %v28771_v44  ;;  %v23336_v63 = vld [vmem:[%s28531_s3 + $0x30] ss:$12 sps:$4 sm:$0xff]  }
 0x596   :  { %4388 = vmatpush1.bf16.msra.mxu1 %v23129_v32  ;;  %19043 = vmatpush3.bf16.msra.mxu0 %v20103_v61  ;;  %v23342_v32 = vld [vmem:[%s28531_s3 + $0x4c] ss:$12 sps:$4 sm:$0xff]  }
 0x597   :  { %4389 = vmatprep.subr.bf16.mxu1 %v23139_v22  ;;  %19044 = vmatprep.subr.bf16.mxu0 %v28771_v44  ;;  %v23348_v22 = vld [vmem:[%s28531_s3 + $0x48] ss:$12 sps:$4 sm:$0xff]  }
 0x59a   :  { %4390 = vmatpush1.bf16.msra.mxu1 %v23145_v19  ;;  %19045 = vmatpush3.bf16.msra.mxu0 %v20104_v1  ;;  %v23355_v19 = vld [vmem:[%s28531_s3 + $0x64] ss:$12 sps:$4 sm:$0xff]  }
 0x59b   :  { %5008 = vmatprep.subr.bf16.mxu0 %v23304_v52  ;;  %18157 = vmatprep.subr.bf16.mxu1 %v20132_v58 }
 0x59d   :  { %4408 = vmatmul.mubr.bf16.vlgmr.msra.gmra.mrb[48].mxu1 %v23245_v41  ;;  %19047 = vmatmul.mubr.bf16.vlgmr.msra.gmra.mrb[64].mxu0 %v23245_v41 }
 0x59e   :  { %5009 = vmatpush1.bf16.msra.mxu0 %v23310_v46  ;;  %18158 = vmatpush3.bf16.msra.mxu1 %v20133_v26 }
 0x59f   :  { %5010 = vmatprep.subr.bf16.mxu0 %v23316_v27  ;;  %18159 = vmatprep.subr.bf16.mxu1 %v20137_v49  ;;  %v28780_v49 = vld [vmem:[#allocation11_spill] sm:$0xff] }
 0x5a2   :  { %5011 = vmatpush1.bf16.msra.mxu0 %v23324_v53  ;;  %18160 = vmatpush3.bf16.msra.mxu1 %v20138_v40  ;;  %v3846_v40 = vunpack.c.l.bf16 %v28780_v49 }
 0x5a3   :  { %5012 = vmatprep.subr.bf16.mxu0 %v23330_v17  ;;  %18161 = vmatprep.subr.bf16.mxu1 %v20142_v2 }
 0x5a6   :  { %5013 = vmatpush1.bf16.msra.mxu0 %v23336_v63  ;;  %18162 = vmatpush3.bf16.msra.mxu1 %v20143_v34 }
 0x5a7   :  { %5014 = vmatprep.subr.bf16.mxu0 %v23342_v32  ;;  %18163 = vmatprep.subr.bf16.mxu1 %v20147_v55  ;;  %v28781_v55 = vld [vmem:[#allocation12_spill] sm:$0xff] }
 0x5aa   :  { %5015 = vmatpush1.bf16.msra.mxu0 %v23348_v22  ;;  %18164 = vmatpush3.bf16.msra.mxu1 %v20148_v6  ;;  %v3847_v6 = vunpack.c.l.bf16 %v28781_v55 }
 0x5ab   :  { %5016 = vmatprep.subr.bf16.mxu0 %v23355_v19  ;;  %18165 = vmatprep.subr.bf16.mxu1 %v20152_v45 }
 0x5ae   :  { %5017 = vmatpush1.bf16.msra.mxu0 %v23360_v29  ;;  %18166 = vmatpush3.bf16.msra.mxu1 %v20153_v50  ;;  %v28782_v50 = vld [vmem:[#allocation7_spill] sm:$0xff] }
 0x5af   :  { %5018 = vmatprep.subr.bf16.mxu0 %v23372_v33  ;;  %18167 = vmatprep.subr.bf16.mxu1 %v20157_v14  ;;  %v3848_v14 = vunpack.c.l.bf16 %v28782_v50 }
 0x5b2   :  { %5019 = vmatpush1.bf16.msra.mxu0 %v23367_v35  ;;  %18168 = vmatpush3.bf16.msra.mxu1 %v20158_v37 }
 0x5b3   :  { %5020 = vmatprep.subr.bf16.mxu0 %v23377_v12  ;;  %18169 = vmatprep.subr.bf16.mxu1 %v20162_v9 }
 0x5b6   :  { %5021 = vmatpush1.bf16.msra.mxu0 %v23390_v57  ;;  %18170 = vmatpush3.bf16.msra.mxu1 %v20163_v54 }
 0x5b7   :  { %5022 = vmatprep.subr.bf16.mxu0 %v23399_v16  ;;  %18171 = vmatprep.subr.bf16.mxu1 %v20167_v56  ;;  %v3849_v56 = vunpack.c.h.bf16 %v28780_v49 }
 0x5ba   :  { %5023 = vmatpush1.bf16.msra.mxu0 %v23411_v4  ;;  %18172 = vmatpush3.bf16.msra.mxu1 %v20168_v13 }
 0x5bb   :  { %5024 = vmatprep.subr.bf16.mxu0 %v23417_v5  ;;  %19050 = vmatprep.subr.bf16.mxu1 %v28771_v44 }
 0x5be   :  { %5025 = vmatpush1.bf16.msra.mxu0 %v23429_v31 }
 0x5bf   :  { %5026 = vmatprep.subr.bf16.mxu0 %v23435_v60 }
 0x5c2   :  { %5027 = vmatpush1.bf16.msra.mxu0 %v23441_v7 }
 0x5c3   :  { %5028 = vmatprep.subr.bf16.mxu0 %v23447_v8 }
 0x5c6   :  { %5029 = vmatpush1.bf16.msra.mxu0 %v23453_v43 }
 0x5c7   :  { %5030 = vmatprep.subr.bf16.mxu0 %v23459_v48 }
 0x5ca   :  { %5031 = vmatpush1.bf16.msra.mxu0 %v23465_v21 }
 0x5cb   :  { %5032 = vmatprep.subr.bf16.mxu0 %v23475_v47 }
 0x5ce   :  { %5033 = vmatpush1.bf16.msra.mxu0 %v23483_v62 }
 0x5cf   :  { %5034 = vmatprep.subr.bf16.mxu0 %v23493_v23 }
 0x5d2   :  { %5035 = vmatpush1.bf16.msra.mxu0 %v23501_v20 }
 0x5d3   :  { %5036 = vmatprep.subr.bf16.mxu0 %v23510_v30 }
 0x5d6   :  { %5037 = vmatpush1.bf16.msra.mxu0 %v23519_v51 }
 0x5d7   :  { %5038 = vmatprep.subr.bf16.mxu0 %v23528_v39 }
 0x5da   :  { %5039 = vmatpush1.bf16.msra.mxu0 %v23537_v36 }
 0x5db   :  { %5051 = vmatprep.subr.bf16.mxu0 %v23547_v24 }
 0x650   :  { %v18142_v3 = vpop.f32.mrb[60].mxu0 }
 0x651   :  { %v18143_v25 = vpop.f32.mrb[61].mxu0 }
 0x652   :  { %v18144_v61 = vadd.f32 %v18143_v25, %v18142_v3  ;;  %v18145_v1 = vpop.f32.mrb[62].mxu0  ;;  %v3851_v3 = vunpack.c.h.bf16 %v28782_v50 }
 0x653   :  { %v18146_v58 = vpop.f32.mrb[63].mxu0 }
 0x654   :  { %v18147_v26 = vadd.f32 %v18146_v58, %v18145_v1  ;;  %v3850_v1 = vunpack.c.h.bf16 %v28781_v55 }
 0x670   :  { %v4409_v2 = vpop.f32.mrb[48].mxu1  ;;  %v4493_v34 = vpop.f32.mrb[64].mxu0 }
 0x671   :  { %v4500_v45 = vadd.f32 %v4409_v2, %v3846_v40  ;;  %v4494_v37 = vadd.f32 %v18144_v61, %v4493_v34  ;;  %v4411_v9 = vpop.f32.mrb[49].mxu1  ;;  %v19048_v54 = vpop.f32.mrb[65].mxu0 }
 0x672   :  { %v4501_v13 = vadd.f32 %v4411_v9, %v3847_v6  ;;  %v4413_v41 = vpop.f32.mrb[50].mxu1  ;;  %v4496_v25 = vpop.f32.mrb[66].mxu0 }
 0x673   :  { %21077 = vtanh.f32 %v4500_v45  ;;  %v4502_v58 = vadd.f32 %v4494_v37, %v3848_v14  ;;  %v4503_v0 = vadd.f32 %v4413_v41, %v3849_v56  ;;  %v4497_v38 = vadd.f32 %v18147_v26, %v4496_v25  ;;  %v4415_v42 = vpop.f32.mrb[51].mxu1  ;;  %v19049_v40 = vpop.f32.mrb[67].mxu0  ;;  %v23584_v26 = vld [vmem:[%s28531_s3 + $0x198] ss:$12 sps:$4 sm:$0xff]   ;;  %v20176_v14 = vld [vmem:[%s28531_s3 + $0x1a0] ss:$12 sps:$4 sm:$0xff]  }
 0x674   :  { %21079 = vtanh.f32 %v4501_v13  ;;  %v4504_v2 = vadd.f32 %v4415_v42, %v3850_v1  ;;  %v23566_v42 = vld [vmem:[%s28531_s3 + $0x180] ss:$12 sps:$4 sm:$0xff]   ;;  %v23603_v56 = vld [vmem:[%s28531_s3 + $0x1b0] ss:$12 sps:$4 sm:$0xff]   ;;  %v20180_v13 = vld [vmem:[%s28531_s3 + $0x1b8] ss:$12 sps:$4 sm:$0xff]  }
 0x675   :  { %21081 = vtanh.f32 %v4502_v58  ;;  %v4505_v61 = vadd.f32 %v4497_v38, %v3851_v3  ;;  %v23574_v38 = vld [vmem:[%s28531_s3 + $0x19c] ss:$12 sps:$4 sm:$0xff]   ;;  %v23594_v37 = vld [vmem:[%s28531_s3 + $0x1b4] ss:$12 sps:$4 sm:$0xff]   ;;  %v23613_v3 = vld [vmem:[%s28531_s3 + $0x1cc] ss:$12 sps:$4 sm:$0xff]  }
 0x676   :  { %21083 = vtanh.f32 %v4503_v0  ;;  %v20172_v0 = vld [vmem:[%s28531_s3 + $0x188] ss:$12 sps:$4 sm:$0xff]   ;;  %v20184_v1 = vld [vmem:[%s28531_s3 + $0x1d0] ss:$12 sps:$4 sm:$0xff]   ;;  %v23635_v40 = vld [vmem:[%s28531_s3 + $0x1e0] ss:$12 sps:$4 sm:$0xff]  }
 0x677   :  { %21085 = vtanh.f32 %v4505_v61  ;;  %v23619_v25 = vld [vmem:[%s28531_s3 + $0x1c8] ss:$12 sps:$4 sm:$0xff]   ;;  %v23629_v58 = vld [vmem:[%s28531_s3 + $0x1e4] ss:$12 sps:$4 sm:$0xff]  }
 0x678   :  { %21087 = vtanh.f32 %v4504_v2  ;;  %v20188_v2 = vld [vmem:[%s28531_s3 + $0x1e8] ss:$12 sps:$4 sm:$0xff]  }
 0x679   :  { %v23645_v61 = vld [vmem:[%s28531_s3 + $0x1fc] ss:$12 sps:$4 sm:$0xff]  }
 0x67d   :  { %v21078_v49 = vpop.eup %21077 }
 0x67e   :  { %v21080_v34 = vpop.eup %21079 }
 0x67f   :  { %v21082_v6 = vpop.eup %21081 }
 0x680   :  { %v21084_v50 = vpop.eup %21083 }
 0x681   :  { %v21086_v9 = vpop.eup %21085  ;;  %v23557_v54 = vpack.c.bf16 %v21084_v50, %v21078_v49  ;;  %v23651_v49 = vld [vmem:[%s28531_s3 + $0x1f8] ss:$12 sps:$4 sm:$0xff]   ;;  %v23667_v50 = vld [vmem:[%s28531_s3 + $0x210] ss:$12 sps:$4 sm:$0xff]  }
 0x682   :  { %v21088_v55 = vpop.eup %21087  ;;  %v23559_v45 = vpack.c.bf16 %v21086_v9, %v21082_v6  ;;  %v23661_v6 = vld [vmem:[%s28531_s3 + $0x214] ss:$12 sps:$4 sm:$0xff]   ;;  %v20196_v9 = vld [vmem:[%s28531_s3 + $0x218] ss:$12 sps:$4 sm:$0xff]  }
 0x683   :  { %v23561_v41 = vpack.c.bf16 %v21088_v55, %v21080_v34  ;;  %v20192_v34 = vld [vmem:[%s28531_s3 + $0x200] ss:$12 sps:$4 sm:$0xff]  }
 0x684   :  { %v23677_v55 = vld [vmem:[%s28531_s3 + $0x22c] ss:$12 sps:$4 sm:$0xff]  }
 0x685   :  { %5040 = vmatprep.mubr.bf16.mxu0 %v23561_v41  ;;  %5126 = vmatprep.mubr.bf16.mxu1 %v23561_v41 }
 0x686   :  { %5041 = vmatmul.mubr.bf16.vlgmr.msra.gmra.mrb[68].mxu0 %v23557_v54  ;;  %5127 = vmatmul.mubr.bf16.vlgmr.msra.gmra.mrb[52].mxu1 %v23557_v54 }
 0x687   :  { %5052 = vmatpush1.bf16.msra.mxu0 %v23566_v42  ;;  %19051 = vmatpush3.bf16.msra.mxu1 %v20172_v0  ;;  %v23683_v0 = vld [vmem:[%s28531_s3 + $0x228] ss:$12 sps:$4 sm:$0xff]  }
 0x688   :  { %5053 = vmatprep.subr.bf16.mxu0 %v23574_v38  ;;  %19052 = vmatprep.subr.bf16.mxu1 %v28771_v44 }
 0x689   :  { %5083 = vmatprep.mubr.bf16.mxu0 %v28772_v18  ;;  %19066 = vmatprep.mubr.msk.bf16.mxu1 %vm21467_vm1, %v28771_v44 }
 0x68b   :  { %5054 = vmatpush1.bf16.msra.mxu0 %v23584_v26  ;;  %19053 = vmatpush3.bf16.msra.mxu1 %v20176_v14  ;;  %v20200_v14 = vld [vmem:[%s28531_s3 + $0x230] ss:$12 sps:$4 sm:$0xff]  }
 0x68c   :  { %5055 = vmatprep.subr.bf16.mxu0 %v23594_v37  ;;  %19054 = vmatprep.subr.bf16.mxu1 %v28771_v44 }
 0x68f   :  { %5056 = vmatpush1.bf16.msra.mxu0 %v23603_v56  ;;  %19055 = vmatpush3.bf16.msra.mxu1 %v20180_v13 }
 0x690   :  { %5057 = vmatprep.subr.bf16.mxu0 %v23613_v3  ;;  %19056 = vmatprep.subr.bf16.mxu1 %v28771_v44 }
 0x693   :  { %5058 = vmatpush1.bf16.msra.mxu0 %v23619_v25  ;;  %19057 = vmatpush3.bf16.msra.mxu1 %v20184_v1 }
 0x694   :  { %5059 = vmatprep.subr.bf16.mxu0 %v23629_v58  ;;  %19058 = vmatprep.subr.bf16.mxu1 %v28771_v44 }
 0x697   :  { %5060 = vmatpush1.bf16.msra.mxu0 %v23635_v40  ;;  %19059 = vmatpush3.bf16.msra.mxu1 %v20188_v2 }
 0x698   :  { %5061 = vmatprep.subr.bf16.mxu0 %v23645_v61  ;;  %19060 = vmatprep.subr.bf16.mxu1 %v28771_v44 }
 0x69b   :  { %5062 = vmatpush1.bf16.msra.mxu0 %v23651_v49  ;;  %19061 = vmatpush3.bf16.msra.mxu1 %v20192_v34 }
 0x69c   :  { %5063 = vmatprep.subr.bf16.mxu0 %v23661_v6  ;;  %19062 = vmatprep.subr.bf16.mxu1 %v28771_v44 }
 0x69f   :  { %5064 = vmatpush1.bf16.msra.mxu0 %v23667_v50  ;;  %19063 = vmatpush3.bf16.msra.mxu1 %v20196_v9 }
 0x6a0   :  { %5065 = vmatprep.subr.bf16.mxu0 %v23677_v55  ;;  %19064 = vmatprep.subr.bf16.mxu1 %v28771_v44 }
 0x6a3   :  { %5066 = vmatpush1.bf16.msra.mxu0 %v23683_v0  ;;  %19065 = vmatpush3.bf16.msra.mxu1 %v20200_v14 }
 0x6a4   :  { %5684 = vmatprep.subr.bf16.mxu1 %v23304_v52  ;;  %v20201_v52 = vld [vmem:[%s28531_s3 + $0xc8] ss:$12 sps:$4 sm:$0xff]  }
 0x6a5   :  { %18188 = vmatprep.subr.bf16.mxu0 %v20201_v52 }
 0x6a6   :  { %5084 = vmatmul.mubr.bf16.vlgmr.msra.gmra.mrb[68].mxu0 %v23559_v45  ;;  %19067 = vmatmul.mubr.bf16.vlgmr.msra.gmra.mrb[56].mxu1 %v23559_v45 }
 0x6a7   :  { %5685 = vmatpush1.bf16.msra.mxu1 %v23310_v46  ;;  %v20202_v46 = vld [vmem:[%s28531_s3 + $0x8] ss:$12 sps:$4 sm:$0xff]  }
 0x6a8   :  { %5686 = vmatprep.subr.bf16.mxu1 %v23316_v27  ;;  %v20203_v27 = vld [vmem:[%s28531_s3 + $0xe0] ss:$12 sps:$4 sm:$0xff]   ;;  %18189 = vmatpush3.bf16.msra.mxu0 %v20202_v46 }
 0x6a9   :  { %18190 = vmatprep.subr.bf16.mxu0 %v20203_v27 }
 0x6ab   :  { %5687 = vmatpush1.bf16.msra.mxu1 %v23324_v53  ;;  %v20204_v53 = vld [vmem:[%s28531_s3 + $0x20] ss:$12 sps:$4 sm:$0xff]  }
 0x6ac   :  { %5688 = vmatprep.subr.bf16.mxu1 %v23330_v17  ;;  %v20205_v17 = vld [vmem:[%s28531_s3 + $0xf8] ss:$12 sps:$4 sm:$0xff]   ;;  %18191 = vmatpush3.bf16.msra.mxu0 %v20204_v53 }
 0x6ad   :  { %18192 = vmatprep.subr.bf16.mxu0 %v20205_v17 }
 0x6af   :  { %5689 = vmatpush1.bf16.msra.mxu1 %v23336_v63  ;;  %v20206_v63 = vld [vmem:[%s28531_s3 + $0x38] ss:$12 sps:$4 sm:$0xff]  }
 0x6b0   :  { %5690 = vmatprep.subr.bf16.mxu1 %v23342_v32  ;;  %v20207_v32 = vld [vmem:[%s28531_s3 + $0x110] ss:$12 sps:$4 sm:$0xff]   ;;  %18193 = vmatpush3.bf16.msra.mxu0 %v20206_v63 }
 0x6b1   :  { %18194 = vmatprep.subr.bf16.mxu0 %v20207_v32 }
 0x6b3   :  { %5691 = vmatpush1.bf16.msra.mxu1 %v23348_v22  ;;  %v20208_v22 = vld [vmem:[%s28531_s3 + $0x50] ss:$12 sps:$4 sm:$0xff]  }
 0x6b4   :  { %5692 = vmatprep.subr.bf16.mxu1 %v23355_v19  ;;  %18195 = vmatpush3.bf16.msra.mxu0 %v20208_v22  ;;  %v20209_v19 = vld [vmem:[%s28531_s3 + $0x128] ss:$12 sps:$4 sm:$0xff]  }
 0x6b5   :  { %18196 = vmatprep.subr.bf16.mxu0 %v20209_v19 }
 0x6b7   :  { %5693 = vmatpush1.bf16.msra.mxu1 %v23360_v29  ;;  %v20210_v29 = vld [vmem:[%s28531_s3 + $0x68] ss:$12 sps:$4 sm:$0xff]  }
 0x6b8   :  { %5694 = vmatprep.subr.bf16.mxu1 %v23372_v33  ;;  %18197 = vmatpush3.bf16.msra.mxu0 %v20210_v29  ;;  %v20212_v33 = vld [vmem:[%s28531_s3 + $0x80] ss:$12 sps:$4 sm:$0xff]  }
 0x6bb   :  { %5695 = vmatpush1.bf16.msra.mxu1 %v23367_v35  ;;  %v20211_v35 = vld [vmem:[%s28531_s3 + $0x140] ss:$12 sps:$4 sm:$0xff]  }
 0x6bc   :  { %5696 = vmatprep.subr.bf16.mxu1 %v23377_v12  ;;  %v20213_v12 = vld [vmem:[%s28531_s3 + $0x158] ss:$12 sps:$4 sm:$0xff]   ;;  %18198 = vmatprep.subr.bf16.mxu0 %v20211_v35 }
 0x6bd   :  { %18199 = vmatpush3.bf16.msra.mxu0 %v20212_v33 }
 0x6be   :  { %18200 = vmatprep.subr.bf16.mxu0 %v20213_v12 }
 0x6bf   :  { %5697 = vmatpush1.bf16.msra.mxu1 %v23390_v57  ;;  %v20214_v57 = vld [vmem:[%s28531_s3 + $0x98] ss:$12 sps:$4 sm:$0xff]  }
 0x6c0   :  { %5698 = vmatprep.subr.bf16.mxu1 %v23399_v16  ;;  %v20215_v16 = vld [vmem:[%s28531_s3 + $0x170] ss:$12 sps:$4 sm:$0xff]  }
 0x6c1   :  { %18201 = vmatpush3.bf16.msra.mxu0 %v20214_v57 }
 0x6c2   :  { %18202 = vmatprep.subr.bf16.mxu0 %v20215_v16 }
 0x6c3   :  { %5699 = vmatpush1.bf16.msra.mxu1 %v23411_v4  ;;  %v20216_v4 = vld [vmem:[%s28531_s3 + $0xb0] ss:$12 sps:$4 sm:$0xff]  }
 0x6c4   :  { %5700 = vmatprep.subr.bf16.mxu1 %v23417_v5 }
 0x6c5   :  { %18203 = vmatpush3.bf16.msra.mxu0 %v20216_v4 }
 0x6c6   :  { %19070 = vmatprep.subr.bf16.mxu0 %v28771_v44 }
 0x6c7   :  { %5701 = vmatpush1.bf16.msra.mxu1 %v23429_v31 }
 0x6c8   :  { %5702 = vmatprep.subr.bf16.mxu1 %v23435_v60 }
 0x6cb   :  { %5703 = vmatpush1.bf16.msra.mxu1 %v23441_v7 }
 0x6cc   :  { %5704 = vmatprep.subr.bf16.mxu1 %v23447_v8 }
 0x6cf   :  { %5705 = vmatpush1.bf16.msra.mxu1 %v23453_v43 }
 0x6d0   :  { %5706 = vmatprep.subr.bf16.mxu1 %v23459_v48  ;;  %v28783_v48 = vld [vmem:[#allocation13_spill] sm:$0xff] }
 0x6d1   :  { %v4525_v1 = vunpack.c.h.bf16 %v28783_v48 }
 0x6d3   :  { %5707 = vmatpush1.bf16.msra.mxu1 %v23465_v21  ;;  %v4522_v21 = vunpack.c.l.bf16 %v28783_v48  ;;  %v20239_v48 = vld [vmem:[%s28533_s2 + $0x38] ss:$12 sps:$4 sm:$0xff]  }
 0x6d4   :  { %5708 = vmatprep.subr.bf16.mxu1 %v23475_v47 }
 0x6d7   :  { %5709 = vmatpush1.bf16.msra.mxu1 %v23483_v62 }
 0x6d8   :  { %5710 = vmatprep.subr.bf16.mxu1 %v23493_v23  ;;  %v28784_v23 = vld [vmem:[#allocation14_spill] sm:$0xff] }
 0x6d9   :  { %v4526_v52 = vunpack.c.h.bf16 %v28784_v23 }
 0x6db   :  { %5711 = vmatpush1.bf16.msra.mxu1 %v23501_v20  ;;  %v4523_v20 = vunpack.c.l.bf16 %v28784_v23  ;;  %v20244_v23 = vld [vmem:[%s28533_s2 + $0x50] ss:$12 sps:$4 sm:$0xff]  }
 0x6dc   :  { %5712 = vmatprep.subr.bf16.mxu1 %v23510_v30 }
 0x6df   :  { %5713 = vmatpush1.bf16.msra.mxu1 %v23519_v51  ;;  %v28785_v51 = vld [vmem:[#allocation10_spill] sm:$0xff] }
 0x6e0   :  { %5714 = vmatprep.subr.bf16.mxu1 %v23528_v39  ;;  %v4524_v39 = vunpack.c.l.bf16 %v28785_v51  ;;  %v4527_v9 = vunpack.c.h.bf16 %v28785_v51  ;;  %v20245_v51 = vld [vmem:[%s28533_s2 + $0x60] ss:$12 sps:$4 sm:$0xff]  }
 0x6e3   :  { %5715 = vmatpush1.bf16.msra.mxu1 %v23537_v36 }
 0x6e4   :  { %5727 = vmatprep.subr.bf16.mxu1 %v23547_v24 }
 0x759   :  { %v18173_v5 = vpop.f32.mrb[52].mxu1 }
 0x75a   :  { %v18174_v31 = vpop.f32.mrb[53].mxu1 }
 0x75b   :  { %v18175_v60 = vadd.f32 %v18174_v31, %v18173_v5  ;;  %v18176_v7 = vpop.f32.mrb[54].mxu1  ;;  %v20217_v31 = vld [vmem:[%s28531_s3 + $0x188] ss:$12 sps:$4 sm:$0xff]  }
 0x75c   :  { %v18177_v8 = vpop.f32.mrb[55].mxu1 }
 0x75d   :  { %v18178_v43 = vadd.f32 %v18177_v8, %v18176_v7  ;;  %v20237_v7 = vld [vmem:[%s28533_s2 + $0x34] ss:$12 sps:$4 sm:$0xff]   ;;  %v20238_v8 = vld [vmem:[%s28533_s2 + $0xf8] ss:$12 sps:$4 sm:$0xff]  }
 0x779   :  { %v5085_v47 = vpop.f32.mrb[68].mxu0  ;;  %v5169_v62 = vpop.f32.mrb[56].mxu1 }
 0x77a   :  { %v5176_v30 = vadd.f32 %v5085_v47, %v4522_v21  ;;  %v5170_v36 = vadd.f32 %v18175_v60, %v5169_v62  ;;  %v5087_v24 = vpop.f32.mrb[69].mxu0  ;;  %v19068_v13 = vpop.f32.mrb[57].mxu1  ;;  %v20218_v60 = vld [vmem:[%s28531_s3 + $0x1a0] ss:$12 sps:$4 sm:$0xff]   ;;  %v20243_v47 = vld [vmem:[%s28533_s2 + $0x110] ss:$12 sps:$4 sm:$0xff]  }
 0x77b   :  { %v5177_v2 = vadd.f32 %v5087_v24, %v4523_v20  ;;  %v5089_v34 = vpop.f32.mrb[70].mxu0  ;;  %v5172_v14 = vpop.f32.mrb[58].mxu1  ;;  %v20242_v21 = vld [vmem:[%s28533_s2 + $0x4c] ss:$12 sps:$4 sm:$0xff]   ;;  %v20240_v62 = vld [vmem:[%s28533_s2 + $0x48] ss:$12 sps:$4 sm:$0xff]  }
 0x77c   :  { %21089 = vtanh.f32 %v5176_v30  ;;  %v5178_v46 = vadd.f32 %v5170_v36, %v4524_v39  ;;  %v5179_v27 = vadd.f32 %v5089_v34, %v4525_v1  ;;  %v5173_v53 = vadd.f32 %v18178_v43, %v5172_v14  ;;  %v5091_v17 = vpop.f32.mrb[71].mxu0  ;;  %v19069_v63 = vpop.f32.mrb[59].mxu1  ;;  %v20235_v43 = vld [vmem:[%s28533_s2 + $0x30] ss:$12 sps:$4 sm:$0xff]   ;;  %v20248_v30 = vld [vmem:[%s28533_s2 + $0x128] ss:$12 sps:$4 sm:$0xff]  }
 0x77d   :  { %21091 = vtanh.f32 %v5177_v2  ;;  %v5180_v32 = vadd.f32 %v5091_v17, %v4526_v52  ;;  %v20247_v20 = vld [vmem:[%s28533_s2 + $0x64] ss:$12 sps:$4 sm:$0xff]   ;;  %v20249_v39 = vld [vmem:[%s28533_s2 + $0x68] ss:$12 sps:$4 sm:$0xff]   ;;  %v20253_v24 = vld [vmem:[%s28533_s2 + $0x140] ss:$12 sps:$4 sm:$0xff]  }
 0x77e   :  { %21093 = vtanh.f32 %v5178_v46  ;;  %v5181_v22 = vadd.f32 %v5173_v53, %v4527_v9  ;;  %v20252_v36 = vld [vmem:[%s28533_s2 + $0x7c] ss:$12 sps:$4 sm:$0xff]   ;;  %v20250_v13 = vld [vmem:[%s28533_s2 + $0x78] ss:$12 sps:$4 sm:$0xff]   ;;  %v20254_v1 = vld [vmem:[%s28533_s2 + $0x80] ss:$12 sps:$4 sm:$0xff]  }
 0x77f   :  { %21095 = vtanh.f32 %v5179_v27  ;;  %v20257_v2 = vld [vmem:[%s28533_s2 + $0x94] ss:$12 sps:$4 sm:$0xff]   ;;  %v20258_v34 = vld [vmem:[%s28533_s2 + $0x158] ss:$12 sps:$4 sm:$0xff]   ;;  %v20255_v9 = vld [vmem:[%s28533_s2 + $0x90] ss:$12 sps:$4 sm:$0xff]  }
 0x780   :  { %21097 = vtanh.f32 %v5181_v22  ;;  %v20259_v14 = vld [vmem:[%s28533_s2 + $0x98] ss:$12 sps:$4 sm:$0xff]   ;;  %v20263_v46 = vld [vmem:[%s28533_s2 + $0x170] ss:$12 sps:$4 sm:$0xff]   ;;  %v20260_v27 = vld [vmem:[%s28533_s2 + $0xa8] ss:$12 sps:$4 sm:$0xff]  }
 0x781   :  { %21099 = vtanh.f32 %v5180_v32  ;;  %v20262_v52 = vld [vmem:[%s28533_s2 + $0xac] ss:$12 sps:$4 sm:$0xff]   ;;  %v20264_v53 = vld [vmem:[%s28533_s2 + $0xb0] ss:$12 sps:$4 sm:$0xff]   ;;  %v20289_v63 = vld [vmem:[%s28533_s2 + $0x188] ss:$12 sps:$4 sm:$0xff]  }
 0x782   :  { %v20267_v17 = vld [vmem:[%s28533_s2 + $0xc4] ss:$12 sps:$4 sm:$0xff]   ;;  %v20265_v32 = vld [vmem:[%s28533_s2 + $0xc0] ss:$12 sps:$4 sm:$0xff]   ;;  %v20270_v22 = vld [vmem:[%s28533_s2 + $0xdc] ss:$12 sps:$4 sm:$0xff]  }
 0x786   :  { %v21090_v19 = vpop.eup %21089 }
 0x787   :  { %v21092_v29 = vpop.eup %21091 }
 0x788   :  { %v21094_v35 = vpop.eup %21093 }
 0x789   :  { %v21096_v33 = vpop.eup %21095 }
 0x78a   :  { %v21098_v12 = vpop.eup %21097  ;;  %v23781_v57 = vpack.c.bf16 %v21096_v33, %v21090_v19  ;;  %v28787_v19 = vld [vmem:[#allocation18_spill] sm:$0xff] }
 0x78b   :  { %v21100_v16 = vpop.eup %21099  ;;  %v23783_v4 = vpack.c.bf16 %v21098_v12, %v21094_v35  ;;  %v20273_v35 = vld [vmem:[%s28533_s2 + $0xf4] ss:$12 sps:$4 sm:$0xff]   ;;  %v20271_v33 = vld [vmem:[%s28533_s2 + $0xf0] ss:$12 sps:$4 sm:$0xff]   ;;  %v20276_v12 = vld [vmem:[%s28533_s2 + $0x10c] ss:$12 sps:$4 sm:$0xff]  }
 0x78c   :  { %v23785_v5 = vpack.c.bf16 %v21100_v16, %v21092_v29  ;;  %v20268_v29 = vld [vmem:[%s28533_s2 + $0xd8] ss:$12 sps:$4 sm:$0xff]   ;;  %v20274_v16 = vld [vmem:[%s28533_s2 + $0x108] ss:$12 sps:$4 sm:$0xff]  }
 0x78e   :  { %5716 = vmatprep.mubr.bf16.mxu1 %v23785_v5  ;;  %5802 = vmatprep.mubr.bf16.mxu0 %v23785_v5 }
 0x78f   :  { %5717 = vmatmul.mubr.bf16.vlgmr.msra.gmra.mrb[60].mxu1 %v23781_v57  ;;  %5803 = vmatmul.mubr.bf16.vlgmr.msra.gmra.mrb[72].mxu0 %v23781_v57 }
 0x790   :  { %5728 = vmatpush1.bf16.msra.mxu1 %v23566_v42  ;;  %19071 = vmatpush3.bf16.msra.mxu0 %v20217_v31  ;;  %v20219_v42 = vld [vmem:[%s28531_s3 + $0x1b8] ss:$12 sps:$4 sm:$0xff]  }
 0x791   :  { %5729 = vmatprep.subr.bf16.mxu1 %v23574_v38  ;;  %19072 = vmatprep.subr.bf16.mxu0 %v28771_v44  ;;  %v20220_v38 = vld [vmem:[%s28531_s3 + $0x1d0] ss:$12 sps:$4 sm:$0xff]  }
 0x792   :  { %5759 = vmatprep.mubr.bf16.mxu1 %v28772_v18  ;;  %19086 = vmatprep.mubr.msk.bf16.mxu0 %vm21467_vm1, %v28771_v44  ;;  %v20279_v31 = vld [vmem:[%s28533_s2 + $0x124] ss:$12 sps:$4 sm:$0xff]  }
 0x794   :  { %5730 = vmatpush1.bf16.msra.mxu1 %v23584_v26  ;;  %19073 = vmatpush3.bf16.msra.mxu0 %v20218_v60  ;;  %v20221_v26 = vld [vmem:[%s28531_s3 + $0x1e8] ss:$12 sps:$4 sm:$0xff]   ;;  %v20277_v60 = vld [vmem:[%s28533_s2 + $0x120] ss:$12 sps:$4 sm:$0xff]  }
 0x795   :  { %5731 = vmatprep.subr.bf16.mxu1 %v23594_v37  ;;  %19074 = vmatprep.subr.bf16.mxu0 %v28771_v44  ;;  %v20222_v37 = vld [vmem:[%s28531_s3 + $0x200] ss:$12 sps:$4 sm:$0xff]  }
 0x798   :  { %5732 = vmatpush1.bf16.msra.mxu1 %v23603_v56  ;;  %19075 = vmatpush3.bf16.msra.mxu0 %v20219_v42  ;;  %v20223_v56 = vld [vmem:[%s28531_s3 + $0x218] ss:$12 sps:$4 sm:$0xff]   ;;  %v20282_v42 = vld [vmem:[%s28533_s2 + $0x13c] ss:$12 sps:$4 sm:$0xff]  }
 0x799   :  { %5733 = vmatprep.subr.bf16.mxu1 %v23613_v3  ;;  %19076 = vmatprep.subr.bf16.mxu0 %v28771_v44  ;;  %v20224_v3 = vld [vmem:[%s28531_s3 + $0x230] ss:$12 sps:$4 sm:$0xff]  }
 0x79c   :  { %5734 = vmatpush1.bf16.msra.mxu1 %v23619_v25  ;;  %19077 = vmatpush3.bf16.msra.mxu0 %v20220_v38  ;;  %v20227_v25 = vld [vmem:[%s28533_s2 + $0x4] ss:$12 sps:$4 sm:$0xff]   ;;  %v28788_v38 = vld [vmem:[#allocation21_spill] sm:$0xff] }
 0x79d   :  { %5735 = vmatprep.subr.bf16.mxu1 %v23629_v58  ;;  %19078 = vmatprep.subr.bf16.mxu0 %v28771_v44  ;;  %v20228_v58 = vld [vmem:[%s28533_s2 + $0xc8] ss:$12 sps:$4 sm:$0xff]  }
 0x7a0   :  { %5736 = vmatpush1.bf16.msra.mxu1 %v23635_v40  ;;  %19079 = vmatpush3.bf16.msra.mxu0 %v20221_v26  ;;  %v20225_v40 = vld [vmem:[%s28533_s2] ss:$12 sps:$4 sm:$0xff]   ;;  %v20280_v26 = vld [vmem:[%s28533_s2 + $0x138] ss:$12 sps:$4 sm:$0xff]  }
 0x7a1   :  { %5737 = vmatprep.subr.bf16.mxu1 %v23645_v61  ;;  %19080 = vmatprep.subr.bf16.mxu0 %v28771_v44  ;;  %v20229_v61 = vld [vmem:[%s28533_s2 + $0x8] ss:$12 sps:$4 sm:$0xff]  }
 0x7a4   :  { %5738 = vmatpush1.bf16.msra.mxu1 %v23651_v49  ;;  %19081 = vmatpush3.bf16.msra.mxu0 %v20222_v37  ;;  %v20232_v49 = vld [vmem:[%s28533_s2 + $0x1c] ss:$12 sps:$4 sm:$0xff]   ;;  %v20285_v37 = vld [vmem:[%s28533_s2 + $0x154] ss:$12 sps:$4 sm:$0xff]  }
 0x7a5   :  { %5739 = vmatprep.subr.bf16.mxu1 %v23661_v6  ;;  %19082 = vmatprep.subr.bf16.mxu0 %v28771_v44  ;;  %v20233_v6 = vld [vmem:[%s28533_s2 + $0xe0] ss:$12 sps:$4 sm:$0xff]  }
 0x7a8   :  { %5740 = vmatpush1.bf16.msra.mxu1 %v23667_v50  ;;  %19083 = vmatpush3.bf16.msra.mxu0 %v20223_v56  ;;  %v28786_v50 = vld [vmem:[#allocation19_spill] sm:$0xff] }
 0x7a9   :  { %5741 = vmatprep.subr.bf16.mxu1 %v23677_v55  ;;  %19084 = vmatprep.subr.bf16.mxu0 %v28771_v44  ;;  %v20230_v55 = vld [vmem:[%s28533_s2 + $0x18] ss:$12 sps:$4 sm:$0xff]   ;;  %v20283_v56 = vld [vmem:[%s28533_s2 + $0x150] ss:$12 sps:$4 sm:$0xff]  }
 0x7ac   :  { %5742 = vmatpush1.bf16.msra.mxu1 %v23683_v0  ;;  %19085 = vmatpush3.bf16.msra.mxu0 %v20224_v3  ;;  %v20234_v0 = vld [vmem:[%s28533_s2 + $0x20] ss:$12 sps:$4 sm:$0xff]  }
 0x7ad   :  { %6392 = vmatprep.subr.bf16.mxu0 %v20227_v25  ;;  %18219 = vmatprep.subr.bf16.mxu1 %v20228_v58  ;;  %v20290_v3 = vld [vmem:[%s28533_s2 + $0x1a0] ss:$12 sps:$4 sm:$0xff]   ;;  %v20291_v58 = vld [vmem:[%s28533_s2 + $0x1b8] ss:$12 sps:$4 sm:$0xff]  }
 0x7ae   :  { %v20288_v25 = vld [vmem:[%s28533_s2 + $0x16c] ss:$12 sps:$4 sm:$0xff]  }
 0x7af   :  { %5760 = vmatmul.mubr.bf16.vlgmr.msra.gmra.mrb[60].mxu1 %v23783_v4  ;;  %19087 = vmatmul.mubr.bf16.vlgmr.msra.gmra.mrb[76].mxu0 %v23783_v4 }
 0x7b0   :  { %6393 = vmatpush1.bf16.msra.mxu0 %v20225_v40  ;;  %6424 = vmatprep.mubr.bf16.mxu0 %v28786_v50  ;;  %v20286_v40 = vld [vmem:[%s28533_s2 + $0x168] ss:$12 sps:$4 sm:$0xff]  }
 0x7b1   :  { %18220 = vmatpush3.bf16.msra.mxu1 %v20229_v61  ;;  %6650 = vmatprep.mubr.bf16.mxu1 %v28786_v50  ;;  %v20292_v61 = vld [vmem:[%s28533_s2 + $0x1d0] ss:$12 sps:$4 sm:$0xff]   ;;  %v20293_v50 = vld [vmem:[%s28533_s2 + $0x180] ss:$12 sps:$4 sm:$0xff]  }
 0x7b2   :  { %6394 = vmatprep.subr.bf16.mxu0 %v20232_v49  ;;  %18221 = vmatprep.subr.bf16.mxu1 %v20233_v6  ;;  %v28789_v49 = vld [vmem:[#allocation25_spill] sm:$0xff]  ;;  %v20295_v6 = vld [vmem:[%s28533_s2 + $0x184] ss:$12 sps:$4 sm:$0xff]  }
 0x7b4   :  { %6395 = vmatpush1.bf16.msra.mxu0 %v20230_v55  ;;  %v20296_v55 = vld [vmem:[%s28533_s2 + $0x1e8] ss:$12 sps:$4 sm:$0xff]  }
 0x7b5   :  { %18222 = vmatpush3.bf16.msra.mxu1 %v20234_v0  ;;  %6396 = vmatprep.subr.bf16.mxu0 %v20237_v7  ;;  %v28790_v0 = vld [vmem:[#allocation8_spill] sm:$0xff] }
 0x7b6   :  { %18223 = vmatprep.subr.bf16.mxu1 %v20238_v8  ;;  %v20300_v7 = vld [vmem:[%s28533_s2 + $0x200] ss:$12 sps:$4 sm:$0xff]   ;;  %v20304_v8 = vld [vmem:[%s28533_s2 + $0x1c8] ss:$12 sps:$4 sm:$0xff]  }
 0x7b8   :  { %6397 = vmatpush1.bf16.msra.mxu0 %v20235_v43  ;;  %v20307_v43 = vld [vmem:[%s28533_s2 + $0x218] ss:$12 sps:$4 sm:$0xff]  }
 0x7b9   :  { %18224 = vmatpush3.bf16.msra.mxu1 %v20239_v48  ;;  %6398 = vmatprep.subr.bf16.mxu0 %v20242_v21  ;;  %v20310_v48 = vld [vmem:[%s28533_s2 + $0x1e4] ss:$12 sps:$4 sm:$0xff]   ;;  %v20308_v21 = vld [vmem:[%s28533_s2 + $0x1e0] ss:$12 sps:$4 sm:$0xff]  }
 0x7ba   :  { %18225 = vmatprep.subr.bf16.mxu1 %v20243_v47  ;;  %v20313_v47 = vld [vmem:[%s28533_s2 + $0x1fc] ss:$12 sps:$4 sm:$0xff]  }
 0x7bc   :  { %6399 = vmatpush1.bf16.msra.mxu0 %v20240_v62  ;;  %v20311_v62 = vld [vmem:[%s28533_s2 + $0x1f8] ss:$12 sps:$4 sm:$0xff]  }
 0x7bd   :  { %18226 = vmatpush3.bf16.msra.mxu1 %v20244_v23  ;;  %6400 = vmatprep.subr.bf16.mxu0 %v20247_v20  ;;  %v20317_v23 = vld [vmem:[%s28533_s2 + $0x214] ss:$12 sps:$4 sm:$0xff]   ;;  %v20314_v20 = vld [vmem:[%s28533_s2 + $0x230] ss:$12 sps:$4 sm:$0xff]  }
 0x7be   :  { %18227 = vmatprep.subr.bf16.mxu1 %v20248_v30  ;;  %v20318_v30 = vld [vmem:[%s28533_s2 + $0x228] ss:$12 sps:$4 sm:$0xff]  }
 0x7c0   :  { %6401 = vmatpush1.bf16.msra.mxu0 %v20245_v51  ;;  %v24088_v51 = vld [vmem:[%s28531_s3 + $0x244] ss:$12 sps:$4 sm:$0xff]  }
 0x7c1   :  { %18228 = vmatpush3.bf16.msra.mxu1 %v20249_v39  ;;  %6402 = vmatprep.subr.bf16.mxu0 %v20252_v36 }
 0x7c2   :  { %18229 = vmatprep.subr.bf16.mxu1 %v20253_v24 }
 0x7c4   :  { %6403 = vmatpush1.bf16.msra.mxu0 %v20250_v13 }
 0x7c5   :  { %18230 = vmatpush3.bf16.msra.mxu1 %v20254_v1  ;;  %6404 = vmatprep.subr.bf16.mxu0 %v20257_v2 }
 0x7c6   :  { %18231 = vmatprep.subr.bf16.mxu1 %v20258_v34  ;;  %v28791_v34 = vld [vmem:[#allocation15_spill] sm:$0xff] }
 0x7c8   :  { %6405 = vmatpush1.bf16.msra.mxu0 %v20255_v9  ;;  %v5198_v9 = vunpack.c.l.bf16 %v28791_v34 }
 0x7c9   :  { %18232 = vmatpush3.bf16.msra.mxu1 %v20259_v14  ;;  %6406 = vmatprep.subr.bf16.mxu0 %v20262_v52 }
 0x7ca   :  { %18233 = vmatprep.subr.bf16.mxu1 %v20263_v46  ;;  %v28792_v46 = vld [vmem:[#allocation16_spill] sm:$0xff] }
 0x7cc   :  { %6407 = vmatpush1.bf16.msra.mxu0 %v20260_v27  ;;  %v5199_v27 = vunpack.c.l.bf16 %v28792_v46 }
 0x7cd   :  { %18234 = vmatpush3.bf16.msra.mxu1 %v20264_v53  ;;  %6408 = vmatprep.subr.bf16.mxu0 %v20267_v17  ;;  %v28793_v17 = vld [vmem:[#allocation9_spill] sm:$0xff] }
 0x7ce   :  { %19090 = vmatprep.subr.bf16.mxu1 %v20289_v63 }
 0x7d0   :  { %6651 = vmatmul.mubr.bf16.vlgmr.msra.gmra.mrb[64].mxu1 %v28787_v19  ;;  %6409 = vmatpush1.bf16.msra.mxu0 %v20265_v32 }
 0x7d1   :  { %6658 = vmatprep.mubr.bf16.mxu1 %v22483_v59  ;;  %6410 = vmatprep.subr.bf16.mxu0 %v20270_v22 }
 0x7d2   :  { %19091 = vmatpush3.bf16.msra.mxu1 %v20289_v63 }
 0x7d3   :  { %19092 = vmatprep.subr.bf16.mxu1 %v20290_v3 }
 0x7d4   :  { %6411 = vmatpush1.bf16.msra.mxu0 %v20268_v29 }
 0x7d5   :  { %6412 = vmatprep.subr.bf16.mxu0 %v20273_v35 }
 0x7d6   :  { %19093 = vmatpush3.bf16.msra.mxu1 %v20290_v3 }
 0x7d7   :  { %19094 = vmatprep.subr.bf16.mxu1 %v20291_v58 }
 0x7d8   :  { %6659 = vmatmul.mubr.bf16.gmra.mrb[68].mxu1 %v22479_v15  ;;  %6413 = vmatpush1.bf16.msra.mxu0 %v20271_v33  ;;  %v5203_v33 = vunpack.c.h.bf16 %v28793_v17 }
 0x7d9   :  { %6666 = vmatprep.mubr.bf16.mxu1 %v22709_v28  ;;  %6414 = vmatprep.subr.bf16.mxu0 %v20276_v12 }
 0x7da   :  { %19095 = vmatpush3.bf16.msra.mxu1 %v20291_v58 }
 0x7db   :  { %19096 = vmatprep.subr.bf16.mxu1 %v20292_v61 }
 0x7dc   :  { %6415 = vmatpush1.bf16.msra.mxu0 %v20274_v16  ;;  %v5202_v16 = vunpack.c.h.bf16 %v28792_v46  ;;  %v24187_v46 = vld [vmem:[%s28531_s3 + $0x2a0] ss:$12 sps:$4 sm:$0xff]  }
 0x7dd   :  { %6416 = vmatprep.subr.bf16.mxu0 %v20279_v31 }
 0x7de   :  { %19097 = vmatpush3.bf16.msra.mxu1 %v20292_v61 }
 0x7df   :  { %19098 = vmatprep.subr.bf16.mxu1 %v20296_v55 }
 0x7e0   :  { %6667 = vmatmul.mubr.bf16.gmra.mrb[72].mxu1 %v28788_v38  ;;  %6417 = vmatpush1.bf16.msra.mxu0 %v20277_v60 }
 0x7e1   :  { %6674 = vmatprep.mubr.bf16.mxu1 %v23023_v10  ;;  %6418 = vmatprep.subr.bf16.mxu0 %v20282_v42 }
 0x7e2   :  { %19099 = vmatpush3.bf16.msra.mxu1 %v20296_v55 }
 0x7e3   :  { %19100 = vmatprep.subr.bf16.mxu1 %v20300_v7 }
 0x7e4   :  { %6419 = vmatpush1.bf16.msra.mxu0 %v20280_v26 }
 0x7e5   :  { %6420 = vmatprep.subr.bf16.mxu0 %v20285_v37 }
 0x7e6   :  { %19101 = vmatpush3.bf16.msra.mxu1 %v20300_v7  ;;  %v20353_v7 = vld [vmem:[%s28531_s3 + $0x320] ss:$12 sps:$4 sm:$0xff]  }
 0x7e7   :  { %19102 = vmatprep.subr.bf16.mxu1 %v20307_v43 }
 0x7e8   :  { %6675 = vmatmul.mubr.bf16.gmra.mrb[76].mxu1 %v23019_v11  ;;  %6421 = vmatpush1.bf16.msra.mxu0 %v20283_v56 }
 0x7e9   :  { %6682 = vmatprep.mubr.bf16.mxu1 %v28789_v49  ;;  %6422 = vmatprep.subr.bf16.mxu0 %v20288_v25 }
 0x7ea   :  { %19103 = vmatpush3.bf16.msra.mxu1 %v20307_v43  ;;  %v24135_v43 = vld [vmem:[%s28531_s3 + $0x274] ss:$12 sps:$4 sm:$0xff]  }
 0x7eb   :  { %19104 = vmatprep.subr.bf16.mxu1 %v20314_v20 }
 0x7ec   :  { %6423 = vmatpush1.bf16.msra.mxu0 %v20286_v40 }
 0x7ed   :  { %6505 = vmatprep.subr.bf16.mxu0 %v20295_v6 }
 0x7ee   :  { %19105 = vmatpush3.bf16.msra.mxu1 %v20314_v20  ;;  %v24146_v20 = vld [vmem:[%s28531_s3 + $0x270] ss:$12 sps:$4 sm:$0xff]  }
 0x7ef   :  { %6425 = vmatmul.mubr.bf16.vlgmr.msra.gmra.mrb[80].mxu0 %v28787_v19  ;;  %7350 = vmatprep.subr.bf16.mxu1 %v24088_v51  ;;  %v5201_v19 = vunpack.c.h.bf16 %v28791_v34 }
 0x7f0   :  { %6683 = vmatmul.mubr.bf16.gmra.mrb[80].mxu1 %v28790_v0  ;;  %6434 = vmatprep.mubr.bf16.mxu0 %v22483_v59  ;;  %v20299_v59 = vld [vmem:[%s28533_s2 + $0x19c] ss:$12 sps:$4 sm:$0xff]  }
 0x7f1   :  { %6690 = vmatprep.mubr.bf16.mxu1 %v23561_v41  ;;  %6506 = vmatpush1.bf16.msra.mxu0 %v20293_v50 }
 0x7f2   :  { %6507 = vmatprep.subr.bf16.mxu0 %v20299_v59  ;;  %v24108_v59 = vld [vmem:[%s28531_s3 + $0x240] ss:$12 sps:$4 sm:$0xff]  }
 0x7f7   :  { %6435 = vmatmul.mubr.bf16.gmra.mrb[84].mxu0 %v22479_v15  ;;  %v20297_v15 = vld [vmem:[%s28533_s2 + $0x198] ss:$12 sps:$4 sm:$0xff]  }
 0x7f8   :  { %6691 = vmatmul.mubr.bf16.gmra.mrb[84].mxu1 %v23557_v54  ;;  %6444 = vmatprep.mubr.bf16.mxu0 %v22709_v28  ;;  %v20303_v28 = vld [vmem:[%s28533_s2 + $0x1b4] ss:$12 sps:$4 sm:$0xff]  }
 0x7f9   :  { %6698 = vmatprep.mubr.bf16.mxu1 %v23785_v5  ;;  %6508 = vmatpush1.bf16.msra.mxu0 %v20297_v15  ;;  %v24113_v15 = vld [vmem:[%s28531_s3 + $0x25c] ss:$12 sps:$4 sm:$0xff]  }
 0x7fa   :  { %6509 = vmatprep.subr.bf16.mxu0 %v20303_v28  ;;  %v20349_v28 = vld [vmem:[%s28531_s3 + $0x248] ss:$12 sps:$4 sm:$0xff]  }
 0x7ff   :  { %6445 = vmatmul.mubr.bf16.gmra.mrb[88].mxu0 %v28788_v38 }
 0x800   :  { %6699 = vmatmul.mubr.bf16.gmra.mrb[88].mxu1 %v23781_v57  ;;  %6454 = vmatprep.mubr.bf16.mxu0 %v23023_v10  ;;  %v20301_v10 = vld [vmem:[%s28533_s2 + $0x1b0] ss:$12 sps:$4 sm:$0xff]  }
 0x801   :  { %6510 = vmatpush1.bf16.msra.mxu0 %v20301_v10  ;;  %v28795_v10 = vld [vmem:[#allocation20_spill] sm:$0xff] }
 0x807   :  { %6455 = vmatmul.mubr.bf16.gmra.mrb[92].mxu0 %v23019_v11  ;;  %v20306_v11 = vld [vmem:[%s28533_s2 + $0x1cc] ss:$12 sps:$4 sm:$0xff]  }
 0x808   :  { %6464 = vmatprep.mubr.bf16.mxu0 %v28789_v49  ;;  %6511 = vmatprep.subr.bf16.mxu0 %v20306_v11  ;;  %v24128_v11 = vld [vmem:[%s28531_s3 + $0x258] ss:$12 sps:$4 sm:$0xff]  }
 0x809   :  { %6512 = vmatpush1.bf16.msra.mxu0 %v20304_v8  ;;  %v28796_v8 = vld [vmem:[#allocation22_spill] sm:$0xff] }
 0x80a   :  { %6513 = vmatprep.subr.bf16.mxu0 %v20310_v48 }
 0x80d   :  { %6514 = vmatpush1.bf16.msra.mxu0 %v20308_v21  ;;  %v20354_v21 = vld [vmem:[%s28531_s3 + $0x260] ss:$12 sps:$4 sm:$0xff]  }
 0x80e   :  { %6515 = vmatprep.subr.bf16.mxu0 %v20313_v47 }
 0x80f   :  { %6465 = vmatmul.mubr.bf16.gmra.mrb[96].mxu0 %v28790_v0  ;;  %v28794_v0 = vld [vmem:[#allocation17_spill] sm:$0xff] }
 0x810   :  { %6474 = vmatprep.mubr.bf16.mxu0 %v23561_v41  ;;  %v20315_v41 = vld [vmem:[%s28533_s2 + $0x210] ss:$12 sps:$4 sm:$0xff]  }
 0x811   :  { %6516 = vmatpush1.bf16.msra.mxu0 %v20311_v62 }
 0x812   :  { %6517 = vmatprep.subr.bf16.mxu0 %v20317_v23 }
 0x815   :  { %6518 = vmatpush1.bf16.msra.mxu0 %v20315_v41 }
 0x817   :  { %6475 = vmatmul.mubr.bf16.gmra.mrb[100].mxu0 %v23557_v54  ;;  %v20320_v54 = vld [vmem:[%s28533_s2 + $0x22c] ss:$12 sps:$4 sm:$0xff]  }
 0x818   :  { %6484 = vmatprep.mubr.bf16.mxu0 %v23785_v5  ;;  %6519 = vmatprep.subr.bf16.mxu0 %v20320_v54  ;;  %v20345_v5 = vld [vmem:[%s28531_s3 + $0x308] ss:$12 sps:$4 sm:$0xff]  }
 0x819   :  { %6520 = vmatpush1.bf16.msra.mxu0 %v20318_v30  ;;  %v24152_v30 = vld [vmem:[%s28531_s3 + $0x28c] ss:$12 sps:$4 sm:$0xff]  }
 0x81a   :  { %18299 = vmatprep.subr.bf16.mxu0 %v20345_v5  ;;  %v20358_v5 = vld [vmem:[%s28531_s3 + $0x338] ss:$12 sps:$4 sm:$0xff]  }
 0x81f   :  { %6485 = vmatmul.mubr.bf16.gmra.mrb[104].mxu0 %v23781_v57  ;;  %v5200_v57 = vunpack.c.l.bf16 %v28793_v17 }
 0x862   :  { %v18204_v39 = vpop.f32.mrb[72].mxu0 }
 0x863   :  { %v18205_v36 = vpop.f32.mrb[73].mxu0 }
 0x864   :  { %v18206_v24 = vadd.f32 %v18205_v36, %v18204_v39  ;;  %v18207_v13 = vpop.f32.mrb[74].mxu0  ;;  %v28797_v39 = vld [vmem:[#allocation23_spill] sm:$0xff] }
 0x865   :  { %v18208_v1 = vpop.f32.mrb[75].mxu0  ;;  %v20359_v36 = vld [vmem:[%s28531_s3 + $0x278] ss:$12 sps:$4 sm:$0xff]  }
 0x866   :  { %v18209_v2 = vadd.f32 %v18208_v1, %v18207_v13  ;;  %v24169_v13 = vld [vmem:[%s28531_s3 + $0x288] ss:$12 sps:$4 sm:$0xff]   ;;  %v20363_v1 = vld [vmem:[%s28531_s3 + $0x350] ss:$12 sps:$4 sm:$0xff]  }
 0x882   :  { %v5761_v14 = vpop.f32.mrb[60].mxu1  ;;  %v5845_v52 = vpop.f32.mrb[76].mxu0 }
 0x883   :  { %v5852_v53 = vadd.f32 %v5761_v14, %v5198_v9  ;;  %v5846_v63 = vadd.f32 %v18206_v24, %v5845_v52  ;;  %v5763_v32 = vpop.f32.mrb[61].mxu1  ;;  %v19088_v22 = vpop.f32.mrb[77].mxu0  ;;  %v28798_v24 = vld [vmem:[#allocation24_spill] sm:$0xff] }
 0x884   :  { %v5853_v29 = vadd.f32 %v5763_v32, %v5199_v27  ;;  %v5765_v35 = vpop.f32.mrb[62].mxu1  ;;  %v5848_v12 = vpop.f32.mrb[78].mxu0  ;;  %v24210_v32 = vld [vmem:[%s28531_s3 + $0x2b8] ss:$12 sps:$4 sm:$0xff]   ;;  %v24217_v22 = vld [vmem:[%s28531_s3 + $0x2d4] ss:$12 sps:$4 sm:$0xff]  }
 0x885   :  { %21101 = vtanh.f32 %v5852_v53  ;;  %v5854_v31 = vadd.f32 %v5846_v63, %v5200_v57  ;;  %v5855_v60 = vadd.f32 %v5765_v35, %v5201_v19  ;;  %v5849_v42 = vadd.f32 %v18209_v2, %v5848_v12  ;;  %v5767_v38 = vpop.f32.mrb[63].mxu1  ;;  %v19089_v26 = vpop.f32.mrb[79].mxu0  ;;  %v24179_v2 = vld [vmem:[%s28531_s3 + $0x2a4] ss:$12 sps:$4 sm:$0xff]   ;;  %v24193_v53 = vld [vmem:[%s28531_s3 + $0x2bc] ss:$12 sps:$4 sm:$0xff]  }
 0x886   :  { %21103 = vtanh.f32 %v5853_v29  ;;  %v5856_v37 = vadd.f32 %v5767_v38, %v5202_v16  ;;  %v20364_v57 = vld [vmem:[%s28531_s3 + $0x290] ss:$12 sps:$4 sm:$0xff]   ;;  %v20368_v63 = vld [vmem:[%s28531_s3 + $0x368] ss:$12 sps:$4 sm:$0xff]   ;;  %v20374_v26 = vld [vmem:[%s28531_s3 + $0x2c0] ss:$12 sps:$4 sm:$0xff]  }
 0x887   :  { %21105 = vtanh.f32 %v5854_v31  ;;  %v5857_v56 = vadd.f32 %v5849_v42, %v5203_v33  ;;  %v20369_v29 = vld [vmem:[%s28531_s3 + $0x2a8] ss:$12 sps:$4 sm:$0xff]   ;;  %v24228_v16 = vld [vmem:[%s28531_s3 + $0x2d0] ss:$12 sps:$4 sm:$0xff]   ;;  %v20373_v42 = vld [vmem:[%s28531_s3 + $0x380] ss:$12 sps:$4 sm:$0xff]  }
 0x888   :  { %21107 = vtanh.f32 %v5855_v60  ;;  %v24234_v60 = vld [vmem:[%s28531_s3 + $0x2ec] ss:$12 sps:$4 sm:$0xff]  }
 0x889   :  { %21109 = vtanh.f32 %v5857_v56  ;;  %v24253_v56 = vld [vmem:[%s28531_s3 + $0x2e8] ss:$12 sps:$4 sm:$0xff]  }
 0x88a   :  { %21111 = vtanh.f32 %v5856_v37  ;;  %v20378_v37 = vld [vmem:[%s28531_s3 + $0x398] ss:$12 sps:$4 sm:$0xff]  }
 0x88f   :  { %v21102_v3 = vpop.eup %21101 }
 0x890   :  { %v21104_v25 = vpop.eup %21103 }
 0x891   :  { %v21106_v58 = vpop.eup %21105 }
 0x892   :  { %v21108_v40 = vpop.eup %21107 }
 0x893   :  { %v21110_v61 = vpop.eup %21109  ;;  %v5864_v49 = vpack.c.bf16 %v21108_v40, %v21102_v3  ;;  %v24260_v3 = vld [vmem:[%s28531_s3 + $0x304] ss:$12 sps:$4 sm:$0xff]  }
 0x894   :  { %v21112_v6 = vpop.eup %21111  ;;  %v24101_v50 = vpack.c.bf16 %v21110_v61, %v21106_v58  ;;  %v20379_v58 = vld [vmem:[%s28531_s3 + $0x2d8] ss:$12 sps:$4 sm:$0xff]   ;;  %v20383_v61 = vld [vmem:[%s28531_s3 + $0x3b0] ss:$12 sps:$4 sm:$0xff]  }
 0x895   :  { %v5865_v55 = vpack.c.bf16 %v21112_v6, %v21104_v25 }
 0x897   :  { %6494 = vmatprep.mubr.bf16.mxu0 %v5865_v55  ;;  %6706 = vmatprep.mubr.bf16.mxu1 %v5865_v55  ;;  %v24275_v55 = vld [vmem:[%s28531_s3 + $0x300] ss:$12 sps:$4 sm:$0xff]  }
 0x898   :  { %6495 = vmatmul.mubr.bf16.gmra.mrb[108].mxu0 %v5864_v49  ;;  %6707 = vmatmul.mubr.bf16.gmra.mrb[92].mxu1 %v5864_v49 }
 0x899   :  { %19106 = vmatprep.mubr.bf16.mxu1 %v28794_v0  ;;  %6537 = vmatprep.mubr.bf16.mxu0 %v28772_v18 }
 0x8a0   :  { %6538 = vmatmul.mubr.bf16.vlgmr.msra.gmra.mrb[80].mxu0 %v28794_v0  ;;  %19107 = vmatmul.mubr.bf16.vlgmr.msra.gmra.mrb[96].mxu1 %v28795_v10 }
 0x8a1   :  { %7351 = vmatpush1.bf16.msra.mxu1 %v24108_v59  ;;  %19110 = vmatprep.mubr.bf16.mxu1 %v28796_v8 }
 0x8a2   :  { %7352 = vmatprep.subr.bf16.mxu1 %v24113_v15  ;;  %6547 = vmatprep.mubr.bf16.mxu0 %v28772_v18 }
 0x8a3   :  { %v18235_v48 = vpop.f32.mrb[64].mxu1  ;;  %18300 = vmatpush3.bf16.msra.mxu0 %v20349_v28  ;;  %v24281_v28 = vld [vmem:[%s28531_s3 + $0x31c] ss:$12 sps:$4 sm:$0xff]  }
 0x8a4   :  { %v18236_v47 = vpop.f32.mrb[65].mxu1  ;;  %18301 = vmatprep.subr.bf16.mxu0 %v20353_v7  ;;  %v20384_v7 = vld [vmem:[%s28531_s3 + $0x2f0] ss:$12 sps:$4 sm:$0xff]  }
 0x8a5   :  { %7353 = vmatpush1.bf16.msra.mxu1 %v24128_v11  ;;  %v24141_v62 = vadd.f32 %v18236_v47, %v18235_v48  ;;  %v18238_v23 = vpop.f32.mrb[66].mxu1  ;;  %v24300_v48 = vld [vmem:[%s28531_s3 + $0x334] ss:$12 sps:$4 sm:$0xff]  }
 0x8a6   :  { %v18239_v41 = vpop.f32.mrb[67].mxu1  ;;  %7354 = vmatprep.subr.bf16.mxu1 %v24135_v43 }
 0x8a7   :  { %v24154_v54 = vadd.f32 %v18239_v41, %v18238_v23  ;;  %18302 = vmatpush3.bf16.msra.mxu0 %v20354_v21 }
 0x8a8   :  { %6548 = vmatmul.mubr.bf16.gmra.mrb[84].mxu0 %v28795_v10  ;;  %19111 = vmatmul.mubr.bf16.gmra.mrb[100].mxu1 %v28797_v39 }
 0x8a9   :  { %7355 = vmatpush1.bf16.msra.mxu1 %v24146_v20  ;;  %19114 = vmatprep.mubr.bf16.mxu1 %v28798_v24 }
 0x8aa   :  { %7356 = vmatprep.subr.bf16.mxu1 %v24152_v30  ;;  %6557 = vmatprep.mubr.bf16.mxu0 %v28772_v18 }
 0x8ab   :  { %v18241_v34 = vpop.f32.mrb[68].mxu1  ;;  %18303 = vmatprep.subr.bf16.mxu0 %v20358_v5  ;;  %v24309_v5 = vld [vmem:[%s28531_s3 + $0x330] ss:$12 sps:$4 sm:$0xff]  }
 0x8ac   :  { %v18242_v9 = vpop.f32.mrb[69].mxu1  ;;  %18304 = vmatpush3.bf16.msra.mxu0 %v20359_v36  ;;  %v24315_v36 = vld [vmem:[%s28531_s3 + $0x34c] ss:$12 sps:$4 sm:$0xff]  }
 0x8ad   :  { %7357 = vmatpush1.bf16.msra.mxu1 %v24169_v13  ;;  %v24182_v14 = vadd.f32 %v18242_v9, %v18241_v34  ;;  %v18244_v52 = vpop.f32.mrb[70].mxu1  ;;  %18305 = vmatprep.subr.bf16.mxu0 %v20363_v1  ;;  %v24324_v1 = vld [vmem:[%s28531_s3 + $0x348] ss:$12 sps:$4 sm:$0xff]   ;;  %v24331_v34 = vld [vmem:[%s28531_s3 + $0x364] ss:$12 sps:$4 sm:$0xff]  }
 0x8ae   :  { %v18245_v27 = vpop.f32.mrb[71].mxu1  ;;  %7358 = vmatprep.subr.bf16.mxu1 %v24179_v2 }
 0x8af   :  { %v24195_v17 = vadd.f32 %v18245_v27, %v18244_v52 }
 0x8b0   :  { %6558 = vmatmul.mubr.bf16.gmra.mrb[88].mxu0 %v28796_v8  ;;  %19115 = vmatmul.mubr.bf16.gmra.mrb[104].mxu1 %v23559_v45  ;;  %v24293_v8 = vld [vmem:[%s28531_s3 + $0x318] ss:$12 sps:$4 sm:$0xff]  }
 0x8b1   :  { %7359 = vmatpush1.bf16.msra.mxu1 %v24187_v46  ;;  %19118 = vmatprep.mubr.bf16.mxu1 %v23783_v4 }
 0x8b2   :  { %7360 = vmatprep.subr.bf16.mxu1 %v24193_v53  ;;  %6567 = vmatprep.mubr.bf16.mxu0 %v28772_v18 }
 0x8b3   :  { %v18247_v19 = vpop.f32.mrb[72].mxu1  ;;  %18306 = vmatpush3.bf16.msra.mxu0 %v20364_v57  ;;  %v24339_v57 = vld [vmem:[%s28531_s3 + $0x360] ss:$12 sps:$4 sm:$0xff]  }
 0x8b4   :  { %v18248_v35 = vpop.f32.mrb[73].mxu1  ;;  %18307 = vmatprep.subr.bf16.mxu0 %v20368_v63 }
 0x8b5   :  { %7361 = vmatpush1.bf16.msra.mxu1 %v24210_v32  ;;  %v24223_v33 = vadd.f32 %v18248_v35, %v18247_v19  ;;  %v18250_v12 = vpop.f32.mrb[74].mxu1  ;;  %v24345_v19 = vld [vmem:[%s28531_s3 + $0x37c] ss:$12 sps:$4 sm:$0xff]   ;;  %v24354_v35 = vld [vmem:[%s28531_s3 + $0x378] ss:$12 sps:$4 sm:$0xff]  }
 0x8b6   :  { %v18251_v31 = vpop.f32.mrb[75].mxu1  ;;  %7362 = vmatprep.subr.bf16.mxu1 %v24217_v22 }
 0x8b7   :  { %v24239_v38 = vadd.f32 %v18251_v31, %v18250_v12  ;;  %18308 = vmatpush3.bf16.msra.mxu0 %v20369_v29  ;;  %v24361_v12 = vld [vmem:[%s28531_s3 + $0x394] ss:$12 sps:$4 sm:$0xff]  }
 0x8b8   :  { %6568 = vmatmul.mubr.bf16.gmra.mrb[92].mxu0 %v28797_v39  ;;  %19119 = vmatmul.mubr.bf16.gmra.mrb[108].mxu1 %v24101_v50 }
 0x8b9   :  { %7363 = vmatpush1.bf16.msra.mxu1 %v24228_v16  ;;  %6577 = vmatprep.mubr.bf16.mxu0 %v28772_v18 }
 0x8ba   :  { %7364 = vmatprep.subr.bf16.mxu1 %v24234_v60  ;;  %18309 = vmatprep.subr.bf16.mxu0 %v20373_v42 }
 0x8bb   :  { %v18253_v25 = vpop.f32.mrb[76].mxu1  ;;  %18310 = vmatpush3.bf16.msra.mxu0 %v20374_v26  ;;  %7382 = vmatprep.mubr.bf16.mxu1 %v28772_v18 }
 0x8bc   :  { %v18254_v40 = vpop.f32.mrb[77].mxu1  ;;  %18311 = vmatprep.subr.bf16.mxu0 %v20378_v37  ;;  %v24369_v37 = vld [vmem:[%s28531_s3 + $0x390] ss:$12 sps:$4 sm:$0xff]  }
 0x8bd   :  { %7365 = vmatpush1.bf16.msra.mxu1 %v24253_v56  ;;  %v24270_v49 = vadd.f32 %v18254_v40, %v18253_v25  ;;  %v18256_v6 = vpop.f32.mrb[78].mxu1 }
 0x8be   :  { %v18257_v0 = vpop.f32.mrb[79].mxu1  ;;  %7366 = vmatprep.subr.bf16.mxu1 %v24260_v3 }
 0x8bf   :  { %v24283_v10 = vadd.f32 %v18257_v0, %v18256_v6  ;;  %18312 = vmatpush3.bf16.msra.mxu0 %v20379_v58  ;;  %v24375_v58 = vld [vmem:[%s28531_s3 + $0x3ac] ss:$12 sps:$4 sm:$0xff]   ;;  %v24391_v6 = vld [vmem:[%s28531_s3 + $0x3c4] ss:$12 sps:$4 sm:$0xff]   ;;  %v20388_v0 = vld [vmem:[%s28531_s3 + $0x3c8] ss:$12 sps:$4 sm:$0xff]  }
 0x8c0   :  { %6578 = vmatmul.mubr.bf16.gmra.mrb[96].mxu0 %v28798_v24  ;;  %18313 = vmatprep.subr.bf16.mxu0 %v20383_v61  ;;  %v24384_v61 = vld [vmem:[%s28531_s3 + $0x3a8] ss:$12 sps:$4 sm:$0xff]  }
 0x8c1   :  { %7367 = vmatpush1.bf16.msra.mxu1 %v24275_v55  ;;  %6587 = vmatprep.mubr.bf16.mxu0 %v28772_v18 }
 0x8c2   :  { %7368 = vmatprep.subr.bf16.mxu1 %v24281_v28 }
 0x8c3   :  { %v18259_v21 = vpop.f32.mrb[80].mxu1  ;;  %18314 = vmatpush3.bf16.msra.mxu0 %v20384_v7  ;;  %v24406_v7 = vld [vmem:[%s28531_s3 + $0x3dc] ss:$12 sps:$4 sm:$0xff]  }
 0x8c4   :  { %v18260_v47 = vpop.f32.mrb[81].mxu1  ;;  %19122 = vmatprep.subr.bf16.mxu0 %v28771_v44 }
 0x8c5   :  { %7369 = vmatpush1.bf16.msra.mxu1 %v24293_v8  ;;  %v24304_v23 = vadd.f32 %v18260_v47, %v18259_v21  ;;  %v18262_v41 = vpop.f32.mrb[82].mxu1  ;;  %v24414_v21 = vld [vmem:[%s28531_s3 + $0x3d8] ss:$12 sps:$4 sm:$0xff]   ;;  %v20392_v47 = vld [vmem:[%s28531_s3 + $0x3e0] ss:$12 sps:$4 sm:$0xff]  }
 0x8c6   :  { %v18263_v39 = vpop.f32.mrb[83].mxu1  ;;  %7370 = vmatprep.subr.bf16.mxu1 %v24300_v48 }
 0x8c7   :  { %v24317_v24 = vadd.f32 %v18263_v39, %v18262_v41  ;;  %v24424_v41 = vld [vmem:[%s28531_s3 + $0x3f4] ss:$12 sps:$4 sm:$0xff]   ;;  %v24433_v39 = vld [vmem:[%s28531_s3 + $0x3f0] ss:$12 sps:$4 sm:$0xff]  }
 0x8c8   :  { %6588 = vmatmul.mubr.bf16.gmra.mrb[100].mxu0 %v23559_v45 }
 0x8c9   :  { %7371 = vmatpush1.bf16.msra.mxu1 %v24309_v5  ;;  %6597 = vmatprep.mubr.bf16.mxu0 %v28772_v18 }
 0x8ca   :  { %7372 = vmatprep.subr.bf16.mxu1 %v24315_v36 }
 0x8cb   :  { %v18265_v9 = vpop.f32.mrb[84].mxu1 }
 0x8cc   :  { %v18266_v52 = vpop.f32.mrb[85].mxu1 }
 0x8cd   :  { %7373 = vmatpush1.bf16.msra.mxu1 %v24324_v1  ;;  %v24334_v45 = vadd.f32 %v18266_v52, %v18265_v9  ;;  %v18268_v27 = vpop.f32.mrb[86].mxu1  ;;  %v20396_v9 = vld [vmem:[%s28531_s3 + $0x3f8] ss:$12 sps:$4 sm:$0xff]  }
 0x8ce   :  { %v18269_v63 = vpop.f32.mrb[87].mxu1  ;;  %7374 = vmatprep.subr.bf16.mxu1 %v24331_v34  ;;  %v24443_v52 = vld [vmem:[%s28531_s3 + $0x40c] ss:$12 sps:$4 sm:$0xff]  }
 0x8cf   :  { %v24347_v29 = vadd.f32 %v18269_v63, %v18268_v27  ;;  %v24449_v27 = vld [vmem:[%s28531_s3 + $0x408] ss:$12 sps:$4 sm:$0xff]   ;;  %v20400_v63 = vld [vmem:[%s28531_s3 + $0x410] ss:$12 sps:$4 sm:$0xff]  }
 0x8d0   :  { %6598 = vmatmul.mubr.bf16.gmra.mrb[104].mxu0 %v23783_v4 }
 0x8d1   :  { %7375 = vmatpush1.bf16.msra.mxu1 %v24339_v57  ;;  %6607 = vmatprep.mubr.bf16.mxu0 %v28772_v18 }
 0x8d2   :  { %7376 = vmatprep.subr.bf16.mxu1 %v24345_v19 }
 0x8d3   :  { %v18271_v31 = vpop.f32.mrb[88].mxu1 }
 0x8d4   :  { %v18272_v42 = vpop.f32.mrb[89].mxu1 }
 0x8d5   :  { %7377 = vmatpush1.bf16.msra.mxu1 %v24354_v35  ;;  %v24364_v4 = vadd.f32 %v18272_v42, %v18271_v31  ;;  %v18274_v26 = vpop.f32.mrb[90].mxu1  ;;  %v24459_v31 = vld [vmem:[%s28531_s3 + $0x424] ss:$12 sps:$4 sm:$0xff]   ;;  %v24465_v42 = vld [vmem:[%s28531_s3 + $0x420] ss:$12 sps:$4 sm:$0xff]  }
 0x8d6   :  { %v18275_v25 = vpop.f32.mrb[91].mxu1  ;;  %7378 = vmatprep.subr.bf16.mxu1 %v24361_v12 }
 0x8d7   :  { %v24377_v40 = vadd.f32 %v18275_v25, %v18274_v26  ;;  %v20404_v26 = vld [vmem:[%s28531_s3 + $0x428] ss:$12 sps:$4 sm:$0xff]  }
 0x8d8   :  { %6608 = vmatmul.mubr.bf16.gmra.mrb[108].mxu0 %v24101_v50  ;;  %v24397_v50 = vld [vmem:[%s28531_s3 + $0x3c0] ss:$12 sps:$4 sm:$0xff]   ;;  %v24475_v25 = vld [vmem:[%s28531_s3 + $0x43c] ss:$12 sps:$4 sm:$0xff]  }
 0x8d9   :  { %7379 = vmatpush1.bf16.msra.mxu1 %v24369_v37  ;;  %7468 = vmatprep.mubr.bf16.mxu0 %v28772_v18  ;;  %28799 = vst [vmem:[#allocation11_spill] sm:$0xff] %v24475_v25 }
 0x8da   :  { %7380 = vmatprep.subr.bf16.mxu1 %v24375_v58 }
 0x8dd   :  { %7381 = vmatpush1.bf16.msra.mxu1 %v24384_v61 }
 0x8de   :  { %7393 = vmatprep.subr.bf16.mxu1 %v24391_v6 }
 0x8e0   :  { %7383 = vmatmul.mubr.bf16.vlgmr.msra.gmra.mrb[112].mxu1 %v28772_v18  ;;  %7469 = vmatmul.mubr.bf16.vlgmr.msra.gmra.mrb[112].mxu0 %v28772_v18 }
 0x8e1   :  { %7394 = vmatpush1.bf16.msra.mxu1 %v24397_v50  ;;  %19123 = vmatpush3.bf16.msra.mxu0 %v20388_v0  ;;  %v24481_v0 = vld [vmem:[%s28531_s3 + $0x438] ss:$12 sps:$4 sm:$0xff]  }
 0x8e2   :  { %7395 = vmatprep.subr.bf16.mxu1 %v24406_v7  ;;  %19124 = vmatprep.subr.bf16.mxu0 %v28771_v44  ;;  %28800 = vst [vmem:[#allocation12_spill] sm:$0xff] %v24481_v0 }
 0x8e3   :  { %7425 = vmatprep.mubr.bf16.mxu1 %v28772_v18  ;;  %19138 = vmatprep.mubr.msk.bf16.mxu0 %vm21467_vm1, %v28771_v44 }
 0x8e5   :  { %7396 = vmatpush1.bf16.msra.mxu1 %v24414_v21  ;;  %19125 = vmatpush3.bf16.msra.mxu0 %v20392_v47  ;;  %v20408_v47 = vld [vmem:[%s28531_s3 + $0x440] ss:$12 sps:$4 sm:$0xff]  }
 0x8e6   :  { %7397 = vmatprep.subr.bf16.mxu1 %v24424_v41  ;;  %19126 = vmatprep.subr.bf16.mxu0 %v28771_v44 }
 0x8e9   :  { %7398 = vmatpush1.bf16.msra.mxu1 %v24433_v39  ;;  %19127 = vmatpush3.bf16.msra.mxu0 %v20396_v9  ;;  %v24491_v9 = vld [vmem:[%s28531_s3 + $0x454] ss:$12 sps:$4 sm:$0xff]  }
 0x8ea   :  { %7399 = vmatprep.subr.bf16.mxu1 %v24443_v52  ;;  %19128 = vmatprep.subr.bf16.mxu0 %v28771_v44 }
 0x8ed   :  { %7400 = vmatpush1.bf16.msra.mxu1 %v24449_v27  ;;  %19129 = vmatpush3.bf16.msra.mxu0 %v20400_v63  ;;  %v24497_v63 = vld [vmem:[%s28531_s3 + $0x450] ss:$12 sps:$4 sm:$0xff]  }
 0x8ee   :  { %7401 = vmatprep.subr.bf16.mxu1 %v24459_v31  ;;  %19130 = vmatprep.subr.bf16.mxu0 %v28771_v44 }
 0x8f1   :  { %7402 = vmatpush1.bf16.msra.mxu1 %v24465_v42  ;;  %19131 = vmatpush3.bf16.msra.mxu0 %v20404_v26  ;;  %v20412_v26 = vld [vmem:[%s28531_s3 + $0x458] ss:$12 sps:$4 sm:$0xff]  }
 0x8f2   :  { %7403 = vmatprep.subr.bf16.mxu1 %v24475_v25  ;;  %19132 = vmatprep.subr.bf16.mxu0 %v28771_v44  ;;  %v24507_v25 = vld [vmem:[%s28531_s3 + $0x46c] ss:$12 sps:$4 sm:$0xff]  }
 0x8f5   :  { %7404 = vmatpush1.bf16.msra.mxu1 %v24481_v0  ;;  %19133 = vmatpush3.bf16.msra.mxu0 %v20408_v47  ;;  %v24513_v47 = vld [vmem:[%s28531_s3 + $0x468] ss:$12 sps:$4 sm:$0xff]   ;;  %v20416_v0 = vld [vmem:[%s28531_s3 + $0x470] ss:$12 sps:$4 sm:$0xff]  }
 0x8f6   :  { %7405 = vmatprep.subr.bf16.mxu1 %v24491_v9  ;;  %19134 = vmatprep.subr.bf16.mxu0 %v28771_v44 }
 0x8f9   :  { %7406 = vmatpush1.bf16.msra.mxu1 %v24497_v63  ;;  %19135 = vmatpush3.bf16.msra.mxu0 %v20412_v26 }
 0x8fa   :  { %7407 = vmatprep.subr.bf16.mxu1 %v24507_v25  ;;  %19136 = vmatprep.subr.bf16.mxu0 %v28771_v44 }
 0x8fd   :  { %7408 = vmatpush1.bf16.msra.mxu1 %v24513_v47  ;;  %19137 = vmatpush3.bf16.msra.mxu0 %v20416_v0 }
 0x8fe   :  { %8025 = vmatprep.subr.bf16.mxu1 %v24088_v51  ;;  %v20417_v51 = vld [vmem:[%s28531_s3 + $0x308] ss:$12 sps:$4 sm:$0xff]  }
 0x8ff   :  { %18330 = vmatprep.subr.bf16.mxu0 %v20417_v51 }
 0x900   :  { %7426 = vmatmul.mubr.bf16.vlgmr.msra.gmra.mrb[112].mxu1 %v28772_v18  ;;  %19139 = vmatmul.mubr.bf16.vlgmr.msra.gmra.mrb[116].mxu0 %v28772_v18 }
 0x901   :  { %8026 = vmatpush1.bf16.msra.mxu1 %v24108_v59  ;;  %v20418_v59 = vld [vmem:[%s28531_s3 + $0x248] ss:$12 sps:$4 sm:$0xff]  }
 0x902   :  { %8027 = vmatprep.subr.bf16.mxu1 %v24113_v15  ;;  %v20419_v15 = vld [vmem:[%s28531_s3 + $0x320] ss:$12 sps:$4 sm:$0xff]   ;;  %18331 = vmatpush3.bf16.msra.mxu0 %v20418_v59 }
 0x903   :  { %18332 = vmatprep.subr.bf16.mxu0 %v20419_v15 }
 0x905   :  { %8028 = vmatpush1.bf16.msra.mxu1 %v24128_v11  ;;  %v20420_v11 = vld [vmem:[%s28531_s3 + $0x260] ss:$12 sps:$4 sm:$0xff]  }
 0x906   :  { %8029 = vmatprep.subr.bf16.mxu1 %v24135_v43  ;;  %v20421_v43 = vld [vmem:[%s28531_s3 + $0x338] ss:$12 sps:$4 sm:$0xff]   ;;  %18333 = vmatpush3.bf16.msra.mxu0 %v20420_v11 }
 0x907   :  { %18334 = vmatprep.subr.bf16.mxu0 %v20421_v43 }
 0x909   :  { %8030 = vmatpush1.bf16.msra.mxu1 %v24146_v20  ;;  %v20422_v20 = vld [vmem:[%s28531_s3 + $0x278] ss:$12 sps:$4 sm:$0xff]  }
 0x90a   :  { %8031 = vmatprep.subr.bf16.mxu1 %v24152_v30  ;;  %v20423_v30 = vld [vmem:[%s28531_s3 + $0x350] ss:$12 sps:$4 sm:$0xff]   ;;  %18335 = vmatpush3.bf16.msra.mxu0 %v20422_v20 }
 0x90b   :  { %18336 = vmatprep.subr.bf16.mxu0 %v20423_v30 }
 0x90d   :  { %8032 = vmatpush1.bf16.msra.mxu1 %v24169_v13  ;;  %v20424_v13 = vld [vmem:[%s28531_s3 + $0x290] ss:$12 sps:$4 sm:$0xff]  }
 0x90e   :  { %8033 = vmatprep.subr.bf16.mxu1 %v24179_v2  ;;  %18337 = vmatpush3.bf16.msra.mxu0 %v20424_v13  ;;  %v20425_v2 = vld [vmem:[%s28531_s3 + $0x368] ss:$12 sps:$4 sm:$0xff]  }
 0x90f   :  { %18338 = vmatprep.subr.bf16.mxu0 %v20425_v2 }
 0x911   :  { %8034 = vmatpush1.bf16.msra.mxu1 %v24187_v46  ;;  %v20426_v46 = vld [vmem:[%s28531_s3 + $0x2a8] ss:$12 sps:$4 sm:$0xff]  }
 0x912   :  { %8035 = vmatprep.subr.bf16.mxu1 %v24193_v53  ;;  %18339 = vmatpush3.bf16.msra.mxu0 %v20426_v46  ;;  %v20427_v53 = vld [vmem:[%s28531_s3 + $0x380] ss:$12 sps:$4 sm:$0xff]  }
 0x913   :  { %18340 = vmatprep.subr.bf16.mxu0 %v20427_v53 }
 0x915   :  { %8036 = vmatpush1.bf16.msra.mxu1 %v24210_v32  ;;  %v20428_v32 = vld [vmem:[%s28531_s3 + $0x2c0] ss:$12 sps:$4 sm:$0xff]  }
 0x916   :  { %8037 = vmatprep.subr.bf16.mxu1 %v24217_v22  ;;  %v20429_v22 = vld [vmem:[%s28531_s3 + $0x398] ss:$12 sps:$4 sm:$0xff]   ;;  %18341 = vmatpush3.bf16.msra.mxu0 %v20428_v32 }
 0x917   :  { %18342 = vmatprep.subr.bf16.mxu0 %v20429_v22 }
 0x919   :  { %8038 = vmatpush1.bf16.msra.mxu1 %v24228_v16  ;;  %v20430_v16 = vld [vmem:[%s28531_s3 + $0x2d8] ss:$12 sps:$4 sm:$0xff]  }
 0x91a   :  { %8039 = vmatprep.subr.bf16.mxu1 %v24234_v60  ;;  %v20431_v60 = vld [vmem:[%s28531_s3 + $0x3b0] ss:$12 sps:$4 sm:$0xff]   ;;  %18343 = vmatpush3.bf16.msra.mxu0 %v20430_v16 }
 0x91b   :  { %18344 = vmatprep.subr.bf16.mxu0 %v20431_v60 }
 0x91d   :  { %8040 = vmatpush1.bf16.msra.mxu1 %v24253_v56  ;;  %v20432_v56 = vld [vmem:[%s28531_s3 + $0x2f0] ss:$12 sps:$4 sm:$0xff]  }
 0x91e   :  { %8041 = vmatprep.subr.bf16.mxu1 %v24260_v3  ;;  %18345 = vmatpush3.bf16.msra.mxu0 %v20432_v56 }
 0x91f   :  { %19142 = vmatprep.subr.bf16.mxu0 %v28771_v44 }
 0x921   :  { %8042 = vmatpush1.bf16.msra.mxu1 %v24275_v55 }
 0x922   :  { %8043 = vmatprep.subr.bf16.mxu1 %v24281_v28  ;;  %v16180_v28 = vld [vmem:[%s28532_s4 + $0x3] sm:$0x7] }
 0x925   :  { %8044 = vmatpush1.bf16.msra.mxu1 %v24293_v8 }
 0x926   :  { %8045 = vmatprep.subr.bf16.mxu1 %v24300_v48 }
 0x929   :  { %8046 = vmatpush1.bf16.msra.mxu1 %v24309_v5 }
 0x92a   :  { %8047 = vmatprep.subr.bf16.mxu1 %v24315_v36 }
 0x92d   :  { %8048 = vmatpush1.bf16.msra.mxu1 %v24324_v1  ;;  %v28801_v1 = vld [vmem:[#allocation6_spill] sm:$0xff] }
 0x92e   :  { %8049 = vmatprep.subr.bf16.mxu1 %v24331_v34  ;;  %v24613_v34 = vrot.slane %v16180_v28, %v28801_v1 }
 0x930   :  { %v6664_v59 = vadd.f32 %v24195_v17, %v24613_v34 }
 0x931   :  { %8050 = vmatpush1.bf16.msra.mxu1 %v24339_v57  ;;  %v28802_v57 = vld [vmem:[#allocation4_spill] sm:$0xff] }
 0x932   :  { %8051 = vmatprep.subr.bf16.mxu1 %v24345_v19  ;;  %v24616_v19 = vrot.slane %v16180_v28, %v28802_v57 }
 0x935   :  { %8052 = vmatpush1.bf16.msra.mxu1 %v24354_v35  ;;  %v6661_v35 = vadd.f32 %v24182_v14, %v24613_v34  ;;  %v6656_v14 = vadd.f32 %v24154_v54, %v24613_v34  ;;  %v6677_v54 = vadd.f32 %v24270_v49, %v24613_v34  ;;  %v6672_v49 = vadd.f32 %v24239_v38, %v24613_v34 }
 0x936   :  { %8053 = vmatprep.subr.bf16.mxu1 %v24361_v12 }
 0x939   :  { %8054 = vmatpush1.bf16.msra.mxu1 %v24369_v37 }
 0x93a   :  { %8055 = vmatprep.subr.bf16.mxu1 %v24375_v58  ;;  %v28803_v58 = vld [vmem:[#allocation5_spill] sm:$0xff] }
 0x93d   :  { %8056 = vmatpush1.bf16.msra.mxu1 %v24384_v61  ;;  %v24621_v61 = vrot.slane %v16180_v28, %v28803_v58  ;;  %v25043_v58 = vld [vmem:[%s28531_s3 + $0x3c4] ss:$12 sps:$4 sm:$0xff]  }
 0x93e   :  { %8068 = vmatprep.subr.bf16.mxu1 %v24391_v6  ;;  %v6653_v6 = vadd.f32 %v24141_v62, %v24613_v34 }
 0x96b   :  { %v18277_v3 = vpop.f32.mrb[92].mxu1 }
 0x96c   :  { %v18278_v55 = vpop.f32.mrb[93].mxu1 }
 0x96d   :  { %v24608_v8 = vadd.f32 %v18278_v55, %v18277_v3  ;;  %v18280_v48 = vpop.f32.mrb[94].mxu1  ;;  %v6669_v55 = vadd.f32 %v24223_v33, %v24613_v34 }
 0x96e   :  { %v18281_v5 = vpop.f32.mrb[95].mxu1 }
 0x96f   :  { %v24610_v36 = vadd.f32 %v18281_v5, %v18280_v48 }
 0x973   :  { %v6539_v12 = vpop.f32.mrb[80].mxu0  ;;  %v19108_v37 = vpop.f32.mrb[96].mxu1 }
 0x974   :  { %v6758_v0 = vadd.f32 %v19108_v37, %v6661_v35  ;;  %v6541_v26 = vpop.f32.mrb[81].mxu0  ;;  %v6749_v51 = vpop.f32.mrb[97].mxu1  ;;  %v19494_v20 = vadd.f32 %v6539_v12, %v24616_v19  ;;  %v6680_v12 = vadd.f32 %v24283_v10, %v24613_v34 }
 0x975   :  { %v6750_v15 = vadd.f32 %v6749_v51, %v6653_v6  ;;  %v6543_v11 = vpop.f32.mrb[82].mxu0  ;;  %v19109_v43 = vpop.f32.mrb[98].mxu1  ;;  %v19495_v62 = vadd.f32 %v6541_v26, %v24621_v61 }
 0x976   :  { %v19496_v30 = vadd.f32 %v6543_v11, %v24616_v19  ;;  %v6761_v13 = vadd.f32 %v19109_v43, %v6664_v59  ;;  %v6545_v2 = vpop.f32.mrb[83].mxu0  ;;  %v6752_v46 = vpop.f32.mrb[99].mxu1 }
 0x977   :  { %v19497_v53 = vadd.f32 %v6545_v2, %v24621_v61  ;;  %v6753_v32 = vadd.f32 %v6752_v46, %v6656_v14  ;;  %v6685_v46 = vadd.f32 %v24304_v23, %v24613_v34 }
 0x978   :  { %v24633_v22 = vpack.c.bf16 %v19496_v30, %v19494_v20  ;;  %v24635_v17 = vpack.c.bf16 %v6761_v13, %v6758_v0  ;;  %v6693_v13 = vadd.f32 %v24334_v45, %v24613_v34  ;;  %v6688_v45 = vadd.f32 %v24317_v24, %v24613_v34 }
 0x979   :  { %v24637_v16 = vpack.c.bf16 %v19497_v53, %v19495_v62  ;;  %v24639_v60 = vpack.c.bf16 %v6753_v32, %v6750_v15 }
 0x97b   :  { %v6549_v56 = vpop.f32.mrb[84].mxu0  ;;  %v19112_v3 = vpop.f32.mrb[100].mxu1 }
 0x97c   :  { %v19498_v28 = vadd.f32 %v6549_v56, %v24616_v19  ;;  %v6774_v48 = vadd.f32 %v19112_v3, %v6677_v54  ;;  %v6551_v5 = vpop.f32.mrb[85].mxu0  ;;  %v6765_v35 = vpop.f32.mrb[101].mxu1  ;;  %v6696_v56 = vadd.f32 %v24347_v29, %v24613_v34 }
 0x97d   :  { %v19499_v37 = vadd.f32 %v6551_v5, %v24621_v61  ;;  %v6766_v6 = vadd.f32 %v6765_v35, %v6669_v55  ;;  %v6553_v0 = vpop.f32.mrb[86].mxu0  ;;  %v19113_v26 = vpop.f32.mrb[102].mxu1 }
 0x97e   :  { %v19500_v51 = vadd.f32 %v6553_v0, %v24616_v19  ;;  %v6777_v59 = vadd.f32 %v19113_v26, %v6680_v12  ;;  %v6555_v33 = vpop.f32.mrb[87].mxu0  ;;  %v6768_v15 = vpop.f32.mrb[103].mxu1 }
 0x97f   :  { %v19501_v11 = vadd.f32 %v6555_v33, %v24621_v61  ;;  %v6769_v43 = vadd.f32 %v6768_v15, %v6672_v49  ;;  %v6701_v33 = vadd.f32 %v24364_v4, %v24613_v34 }
 0x980   :  { %v24653_v14 = vpack.c.bf16 %v19500_v51, %v19498_v28  ;;  %v24655_v20 = vpack.c.bf16 %v6777_v59, %v6774_v48  ;;  %v6709_v51 = vadd.f32 %v24608_v8, %v24613_v34  ;;  %v6704_v8 = vadd.f32 %v24377_v40, %v24613_v34 }
 0x981   :  { %v24657_v10 = vpack.c.bf16 %v19501_v11, %v19499_v37  ;;  %v24659_v30 = vpack.c.bf16 %v6769_v43, %v6766_v6 }
 0x982   :  { %28804 = vst [vmem:[#allocation7_spill] sm:$0xff] %v24655_v20 }
 0x983   :  { %v6559_v38 = vpop.f32.mrb[88].mxu0  ;;  %v19116_v2 = vpop.f32.mrb[104].mxu1 }
 0x984   :  { %v19502_v62 = vadd.f32 %v6559_v38, %v24616_v19  ;;  %v6790_v53 = vadd.f32 %v19116_v2, %v6693_v13  ;;  %v6561_v32 = vpop.f32.mrb[89].mxu0  ;;  %v6781_v54 = vpop.f32.mrb[105].mxu1  ;;  %v6712_v38 = vadd.f32 %v24610_v36, %v24613_v34 }
 0x985   :  { %v19503_v3 = vadd.f32 %v6561_v32, %v24621_v61  ;;  %v6782_v55 = vadd.f32 %v6781_v54, %v6685_v46  ;;  %v6563_v28 = vpop.f32.mrb[90].mxu0  ;;  %v19117_v48 = vpop.f32.mrb[106].mxu1 }
 0x986   :  { %v19504_v5 = vadd.f32 %v6563_v28, %v24616_v19  ;;  %v6793_v35 = vadd.f32 %v19117_v48, %v6696_v56  ;;  %v6565_v23 = vpop.f32.mrb[91].mxu0  ;;  %v6784_v12 = vpop.f32.mrb[107].mxu1 }
 0x987   :  { %v19505_v37 = vadd.f32 %v6565_v23, %v24621_v61  ;;  %v6785_v6 = vadd.f32 %v6784_v12, %v6688_v45 }
 0x988   :  { %v24673_v0 = vpack.c.bf16 %v19504_v5, %v19502_v62  ;;  %v24675_v26 = vpack.c.bf16 %v6793_v35, %v6790_v53 }
 0x989   :  { %v24677_v29 = vpack.c.bf16 %v19505_v37, %v19503_v3  ;;  %v24679_v49 = vpack.c.bf16 %v6785_v6, %v6782_v55 }
 0x98a   :  { %28805 = vst [vmem:[#allocation13_spill] sm:$0xff] %v24675_v26 }
 0x98b   :  { %28806 = vst [vmem:[#allocation14_spill] sm:$0xff] %v24679_v49  ;;  %v6569_v24 = vpop.f32.mrb[92].mxu0  ;;  %v19120_v59 = vpop.f32.mrb[108].mxu1 }
 0x98c   :  { %v19506_v15 = vadd.f32 %v6569_v24, %v24616_v19  ;;  %v6806_v11 = vadd.f32 %v19120_v59, %v6709_v51  ;;  %v6571_v43 = vpop.f32.mrb[93].mxu0  ;;  %v6797_v13 = vpop.f32.mrb[109].mxu1 }
 0x98d   :  { %v19507_v2 = vadd.f32 %v6571_v43, %v24621_v61  ;;  %v6798_v46 = vadd.f32 %v6797_v13, %v6701_v33  ;;  %v6573_v62 = vpop.f32.mrb[94].mxu0  ;;  %v19121_v53 = vpop.f32.mrb[110].mxu1 }
 0x98e   :  { %v19508_v32 = vadd.f32 %v6573_v62, %v24616_v19  ;;  %v6809_v54 = vadd.f32 %v19121_v53, %v6712_v38  ;;  %v6575_v4 = vpop.f32.mrb[95].mxu0  ;;  %v6800_v56 = vpop.f32.mrb[111].mxu1 }
 0x98f   :  { %v19509_v3 = vadd.f32 %v6575_v4, %v24621_v61  ;;  %v6801_v55 = vadd.f32 %v6800_v56, %v6704_v8 }
 0x990   :  { %v24693_v28 = vpack.c.bf16 %v19508_v32, %v19506_v15  ;;  %v24695_v48 = vpack.c.bf16 %v6809_v54, %v6806_v11 }
 0x991   :  { %v24697_v36 = vpack.c.bf16 %v19509_v3, %v19507_v2  ;;  %v24699_v45 = vpack.c.bf16 %v6801_v55, %v6798_v46 }
 0x992   :  { %28807 = vst [vmem:[#allocation10_spill] sm:$0xff] %v24695_v48 }
 0x993   :  { %28808 = vst [vmem:[#allocation19_spill] sm:$0xff] %v24699_v45  ;;  %v6579_v5 = vpop.f32.mrb[96].mxu0  ;;  %v7541_v45 = vunpack.c.l.bf16 %v24635_v17 }
 0x994   :  { %v19510_v35 = vadd.f32 %v6579_v5, %v24616_v19  ;;  %v6581_v40 = vpop.f32.mrb[97].mxu0 }
 0x995   :  { %v19511_v34 = vadd.f32 %v6581_v40, %v24621_v61  ;;  %v6583_v23 = vpop.f32.mrb[98].mxu0 }
 0x996   :  { %v19512_v12 = vadd.f32 %v6583_v23, %v24616_v19  ;;  %v6585_v37 = vpop.f32.mrb[99].mxu0 }
 0x997   :  { %v19513_v6 = vadd.f32 %v6585_v37, %v24621_v61 }
 0x998   :  { %v24705_v51 = vpack.c.bf16 %v19512_v12, %v19510_v35 }
 0x999   :  { %v24707_v24 = vpack.c.bf16 %v19513_v6, %v19511_v34 }
 0x99a   :  { %28809 = vst [vmem:[#allocation18_spill] sm:$0xff] %v24705_v51 }
 0x99b   :  { %28810 = vst [vmem:[#allocation21_spill] sm:$0xff] %v24707_v24  ;;  %v6589_v59 = vpop.f32.mrb[100].mxu0 }
 0x99c   :  { %v19514_v33 = vadd.f32 %v6589_v59, %v24616_v19  ;;  %v6591_v15 = vpop.f32.mrb[101].mxu0 }
 0x99d   :  { %v19515_v11 = vadd.f32 %v6591_v15, %v24621_v61  ;;  %v6593_v43 = vpop.f32.mrb[102].mxu0 }
 0x99e   :  { %v19516_v13 = vadd.f32 %v6593_v43, %v24616_v19  ;;  %v6595_v38 = vpop.f32.mrb[103].mxu0 }
 0x99f   :  { %v19517_v2 = vadd.f32 %v6595_v38, %v24621_v61 }
 0x9a0   :  { %v24713_v46 = vpack.c.bf16 %v19516_v13, %v19514_v33 }
 0x9a1   :  { %v24715_v62 = vpack.c.bf16 %v19517_v2, %v19515_v11 }
 0x9a2   :  { %28811 = vst [vmem:[#allocation25_spill] sm:$0xff] %v24713_v46 }
 0x9a3   :  { %28812 = vst [vmem:[#allocation8_spill] sm:$0xff] %v24715_v62  ;;  %v6599_v53 = vpop.f32.mrb[104].mxu0  ;;  %v7542_v62 = vunpack.c.h.bf16 %v24653_v14 }
 0x9a4   :  { %v19518_v8 = vadd.f32 %v6599_v53, %v24616_v19  ;;  %v6601_v32 = vpop.f32.mrb[105].mxu0 }
 0x9a5   :  { %v19519_v54 = vadd.f32 %v6601_v32, %v24621_v61  ;;  %v6603_v4 = vpop.f32.mrb[106].mxu0  ;;  %v6863_v32 = vunpack.c.l.bf16 %v24633_v22 }
 0x9a6   :  { %v19520_v56 = vadd.f32 %v6603_v4, %v24616_v19  ;;  %v6605_v3 = vpop.f32.mrb[107].mxu0 }
 0x9a7   :  { %v19521_v55 = vadd.f32 %v6605_v3, %v24621_v61  ;;  %v6865_v3 = vunpack.c.l.bf16 %v24639_v60 }
 0x9a8   :  { %v24721_v5 = vpack.c.bf16 %v19520_v56, %v19518_v8  ;;  %v6864_v56 = vunpack.c.l.bf16 %v24637_v16 }
 0x9a9   :  { %v24723_v35 = vpack.c.bf16 %v19521_v55, %v19519_v54 }
 0x9aa   :  { %28813 = vst [vmem:[#allocation15_spill] sm:$0xff] %v24721_v5 }
 0x9ab   :  { %28814 = vst [vmem:[#allocation16_spill] sm:$0xff] %v24723_v35  ;;  %v6609_v40 = vpop.f32.mrb[108].mxu0 }
 0x9ac   :  { %v19522_v34 = vadd.f32 %v6609_v40, %v24616_v19  ;;  %v6611_v23 = vpop.f32.mrb[109].mxu0 }
 0x9ad   :  { %v19523_v12 = vadd.f32 %v6611_v23, %v24621_v61  ;;  %v6613_v37 = vpop.f32.mrb[110].mxu0 }
 0x9ae   :  { %v19524_v6 = vadd.f32 %v6613_v37, %v24616_v19  ;;  %v6615_v59 = vpop.f32.mrb[111].mxu0  ;;  %v6868_v37 = vunpack.c.h.bf16 %v24639_v60 }
 0x9af   :  { %v19525_v33 = vadd.f32 %v6615_v59, %v24621_v61  ;;  %v6867_v59 = vunpack.c.h.bf16 %v24637_v16 }
 0x9b0   :  { %v24729_v15 = vpack.c.bf16 %v19524_v6, %v19522_v34  ;;  %v6866_v34 = vunpack.c.h.bf16 %v24633_v22 }
 0x9b1   :  { %v24731_v11 = vpack.c.bf16 %v19525_v33, %v19523_v12 }
 0x9b2   :  { %28815 = vst [vmem:[#allocation9_spill] sm:$0xff] %v24729_v15 }
 0x9b3   :  { %28816 = vst [vmem:[#allocation17_spill] sm:$0xff] %v24731_v11  ;;  %v18315_v43 = vpop.f32.mrb[112].mxu0 }
 0x9b4   :  { %v18316_v13 = vpop.f32.mrb[113].mxu0 }
 0x9b5   :  { %v18317_v38 = vadd.f32 %v18316_v13, %v18315_v43  ;;  %v18318_v2 = vpop.f32.mrb[114].mxu0 }
 0x9b6   :  { %v18319_v53 = vpop.f32.mrb[115].mxu0 }
 0x9b7   :  { %v18320_v8 = vadd.f32 %v18319_v53, %v18318_v2 }
 0x9d3   :  { %v7427_v54 = vpop.f32.mrb[112].mxu1  ;;  %v7511_v4 = vpop.f32.mrb[116].mxu0 }
 0x9d4   :  { %v7518_v19 = vadd.f32 %v7427_v54, %v6863_v32  ;;  %v7512_v61 = vadd.f32 %v18317_v38, %v7511_v4  ;;  %v7429_v55 = vpop.f32.mrb[113].mxu1  ;;  %v19140_v40 = vpop.f32.mrb[117].mxu0 }
 0x9d5   :  { %v7519_v23 = vadd.f32 %v7429_v55, %v6864_v56  ;;  %v7431_v12 = vpop.f32.mrb[114].mxu1  ;;  %v7514_v6 = vpop.f32.mrb[118].mxu0  ;;  %v24832_v40 = vld [vmem:[%s28531_s3 + $0x270] ss:$12 sps:$4 sm:$0xff]  }
 0x9d6   :  { %21113 = vtanh.f32 %v7518_v19  ;;  %v7520_v33 = vadd.f32 %v7512_v61, %v6865_v3  ;;  %v7521_v43 = vadd.f32 %v7431_v12, %v6866_v34  ;;  %v7515_v13 = vadd.f32 %v18320_v8, %v7514_v6  ;;  %v7433_v2 = vpop.f32.mrb[115].mxu1  ;;  %v19141_v53 = vpop.f32.mrb[119].mxu0  ;;  %v20433_v3 = vld [vmem:[%s28531_s3 + $0x3c8] ss:$12 sps:$4 sm:$0xff]   ;;  %v20434_v61 = vld [vmem:[%s28531_s3 + $0x3e0] ss:$12 sps:$4 sm:$0xff]  }
 0x9d7   :  { %21115 = vtanh.f32 %v7519_v23  ;;  %v7522_v32 = vadd.f32 %v7433_v2, %v6867_v59  ;;  %v24838_v34 = vld [vmem:[%s28531_s3 + $0x28c] ss:$12 sps:$4 sm:$0xff]   ;;  %v24844_v23 = vld [vmem:[%s28531_s3 + $0x288] ss:$12 sps:$4 sm:$0xff]   ;;  %v24851_v12 = vld [vmem:[%s28531_s3 + $0x2a4] ss:$12 sps:$4 sm:$0xff]  }
 0x9d8   :  { %21117 = vtanh.f32 %v7520_v33  ;;  %v7523_v38 = vadd.f32 %v7515_v13, %v6868_v37  ;;  %v24856_v37 = vld [vmem:[%s28531_s3 + $0x2a0] ss:$12 sps:$4 sm:$0xff]   ;;  %v24863_v6 = vld [vmem:[%s28531_s3 + $0x2b8] ss:$12 sps:$4 sm:$0xff]   ;;  %v24868_v59 = vld [vmem:[%s28531_s3 + $0x2bc] ss:$12 sps:$4 sm:$0xff]  }
 0x9d9   :  { %21119 = vtanh.f32 %v7521_v43  ;;  %v24873_v33 = vld [vmem:[%s28531_s3 + $0x2d4] ss:$12 sps:$4 sm:$0xff]   ;;  %v24886_v2 = vld [vmem:[%s28531_s3 + $0x2d0] ss:$12 sps:$4 sm:$0xff]  }
 0x9da   :  { %21121 = vtanh.f32 %v7523_v38  ;;  %v20468_v43 = vld [vmem:[%s28531_s3 + $0x308] ss:$12 sps:$4 sm:$0xff]   ;;  %v20473_v53 = vld [vmem:[%s28531_s3 + $0x320] ss:$12 sps:$4 sm:$0xff]  }
 0x9db   :  { %21123 = vtanh.f32 %v7522_v32  ;;  %v20469_v13 = vld [vmem:[%s28531_s3 + $0x248] ss:$12 sps:$4 sm:$0xff]   ;;  %v24895_v32 = vld [vmem:[%s28531_s3 + $0x2ec] ss:$12 sps:$4 sm:$0xff]  }
 0x9dc   :  { %v20474_v38 = vld [vmem:[%s28531_s3 + $0x260] ss:$12 sps:$4 sm:$0xff]  }
 0x9e0   :  { %v21114_v22 = vpop.eup %21113 }
 0x9e1   :  { %v21116_v54 = vpop.eup %21115 }
 0x9e2   :  { %v21118_v4 = vpop.eup %21117 }
 0x9e3   :  { %v21120_v60 = vpop.eup %21119 }
 0x9e4   :  { %v21122_v56 = vpop.eup %21121  ;;  %v24739_v55 = vpack.c.bf16 %v21120_v60, %v21114_v22  ;;  %v20478_v22 = vld [vmem:[%s28531_s3 + $0x338] ss:$12 sps:$4 sm:$0xff]  }
 0x9e5   :  { %v21124_v16 = vpop.eup %21123  ;;  %v24741_v19 = vpack.c.bf16 %v21122_v56, %v21118_v4  ;;  %v24913_v4 = vld [vmem:[%s28531_s3 + $0x304] ss:$12 sps:$4 sm:$0xff]  }
 0x9e6   :  { %28817 = vst [vmem:[#allocation20_spill] sm:$0xff] %v24739_v55  ;;  %v24743_v8 = vpack.c.bf16 %v21124_v16, %v21116_v54  ;;  %v24907_v54 = vld [vmem:[%s28531_s3 + $0x2e8] ss:$12 sps:$4 sm:$0xff]   ;;  %v20479_v60 = vld [vmem:[%s28531_s3 + $0x278] ss:$12 sps:$4 sm:$0xff]  }
 0x9e7   :  { %28818 = vst [vmem:[#allocation22_spill] sm:$0xff] %v24741_v19  ;;  %v20483_v56 = vld [vmem:[%s28531_s3 + $0x350] ss:$12 sps:$4 sm:$0xff]   ;;  %v24925_v16 = vld [vmem:[%s28531_s3 + $0x300] ss:$12 sps:$4 sm:$0xff]  }
 0x9e8   :  { %28819 = vst [vmem:[#allocation23_spill] sm:$0xff] %v24743_v8  ;;  %8057 = vmatprep.mubr.bf16.mxu1 %v24743_v8  ;;  %8143 = vmatprep.mubr.bf16.mxu0 %v24743_v8 }
 0x9e9   :  { %8058 = vmatmul.mubr.bf16.vlgmr.msra.gmra.mrb[116].mxu1 %v24739_v55  ;;  %8144 = vmatmul.mubr.bf16.vlgmr.msra.gmra.mrb[120].mxu0 %v24739_v55 }
 0x9ea   :  { %8069 = vmatpush1.bf16.msra.mxu1 %v24397_v50  ;;  %19143 = vmatpush3.bf16.msra.mxu0 %v20433_v3  ;;  %v20435_v50 = vld [vmem:[%s28531_s3 + $0x3f8] ss:$12 sps:$4 sm:$0xff]   ;;  %v24931_v3 = vld [vmem:[%s28531_s3 + $0x31c] ss:$12 sps:$4 sm:$0xff]  }
 0x9eb   :  { %8070 = vmatprep.subr.bf16.mxu1 %v24406_v7  ;;  %19144 = vmatprep.subr.bf16.mxu0 %v28771_v44  ;;  %v20436_v7 = vld [vmem:[%s28531_s3 + $0x410] ss:$12 sps:$4 sm:$0xff]  }
 0x9ec   :  { %8100 = vmatprep.mubr.bf16.mxu1 %v28772_v18  ;;  %19158 = vmatprep.mubr.msk.bf16.mxu0 %vm21467_vm1, %v28771_v44 }
 0x9ee   :  { %8071 = vmatpush1.bf16.msra.mxu1 %v24414_v21  ;;  %19145 = vmatpush3.bf16.msra.mxu0 %v20434_v61  ;;  %v20437_v21 = vld [vmem:[%s28531_s3 + $0x428] ss:$12 sps:$4 sm:$0xff]   ;;  %v24937_v61 = vld [vmem:[%s28531_s3 + $0x318] ss:$12 sps:$4 sm:$0xff]  }
 0x9ef   :  { %8072 = vmatprep.subr.bf16.mxu1 %v24424_v41  ;;  %19146 = vmatprep.subr.bf16.mxu0 %v28771_v44  ;;  %v20438_v41 = vld [vmem:[%s28531_s3 + $0x440] ss:$12 sps:$4 sm:$0xff]  }
 0x9f2   :  { %8073 = vmatpush1.bf16.msra.mxu1 %v24433_v39  ;;  %19147 = vmatpush3.bf16.msra.mxu0 %v20435_v50  ;;  %v28820_v39 = vld [vmem:[#allocation11_spill] sm:$0xff]  ;;  %v24943_v50 = vld [vmem:[%s28531_s3 + $0x334] ss:$12 sps:$4 sm:$0xff]  }
 0x9f3   :  { %8074 = vmatprep.subr.bf16.mxu1 %v24443_v52  ;;  %19148 = vmatprep.subr.bf16.mxu0 %v28771_v44  ;;  %v28821_v52 = vld [vmem:[#allocation12_spill] sm:$0xff] }
 0x9f6   :  { %8075 = vmatpush1.bf16.msra.mxu1 %v24449_v27  ;;  %19149 = vmatpush3.bf16.msra.mxu0 %v20436_v7  ;;  %v20439_v27 = vld [vmem:[%s28531_s3 + $0x458] ss:$12 sps:$4 sm:$0xff]   ;;  %v24949_v7 = vld [vmem:[%s28531_s3 + $0x330] ss:$12 sps:$4 sm:$0xff]  }
 0x9f7   :  { %8076 = vmatprep.subr.bf16.mxu1 %v24459_v31  ;;  %19150 = vmatprep.subr.bf16.mxu0 %v28771_v44  ;;  %v20440_v31 = vld [vmem:[%s28531_s3 + $0x470] ss:$12 sps:$4 sm:$0xff]  }
 0x9fa   :  { %8077 = vmatpush1.bf16.msra.mxu1 %v24465_v42  ;;  %19151 = vmatpush3.bf16.msra.mxu0 %v20437_v21  ;;  %v24800_v42 = vld [vmem:[%s28531_s3 + $0x244] ss:$12 sps:$4 sm:$0xff]   ;;  %v24955_v21 = vld [vmem:[%s28531_s3 + $0x34c] ss:$12 sps:$4 sm:$0xff]  }
 0x9fb   :  { %8078 = vmatprep.subr.bf16.mxu1 %v28820_v39  ;;  %19152 = vmatprep.subr.bf16.mxu0 %v28771_v44  ;;  %v20484_v39 = vld [vmem:[%s28531_s3 + $0x290] ss:$12 sps:$4 sm:$0xff]  }
 0x9fe   :  { %8079 = vmatpush1.bf16.msra.mxu1 %v28821_v52  ;;  %19153 = vmatpush3.bf16.msra.mxu0 %v20438_v41  ;;  %v24961_v41 = vld [vmem:[%s28531_s3 + $0x348] ss:$12 sps:$4 sm:$0xff]   ;;  %v24971_v52 = vld [vmem:[%s28531_s3 + $0x364] ss:$12 sps:$4 sm:$0xff]  }
 0x9ff   :  { %8080 = vmatprep.subr.bf16.mxu1 %v24491_v9  ;;  %19154 = vmatprep.subr.bf16.mxu0 %v28771_v44  ;;  %v24806_v9 = vld [vmem:[%s28531_s3 + $0x240] ss:$12 sps:$4 sm:$0xff]  }
 0xa02   :  { %8081 = vmatpush1.bf16.msra.mxu1 %v24497_v63  ;;  %19155 = vmatpush3.bf16.msra.mxu0 %v20439_v27  ;;  %v24820_v63 = vld [vmem:[%s28531_s3 + $0x258] ss:$12 sps:$4 sm:$0xff]   ;;  %v20488_v27 = vld [vmem:[%s28531_s3 + $0x368] ss:$12 sps:$4 sm:$0xff]  }
 0xa03   :  { %8082 = vmatprep.subr.bf16.mxu1 %v24507_v25  ;;  %19156 = vmatprep.subr.bf16.mxu0 %v28771_v44  ;;  %v24812_v25 = vld [vmem:[%s28531_s3 + $0x25c] ss:$12 sps:$4 sm:$0xff]  }
 0xa06   :  { %8083 = vmatpush1.bf16.msra.mxu1 %v24513_v47  ;;  %19157 = vmatpush3.bf16.msra.mxu0 %v20440_v31  ;;  %v24826_v47 = vld [vmem:[%s28531_s3 + $0x274] ss:$12 sps:$4 sm:$0xff]  }
 0xa07   :  { %8700 = vmatprep.subr.bf16.mxu0 %v24800_v42  ;;  %18361 = vmatprep.subr.bf16.mxu1 %v20468_v43  ;;  %v24979_v31 = vld [vmem:[%s28531_s3 + $0x360] ss:$12 sps:$4 sm:$0xff]   ;;  %v20489_v43 = vld [vmem:[%s28531_s3 + $0x2a8] ss:$12 sps:$4 sm:$0xff]  }
 0xa09   :  { %8101 = vmatmul.mubr.bf16.vlgmr.msra.gmra.mrb[116].mxu1 %v24741_v19  ;;  %19159 = vmatmul.mubr.bf16.vlgmr.msra.gmra.mrb[124].mxu0 %v24741_v19 }
 0xa0a   :  { %8701 = vmatpush1.bf16.msra.mxu0 %v24806_v9  ;;  %18362 = vmatpush3.bf16.msra.mxu1 %v20469_v13  ;;  %v24989_v13 = vld [vmem:[%s28531_s3 + $0x37c] ss:$12 sps:$4 sm:$0xff]  }
 0xa0b   :  { %8702 = vmatprep.subr.bf16.mxu0 %v24812_v25  ;;  %18363 = vmatprep.subr.bf16.mxu1 %v20473_v53  ;;  %v20493_v53 = vld [vmem:[%s28531_s3 + $0x380] ss:$12 sps:$4 sm:$0xff]  }
 0xa0e   :  { %8703 = vmatpush1.bf16.msra.mxu0 %v24820_v63  ;;  %18364 = vmatpush3.bf16.msra.mxu1 %v20474_v38  ;;  %v24997_v38 = vld [vmem:[%s28531_s3 + $0x378] ss:$12 sps:$4 sm:$0xff]  }
 0xa0f   :  { %8704 = vmatprep.subr.bf16.mxu0 %v24826_v47  ;;  %18365 = vmatprep.subr.bf16.mxu1 %v20478_v22  ;;  %v20494_v22 = vld [vmem:[%s28531_s3 + $0x2c0] ss:$12 sps:$4 sm:$0xff]  }
 0xa12   :  { %8705 = vmatpush1.bf16.msra.mxu0 %v24832_v40  ;;  %18366 = vmatpush3.bf16.msra.mxu1 %v20479_v60  ;;  %v25006_v60 = vld [vmem:[%s28531_s3 + $0x394] ss:$12 sps:$4 sm:$0xff]  }
 0xa13   :  { %8706 = vmatprep.subr.bf16.mxu0 %v24838_v34  ;;  %18367 = vmatprep.subr.bf16.mxu1 %v20483_v56  ;;  %v20498_v56 = vld [vmem:[%s28531_s3 + $0x398] ss:$12 sps:$4 sm:$0xff]  }
 0xa16   :  { %8707 = vmatpush1.bf16.msra.mxu0 %v24844_v23  ;;  %18368 = vmatpush3.bf16.msra.mxu1 %v20484_v39  ;;  %v25015_v39 = vld [vmem:[%s28531_s3 + $0x390] ss:$12 sps:$4 sm:$0xff]  }
 0xa17   :  { %8708 = vmatprep.subr.bf16.mxu0 %v24851_v12  ;;  %18369 = vmatprep.subr.bf16.mxu1 %v20488_v27  ;;  %v20499_v27 = vld [vmem:[%s28531_s3 + $0x2d8] ss:$12 sps:$4 sm:$0xff]  }
 0xa1a   :  { %8709 = vmatpush1.bf16.msra.mxu0 %v24856_v37  ;;  %18370 = vmatpush3.bf16.msra.mxu1 %v20489_v43  ;;  %v25024_v43 = vld [vmem:[%s28531_s3 + $0x3ac] ss:$12 sps:$4 sm:$0xff]  }
 0xa1b   :  { %8710 = vmatprep.subr.bf16.mxu0 %v24868_v59  ;;  %18371 = vmatprep.subr.bf16.mxu1 %v20493_v53  ;;  %v20503_v53 = vld [vmem:[%s28531_s3 + $0x3b0] ss:$12 sps:$4 sm:$0xff]  }
 0xa1e   :  { %8711 = vmatpush1.bf16.msra.mxu0 %v24863_v6  ;;  %18372 = vmatpush3.bf16.msra.mxu1 %v20494_v22  ;;  %v25033_v22 = vld [vmem:[%s28531_s3 + $0x3a8] ss:$12 sps:$4 sm:$0xff]  }
 0xa1f   :  { %8712 = vmatprep.subr.bf16.mxu0 %v24873_v33  ;;  %18373 = vmatprep.subr.bf16.mxu1 %v20498_v56  ;;  %v20504_v56 = vld [vmem:[%s28531_s3 + $0x2f0] ss:$12 sps:$4 sm:$0xff]  }
 0xa22   :  { %8713 = vmatpush1.bf16.msra.mxu0 %v24886_v2  ;;  %18374 = vmatpush3.bf16.msra.mxu1 %v20499_v27 }
 0xa23   :  { %8714 = vmatprep.subr.bf16.mxu0 %v24895_v32  ;;  %18375 = vmatprep.subr.bf16.mxu1 %v20503_v53  ;;  %v7539_v53 = vunpack.c.l.bf16 %v24653_v14 }
 0xa26   :  { %8715 = vmatpush1.bf16.msra.mxu0 %v24907_v54  ;;  %18376 = vmatpush3.bf16.msra.mxu1 %v20504_v56  ;;  %v7540_v56 = vunpack.c.l.bf16 %v24657_v10 }
 0xa27   :  { %8716 = vmatprep.subr.bf16.mxu0 %v24913_v4  ;;  %19162 = vmatprep.subr.bf16.mxu1 %v28771_v44 }
 0xa2a   :  { %8717 = vmatpush1.bf16.msra.mxu0 %v24925_v16 }
 0xa2b   :  { %8718 = vmatprep.subr.bf16.mxu0 %v24931_v3 }
 0xa2e   :  { %8719 = vmatpush1.bf16.msra.mxu0 %v24937_v61 }
 0xa2f   :  { %8720 = vmatprep.subr.bf16.mxu0 %v24943_v50 }
 0xa32   :  { %8721 = vmatpush1.bf16.msra.mxu0 %v24949_v7 }
 0xa33   :  { %8722 = vmatprep.subr.bf16.mxu0 %v24955_v21 }
 0xa36   :  { %8723 = vmatpush1.bf16.msra.mxu0 %v24961_v41 }
 0xa37   :  { %8724 = vmatprep.subr.bf16.mxu0 %v24971_v52 }
 0xa3a   :  { %8725 = vmatpush1.bf16.msra.mxu0 %v24979_v31 }
 0xa3b   :  { %8726 = vmatprep.subr.bf16.mxu0 %v24989_v13 }
 0xa3e   :  { %8727 = vmatpush1.bf16.msra.mxu0 %v24997_v38 }
 0xa3f   :  { %8728 = vmatprep.subr.bf16.mxu0 %v25006_v60 }
 0xa42   :  { %8729 = vmatpush1.bf16.msra.mxu0 %v25015_v39 }
 0xa43   :  { %8730 = vmatprep.subr.bf16.mxu0 %v25024_v43 }
 0xa46   :  { %8731 = vmatpush1.bf16.msra.mxu0 %v25033_v22 }
 0xa47   :  { %8743 = vmatprep.subr.bf16.mxu0 %v25043_v58 }
 0xabc   :  { %v18346_v27 = vpop.f32.mrb[120].mxu0 }
 0xabd   :  { %v18347_v57 = vpop.f32.mrb[121].mxu0 }
 0xabe   :  { %v18348_v1 = vadd.f32 %v18347_v57, %v18346_v27  ;;  %v18349_v19 = vpop.f32.mrb[122].mxu0  ;;  %v7544_v57 = vunpack.c.h.bf16 %v24635_v17 }
 0xabf   :  { %v18350_v48 = vpop.f32.mrb[123].mxu0 }
 0xac0   :  { %v18351_v11 = vadd.f32 %v18350_v48, %v18349_v19  ;;  %v7543_v48 = vunpack.c.h.bf16 %v24657_v10 }
 0xadc   :  { %v8102_v15 = vpop.f32.mrb[116].mxu1  ;;  %v8186_v55 = vpop.f32.mrb[124].mxu0 }
 0xadd   :  { %v8193_v8 = vadd.f32 %v8102_v15, %v7539_v53  ;;  %v8187_v35 = vadd.f32 %v18348_v1, %v8186_v55  ;;  %v8104_v5 = vpop.f32.mrb[117].mxu1  ;;  %v19160_v26 = vpop.f32.mrb[125].mxu0 }
 0xade   :  { %v8194_v46 = vadd.f32 %v8104_v5, %v7540_v56  ;;  %v8106_v49 = vpop.f32.mrb[118].mxu1  ;;  %v8189_v27 = vpop.f32.mrb[126].mxu0 }
 0xadf   :  { %21125 = vtanh.f32 %v8193_v8  ;;  %v8195_v19 = vadd.f32 %v8187_v35, %v7541_v45  ;;  %v8196_v24 = vadd.f32 %v8106_v49, %v7542_v62  ;;  %v8190_v51 = vadd.f32 %v18351_v11, %v8189_v27  ;;  %v8108_v20 = vpop.f32.mrb[119].mxu1  ;;  %v19161_v15 = vpop.f32.mrb[127].mxu0  ;;  %v20512_v62 = vld [vmem:[%s28531_s3 + $0x3e0] ss:$12 sps:$4 sm:$0xff]   ;;  %v25099_v11 = vld [vmem:[%s28531_s3 + $0x3f0] ss:$12 sps:$4 sm:$0xff]  }
 0xae0   :  { %21127 = vtanh.f32 %v8194_v46  ;;  %v8197_v53 = vadd.f32 %v8108_v20, %v7543_v48  ;;  %v25062_v20 = vld [vmem:[%s28531_s3 + $0x3c0] ss:$12 sps:$4 sm:$0xff]   ;;  %v25080_v46 = vld [vmem:[%s28531_s3 + $0x3d8] ss:$12 sps:$4 sm:$0xff]   ;;  %v25115_v27 = vld [vmem:[%s28531_s3 + $0x408] ss:$12 sps:$4 sm:$0xff]  }
 0xae1   :  { %21129 = vtanh.f32 %v8195_v19  ;;  %v8198_v1 = vadd.f32 %v8190_v51, %v7544_v57  ;;  %v20508_v51 = vld [vmem:[%s28531_s3 + $0x3c8] ss:$12 sps:$4 sm:$0xff]   ;;  %v20516_v8 = vld [vmem:[%s28531_s3 + $0x3f8] ss:$12 sps:$4 sm:$0xff]   ;;  %v20520_v48 = vld [vmem:[%s28531_s3 + $0x410] ss:$12 sps:$4 sm:$0xff]  }
 0xae2   :  { %21131 = vtanh.f32 %v8196_v24  ;;  %v25070_v24 = vld [vmem:[%s28531_s3 + $0x3dc] ss:$12 sps:$4 sm:$0xff]   ;;  %v25090_v35 = vld [vmem:[%s28531_s3 + $0x3f4] ss:$12 sps:$4 sm:$0xff]   ;;  %v25109_v57 = vld [vmem:[%s28531_s3 + $0x40c] ss:$12 sps:$4 sm:$0xff]  }
 0xae3   :  { %21133 = vtanh.f32 %v8198_v1  ;;  %v25125_v19 = vld [vmem:[%s28531_s3 + $0x424] ss:$12 sps:$4 sm:$0xff]   ;;  %v25131_v15 = vld [vmem:[%s28531_s3 + $0x420] ss:$12 sps:$4 sm:$0xff]   ;;  %v25141_v1 = vld [vmem:[%s28531_s3 + $0x43c] ss:$12 sps:$4 sm:$0xff]  }
 0xae4   :  { %21135 = vtanh.f32 %v8197_v53  ;;  %v20524_v53 = vld [vmem:[%s28531_s3 + $0x428] ss:$12 sps:$4 sm:$0xff]  }
 0xae9   :  { %v21126_v14 = vpop.eup %21125 }
 0xaea   :  { %v21128_v26 = vpop.eup %21127 }
 0xaeb   :  { %v21130_v5 = vpop.eup %21129 }
 0xaec   :  { %v21132_v17 = vpop.eup %21131 }
 0xaed   :  { %v21134_v55 = vpop.eup %21133  ;;  %v25053_v56 = vpack.c.bf16 %v21132_v17, %v21126_v14  ;;  %v25147_v14 = vld [vmem:[%s28531_s3 + $0x438] ss:$12 sps:$4 sm:$0xff]   ;;  %v25163_v17 = vld [vmem:[%s28531_s3 + $0x450] ss:$12 sps:$4 sm:$0xff]  }
 0xaee   :  { %v21136_v10 = vpop.eup %21135  ;;  %v25055_v45 = vpack.c.bf16 %v21134_v55, %v21130_v5  ;;  %v25157_v5 = vld [vmem:[%s28531_s3 + $0x454] ss:$12 sps:$4 sm:$0xff]   ;;  %v20532_v55 = vld [vmem:[%s28531_s3 + $0x458] ss:$12 sps:$4 sm:$0xff]  }
 0xaef   :  { %v25057_v49 = vpack.c.bf16 %v21136_v10, %v21128_v26  ;;  %v20528_v26 = vld [vmem:[%s28531_s3 + $0x440] ss:$12 sps:$4 sm:$0xff]  }
 0xaf0   :  { %28822 = vst [vmem:[#allocation24_spill] sm:$0xff] %v25055_v45  ;;  %v25173_v10 = vld [vmem:[%s28531_s3 + $0x46c] ss:$12 sps:$4 sm:$0xff]  }
 0xaf1   :  { %8732 = vmatprep.mubr.bf16.mxu0 %v25057_v49  ;;  %8818 = vmatprep.mubr.bf16.mxu1 %v25057_v49 }
 0xaf2   :  { %8733 = vmatmul.mubr.bf16.vlgmr.msra.gmra.mrb[128].mxu0 %v25053_v56  ;;  %8819 = vmatmul.mubr.bf16.vlgmr.msra.gmra.mrb[120].mxu1 %v25053_v56 }
 0xaf3   :  { %8744 = vmatpush1.bf16.msra.mxu0 %v25062_v20  ;;  %19163 = vmatpush3.bf16.msra.mxu1 %v20508_v51  ;;  %v25179_v51 = vld [vmem:[%s28531_s3 + $0x468] ss:$12 sps:$4 sm:$0xff]  }
 0xaf4   :  { %8745 = vmatprep.subr.bf16.mxu0 %v25070_v24  ;;  %19164 = vmatprep.subr.bf16.mxu1 %v28771_v44 }
 0xaf5   :  { %8775 = vmatprep.mubr.bf16.mxu0 %v28772_v18  ;;  %19178 = vmatprep.mubr.msk.bf16.mxu1 %vm21467_vm1, %v28771_v44 }
 0xaf7   :  { %8746 = vmatpush1.bf16.msra.mxu0 %v25080_v46  ;;  %19165 = vmatpush3.bf16.msra.mxu1 %v20512_v62  ;;  %v20536_v62 = vld [vmem:[%s28531_s3 + $0x470] ss:$12 sps:$4 sm:$0xff]  }
 0xaf8   :  { %8747 = vmatprep.subr.bf16.mxu0 %v25090_v35  ;;  %19166 = vmatprep.subr.bf16.mxu1 %v28771_v44 }
 0xafb   :  { %8748 = vmatpush1.bf16.msra.mxu0 %v25099_v11  ;;  %19167 = vmatpush3.bf16.msra.mxu1 %v20516_v8 }
 0xafc   :  { %8749 = vmatprep.subr.bf16.mxu0 %v25109_v57  ;;  %19168 = vmatprep.subr.bf16.mxu1 %v28771_v44 }
 0xaff   :  { %8750 = vmatpush1.bf16.msra.mxu0 %v25115_v27  ;;  %19169 = vmatpush3.bf16.msra.mxu1 %v20520_v48  ;;  %v8219_v48 = vunpack.c.h.bf16 %v24659_v30 }
 0xb00   :  { %8751 = vmatprep.subr.bf16.mxu0 %v25125_v19  ;;  %19170 = vmatprep.subr.bf16.mxu1 %v28771_v44 }
 0xb03   :  { %8752 = vmatpush1.bf16.msra.mxu0 %v25131_v15  ;;  %19171 = vmatpush3.bf16.msra.mxu1 %v20524_v53 }
 0xb04   :  { %8753 = vmatprep.subr.bf16.mxu0 %v25141_v1  ;;  %19172 = vmatprep.subr.bf16.mxu1 %v28771_v44 }
 0xb07   :  { %8754 = vmatpush1.bf16.msra.mxu0 %v25147_v14  ;;  %19173 = vmatpush3.bf16.msra.mxu1 %v20528_v26  ;;  %v8218_v26 = vunpack.c.h.bf16 %v24677_v29 }
 0xb08   :  { %8755 = vmatprep.subr.bf16.mxu0 %v25157_v5  ;;  %19174 = vmatprep.subr.bf16.mxu1 %v28771_v44 }
 0xb0b   :  { %8756 = vmatpush1.bf16.msra.mxu0 %v25163_v17  ;;  %19175 = vmatpush3.bf16.msra.mxu1 %v20532_v55 }
 0xb0c   :  { %8757 = vmatprep.subr.bf16.mxu0 %v25173_v10  ;;  %19176 = vmatprep.subr.bf16.mxu1 %v28771_v44 }
 0xb0f   :  { %8758 = vmatpush1.bf16.msra.mxu0 %v25179_v51  ;;  %19177 = vmatpush3.bf16.msra.mxu1 %v20536_v62 }
 0xb10   :  { %9375 = vmatprep.subr.bf16.mxu1 %v24800_v42  ;;  %v20537_v42 = vld [vmem:[%s28531_s3 + $0x308] ss:$12 sps:$4 sm:$0xff]  }
 0xb11   :  { %18392 = vmatprep.subr.bf16.mxu0 %v20537_v42 }
 0xb12   :  { %8776 = vmatmul.mubr.bf16.vlgmr.msra.gmra.mrb[128].mxu0 %v25055_v45  ;;  %19179 = vmatmul.mubr.bf16.vlgmr.msra.gmra.mrb[124].mxu1 %v25055_v45 }
 0xb13   :  { %9376 = vmatpush1.bf16.msra.mxu1 %v24806_v9  ;;  %v20538_v9 = vld [vmem:[%s28531_s3 + $0x248] ss:$12 sps:$4 sm:$0xff]  }
 0xb14   :  { %9377 = vmatprep.subr.bf16.mxu1 %v24812_v25  ;;  %v20539_v25 = vld [vmem:[%s28531_s3 + $0x320] ss:$12 sps:$4 sm:$0xff]   ;;  %18393 = vmatpush3.bf16.msra.mxu0 %v20538_v9 }
 0xb15   :  { %18394 = vmatprep.subr.bf16.mxu0 %v20539_v25 }
 0xb17   :  { %9378 = vmatpush1.bf16.msra.mxu1 %v24820_v63  ;;  %v20540_v63 = vld [vmem:[%s28531_s3 + $0x260] ss:$12 sps:$4 sm:$0xff]  }
 0xb18   :  { %9379 = vmatprep.subr.bf16.mxu1 %v24826_v47  ;;  %v20541_v47 = vld [vmem:[%s28531_s3 + $0x338] ss:$12 sps:$4 sm:$0xff]   ;;  %18395 = vmatpush3.bf16.msra.mxu0 %v20540_v63 }
 0xb19   :  { %18396 = vmatprep.subr.bf16.mxu0 %v20541_v47 }
 0xb1b   :  { %9380 = vmatpush1.bf16.msra.mxu1 %v24832_v40  ;;  %v20542_v40 = vld [vmem:[%s28531_s3 + $0x278] ss:$12 sps:$4 sm:$0xff]  }
 0xb1c   :  { %9381 = vmatprep.subr.bf16.mxu1 %v24838_v34  ;;  %v20543_v34 = vld [vmem:[%s28531_s3 + $0x350] ss:$12 sps:$4 sm:$0xff]   ;;  %18397 = vmatpush3.bf16.msra.mxu0 %v20542_v40 }
 0xb1d   :  { %18398 = vmatprep.subr.bf16.mxu0 %v20543_v34 }
 0xb1f   :  { %9382 = vmatpush1.bf16.msra.mxu1 %v24844_v23  ;;  %v20544_v23 = vld [vmem:[%s28531_s3 + $0x290] ss:$12 sps:$4 sm:$0xff]  }
 0xb20   :  { %9383 = vmatprep.subr.bf16.mxu1 %v24851_v12  ;;  %18399 = vmatpush3.bf16.msra.mxu0 %v20544_v23  ;;  %v20545_v12 = vld [vmem:[%s28531_s3 + $0x368] ss:$12 sps:$4 sm:$0xff]  }
 0xb21   :  { %18400 = vmatprep.subr.bf16.mxu0 %v20545_v12 }
 0xb23   :  { %9384 = vmatpush1.bf16.msra.mxu1 %v24856_v37  ;;  %v20547_v37 = vld [vmem:[%s28531_s3 + $0x380] ss:$12 sps:$4 sm:$0xff]  }
 0xb24   :  { %9385 = vmatprep.subr.bf16.mxu1 %v24868_v59  ;;  %v20549_v59 = vld [vmem:[%s28531_s3 + $0x398] ss:$12 sps:$4 sm:$0xff]  }
 0xb27   :  { %9386 = vmatpush1.bf16.msra.mxu1 %v24863_v6  ;;  %v20548_v6 = vld [vmem:[%s28531_s3 + $0x2c0] ss:$12 sps:$4 sm:$0xff]  }
 0xb28   :  { %9387 = vmatprep.subr.bf16.mxu1 %v24873_v33  ;;  %v20550_v33 = vld [vmem:[%s28531_s3 + $0x2d8] ss:$12 sps:$4 sm:$0xff]  }
 0xb2b   :  { %9388 = vmatpush1.bf16.msra.mxu1 %v24886_v2  ;;  %v20551_v2 = vld [vmem:[%s28531_s3 + $0x3b0] ss:$12 sps:$4 sm:$0xff]  }
 0xb2c   :  { %9389 = vmatprep.subr.bf16.mxu1 %v24895_v32  ;;  %v20552_v32 = vld [vmem:[%s28531_s3 + $0x2f0] ss:$12 sps:$4 sm:$0xff]  }
 0xb2f   :  { %9390 = vmatpush1.bf16.msra.mxu1 %v24907_v54 }
 0xb30   :  { %9391 = vmatprep.subr.bf16.mxu1 %v24913_v4 }
 0xb33   :  { %9392 = vmatpush1.bf16.msra.mxu1 %v24925_v16 }
 0xb34   :  { %9393 = vmatprep.subr.bf16.mxu1 %v24931_v3 }
 0xb37   :  { %9394 = vmatpush1.bf16.msra.mxu1 %v24937_v61 }
 0xb38   :  { %9395 = vmatprep.subr.bf16.mxu1 %v24943_v50 }
 0xb3b   :  { %9396 = vmatpush1.bf16.msra.mxu1 %v24949_v7  ;;  %v8214_v7 = vunpack.c.l.bf16 %v24673_v0 }
 0xb3c   :  { %9397 = vmatprep.subr.bf16.mxu1 %v24955_v21 }
 0xb3f   :  { %9398 = vmatpush1.bf16.msra.mxu1 %v24961_v41 }
 0xb40   :  { %9399 = vmatprep.subr.bf16.mxu1 %v24971_v52  ;;  %v8215_v52 = vunpack.c.l.bf16 %v24677_v29 }
 0xb43   :  { %9400 = vmatpush1.bf16.msra.mxu1 %v24979_v31 }
 0xb44   :  { %9401 = vmatprep.subr.bf16.mxu1 %v24989_v13  ;;  %v8216_v13 = vunpack.c.l.bf16 %v24659_v30 }
 0xb47   :  { %9402 = vmatpush1.bf16.msra.mxu1 %v24997_v38 }
 0xb48   :  { %9403 = vmatprep.subr.bf16.mxu1 %v25006_v60 }
 0xb4b   :  { %9404 = vmatpush1.bf16.msra.mxu1 %v25015_v39 }
 0xb4c   :  { %9405 = vmatprep.subr.bf16.mxu1 %v25024_v43  ;;  %v8217_v43 = vunpack.c.h.bf16 %v24673_v0 }
 0xb4f   :  { %9406 = vmatpush1.bf16.msra.mxu1 %v25033_v22 }
 0xb50   :  { %9418 = vmatprep.subr.bf16.mxu1 %v25043_v58  ;;  %v20546_v58 = vld [vmem:[%s28531_s3 + $0x2a8] ss:$12 sps:$4 sm:$0xff]  }
 0xb51   :  { %18401 = vmatpush3.bf16.msra.mxu0 %v20546_v58 }
 0xb52   :  { %18402 = vmatprep.subr.bf16.mxu0 %v20547_v37 }
 0xb55   :  { %18403 = vmatpush3.bf16.msra.mxu0 %v20548_v6  ;;  %v20553_v6 = vld [vmem:[%s28531_s3 + $0x3c8] ss:$12 sps:$4 sm:$0xff]  }
 0xb56   :  { %18404 = vmatprep.subr.bf16.mxu0 %v20549_v59  ;;  %v20554_v59 = vld [vmem:[%s28531_s3 + $0x3e0] ss:$12 sps:$4 sm:$0xff]  }
 0xb59   :  { %18405 = vmatpush3.bf16.msra.mxu0 %v20550_v33  ;;  %v25394_v33 = vld [vmem:[%s28531_s3 + $0x2a0] ss:$12 sps:$4 sm:$0xff]  }
 0xb5a   :  { %18406 = vmatprep.subr.bf16.mxu0 %v20551_v2  ;;  %v25401_v2 = vld [vmem:[%s28531_s3 + $0x2b8] ss:$12 sps:$4 sm:$0xff]  }
 0xb5d   :  { %18407 = vmatpush3.bf16.msra.mxu0 %v20552_v32  ;;  %v25406_v32 = vld [vmem:[%s28531_s3 + $0x2bc] ss:$12 sps:$4 sm:$0xff]  }
 0xb5e   :  { %19182 = vmatprep.subr.bf16.mxu0 %v28771_v44 }
 0xbc5   :  { %v18377_v54 = vpop.f32.mrb[120].mxu1 }
 0xbc6   :  { %v18378_v4 = vpop.f32.mrb[121].mxu1 }
 0xbc7   :  { %v18379_v16 = vadd.f32 %v18378_v4, %v18377_v54  ;;  %v18380_v3 = vpop.f32.mrb[122].mxu1  ;;  %v25411_v54 = vld [vmem:[%s28531_s3 + $0x2d4] ss:$12 sps:$4 sm:$0xff]  }
 0xbc8   :  { %v18381_v61 = vpop.f32.mrb[123].mxu1  ;;  %v20588_v4 = vld [vmem:[%s28531_s3 + $0x308] ss:$12 sps:$4 sm:$0xff]  }
 0xbc9   :  { %v18382_v50 = vadd.f32 %v18381_v61, %v18380_v3  ;;  %v25424_v3 = vld [vmem:[%s28531_s3 + $0x2d0] ss:$12 sps:$4 sm:$0xff]   ;;  %v20593_v61 = vld [vmem:[%s28531_s3 + $0x320] ss:$12 sps:$4 sm:$0xff]  }
 0xbe5   :  { %v8777_v21 = vpop.f32.mrb[128].mxu0  ;;  %v8861_v41 = vpop.f32.mrb[124].mxu1 }
 0xbe6   :  { %v8868_v31 = vadd.f32 %v8777_v21, %v8214_v7  ;;  %v8862_v38 = vadd.f32 %v18379_v16, %v8861_v41  ;;  %v8779_v60 = vpop.f32.mrb[129].mxu0  ;;  %v19180_v39 = vpop.f32.mrb[125].mxu1  ;;  %v20589_v16 = vld [vmem:[%s28531_s3 + $0x248] ss:$12 sps:$4 sm:$0xff]   ;;  %v20594_v7 = vld [vmem:[%s28531_s3 + $0x260] ss:$12 sps:$4 sm:$0xff]  }
 0xbe7   :  { %v8869_v22 = vadd.f32 %v8779_v60, %v8215_v52  ;;  %v8781_v8 = vpop.f32.mrb[130].mxu0  ;;  %v8864_v53 = vpop.f32.mrb[126].mxu1  ;;  %v20598_v21 = vld [vmem:[%s28531_s3 + $0x338] ss:$12 sps:$4 sm:$0xff]   ;;  %v25445_v41 = vld [vmem:[%s28531_s3 + $0x2e8] ss:$12 sps:$4 sm:$0xff]  }
 0xbe8   :  { %21137 = vtanh.f32 %v8868_v31  ;;  %v8870_v55 = vadd.f32 %v8862_v38, %v8216_v13  ;;  %v8871_v62 = vadd.f32 %v8781_v8, %v8217_v43  ;;  %v8865_v42 = vadd.f32 %v18382_v50, %v8864_v53  ;;  %v8783_v9 = vpop.f32.mrb[131].mxu0  ;;  %v19181_v25 = vpop.f32.mrb[127].mxu1  ;;  %v25433_v50 = vld [vmem:[%s28531_s3 + $0x2ec] ss:$12 sps:$4 sm:$0xff]   ;;  %v25451_v52 = vld [vmem:[%s28531_s3 + $0x304] ss:$12 sps:$4 sm:$0xff]  }
 0xbe9   :  { %21139 = vtanh.f32 %v8869_v22  ;;  %v8872_v63 = vadd.f32 %v8783_v9, %v8218_v26  ;;  %v20599_v31 = vld [vmem:[%s28531_s3 + $0x278] ss:$12 sps:$4 sm:$0xff]   ;;  %v20603_v13 = vld [vmem:[%s28531_s3 + $0x350] ss:$12 sps:$4 sm:$0xff]   ;;  %v25463_v38 = vld [vmem:[%s28531_s3 + $0x300] ss:$12 sps:$4 sm:$0xff]  }
 0xbea   :  { %21141 = vtanh.f32 %v8870_v55  ;;  %v8873_v47 = vadd.f32 %v8865_v42, %v8219_v48  ;;  %v25469_v60 = vld [vmem:[%s28531_s3 + $0x31c] ss:$12 sps:$4 sm:$0xff]   ;;  %v25475_v39 = vld [vmem:[%s28531_s3 + $0x318] ss:$12 sps:$4 sm:$0xff]   ;;  %v25481_v43 = vld [vmem:[%s28531_s3 + $0x334] ss:$12 sps:$4 sm:$0xff]  }
 0xbeb   :  { %21143 = vtanh.f32 %v8871_v62  ;;  %v25487_v22 = vld [vmem:[%s28531_s3 + $0x330] ss:$12 sps:$4 sm:$0xff]   ;;  %v25493_v8 = vld [vmem:[%s28531_s3 + $0x34c] ss:$12 sps:$4 sm:$0xff]   ;;  %v25499_v48 = vld [vmem:[%s28531_s3 + $0x348] ss:$12 sps:$4 sm:$0xff]  }
 0xbec   :  { %21145 = vtanh.f32 %v8873_v47  ;;  %v20604_v53 = vld [vmem:[%s28531_s3 + $0x290] ss:$12 sps:$4 sm:$0xff]   ;;  %v20608_v55 = vld [vmem:[%s28531_s3 + $0x368] ss:$12 sps:$4 sm:$0xff]   ;;  %v25517_v62 = vld [vmem:[%s28531_s3 + $0x360] ss:$12 sps:$4 sm:$0xff]  }
 0xbed   :  { %21147 = vtanh.f32 %v8872_v63  ;;  %v25509_v26 = vld [vmem:[%s28531_s3 + $0x364] ss:$12 sps:$4 sm:$0xff]   ;;  %v20609_v42 = vld [vmem:[%s28531_s3 + $0x2a8] ss:$12 sps:$4 sm:$0xff]   ;;  %v20613_v25 = vld [vmem:[%s28531_s3 + $0x380] ss:$12 sps:$4 sm:$0xff]  }
 0xbee   :  { %v25527_v9 = vld [vmem:[%s28531_s3 + $0x37c] ss:$12 sps:$4 sm:$0xff]   ;;  %v25535_v63 = vld [vmem:[%s28531_s3 + $0x378] ss:$12 sps:$4 sm:$0xff]   ;;  %v20614_v47 = vld [vmem:[%s28531_s3 + $0x2c0] ss:$12 sps:$4 sm:$0xff]  }
 0xbf2   :  { %v21138_v0 = vpop.eup %21137 }
 0xbf3   :  { %v21140_v40 = vpop.eup %21139 }
 0xbf4   :  { %v21142_v34 = vpop.eup %21141 }
 0xbf5   :  { %v21144_v30 = vpop.eup %21143 }
 0xbf6   :  { %v21146_v23 = vpop.eup %21145  ;;  %v25277_v12 = vpack.c.bf16 %v21144_v30, %v21138_v0  ;;  %v25544_v0 = vld [vmem:[%s28531_s3 + $0x394] ss:$12 sps:$4 sm:$0xff]   ;;  %v20619_v30 = vld [vmem:[%s28531_s3 + $0x2d8] ss:$12 sps:$4 sm:$0xff]  }
 0xbf7   :  { %v21148_v29 = vpop.eup %21147  ;;  %v25279_v58 = vpack.c.bf16 %v21146_v23, %v21142_v34  ;;  %v25553_v34 = vld [vmem:[%s28531_s3 + $0x390] ss:$12 sps:$4 sm:$0xff]   ;;  %v25562_v23 = vld [vmem:[%s28531_s3 + $0x3ac] ss:$12 sps:$4 sm:$0xff]  }
 0xbf8   :  { %v25281_v37 = vpack.c.bf16 %v21148_v29, %v21140_v40  ;;  %v20618_v40 = vld [vmem:[%s28531_s3 + $0x398] ss:$12 sps:$4 sm:$0xff]   ;;  %v20623_v29 = vld [vmem:[%s28531_s3 + $0x3b0] ss:$12 sps:$4 sm:$0xff]  }
 0xbf9   :  { %28823 = vst [vmem:[#allocation11_spill] sm:$0xff] %v25279_v58 }
 0xbfa   :  { %9407 = vmatprep.mubr.bf16.mxu1 %v25281_v37  ;;  %9493 = vmatprep.mubr.bf16.mxu0 %v25281_v37 }
 0xbfb   :  { %9408 = vmatmul.mubr.bf16.vlgmr.msra.gmra.mrb[128].mxu1 %v25277_v12  ;;  %9494 = vmatmul.mubr.bf16.vlgmr.msra.gmra.mrb[132].mxu0 %v25277_v12 }
 0xbfc   :  { %9419 = vmatpush1.bf16.msra.mxu1 %v25062_v20  ;;  %19183 = vmatpush3.bf16.msra.mxu0 %v20553_v6  ;;  %v20555_v20 = vld [vmem:[%s28531_s3 + $0x3f8] ss:$12 sps:$4 sm:$0xff]   ;;  %v25571_v6 = vld [vmem:[%s28531_s3 + $0x3a8] ss:$12 sps:$4 sm:$0xff]  }
 0xbfd   :  { %9420 = vmatprep.subr.bf16.mxu1 %v25070_v24  ;;  %19184 = vmatprep.subr.bf16.mxu0 %v28771_v44  ;;  %v20556_v24 = vld [vmem:[%s28531_s3 + $0x410] ss:$12 sps:$4 sm:$0xff]  }
 0xbfe   :  { %9450 = vmatprep.mubr.bf16.mxu1 %v28772_v18  ;;  %19198 = vmatprep.mubr.msk.bf16.mxu0 %vm21467_vm1, %v28771_v44 }
 0xc00   :  { %9421 = vmatpush1.bf16.msra.mxu1 %v25080_v46  ;;  %19185 = vmatpush3.bf16.msra.mxu0 %v20554_v59  ;;  %v20557_v46 = vld [vmem:[%s28531_s3 + $0x428] ss:$12 sps:$4 sm:$0xff]   ;;  %v20624_v59 = vld [vmem:[%s28531_s3 + $0x2f0] ss:$12 sps:$4 sm:$0xff]  }
 0xc01   :  { %9422 = vmatprep.subr.bf16.mxu1 %v25090_v35  ;;  %19186 = vmatprep.subr.bf16.mxu0 %v28771_v44  ;;  %v20558_v35 = vld [vmem:[%s28531_s3 + $0x440] ss:$12 sps:$4 sm:$0xff]  }
 0xc04   :  { %9423 = vmatpush1.bf16.msra.mxu1 %v25099_v11  ;;  %19187 = vmatpush3.bf16.msra.mxu0 %v20555_v20  ;;  %v20559_v11 = vld [vmem:[%s28531_s3 + $0x458] ss:$12 sps:$4 sm:$0xff]  }
 0xc05   :  { %9424 = vmatprep.subr.bf16.mxu1 %v25109_v57  ;;  %19188 = vmatprep.subr.bf16.mxu0 %v28771_v44  ;;  %v20560_v57 = vld [vmem:[%s28531_s3 + $0x470] ss:$12 sps:$4 sm:$0xff]  }
 0xc06   :  { %v25581_v20 = vld [vmem:[%s28531_s3 + $0x3c4] ss:$12 sps:$4 sm:$0xff]  }
 0xc08   :  { %9425 = vmatpush1.bf16.msra.mxu1 %v25115_v27  ;;  %19189 = vmatpush3.bf16.msra.mxu0 %v20556_v24  ;;  %v25338_v27 = vld [vmem:[%s28531_s3 + $0x244] ss:$12 sps:$4 sm:$0xff]  }
 0xc09   :  { %9426 = vmatprep.subr.bf16.mxu1 %v25125_v19  ;;  %19190 = vmatprep.subr.bf16.mxu0 %v28771_v44  ;;  %v25344_v19 = vld [vmem:[%s28531_s3 + $0x240] ss:$12 sps:$4 sm:$0xff]  }
 0xc0c   :  { %9427 = vmatpush1.bf16.msra.mxu1 %v25131_v15  ;;  %19191 = vmatpush3.bf16.msra.mxu0 %v20557_v46  ;;  %v25350_v15 = vld [vmem:[%s28531_s3 + $0x25c] ss:$12 sps:$4 sm:$0xff]  }
 0xc0d   :  { %9428 = vmatprep.subr.bf16.mxu1 %v25141_v1  ;;  %19192 = vmatprep.subr.bf16.mxu0 %v28771_v44  ;;  %v25358_v1 = vld [vmem:[%s28531_s3 + $0x258] ss:$12 sps:$4 sm:$0xff]  }
 0xc10   :  { %9429 = vmatpush1.bf16.msra.mxu1 %v25147_v14  ;;  %19193 = vmatpush3.bf16.msra.mxu0 %v20558_v35  ;;  %v25364_v14 = vld [vmem:[%s28531_s3 + $0x274] ss:$12 sps:$4 sm:$0xff]  }
 0xc11   :  { %9430 = vmatprep.subr.bf16.mxu1 %v25157_v5  ;;  %19194 = vmatprep.subr.bf16.mxu0 %v28771_v44  ;;  %v25370_v5 = vld [vmem:[%s28531_s3 + $0x270] ss:$12 sps:$4 sm:$0xff]  }
 0xc14   :  { %9431 = vmatpush1.bf16.msra.mxu1 %v25163_v17  ;;  %19195 = vmatpush3.bf16.msra.mxu0 %v20559_v11  ;;  %v25376_v17 = vld [vmem:[%s28531_s3 + $0x28c] ss:$12 sps:$4 sm:$0xff]  }
 0xc15   :  { %9432 = vmatprep.subr.bf16.mxu1 %v25173_v10  ;;  %19196 = vmatprep.subr.bf16.mxu0 %v28771_v44  ;;  %v25382_v10 = vld [vmem:[%s28531_s3 + $0x288] ss:$12 sps:$4 sm:$0xff]  }
 0xc18   :  { %9433 = vmatpush1.bf16.msra.mxu1 %v25179_v51  ;;  %19197 = vmatpush3.bf16.msra.mxu0 %v20560_v57  ;;  %v25389_v51 = vld [vmem:[%s28531_s3 + $0x2a4] ss:$12 sps:$4 sm:$0xff]  }
 0xc19   :  { %10050 = vmatprep.subr.bf16.mxu0 %v25338_v27  ;;  %18423 = vmatprep.subr.bf16.mxu1 %v20588_v4 }
 0xc1b   :  { %9451 = vmatmul.mubr.bf16.vlgmr.msra.gmra.mrb[128].mxu1 %v25279_v58  ;;  %19199 = vmatmul.mubr.bf16.vlgmr.msra.gmra.mrb[136].mxu0 %v25279_v58 }
 0xc1c   :  { %10051 = vmatpush1.bf16.msra.mxu0 %v25344_v19  ;;  %18424 = vmatpush3.bf16.msra.mxu1 %v20589_v16  ;;  %v8889_v16 = vunpack.c.l.bf16 %v24693_v28 }
 0xc1d   :  { %10052 = vmatprep.subr.bf16.mxu0 %v25350_v15  ;;  %18425 = vmatprep.subr.bf16.mxu1 %v20593_v61 }
 0xc20   :  { %10053 = vmatpush1.bf16.msra.mxu0 %v25358_v1  ;;  %18426 = vmatpush3.bf16.msra.mxu1 %v20594_v7 }
 0xc21   :  { %10054 = vmatprep.subr.bf16.mxu0 %v25364_v14  ;;  %18427 = vmatprep.subr.bf16.mxu1 %v20598_v21  ;;  %v8890_v21 = vunpack.c.l.bf16 %v24697_v36 }
 0xc24   :  { %10055 = vmatpush1.bf16.msra.mxu0 %v25370_v5  ;;  %18428 = vmatpush3.bf16.msra.mxu1 %v20599_v31 }
 0xc25   :  { %10056 = vmatprep.subr.bf16.mxu0 %v25376_v17  ;;  %18429 = vmatprep.subr.bf16.mxu1 %v20603_v13  ;;  %v28824_v13 = vld [vmem:[#allocation7_spill] sm:$0xff] }
 0xc28   :  { %10057 = vmatpush1.bf16.msra.mxu0 %v25382_v10  ;;  %18430 = vmatpush3.bf16.msra.mxu1 %v20604_v53  ;;  %v8891_v53 = vunpack.c.l.bf16 %v28824_v13 }
 0xc29   :  { %10058 = vmatprep.subr.bf16.mxu0 %v25389_v51  ;;  %18431 = vmatprep.subr.bf16.mxu1 %v20608_v55 }
 0xc2c   :  { %10059 = vmatpush1.bf16.msra.mxu0 %v25394_v33  ;;  %18432 = vmatpush3.bf16.msra.mxu1 %v20609_v42 }
 0xc2d   :  { %10060 = vmatprep.subr.bf16.mxu0 %v25406_v32  ;;  %18433 = vmatprep.subr.bf16.mxu1 %v20613_v25 }
 0xc30   :  { %10061 = vmatpush1.bf16.msra.mxu0 %v25401_v2  ;;  %18434 = vmatpush3.bf16.msra.mxu1 %v20614_v47  ;;  %v8892_v47 = vunpack.c.h.bf16 %v24693_v28 }
 0xc31   :  { %10062 = vmatprep.subr.bf16.mxu0 %v25411_v54  ;;  %18435 = vmatprep.subr.bf16.mxu1 %v20618_v40 }
 0xc34   :  { %10063 = vmatpush1.bf16.msra.mxu0 %v25424_v3  ;;  %18436 = vmatpush3.bf16.msra.mxu1 %v20619_v30 }
 0xc35   :  { %10064 = vmatprep.subr.bf16.mxu0 %v25433_v50  ;;  %18437 = vmatprep.subr.bf16.mxu1 %v20623_v29  ;;  %v8894_v29 = vunpack.c.h.bf16 %v28824_v13 }
 0xc38   :  { %10065 = vmatpush1.bf16.msra.mxu0 %v25445_v41  ;;  %18438 = vmatpush3.bf16.msra.mxu1 %v20624_v59 }
 0xc39   :  { %10066 = vmatprep.subr.bf16.mxu0 %v25451_v52  ;;  %19202 = vmatprep.subr.bf16.mxu1 %v28771_v44 }
 0xc3c   :  { %10067 = vmatpush1.bf16.msra.mxu0 %v25463_v38 }
 0xc3d   :  { %10068 = vmatprep.subr.bf16.mxu0 %v25469_v60 }
 0xc40   :  { %10069 = vmatpush1.bf16.msra.mxu0 %v25475_v39 }
 0xc41   :  { %10070 = vmatprep.subr.bf16.mxu0 %v25481_v43 }
 0xc44   :  { %10071 = vmatpush1.bf16.msra.mxu0 %v25487_v22 }
 0xc45   :  { %10072 = vmatprep.subr.bf16.mxu0 %v25493_v8 }
 0xc48   :  { %10073 = vmatpush1.bf16.msra.mxu0 %v25499_v48 }
 0xc49   :  { %10074 = vmatprep.subr.bf16.mxu0 %v25509_v26 }
 0xc4c   :  { %10075 = vmatpush1.bf16.msra.mxu0 %v25517_v62 }
 0xc4d   :  { %10076 = vmatprep.subr.bf16.mxu0 %v25527_v9 }
 0xc50   :  { %10077 = vmatpush1.bf16.msra.mxu0 %v25535_v63 }
 0xc51   :  { %10078 = vmatprep.subr.bf16.mxu0 %v25544_v0 }
 0xc54   :  { %10079 = vmatpush1.bf16.msra.mxu0 %v25553_v34 }
 0xc55   :  { %10080 = vmatprep.subr.bf16.mxu0 %v25562_v23 }
 0xc58   :  { %10081 = vmatpush1.bf16.msra.mxu0 %v25571_v6 }
 0xc59   :  { %10093 = vmatprep.subr.bf16.mxu0 %v25581_v20 }
 0xcce   :  { %v18408_v24 = vpop.f32.mrb[132].mxu0 }
 0xccf   :  { %v18409_v46 = vpop.f32.mrb[133].mxu0 }
 0xcd0   :  { %v18410_v35 = vadd.f32 %v18409_v46, %v18408_v24  ;;  %v18411_v11 = vpop.f32.mrb[134].mxu0  ;;  %v8893_v24 = vunpack.c.h.bf16 %v24697_v36 }
 0xcd1   :  { %v18412_v57 = vpop.f32.mrb[135].mxu0 }
 0xcd2   :  { %v18413_v4 = vadd.f32 %v18412_v57, %v18411_v11 }
 0xcee   :  { %v9452_v61 = vpop.f32.mrb[128].mxu1  ;;  %v9536_v7 = vpop.f32.mrb[136].mxu0 }
 0xcef   :  { %v9543_v31 = vadd.f32 %v9452_v61, %v8889_v16  ;;  %v9537_v55 = vadd.f32 %v18410_v35, %v9536_v7  ;;  %v9454_v42 = vpop.f32.mrb[129].mxu1  ;;  %v19200_v25 = vpop.f32.mrb[137].mxu0 }
 0xcf0   :  { %v9544_v40 = vadd.f32 %v9454_v42, %v8890_v21  ;;  %v9456_v30 = vpop.f32.mrb[130].mxu1  ;;  %v9539_v59 = vpop.f32.mrb[138].mxu0 }
 0xcf1   :  { %21149 = vtanh.f32 %v9543_v31  ;;  %v9545_v46 = vadd.f32 %v9537_v55, %v8891_v53  ;;  %v9546_v11 = vadd.f32 %v9456_v30, %v8892_v47  ;;  %v9540_v57 = vadd.f32 %v18413_v4, %v9539_v59  ;;  %v9458_v58 = vpop.f32.mrb[131].mxu1  ;;  %v19201_v16 = vpop.f32.mrb[139].mxu0  ;;  %v20628_v53 = vld [vmem:[%s28531_s3 + $0x3c8] ss:$12 sps:$4 sm:$0xff]   ;;  %v25618_v47 = vld [vmem:[%s28531_s3 + $0x3d8] ss:$12 sps:$4 sm:$0xff]  }
 0xcf2   :  { %21151 = vtanh.f32 %v9544_v40  ;;  %v9547_v61 = vadd.f32 %v9458_v58, %v8893_v24  ;;  %v25600_v58 = vld [vmem:[%s28531_s3 + $0x3c0] ss:$12 sps:$4 sm:$0xff]   ;;  %v25608_v55 = vld [vmem:[%s28531_s3 + $0x3dc] ss:$12 sps:$4 sm:$0xff]   ;;  %v20636_v59 = vld [vmem:[%s28531_s3 + $0x3f8] ss:$12 sps:$4 sm:$0xff]  }
 0xcf3   :  { %21153 = vtanh.f32 %v9545_v46  ;;  %v9548_v35 = vadd.f32 %v9540_v57, %v8894_v29  ;;  %v20632_v40 = vld [vmem:[%s28531_s3 + $0x3e0] ss:$12 sps:$4 sm:$0xff]   ;;  %v25637_v29 = vld [vmem:[%s28531_s3 + $0x3f0] ss:$12 sps:$4 sm:$0xff]   ;;  %v25653_v46 = vld [vmem:[%s28531_s3 + $0x408] ss:$12 sps:$4 sm:$0xff]  }
 0xcf4   :  { %21155 = vtanh.f32 %v9546_v11  ;;  %v25628_v30 = vld [vmem:[%s28531_s3 + $0x3f4] ss:$12 sps:$4 sm:$0xff]   ;;  %v25647_v24 = vld [vmem:[%s28531_s3 + $0x40c] ss:$12 sps:$4 sm:$0xff]   ;;  %v20640_v11 = vld [vmem:[%s28531_s3 + $0x410] ss:$12 sps:$4 sm:$0xff]  }
 0xcf5   :  { %21157 = vtanh.f32 %v9548_v35  ;;  %v25663_v57 = vld [vmem:[%s28531_s3 + $0x424] ss:$12 sps:$4 sm:$0xff]   ;;  %v25669_v16 = vld [vmem:[%s28531_s3 + $0x420] ss:$12 sps:$4 sm:$0xff]   ;;  %v25679_v35 = vld [vmem:[%s28531_s3 + $0x43c] ss:$12 sps:$4 sm:$0xff]  }
 0xcf6   :  { %21159 = vtanh.f32 %v9547_v61  ;;  %v20644_v61 = vld [vmem:[%s28531_s3 + $0x428] ss:$12 sps:$4 sm:$0xff]  }
 0xcfb   :  { %v21150_v28 = vpop.eup %21149 }
 0xcfc   :  { %v21152_v7 = vpop.eup %21151 }
 0xcfd   :  { %v21154_v21 = vpop.eup %21153 }
 0xcfe   :  { %v21156_v13 = vpop.eup %21155 }
 0xcff   :  { %v21158_v42 = vpop.eup %21157  ;;  %v25591_v25 = vpack.c.bf16 %v21156_v13, %v21150_v28  ;;  %v25685_v28 = vld [vmem:[%s28531_s3 + $0x438] ss:$12 sps:$4 sm:$0xff]   ;;  %v25701_v13 = vld [vmem:[%s28531_s3 + $0x450] ss:$12 sps:$4 sm:$0xff]  }
 0xd00   :  { %v21160_v36 = vpop.eup %21159  ;;  %v25593_v31 = vpack.c.bf16 %v21158_v42, %v21154_v21  ;;  %v25695_v21 = vld [vmem:[%s28531_s3 + $0x454] ss:$12 sps:$4 sm:$0xff]   ;;  %v20652_v42 = vld [vmem:[%s28531_s3 + $0x458] ss:$12 sps:$4 sm:$0xff]  }
 0xd01   :  { %28825 = vst [vmem:[#allocation12_spill] sm:$0xff] %v25591_v25  ;;  %v25595_v4 = vpack.c.bf16 %v21160_v36, %v21152_v7  ;;  %v20648_v7 = vld [vmem:[%s28531_s3 + $0x440] ss:$12 sps:$4 sm:$0xff]  }
 0xd02   :  { %28826 = vst [vmem:[#allocation7_spill] sm:$0xff] %v25593_v31  ;;  %v25711_v36 = vld [vmem:[%s28531_s3 + $0x46c] ss:$12 sps:$4 sm:$0xff]  }
 0xd03   :  { %10082 = vmatprep.mubr.bf16.mxu0 %v25595_v4  ;;  %10168 = vmatprep.mubr.bf16.mxu1 %v25595_v4 }
 0xd04   :  { %10083 = vmatmul.mubr.bf16.vlgmr.msra.gmra.mrb[140].mxu0 %v25591_v25  ;;  %10169 = vmatmul.mubr.bf16.vlgmr.msra.gmra.mrb[132].mxu1 %v25591_v25 }
 0xd05   :  { %10094 = vmatpush1.bf16.msra.mxu0 %v25600_v58  ;;  %19203 = vmatpush3.bf16.msra.mxu1 %v20628_v53  ;;  %v25717_v53 = vld [vmem:[%s28531_s3 + $0x468] ss:$12 sps:$4 sm:$0xff]  }
 0xd06   :  { %10095 = vmatprep.subr.bf16.mxu0 %v25608_v55  ;;  %19204 = vmatprep.subr.bf16.mxu1 %v28771_v44 }
 0xd07   :  { %10125 = vmatprep.mubr.bf16.mxu0 %v28772_v18  ;;  %19218 = vmatprep.mubr.msk.bf16.mxu1 %vm21467_vm1, %v28771_v44 }
 0xd09   :  { %10096 = vmatpush1.bf16.msra.mxu0 %v25618_v47  ;;  %19205 = vmatpush3.bf16.msra.mxu1 %v20632_v40  ;;  %v20656_v40 = vld [vmem:[%s28531_s3 + $0x470] ss:$12 sps:$4 sm:$0xff]  }
 0xd0a   :  { %10097 = vmatprep.subr.bf16.mxu0 %v25628_v30  ;;  %19206 = vmatprep.subr.bf16.mxu1 %v28771_v44 }
 0xd0d   :  { %10098 = vmatpush1.bf16.msra.mxu0 %v25637_v29  ;;  %19207 = vmatpush3.bf16.msra.mxu1 %v20636_v59 }
 0xd0e   :  { %10099 = vmatprep.subr.bf16.mxu0 %v25647_v24  ;;  %19208 = vmatprep.subr.bf16.mxu1 %v28771_v44 }
 0xd11   :  { %10100 = vmatpush1.bf16.msra.mxu0 %v25653_v46  ;;  %19209 = vmatpush3.bf16.msra.mxu1 %v20640_v11 }
 0xd12   :  { %10101 = vmatprep.subr.bf16.mxu0 %v25663_v57  ;;  %19210 = vmatprep.subr.bf16.mxu1 %v28771_v44 }
 0xd15   :  { %10102 = vmatpush1.bf16.msra.mxu0 %v25669_v16  ;;  %19211 = vmatpush3.bf16.msra.mxu1 %v20644_v61 }
 0xd16   :  { %10103 = vmatprep.subr.bf16.mxu0 %v25679_v35  ;;  %19212 = vmatprep.subr.bf16.mxu1 %v28771_v44 }
 0xd19   :  { %10104 = vmatpush1.bf16.msra.mxu0 %v25685_v28  ;;  %19213 = vmatpush3.bf16.msra.mxu1 %v20648_v7 }
 0xd1a   :  { %10105 = vmatprep.subr.bf16.mxu0 %v25695_v21  ;;  %19214 = vmatprep.subr.bf16.mxu1 %v28771_v44 }
 0xd1d   :  { %10106 = vmatpush1.bf16.msra.mxu0 %v25701_v13  ;;  %19215 = vmatpush3.bf16.msra.mxu1 %v20652_v42 }
 0xd1e   :  { %10107 = vmatprep.subr.bf16.mxu0 %v25711_v36  ;;  %19216 = vmatprep.subr.bf16.mxu1 %v28771_v44 }
 0xd21   :  { %10108 = vmatpush1.bf16.msra.mxu0 %v25717_v53  ;;  %19217 = vmatpush3.bf16.msra.mxu1 %v20656_v40 }
 0xd22   :  { %10725 = vmatprep.subr.bf16.mxu1 %v25338_v27  ;;  %v20657_v27 = vld [vmem:[%s28531_s3 + $0x308] ss:$12 sps:$4 sm:$0xff]  }
 0xd23   :  { %18454 = vmatprep.subr.bf16.mxu0 %v20657_v27 }
 0xd24   :  { %10126 = vmatmul.mubr.bf16.vlgmr.msra.gmra.mrb[140].mxu0 %v25593_v31  ;;  %19219 = vmatmul.mubr.bf16.vlgmr.msra.gmra.mrb[136].mxu1 %v25593_v31 }
 0xd25   :  { %10726 = vmatpush1.bf16.msra.mxu1 %v25344_v19  ;;  %v20658_v19 = vld [vmem:[%s28531_s3 + $0x248] ss:$12 sps:$4 sm:$0xff]  }
 0xd26   :  { %10727 = vmatprep.subr.bf16.mxu1 %v25350_v15  ;;  %v20659_v15 = vld [vmem:[%s28531_s3 + $0x320] ss:$12 sps:$4 sm:$0xff]   ;;  %18455 = vmatpush3.bf16.msra.mxu0 %v20658_v19 }
 0xd27   :  { %18456 = vmatprep.subr.bf16.mxu0 %v20659_v15 }
 0xd29   :  { %10728 = vmatpush1.bf16.msra.mxu1 %v25358_v1  ;;  %v20660_v1 = vld [vmem:[%s28531_s3 + $0x260] ss:$12 sps:$4 sm:$0xff]  }
 0xd2a   :  { %10729 = vmatprep.subr.bf16.mxu1 %v25364_v14  ;;  %v20661_v14 = vld [vmem:[%s28531_s3 + $0x338] ss:$12 sps:$4 sm:$0xff]   ;;  %18457 = vmatpush3.bf16.msra.mxu0 %v20660_v1 }
 0xd2b   :  { %18458 = vmatprep.subr.bf16.mxu0 %v20661_v14 }
 0xd2d   :  { %10730 = vmatpush1.bf16.msra.mxu1 %v25370_v5  ;;  %v20662_v5 = vld [vmem:[%s28531_s3 + $0x278] ss:$12 sps:$4 sm:$0xff]  }
 0xd2e   :  { %10731 = vmatprep.subr.bf16.mxu1 %v25376_v17  ;;  %v20663_v17 = vld [vmem:[%s28531_s3 + $0x350] ss:$12 sps:$4 sm:$0xff]   ;;  %18459 = vmatpush3.bf16.msra.mxu0 %v20662_v5 }
 0xd2f   :  { %18460 = vmatprep.subr.bf16.mxu0 %v20663_v17 }
 0xd31   :  { %10732 = vmatpush1.bf16.msra.mxu1 %v25382_v10  ;;  %v20664_v10 = vld [vmem:[%s28531_s3 + $0x290] ss:$12 sps:$4 sm:$0xff]  }
 0xd32   :  { %10733 = vmatprep.subr.bf16.mxu1 %v25389_v51  ;;  %18461 = vmatpush3.bf16.msra.mxu0 %v20664_v10  ;;  %v20665_v51 = vld [vmem:[%s28531_s3 + $0x368] ss:$12 sps:$4 sm:$0xff]  }
 0xd33   :  { %18462 = vmatprep.subr.bf16.mxu0 %v20665_v51 }
 0xd35   :  { %10734 = vmatpush1.bf16.msra.mxu1 %v25394_v33  ;;  %v20666_v33 = vld [vmem:[%s28531_s3 + $0x2a8] ss:$12 sps:$4 sm:$0xff]  }
 0xd36   :  { %10735 = vmatprep.subr.bf16.mxu1 %v25406_v32  ;;  %18463 = vmatpush3.bf16.msra.mxu0 %v20666_v33  ;;  %v20668_v32 = vld [vmem:[%s28531_s3 + $0x2c0] ss:$12 sps:$4 sm:$0xff]  }
 0xd39   :  { %10736 = vmatpush1.bf16.msra.mxu1 %v25401_v2  ;;  %v20667_v2 = vld [vmem:[%s28531_s3 + $0x380] ss:$12 sps:$4 sm:$0xff]  }
 0xd3a   :  { %10737 = vmatprep.subr.bf16.mxu1 %v25411_v54  ;;  %v20669_v54 = vld [vmem:[%s28531_s3 + $0x398] ss:$12 sps:$4 sm:$0xff]   ;;  %18464 = vmatprep.subr.bf16.mxu0 %v20667_v2 }
 0xd3b   :  { %18465 = vmatpush3.bf16.msra.mxu0 %v20668_v32 }
 0xd3c   :  { %18466 = vmatprep.subr.bf16.mxu0 %v20669_v54 }
 0xd3d   :  { %10738 = vmatpush1.bf16.msra.mxu1 %v25424_v3  ;;  %v20670_v3 = vld [vmem:[%s28531_s3 + $0x2d8] ss:$12 sps:$4 sm:$0xff]  }
 0xd3e   :  { %10739 = vmatprep.subr.bf16.mxu1 %v25433_v50  ;;  %v20671_v50 = vld [vmem:[%s28531_s3 + $0x3b0] ss:$12 sps:$4 sm:$0xff]  }
 0xd3f   :  { %18467 = vmatpush3.bf16.msra.mxu0 %v20670_v3 }
 0xd40   :  { %18468 = vmatprep.subr.bf16.mxu0 %v20671_v50 }
 0xd41   :  { %10740 = vmatpush1.bf16.msra.mxu1 %v25445_v41  ;;  %v20672_v41 = vld [vmem:[%s28531_s3 + $0x2f0] ss:$12 sps:$4 sm:$0xff]  }
 0xd42   :  { %10741 = vmatprep.subr.bf16.mxu1 %v25451_v52 }
 0xd43   :  { %18469 = vmatpush3.bf16.msra.mxu0 %v20672_v41 }
 0xd44   :  { %19222 = vmatprep.subr.bf16.mxu0 %v28771_v44 }
 0xd45   :  { %10742 = vmatpush1.bf16.msra.mxu1 %v25463_v38 }
 0xd46   :  { %10743 = vmatprep.subr.bf16.mxu1 %v25469_v60 }
 0xd49   :  { %10744 = vmatpush1.bf16.msra.mxu1 %v25475_v39 }
 0xd4a   :  { %10745 = vmatprep.subr.bf16.mxu1 %v25481_v43 }
 0xd4d   :  { %10746 = vmatpush1.bf16.msra.mxu1 %v25487_v22 }
 0xd4e   :  { %10747 = vmatprep.subr.bf16.mxu1 %v25493_v8  ;;  %v28827_v8 = vld [vmem:[#allocation18_spill] sm:$0xff] }
 0xd4f   :  { %v9567_v11 = vunpack.c.h.bf16 %v28827_v8 }
 0xd51   :  { %10748 = vmatpush1.bf16.msra.mxu1 %v25499_v48  ;;  %v9564_v48 = vunpack.c.l.bf16 %v28827_v8  ;;  %v25949_v8 = vld [vmem:[%s28531_s3 + $0x2d4] ss:$12 sps:$4 sm:$0xff]  }
 0xd52   :  { %10749 = vmatprep.subr.bf16.mxu1 %v25509_v26 }
 0xd55   :  { %10750 = vmatpush1.bf16.msra.mxu1 %v25517_v62 }
 0xd56   :  { %10751 = vmatprep.subr.bf16.mxu1 %v25527_v9  ;;  %v28828_v9 = vld [vmem:[#allocation21_spill] sm:$0xff] }
 0xd57   :  { %v9568_v27 = vunpack.c.h.bf16 %v28828_v9 }
 0xd59   :  { %10752 = vmatpush1.bf16.msra.mxu1 %v25535_v63  ;;  %v9565_v63 = vunpack.c.l.bf16 %v28828_v9  ;;  %v20713_v9 = vld [vmem:[%s28531_s3 + $0x320] ss:$12 sps:$4 sm:$0xff]  }
 0xd5a   :  { %10753 = vmatprep.subr.bf16.mxu1 %v25544_v0 }
 0xd5d   :  { %10754 = vmatpush1.bf16.msra.mxu1 %v25553_v34  ;;  %v28829_v34 = vld [vmem:[#allocation14_spill] sm:$0xff] }
 0xd5e   :  { %10755 = vmatprep.subr.bf16.mxu1 %v25562_v23  ;;  %v9566_v23 = vunpack.c.l.bf16 %v28829_v34  ;;  %v9569_v42 = vunpack.c.h.bf16 %v28829_v34  ;;  %v20718_v34 = vld [vmem:[%s28531_s3 + $0x338] ss:$12 sps:$4 sm:$0xff]  }
 0xd61   :  { %10756 = vmatpush1.bf16.msra.mxu1 %v25571_v6 }
 0xd62   :  { %10768 = vmatprep.subr.bf16.mxu1 %v25581_v20 }
 0xdd7   :  { %v18439_v52 = vpop.f32.mrb[132].mxu1 }
 0xdd8   :  { %v18440_v38 = vpop.f32.mrb[133].mxu1 }
 0xdd9   :  { %v18441_v60 = vadd.f32 %v18440_v38, %v18439_v52  ;;  %v18442_v39 = vpop.f32.mrb[134].mxu1  ;;  %v20673_v38 = vld [vmem:[%s28531_s3 + $0x3c8] ss:$12 sps:$4 sm:$0xff]  }
 0xdda   :  { %v18443_v43 = vpop.f32.mrb[135].mxu1 }
 0xddb   :  { %v18444_v22 = vadd.f32 %v18443_v43, %v18442_v39  ;;  %v25932_v39 = vld [vmem:[%s28531_s3 + $0x2a0] ss:$12 sps:$4 sm:$0xff]   ;;  %v25939_v43 = vld [vmem:[%s28531_s3 + $0x2b8] ss:$12 sps:$4 sm:$0xff]  }
 0xdf7   :  { %v10127_v26 = vpop.f32.mrb[140].mxu0  ;;  %v10211_v62 = vpop.f32.mrb[136].mxu1 }
 0xdf8   :  { %v10218_v0 = vadd.f32 %v10127_v26, %v9564_v48  ;;  %v10212_v6 = vadd.f32 %v18441_v60, %v10211_v62  ;;  %v10129_v20 = vpop.f32.mrb[141].mxu0  ;;  %v19220_v59 = vpop.f32.mrb[137].mxu1  ;;  %v20674_v60 = vld [vmem:[%s28531_s3 + $0x3e0] ss:$12 sps:$4 sm:$0xff]   ;;  %v20708_v48 = vld [vmem:[%s28531_s3 + $0x308] ss:$12 sps:$4 sm:$0xff]  }
 0xdf9   :  { %v10219_v61 = vadd.f32 %v10129_v20, %v9565_v63  ;;  %v10131_v7 = vpop.f32.mrb[142].mxu0  ;;  %v10214_v40 = vpop.f32.mrb[138].mxu1  ;;  %v20709_v26 = vld [vmem:[%s28531_s3 + $0x248] ss:$12 sps:$4 sm:$0xff]   ;;  %v25962_v62 = vld [vmem:[%s28531_s3 + $0x2d0] ss:$12 sps:$4 sm:$0xff]  }
 0xdfa   :  { %21161 = vtanh.f32 %v10218_v0  ;;  %v10220_v19 = vadd.f32 %v10212_v6, %v9566_v23  ;;  %v10221_v15 = vadd.f32 %v10131_v7, %v9567_v11  ;;  %v10215_v1 = vadd.f32 %v18444_v22, %v10214_v40  ;;  %v10133_v14 = vpop.f32.mrb[143].mxu0  ;;  %v19221_v5 = vpop.f32.mrb[139].mxu1  ;;  %v25944_v22 = vld [vmem:[%s28531_s3 + $0x2bc] ss:$12 sps:$4 sm:$0xff]   ;;  %v25971_v63 = vld [vmem:[%s28531_s3 + $0x2ec] ss:$12 sps:$4 sm:$0xff]  }
 0xdfb   :  { %21163 = vtanh.f32 %v10219_v61  ;;  %v10222_v17 = vadd.f32 %v10133_v14, %v9568_v27  ;;  %v20714_v0 = vld [vmem:[%s28531_s3 + $0x260] ss:$12 sps:$4 sm:$0xff]   ;;  %v25983_v23 = vld [vmem:[%s28531_s3 + $0x2e8] ss:$12 sps:$4 sm:$0xff]   ;;  %v25989_v6 = vld [vmem:[%s28531_s3 + $0x304] ss:$12 sps:$4 sm:$0xff]  }
 0xdfc   :  { %21165 = vtanh.f32 %v10220_v19  ;;  %v10223_v10 = vadd.f32 %v10215_v1, %v9569_v42  ;;  %v20719_v20 = vld [vmem:[%s28531_s3 + $0x278] ss:$12 sps:$4 sm:$0xff]   ;;  %v20723_v59 = vld [vmem:[%s28531_s3 + $0x350] ss:$12 sps:$4 sm:$0xff]   ;;  %v26001_v11 = vld [vmem:[%s28531_s3 + $0x300] ss:$12 sps:$4 sm:$0xff]  }
 0xdfd   :  { %21167 = vtanh.f32 %v10221_v15  ;;  %v26007_v61 = vld [vmem:[%s28531_s3 + $0x31c] ss:$12 sps:$4 sm:$0xff]   ;;  %v26013_v7 = vld [vmem:[%s28531_s3 + $0x318] ss:$12 sps:$4 sm:$0xff]   ;;  %v26019_v42 = vld [vmem:[%s28531_s3 + $0x334] ss:$12 sps:$4 sm:$0xff]  }
 0xdfe   :  { %21169 = vtanh.f32 %v10223_v10  ;;  %v26025_v40 = vld [vmem:[%s28531_s3 + $0x330] ss:$12 sps:$4 sm:$0xff]   ;;  %v26031_v27 = vld [vmem:[%s28531_s3 + $0x34c] ss:$12 sps:$4 sm:$0xff]   ;;  %v26037_v19 = vld [vmem:[%s28531_s3 + $0x348] ss:$12 sps:$4 sm:$0xff]  }
 0xdff   :  { %21171 = vtanh.f32 %v10222_v17  ;;  %v20724_v15 = vld [vmem:[%s28531_s3 + $0x290] ss:$12 sps:$4 sm:$0xff]   ;;  %v20728_v14 = vld [vmem:[%s28531_s3 + $0x368] ss:$12 sps:$4 sm:$0xff]   ;;  %v26055_v5 = vld [vmem:[%s28531_s3 + $0x360] ss:$12 sps:$4 sm:$0xff]  }
 0xe00   :  { %v26047_v1 = vld [vmem:[%s28531_s3 + $0x364] ss:$12 sps:$4 sm:$0xff]   ;;  %v20729_v17 = vld [vmem:[%s28531_s3 + $0x2a8] ss:$12 sps:$4 sm:$0xff]  }
 0xe01   :  { %v26065_v10 = vld [vmem:[%s28531_s3 + $0x37c] ss:$12 sps:$4 sm:$0xff]  }
 0xe04   :  { %v21162_v51 = vpop.eup %21161 }
 0xe05   :  { %v21164_v33 = vpop.eup %21163 }
 0xe06   :  { %v21166_v2 = vpop.eup %21165 }
 0xe07   :  { %v21168_v32 = vpop.eup %21167 }
 0xe08   :  { %v21170_v54 = vpop.eup %21169  ;;  %v25815_v3 = vpack.c.bf16 %v21168_v32, %v21162_v51  ;;  %v20733_v51 = vld [vmem:[%s28531_s3 + $0x380] ss:$12 sps:$4 sm:$0xff]  }
 0xe09   :  { %v21172_v50 = vpop.eup %21171  ;;  %v25817_v41 = vpack.c.bf16 %v21170_v54, %v21166_v2  ;;  %v20734_v2 = vld [vmem:[%s28531_s3 + $0x2c0] ss:$12 sps:$4 sm:$0xff]   ;;  %v20738_v54 = vld [vmem:[%s28531_s3 + $0x398] ss:$12 sps:$4 sm:$0xff]  }
 0xe0a   :  { %28830 = vst [vmem:[#allocation18_spill] sm:$0xff] %v25815_v3  ;;  %v25819_v52 = vpack.c.bf16 %v21172_v50, %v21164_v33  ;;  %v26073_v33 = vld [vmem:[%s28531_s3 + $0x378] ss:$12 sps:$4 sm:$0xff]   ;;  %v26082_v32 = vld [vmem:[%s28531_s3 + $0x394] ss:$12 sps:$4 sm:$0xff]  }
 0xe0b   :  { %28831 = vst [vmem:[#allocation21_spill] sm:$0xff] %v25817_v41  ;;  %v26091_v50 = vld [vmem:[%s28531_s3 + $0x390] ss:$12 sps:$4 sm:$0xff]  }
 0xe0c   :  { %28832 = vst [vmem:[#allocation14_spill] sm:$0xff] %v25819_v52  ;;  %10757 = vmatprep.mubr.bf16.mxu1 %v25819_v52  ;;  %10843 = vmatprep.mubr.bf16.mxu0 %v25819_v52 }
 0xe0d   :  { %10758 = vmatmul.mubr.bf16.vlgmr.msra.gmra.mrb[140].mxu1 %v25815_v3  ;;  %10844 = vmatmul.mubr.bf16.vlgmr.msra.gmra.mrb[144].mxu0 %v25815_v3 }
 0xe0e   :  { %10769 = vmatpush1.bf16.msra.mxu1 %v25600_v58  ;;  %19223 = vmatpush3.bf16.msra.mxu0 %v20673_v38  ;;  %v20675_v58 = vld [vmem:[%s28531_s3 + $0x3f8] ss:$12 sps:$4 sm:$0xff]  }
 0xe0f   :  { %10770 = vmatprep.subr.bf16.mxu1 %v25608_v55  ;;  %19224 = vmatprep.subr.bf16.mxu0 %v28771_v44  ;;  %v20676_v55 = vld [vmem:[%s28531_s3 + $0x410] ss:$12 sps:$4 sm:$0xff]   ;;  %v20739_v38 = vld [vmem:[%s28531_s3 + $0x2d8] ss:$12 sps:$4 sm:$0xff]  }
 0xe10   :  { %10800 = vmatprep.mubr.bf16.mxu1 %v28772_v18  ;;  %19238 = vmatprep.mubr.msk.bf16.mxu0 %vm21467_vm1, %v28771_v44 }
 0xe12   :  { %10771 = vmatpush1.bf16.msra.mxu1 %v25618_v47  ;;  %19225 = vmatpush3.bf16.msra.mxu0 %v20674_v60  ;;  %v20677_v47 = vld [vmem:[%s28531_s3 + $0x428] ss:$12 sps:$4 sm:$0xff]   ;;  %v26100_v60 = vld [vmem:[%s28531_s3 + $0x3ac] ss:$12 sps:$4 sm:$0xff]  }
 0xe13   :  { %10772 = vmatprep.subr.bf16.mxu1 %v25628_v30  ;;  %19226 = vmatprep.subr.bf16.mxu0 %v28771_v44  ;;  %v20678_v30 = vld [vmem:[%s28531_s3 + $0x440] ss:$12 sps:$4 sm:$0xff]  }
 0xe16   :  { %10773 = vmatpush1.bf16.msra.mxu1 %v25637_v29  ;;  %19227 = vmatpush3.bf16.msra.mxu0 %v20675_v58  ;;  %v20679_v29 = vld [vmem:[%s28531_s3 + $0x458] ss:$12 sps:$4 sm:$0xff]   ;;  %v20743_v58 = vld [vmem:[%s28531_s3 + $0x3b0] ss:$12 sps:$4 sm:$0xff]  }
 0xe17   :  { %10774 = vmatprep.subr.bf16.mxu1 %v25647_v24  ;;  %19228 = vmatprep.subr.bf16.mxu0 %v28771_v44  ;;  %v20680_v24 = vld [vmem:[%s28531_s3 + $0x470] ss:$12 sps:$4 sm:$0xff]  }
 0xe1a   :  { %10775 = vmatpush1.bf16.msra.mxu1 %v25653_v46  ;;  %19229 = vmatpush3.bf16.msra.mxu0 %v20676_v55  ;;  %v25876_v46 = vld [vmem:[%s28531_s3 + $0x244] ss:$12 sps:$4 sm:$0xff]   ;;  %v26109_v55 = vld [vmem:[%s28531_s3 + $0x3a8] ss:$12 sps:$4 sm:$0xff]  }
 0xe1b   :  { %10776 = vmatprep.subr.bf16.mxu1 %v25663_v57  ;;  %19230 = vmatprep.subr.bf16.mxu0 %v28771_v44  ;;  %v25882_v57 = vld [vmem:[%s28531_s3 + $0x240] ss:$12 sps:$4 sm:$0xff]  }
 0xe1e   :  { %10777 = vmatpush1.bf16.msra.mxu1 %v25669_v16  ;;  %19231 = vmatpush3.bf16.msra.mxu0 %v20677_v47  ;;  %v25888_v16 = vld [vmem:[%s28531_s3 + $0x25c] ss:$12 sps:$4 sm:$0xff]  }
 0xe1f   :  { %10778 = vmatprep.subr.bf16.mxu1 %v25679_v35  ;;  %19232 = vmatprep.subr.bf16.mxu0 %v28771_v44  ;;  %v25896_v35 = vld [vmem:[%s28531_s3 + $0x258] ss:$12 sps:$4 sm:$0xff]   ;;  %v20744_v47 = vld [vmem:[%s28531_s3 + $0x2f0] ss:$12 sps:$4 sm:$0xff]  }
 0xe22   :  { %10779 = vmatpush1.bf16.msra.mxu1 %v25685_v28  ;;  %19233 = vmatpush3.bf16.msra.mxu0 %v20678_v30  ;;  %v25902_v28 = vld [vmem:[%s28531_s3 + $0x274] ss:$12 sps:$4 sm:$0xff]   ;;  %v26119_v30 = vld [vmem:[%s28531_s3 + $0x3c4] ss:$12 sps:$4 sm:$0xff]  }
 0xe23   :  { %10780 = vmatprep.subr.bf16.mxu1 %v25695_v21  ;;  %19234 = vmatprep.subr.bf16.mxu0 %v28771_v44  ;;  %v25908_v21 = vld [vmem:[%s28531_s3 + $0x270] ss:$12 sps:$4 sm:$0xff]  }
 0xe26   :  { %10781 = vmatpush1.bf16.msra.mxu1 %v25701_v13  ;;  %19235 = vmatpush3.bf16.msra.mxu0 %v20679_v29  ;;  %v25914_v13 = vld [vmem:[%s28531_s3 + $0x28c] ss:$12 sps:$4 sm:$0xff]  }
 0xe27   :  { %10782 = vmatprep.subr.bf16.mxu1 %v25711_v36  ;;  %19236 = vmatprep.subr.bf16.mxu0 %v28771_v44  ;;  %v25920_v36 = vld [vmem:[%s28531_s3 + $0x288] ss:$12 sps:$4 sm:$0xff]  }
 0xe2a   :  { %10783 = vmatpush1.bf16.msra.mxu1 %v25717_v53  ;;  %19237 = vmatpush3.bf16.msra.mxu0 %v20680_v24  ;;  %v25927_v53 = vld [vmem:[%s28531_s3 + $0x2a4] ss:$12 sps:$4 sm:$0xff]  }
 0xe2b   :  { %11400 = vmatprep.subr.bf16.mxu0 %v25876_v46  ;;  %18485 = vmatprep.subr.bf16.mxu1 %v20708_v48 }
 0xe2d   :  { %10801 = vmatmul.mubr.bf16.vlgmr.msra.gmra.mrb[140].mxu1 %v25817_v41  ;;  %19239 = vmatmul.mubr.bf16.vlgmr.msra.gmra.mrb[148].mxu0 %v25817_v41 }
 0xe2e   :  { %11401 = vmatpush1.bf16.msra.mxu0 %v25882_v57  ;;  %18486 = vmatpush3.bf16.msra.mxu1 %v20709_v26 }
 0xe2f   :  { %11402 = vmatprep.subr.bf16.mxu0 %v25888_v16  ;;  %18487 = vmatprep.subr.bf16.mxu1 %v20713_v9 }
 0xe32   :  { %11403 = vmatpush1.bf16.msra.mxu0 %v25896_v35  ;;  %18488 = vmatpush3.bf16.msra.mxu1 %v20714_v0 }
 0xe33   :  { %11404 = vmatprep.subr.bf16.mxu0 %v25902_v28  ;;  %18489 = vmatprep.subr.bf16.mxu1 %v20718_v34  ;;  %v28833_v34 = vld [vmem:[#allocation25_spill] sm:$0xff] }
 0xe34   :  { %v10242_v41 = vunpack.c.h.bf16 %v28833_v34 }
 0xe36   :  { %11405 = vmatpush1.bf16.msra.mxu0 %v25908_v21  ;;  %18490 = vmatpush3.bf16.msra.mxu1 %v20719_v20  ;;  %v10239_v20 = vunpack.c.l.bf16 %v28833_v34 }
 0xe37   :  { %11406 = vmatprep.subr.bf16.mxu0 %v25914_v13  ;;  %18491 = vmatprep.subr.bf16.mxu1 %v20723_v59 }
 0xe3a   :  { %11407 = vmatpush1.bf16.msra.mxu0 %v25920_v36  ;;  %18492 = vmatpush3.bf16.msra.mxu1 %v20724_v15 }
 0xe3b   :  { %11408 = vmatprep.subr.bf16.mxu0 %v25927_v53  ;;  %18493 = vmatprep.subr.bf16.mxu1 %v20728_v14  ;;  %v28834_v14 = vld [vmem:[#allocation8_spill] sm:$0xff] }
 0xe3e   :  { %11409 = vmatpush1.bf16.msra.mxu0 %v25932_v39  ;;  %18494 = vmatpush3.bf16.msra.mxu1 %v20729_v17  ;;  %v10240_v17 = vunpack.c.l.bf16 %v28834_v14 }
 0xe3f   :  { %11410 = vmatprep.subr.bf16.mxu0 %v25944_v22  ;;  %18495 = vmatprep.subr.bf16.mxu1 %v20733_v51 }
 0xe42   :  { %11411 = vmatpush1.bf16.msra.mxu0 %v25939_v43  ;;  %18496 = vmatpush3.bf16.msra.mxu1 %v20734_v2  ;;  %v28835_v2 = vld [vmem:[#allocation13_spill] sm:$0xff] }
 0xe43   :  { %11412 = vmatprep.subr.bf16.mxu0 %v25949_v8  ;;  %18497 = vmatprep.subr.bf16.mxu1 %v20738_v54  ;;  %v10241_v54 = vunpack.c.l.bf16 %v28835_v2 }
 0xe46   :  { %11413 = vmatpush1.bf16.msra.mxu0 %v25962_v62  ;;  %18498 = vmatpush3.bf16.msra.mxu1 %v20739_v38 }
 0xe47   :  { %11414 = vmatprep.subr.bf16.mxu0 %v25971_v63  ;;  %18499 = vmatprep.subr.bf16.mxu1 %v20743_v58 }
 0xe4a   :  { %11415 = vmatpush1.bf16.msra.mxu0 %v25983_v23  ;;  %18500 = vmatpush3.bf16.msra.mxu1 %v20744_v47 }
 0xe4b   :  { %11416 = vmatprep.subr.bf16.mxu0 %v25989_v6  ;;  %19242 = vmatprep.subr.bf16.mxu1 %v28771_v44 }
 0xe4e   :  { %11417 = vmatpush1.bf16.msra.mxu0 %v26001_v11 }
 0xe4f   :  { %11418 = vmatprep.subr.bf16.mxu0 %v26007_v61 }
 0xe52   :  { %11419 = vmatpush1.bf16.msra.mxu0 %v26013_v7 }
 0xe53   :  { %11420 = vmatprep.subr.bf16.mxu0 %v26019_v42 }
 0xe56   :  { %11421 = vmatpush1.bf16.msra.mxu0 %v26025_v40 }
 0xe57   :  { %11422 = vmatprep.subr.bf16.mxu0 %v26031_v27 }
 0xe5a   :  { %11423 = vmatpush1.bf16.msra.mxu0 %v26037_v19 }
 0xe5b   :  { %11424 = vmatprep.subr.bf16.mxu0 %v26047_v1 }
 0xe5e   :  { %11425 = vmatpush1.bf16.msra.mxu0 %v26055_v5 }
 0xe5f   :  { %11426 = vmatprep.subr.bf16.mxu0 %v26065_v10 }
 0xe62   :  { %11427 = vmatpush1.bf16.msra.mxu0 %v26073_v33 }
 0xe63   :  { %11428 = vmatprep.subr.bf16.mxu0 %v26082_v32 }
 0xe66   :  { %11429 = vmatpush1.bf16.msra.mxu0 %v26091_v50 }
 0xe67   :  { %11430 = vmatprep.subr.bf16.mxu0 %v26100_v60 }
 0xe6a   :  { %11431 = vmatpush1.bf16.msra.mxu0 %v26109_v55 }
 0xe6b   :  { %11443 = vmatprep.subr.bf16.mxu0 %v26119_v30 }
 0xee0   :  { %v18470_v29 = vpop.f32.mrb[144].mxu0 }
 0xee1   :  { %v18471_v24 = vpop.f32.mrb[145].mxu0 }
 0xee2   :  { %v18472_v48 = vadd.f32 %v18471_v24, %v18470_v29  ;;  %v18473_v26 = vpop.f32.mrb[146].mxu0  ;;  %v10244_v29 = vunpack.c.h.bf16 %v28835_v2 }
 0xee3   :  { %v18474_v9 = vpop.f32.mrb[147].mxu0 }
 0xee4   :  { %v18475_v0 = vadd.f32 %v18474_v9, %v18473_v26  ;;  %v10243_v26 = vunpack.c.h.bf16 %v28834_v14 }
 0xf00   :  { %v10802_v59 = vpop.f32.mrb[140].mxu1  ;;  %v10886_v15 = vpop.f32.mrb[148].mxu0 }
 0xf01   :  { %v10893_v51 = vadd.f32 %v10802_v59, %v10239_v20  ;;  %v10887_v38 = vadd.f32 %v18472_v48, %v10886_v15  ;;  %v10804_v58 = vpop.f32.mrb[141].mxu1  ;;  %v19240_v47 = vpop.f32.mrb[149].mxu0 }
 0xf02   :  { %v10894_v31 = vadd.f32 %v10804_v58, %v10240_v17  ;;  %v10806_v45 = vpop.f32.mrb[142].mxu1  ;;  %v10889_v24 = vpop.f32.mrb[150].mxu0 }
 0xf03   :  { %21173 = vtanh.f32 %v10893_v51  ;;  %v10895_v9 = vadd.f32 %v10887_v38, %v10241_v54  ;;  %v10896_v3 = vadd.f32 %v10806_v45, %v10242_v41  ;;  %v10890_v52 = vadd.f32 %v18475_v0, %v10889_v24  ;;  %v10808_v25 = vpop.f32.mrb[143].mxu1  ;;  %v19241_v20 = vpop.f32.mrb[151].mxu0  ;;  %v26156_v41 = vld [vmem:[%s28531_s3 + $0x3d8] ss:$12 sps:$4 sm:$0xff]   ;;  %v26166_v0 = vld [vmem:[%s28531_s3 + $0x3f4] ss:$12 sps:$4 sm:$0xff]  }
 0xf04   :  { %21175 = vtanh.f32 %v10894_v31  ;;  %v10897_v59 = vadd.f32 %v10808_v25, %v10243_v26  ;;  %v26138_v25 = vld [vmem:[%s28531_s3 + $0x3c0] ss:$12 sps:$4 sm:$0xff]   ;;  %v20748_v31 = vld [vmem:[%s28531_s3 + $0x3c8] ss:$12 sps:$4 sm:$0xff]   ;;  %v26175_v54 = vld [vmem:[%s28531_s3 + $0x3f0] ss:$12 sps:$4 sm:$0xff]  }
 0xf05   :  { %21177 = vtanh.f32 %v10895_v9  ;;  %v10898_v48 = vadd.f32 %v10890_v52, %v10244_v29  ;;  %v20752_v52 = vld [vmem:[%s28531_s3 + $0x3e0] ss:$12 sps:$4 sm:$0xff]   ;;  %v20756_v38 = vld [vmem:[%s28531_s3 + $0x3f8] ss:$12 sps:$4 sm:$0xff]   ;;  %v26191_v24 = vld [vmem:[%s28531_s3 + $0x408] ss:$12 sps:$4 sm:$0xff]  }
 0xf06   :  { %21179 = vtanh.f32 %v10896_v3  ;;  %v26146_v3 = vld [vmem:[%s28531_s3 + $0x3dc] ss:$12 sps:$4 sm:$0xff]   ;;  %v26185_v29 = vld [vmem:[%s28531_s3 + $0x40c] ss:$12 sps:$4 sm:$0xff]   ;;  %v26201_v9 = vld [vmem:[%s28531_s3 + $0x424] ss:$12 sps:$4 sm:$0xff]  }
 0xf07   :  { %21181 = vtanh.f32 %v10898_v48  ;;  %v20760_v26 = vld [vmem:[%s28531_s3 + $0x410] ss:$12 sps:$4 sm:$0xff]   ;;  %v26207_v20 = vld [vmem:[%s28531_s3 + $0x420] ss:$12 sps:$4 sm:$0xff]  }
 0xf08   :  { %21183 = vtanh.f32 %v10897_v59  ;;  %v20764_v59 = vld [vmem:[%s28531_s3 + $0x428] ss:$12 sps:$4 sm:$0xff]  }
 0xf09   :  { %v26217_v48 = vld [vmem:[%s28531_s3 + $0x43c] ss:$12 sps:$4 sm:$0xff]  }
 0xf0d   :  { %v21174_v34 = vpop.eup %21173 }
 0xf0e   :  { %v21176_v15 = vpop.eup %21175 }
 0xf0f   :  { %v21178_v17 = vpop.eup %21177 }
 0xf10   :  { %v21180_v2 = vpop.eup %21179 }
 0xf11   :  { %v21182_v58 = vpop.eup %21181  ;;  %v26129_v47 = vpack.c.bf16 %v21180_v2, %v21174_v34  ;;  %v26223_v34 = vld [vmem:[%s28531_s3 + $0x438] ss:$12 sps:$4 sm:$0xff]   ;;  %v26239_v2 = vld [vmem:[%s28531_s3 + $0x450] ss:$12 sps:$4 sm:$0xff]  }
 0xf12   :  { %v21184_v14 = vpop.eup %21183  ;;  %v26131_v51 = vpack.c.bf16 %v21182_v58, %v21178_v17  ;;  %v26233_v17 = vld [vmem:[%s28531_s3 + $0x454] ss:$12 sps:$4 sm:$0xff]   ;;  %v20772_v58 = vld [vmem:[%s28531_s3 + $0x458] ss:$12 sps:$4 sm:$0xff]  }
 0xf13   :  { %v26133_v45 = vpack.c.bf16 %v21184_v14, %v21176_v15  ;;  %v20768_v15 = vld [vmem:[%s28531_s3 + $0x440] ss:$12 sps:$4 sm:$0xff]  }
 0xf14   :  { %v26249_v14 = vld [vmem:[%s28531_s3 + $0x46c] ss:$12 sps:$4 sm:$0xff]  }
 0xf15   :  { %11432 = vmatprep.mubr.bf16.mxu0 %v26133_v45  ;;  %11518 = vmatprep.mubr.bf16.mxu1 %v26133_v45 }
 0xf16   :  { %11433 = vmatmul.mubr.bf16.vlgmr.msra.gmra.mrb[152].mxu0 %v26129_v47  ;;  %11519 = vmatmul.mubr.bf16.vlgmr.msra.gmra.mrb[144].mxu1 %v26129_v47 }
 0xf17   :  { %11444 = vmatpush1.bf16.msra.mxu0 %v26138_v25  ;;  %19243 = vmatpush3.bf16.msra.mxu1 %v20748_v31  ;;  %v26255_v31 = vld [vmem:[%s28531_s3 + $0x468] ss:$12 sps:$4 sm:$0xff]  }
 0xf18   :  { %11445 = vmatprep.subr.bf16.mxu0 %v26146_v3  ;;  %19244 = vmatprep.subr.bf16.mxu1 %v28771_v44 }
 0xf19   :  { %11475 = vmatprep.mubr.bf16.mxu0 %v28772_v18  ;;  %19258 = vmatprep.mubr.msk.bf16.mxu1 %vm21467_vm1, %v28771_v44 }
 0xf1b   :  { %11446 = vmatpush1.bf16.msra.mxu0 %v26156_v41  ;;  %19245 = vmatpush3.bf16.msra.mxu1 %v20752_v52  ;;  %v20776_v52 = vld [vmem:[%s28531_s3 + $0x470] ss:$12 sps:$4 sm:$0xff]  }
 0xf1c   :  { %11447 = vmatprep.subr.bf16.mxu0 %v26166_v0  ;;  %19246 = vmatprep.subr.bf16.mxu1 %v28771_v44 }
 0xf1f   :  { %11448 = vmatpush1.bf16.msra.mxu0 %v26175_v54  ;;  %19247 = vmatpush3.bf16.msra.mxu1 %v20756_v38 }
 0xf20   :  { %11449 = vmatprep.subr.bf16.mxu0 %v26185_v29  ;;  %19248 = vmatprep.subr.bf16.mxu1 %v28771_v44 }
 0xf23   :  { %11450 = vmatpush1.bf16.msra.mxu0 %v26191_v24  ;;  %19249 = vmatpush3.bf16.msra.mxu1 %v20760_v26 }
 0xf24   :  { %11451 = vmatprep.subr.bf16.mxu0 %v26201_v9  ;;  %19250 = vmatprep.subr.bf16.mxu1 %v28771_v44 }
 0xf27   :  { %11452 = vmatpush1.bf16.msra.mxu0 %v26207_v20  ;;  %19251 = vmatpush3.bf16.msra.mxu1 %v20764_v59 }
 0xf28   :  { %11453 = vmatprep.subr.bf16.mxu0 %v26217_v48  ;;  %19252 = vmatprep.subr.bf16.mxu1 %v28771_v44 }
 0xf2b   :  { %11454 = vmatpush1.bf16.msra.mxu0 %v26223_v34  ;;  %19253 = vmatpush3.bf16.msra.mxu1 %v20768_v15 }
 0xf2c   :  { %11455 = vmatprep.subr.bf16.mxu0 %v26233_v17  ;;  %19254 = vmatprep.subr.bf16.mxu1 %v28771_v44 }
 0xf2f   :  { %11456 = vmatpush1.bf16.msra.mxu0 %v26239_v2  ;;  %19255 = vmatpush3.bf16.msra.mxu1 %v20772_v58 }
 0xf30   :  { %11457 = vmatprep.subr.bf16.mxu0 %v26249_v14  ;;  %19256 = vmatprep.subr.bf16.mxu1 %v28771_v44 }
 0xf33   :  { %11458 = vmatpush1.bf16.msra.mxu0 %v26255_v31  ;;  %19257 = vmatpush3.bf16.msra.mxu1 %v20776_v52 }
 0xf34   :  { %12075 = vmatprep.subr.bf16.mxu1 %v25876_v46  ;;  %v20777_v46 = vld [vmem:[%s28531_s3 + $0x308] ss:$12 sps:$4 sm:$0xff]  }
 0xf35   :  { %18516 = vmatprep.subr.bf16.mxu0 %v20777_v46 }
 0xf36   :  { %11476 = vmatmul.mubr.bf16.vlgmr.msra.gmra.mrb[152].mxu0 %v26131_v51  ;;  %19259 = vmatmul.mubr.bf16.vlgmr.msra.gmra.mrb[148].mxu1 %v26131_v51 }
 0xf37   :  { %12076 = vmatpush1.bf16.msra.mxu1 %v25882_v57  ;;  %v20778_v57 = vld [vmem:[%s28531_s3 + $0x248] ss:$12 sps:$4 sm:$0xff]  }
 0xf38   :  { %12077 = vmatprep.subr.bf16.mxu1 %v25888_v16  ;;  %v20779_v16 = vld [vmem:[%s28531_s3 + $0x320] ss:$12 sps:$4 sm:$0xff]   ;;  %18517 = vmatpush3.bf16.msra.mxu0 %v20778_v57 }
 0xf39   :  { %18518 = vmatprep.subr.bf16.mxu0 %v20779_v16 }
 0xf3b   :  { %12078 = vmatpush1.bf16.msra.mxu1 %v25896_v35  ;;  %v20780_v35 = vld [vmem:[%s28531_s3 + $0x260] ss:$12 sps:$4 sm:$0xff]  }
 0xf3c   :  { %12079 = vmatprep.subr.bf16.mxu1 %v25902_v28  ;;  %v20781_v28 = vld [vmem:[%s28531_s3 + $0x338] ss:$12 sps:$4 sm:$0xff]   ;;  %18519 = vmatpush3.bf16.msra.mxu0 %v20780_v35 }
 0xf3d   :  { %18520 = vmatprep.subr.bf16.mxu0 %v20781_v28 }
 0xf3f   :  { %12080 = vmatpush1.bf16.msra.mxu1 %v25908_v21  ;;  %v20782_v21 = vld [vmem:[%s28531_s3 + $0x278] ss:$12 sps:$4 sm:$0xff]  }
 0xf40   :  { %12081 = vmatprep.subr.bf16.mxu1 %v25914_v13  ;;  %v20783_v13 = vld [vmem:[%s28531_s3 + $0x350] ss:$12 sps:$4 sm:$0xff]   ;;  %18521 = vmatpush3.bf16.msra.mxu0 %v20782_v21 }
 0xf41   :  { %18522 = vmatprep.subr.bf16.mxu0 %v20783_v13 }
 0xf43   :  { %12082 = vmatpush1.bf16.msra.mxu1 %v25920_v36  ;;  %v20784_v36 = vld [vmem:[%s28531_s3 + $0x290] ss:$12 sps:$4 sm:$0xff]  }
 0xf44   :  { %12083 = vmatprep.subr.bf16.mxu1 %v25927_v53  ;;  %18523 = vmatpush3.bf16.msra.mxu0 %v20784_v36  ;;  %v20785_v53 = vld [vmem:[%s28531_s3 + $0x368] ss:$12 sps:$4 sm:$0xff]  }
 0xf45   :  { %18524 = vmatprep.subr.bf16.mxu0 %v20785_v53 }
 0xf47   :  { %12084 = vmatpush1.bf16.msra.mxu1 %v25932_v39  ;;  %v20786_v39 = vld [vmem:[%s28531_s3 + $0x2a8] ss:$12 sps:$4 sm:$0xff]  }
 0xf48   :  { %12085 = vmatprep.subr.bf16.mxu1 %v25944_v22  ;;  %18525 = vmatpush3.bf16.msra.mxu0 %v20786_v39  ;;  %v20788_v22 = vld [vmem:[%s28531_s3 + $0x2c0] ss:$12 sps:$4 sm:$0xff]  }
 0xf4b   :  { %12086 = vmatpush1.bf16.msra.mxu1 %v25939_v43  ;;  %v20787_v43 = vld [vmem:[%s28531_s3 + $0x380] ss:$12 sps:$4 sm:$0xff]  }
 0xf4c   :  { %12087 = vmatprep.subr.bf16.mxu1 %v25949_v8  ;;  %v20789_v8 = vld [vmem:[%s28531_s3 + $0x398] ss:$12 sps:$4 sm:$0xff]   ;;  %18526 = vmatprep.subr.bf16.mxu0 %v20787_v43 }
 0xf4d   :  { %18527 = vmatpush3.bf16.msra.mxu0 %v20788_v22 }
 0xf4e   :  { %18528 = vmatprep.subr.bf16.mxu0 %v20789_v8 }
 0xf4f   :  { %12088 = vmatpush1.bf16.msra.mxu1 %v25962_v62  ;;  %v20790_v62 = vld [vmem:[%s28531_s3 + $0x2d8] ss:$12 sps:$4 sm:$0xff]  }
 0xf50   :  { %12089 = vmatprep.subr.bf16.mxu1 %v25971_v63  ;;  %v20791_v63 = vld [vmem:[%s28531_s3 + $0x3b0] ss:$12 sps:$4 sm:$0xff]  }
 0xf51   :  { %18529 = vmatpush3.bf16.msra.mxu0 %v20790_v62 }
 0xf52   :  { %18530 = vmatprep.subr.bf16.mxu0 %v20791_v63 }
 0xf53   :  { %12090 = vmatpush1.bf16.msra.mxu1 %v25983_v23  ;;  %v20792_v23 = vld [vmem:[%s28531_s3 + $0x2f0] ss:$12 sps:$4 sm:$0xff]  }
 0xf54   :  { %12091 = vmatprep.subr.bf16.mxu1 %v25989_v6 }
 0xf55   :  { %18531 = vmatpush3.bf16.msra.mxu0 %v20792_v23 }
 0xf56   :  { %19262 = vmatprep.subr.bf16.mxu0 %v28771_v44 }
 0xf57   :  { %12092 = vmatpush1.bf16.msra.mxu1 %v26001_v11 }
 0xf58   :  { %12093 = vmatprep.subr.bf16.mxu1 %v26007_v61 }
 0xf5b   :  { %12094 = vmatpush1.bf16.msra.mxu1 %v26013_v7 }
 0xf5c   :  { %12095 = vmatprep.subr.bf16.mxu1 %v26019_v42 }
 0xf5f   :  { %12096 = vmatpush1.bf16.msra.mxu1 %v26025_v40 }
 0xf60   :  { %12097 = vmatprep.subr.bf16.mxu1 %v26031_v27  ;;  %v28836_v27 = vld [vmem:[#allocation15_spill] sm:$0xff] }
 0xf61   :  { %v10917_v26 = vunpack.c.h.bf16 %v28836_v27 }
 0xf63   :  { %12098 = vmatpush1.bf16.msra.mxu1 %v26037_v19  ;;  %v10914_v19 = vunpack.c.l.bf16 %v28836_v27  ;;  %v20815_v27 = vld [vmem:[%s28533_s2 + $0x278] ss:$12 sps:$4 sm:$0xff]  }
 0xf64   :  { %12099 = vmatprep.subr.bf16.mxu1 %v26047_v1 }
 0xf67   :  { %12100 = vmatpush1.bf16.msra.mxu1 %v26055_v5 }
 0xf68   :  { %12101 = vmatprep.subr.bf16.mxu1 %v26065_v10  ;;  %v28837_v10 = vld [vmem:[#allocation16_spill] sm:$0xff] }
 0xf69   :  { %v10918_v46 = vunpack.c.h.bf16 %v28837_v10 }
 0xf6b   :  { %12102 = vmatpush1.bf16.msra.mxu1 %v26073_v33  ;;  %v10915_v33 = vunpack.c.l.bf16 %v28837_v10  ;;  %v20820_v10 = vld [vmem:[%s28533_s2 + $0x290] ss:$12 sps:$4 sm:$0xff]  }
 0xf6c   :  { %12103 = vmatprep.subr.bf16.mxu1 %v26082_v32 }
 0xf6f   :  { %12104 = vmatpush1.bf16.msra.mxu1 %v26091_v50  ;;  %v28838_v50 = vld [vmem:[#allocation19_spill] sm:$0xff] }
 0xf70   :  { %12105 = vmatprep.subr.bf16.mxu1 %v26100_v60  ;;  %v10916_v60 = vunpack.c.l.bf16 %v28838_v50  ;;  %v10919_v58 = vunpack.c.h.bf16 %v28838_v50  ;;  %v20821_v50 = vld [vmem:[%s28533_s2 + $0x2a0] ss:$12 sps:$4 sm:$0xff]  }
 0xf73   :  { %12106 = vmatpush1.bf16.msra.mxu1 %v26109_v55 }
 0xf74   :  { %12118 = vmatprep.subr.bf16.mxu1 %v26119_v30 }
 0xfe9   :  { %v18501_v6 = vpop.f32.mrb[144].mxu1 }
 0xfea   :  { %v18502_v11 = vpop.f32.mrb[145].mxu1 }
 0xfeb   :  { %v18503_v61 = vadd.f32 %v18502_v11, %v18501_v6  ;;  %v18504_v7 = vpop.f32.mrb[146].mxu1  ;;  %v20793_v11 = vld [vmem:[%s28531_s3 + $0x3c8] ss:$12 sps:$4 sm:$0xff]  }
 0xfec   :  { %v18505_v42 = vpop.f32.mrb[147].mxu1 }
 0xfed   :  { %v18506_v40 = vadd.f32 %v18505_v42, %v18504_v7  ;;  %v20813_v7 = vld [vmem:[%s28533_s2 + $0x274] ss:$12 sps:$4 sm:$0xff]   ;;  %v20814_v42 = vld [vmem:[%s28533_s2 + $0x338] ss:$12 sps:$4 sm:$0xff]  }
0x1009   :  { %v11477_v1 = vpop.f32.mrb[152].mxu0  ;;  %v11561_v5 = vpop.f32.mrb[148].mxu1 }
0x100a   :  { %v11568_v32 = vadd.f32 %v11477_v1, %v10914_v19  ;;  %v11562_v55 = vadd.f32 %v18503_v61, %v11561_v5  ;;  %v11479_v30 = vpop.f32.mrb[153].mxu0  ;;  %v19260_v38 = vpop.f32.mrb[149].mxu1  ;;  %v20794_v61 = vld [vmem:[%s28531_s3 + $0x3e0] ss:$12 sps:$4 sm:$0xff]   ;;  %v20819_v1 = vld [vmem:[%s28533_s2 + $0x350] ss:$12 sps:$4 sm:$0xff]  }
0x100b   :  { %v11569_v59 = vadd.f32 %v11479_v30, %v10915_v33  ;;  %v11481_v15 = vpop.f32.mrb[154].mxu0  ;;  %v11564_v52 = vpop.f32.mrb[150].mxu1  ;;  %v20818_v19 = vld [vmem:[%s28533_s2 + $0x28c] ss:$12 sps:$4 sm:$0xff]   ;;  %v20816_v5 = vld [vmem:[%s28533_s2 + $0x288] ss:$12 sps:$4 sm:$0xff]  }
0x100c   :  { %21185 = vtanh.f32 %v11568_v32  ;;  %v11570_v57 = vadd.f32 %v11562_v55, %v10916_v60  ;;  %v11571_v16 = vadd.f32 %v11481_v15, %v10917_v26  ;;  %v11565_v35 = vadd.f32 %v18506_v40, %v11564_v52  ;;  %v11483_v28 = vpop.f32.mrb[155].mxu0  ;;  %v19261_v21 = vpop.f32.mrb[151].mxu1  ;;  %v20811_v40 = vld [vmem:[%s28533_s2 + $0x270] ss:$12 sps:$4 sm:$0xff]   ;;  %v20824_v32 = vld [vmem:[%s28533_s2 + $0x368] ss:$12 sps:$4 sm:$0xff]  }
0x100d   :  { %21187 = vtanh.f32 %v11569_v59  ;;  %v11572_v13 = vadd.f32 %v11483_v28, %v10918_v46  ;;  %v20823_v33 = vld [vmem:[%s28533_s2 + $0x2a4] ss:$12 sps:$4 sm:$0xff]   ;;  %v20825_v60 = vld [vmem:[%s28533_s2 + $0x2a8] ss:$12 sps:$4 sm:$0xff]   ;;  %v20829_v30 = vld [vmem:[%s28533_s2 + $0x380] ss:$12 sps:$4 sm:$0xff]  }
0x100e   :  { %21189 = vtanh.f32 %v11570_v57  ;;  %v11573_v36 = vadd.f32 %v11565_v35, %v10919_v58  ;;  %v20828_v55 = vld [vmem:[%s28533_s2 + $0x2bc] ss:$12 sps:$4 sm:$0xff]   ;;  %v20826_v38 = vld [vmem:[%s28533_s2 + $0x2b8] ss:$12 sps:$4 sm:$0xff]   ;;  %v20830_v26 = vld [vmem:[%s28533_s2 + $0x2c0] ss:$12 sps:$4 sm:$0xff]  }
0x100f   :  { %21191 = vtanh.f32 %v11571_v16  ;;  %v20833_v59 = vld [vmem:[%s28533_s2 + $0x2d4] ss:$12 sps:$4 sm:$0xff]   ;;  %v20834_v15 = vld [vmem:[%s28533_s2 + $0x398] ss:$12 sps:$4 sm:$0xff]   ;;  %v20831_v58 = vld [vmem:[%s28533_s2 + $0x2d0] ss:$12 sps:$4 sm:$0xff]  }
0x1010   :  { %21193 = vtanh.f32 %v11573_v36  ;;  %v20835_v52 = vld [vmem:[%s28533_s2 + $0x2d8] ss:$12 sps:$4 sm:$0xff]   ;;  %v20839_v57 = vld [vmem:[%s28533_s2 + $0x3b0] ss:$12 sps:$4 sm:$0xff]   ;;  %v20836_v16 = vld [vmem:[%s28533_s2 + $0x2e8] ss:$12 sps:$4 sm:$0xff]  }
0x1011   :  { %21195 = vtanh.f32 %v11572_v13  ;;  %v20838_v46 = vld [vmem:[%s28533_s2 + $0x2ec] ss:$12 sps:$4 sm:$0xff]   ;;  %v20840_v35 = vld [vmem:[%s28533_s2 + $0x2f0] ss:$12 sps:$4 sm:$0xff]   ;;  %v20865_v21 = vld [vmem:[%s28533_s2 + $0x3c8] ss:$12 sps:$4 sm:$0xff]  }
0x1012   :  { %v20843_v28 = vld [vmem:[%s28533_s2 + $0x304] ss:$12 sps:$4 sm:$0xff]   ;;  %v20841_v13 = vld [vmem:[%s28533_s2 + $0x300] ss:$12 sps:$4 sm:$0xff]   ;;  %v20846_v36 = vld [vmem:[%s28533_s2 + $0x31c] ss:$12 sps:$4 sm:$0xff]  }
0x1016   :  { %v21186_v53 = vpop.eup %21185 }
0x1017   :  { %v21188_v39 = vpop.eup %21187 }
0x1018   :  { %v21190_v43 = vpop.eup %21189 }
0x1019   :  { %v21192_v22 = vpop.eup %21191 }
0x101a   :  { %v21194_v8 = vpop.eup %21193  ;;  %v26353_v62 = vpack.c.bf16 %v21192_v22, %v21186_v53  ;;  %v28840_v53 = vld [vmem:[#allocation20_spill] sm:$0xff]  ;;  %v20847_v22 = vld [vmem:[%s28533_s2 + $0x330] ss:$12 sps:$4 sm:$0xff]  }
0x101b   :  { %v21196_v63 = vpop.eup %21195  ;;  %v26355_v23 = vpack.c.bf16 %v21194_v8, %v21190_v43  ;;  %v20849_v43 = vld [vmem:[%s28533_s2 + $0x334] ss:$12 sps:$4 sm:$0xff]   ;;  %v20852_v8 = vld [vmem:[%s28533_s2 + $0x34c] ss:$12 sps:$4 sm:$0xff]  }
0x101c   :  { %v26357_v6 = vpack.c.bf16 %v21196_v63, %v21188_v39  ;;  %v20844_v39 = vld [vmem:[%s28533_s2 + $0x318] ss:$12 sps:$4 sm:$0xff]   ;;  %v20850_v63 = vld [vmem:[%s28533_s2 + $0x348] ss:$12 sps:$4 sm:$0xff]  }
0x101e   :  { %12107 = vmatprep.mubr.bf16.mxu1 %v26357_v6  ;;  %12193 = vmatprep.mubr.bf16.mxu0 %v26357_v6 }
0x101f   :  { %12108 = vmatmul.mubr.bf16.vlgmr.msra.gmra.mrb[152].mxu1 %v26353_v62  ;;  %12194 = vmatmul.mubr.bf16.vlgmr.msra.gmra.mrb[156].mxu0 %v26353_v62 }
0x1020   :  { %12119 = vmatpush1.bf16.msra.mxu1 %v26138_v25  ;;  %19263 = vmatpush3.bf16.msra.mxu0 %v20793_v11  ;;  %v20795_v25 = vld [vmem:[%s28531_s3 + $0x3f8] ss:$12 sps:$4 sm:$0xff]  }
0x1021   :  { %12120 = vmatprep.subr.bf16.mxu1 %v26146_v3  ;;  %19264 = vmatprep.subr.bf16.mxu0 %v28771_v44  ;;  %v20796_v3 = vld [vmem:[%s28531_s3 + $0x410] ss:$12 sps:$4 sm:$0xff]  }
0x1022   :  { %12150 = vmatprep.mubr.bf16.mxu1 %v28772_v18  ;;  %19278 = vmatprep.mubr.msk.bf16.mxu0 %vm21467_vm1, %v28771_v44  ;;  %v20855_v11 = vld [vmem:[%s28533_s2 + $0x364] ss:$12 sps:$4 sm:$0xff]  }
0x1024   :  { %12121 = vmatpush1.bf16.msra.mxu1 %v26156_v41  ;;  %19265 = vmatpush3.bf16.msra.mxu0 %v20794_v61  ;;  %v20797_v41 = vld [vmem:[%s28531_s3 + $0x428] ss:$12 sps:$4 sm:$0xff]   ;;  %v20853_v61 = vld [vmem:[%s28533_s2 + $0x360] ss:$12 sps:$4 sm:$0xff]  }
0x1025   :  { %12122 = vmatprep.subr.bf16.mxu1 %v26166_v0  ;;  %19266 = vmatprep.subr.bf16.mxu0 %v28771_v44  ;;  %v20798_v0 = vld [vmem:[%s28531_s3 + $0x440] ss:$12 sps:$4 sm:$0xff]  }
0x1028   :  { %12123 = vmatpush1.bf16.msra.mxu1 %v26175_v54  ;;  %19267 = vmatpush3.bf16.msra.mxu0 %v20795_v25  ;;  %v20799_v54 = vld [vmem:[%s28531_s3 + $0x458] ss:$12 sps:$4 sm:$0xff]   ;;  %v20858_v25 = vld [vmem:[%s28533_s2 + $0x37c] ss:$12 sps:$4 sm:$0xff]  }
0x1029   :  { %12124 = vmatprep.subr.bf16.mxu1 %v26185_v29  ;;  %19268 = vmatprep.subr.bf16.mxu0 %v28771_v44  ;;  %v20800_v29 = vld [vmem:[%s28531_s3 + $0x470] ss:$12 sps:$4 sm:$0xff]  }
0x102c   :  { %12125 = vmatpush1.bf16.msra.mxu1 %v26191_v24  ;;  %19269 = vmatpush3.bf16.msra.mxu0 %v20796_v3  ;;  %v20803_v24 = vld [vmem:[%s28533_s2 + $0x244] ss:$12 sps:$4 sm:$0xff]  }
0x102d   :  { %12126 = vmatprep.subr.bf16.mxu1 %v26201_v9  ;;  %19270 = vmatprep.subr.bf16.mxu0 %v28771_v44  ;;  %v20804_v9 = vld [vmem:[%s28533_s2 + $0x308] ss:$12 sps:$4 sm:$0xff]   ;;  %v20856_v3 = vld [vmem:[%s28533_s2 + $0x378] ss:$12 sps:$4 sm:$0xff]  }
0x1030   :  { %12127 = vmatpush1.bf16.msra.mxu1 %v26207_v20  ;;  %19271 = vmatpush3.bf16.msra.mxu0 %v20797_v41  ;;  %v20801_v20 = vld [vmem:[%s28533_s2 + $0x240] ss:$12 sps:$4 sm:$0xff]  }
0x1031   :  { %12128 = vmatprep.subr.bf16.mxu1 %v26217_v48  ;;  %19272 = vmatprep.subr.bf16.mxu0 %v28771_v44  ;;  %v20805_v48 = vld [vmem:[%s28533_s2 + $0x248] ss:$12 sps:$4 sm:$0xff]  }
0x1032   :  { %v20861_v41 = vld [vmem:[%s28533_s2 + $0x394] ss:$12 sps:$4 sm:$0xff]  }
0x1034   :  { %12129 = vmatpush1.bf16.msra.mxu1 %v26223_v34  ;;  %19273 = vmatpush3.bf16.msra.mxu0 %v20798_v0  ;;  %v20808_v34 = vld [vmem:[%s28533_s2 + $0x25c] ss:$12 sps:$4 sm:$0xff]  }
0x1035   :  { %12130 = vmatprep.subr.bf16.mxu1 %v26233_v17  ;;  %19274 = vmatprep.subr.bf16.mxu0 %v28771_v44  ;;  %v20809_v17 = vld [vmem:[%s28533_s2 + $0x320] ss:$12 sps:$4 sm:$0xff]   ;;  %v20859_v0 = vld [vmem:[%s28533_s2 + $0x390] ss:$12 sps:$4 sm:$0xff]  }
0x1038   :  { %12131 = vmatpush1.bf16.msra.mxu1 %v26239_v2  ;;  %19275 = vmatpush3.bf16.msra.mxu0 %v20799_v54  ;;  %v28839_v2 = vld [vmem:[#allocation23_spill] sm:$0xff]  ;;  %v20866_v54 = vld [vmem:[%s28533_s2 + $0x3e0] ss:$12 sps:$4 sm:$0xff]  }
0x1039   :  { %12132 = vmatprep.subr.bf16.mxu1 %v26249_v14  ;;  %19276 = vmatprep.subr.bf16.mxu0 %v28771_v44  ;;  %v20806_v14 = vld [vmem:[%s28533_s2 + $0x258] ss:$12 sps:$4 sm:$0xff]  }
0x103c   :  { %12133 = vmatpush1.bf16.msra.mxu1 %v26255_v31  ;;  %19277 = vmatpush3.bf16.msra.mxu0 %v20800_v29  ;;  %v20810_v31 = vld [vmem:[%s28533_s2 + $0x260] ss:$12 sps:$4 sm:$0xff]  }
0x103d   :  { %12784 = vmatprep.subr.bf16.mxu0 %v20803_v24  ;;  %18547 = vmatprep.subr.bf16.mxu1 %v20804_v9  ;;  %v20864_v29 = vld [vmem:[%s28533_s2 + $0x3ac] ss:$12 sps:$4 sm:$0xff]   ;;  %v28841_v9 = vld [vmem:[#allocation12_spill] sm:$0xff] }
0x103e   :  { %v20867_v24 = vld [vmem:[%s28533_s2 + $0x3f8] ss:$12 sps:$4 sm:$0xff]  }
0x103f   :  { %12151 = vmatmul.mubr.bf16.vlgmr.msra.gmra.mrb[152].mxu1 %v26355_v23  ;;  %19279 = vmatmul.mubr.bf16.vlgmr.msra.gmra.mrb[160].mxu0 %v26355_v23 }
0x1040   :  { %12785 = vmatpush1.bf16.msra.mxu0 %v20801_v20  ;;  %12816 = vmatprep.mubr.bf16.mxu0 %v28839_v2  ;;  %v20862_v20 = vld [vmem:[%s28533_s2 + $0x3a8] ss:$12 sps:$4 sm:$0xff]  }
0x1041   :  { %18548 = vmatpush3.bf16.msra.mxu1 %v20805_v48  ;;  %13042 = vmatprep.mubr.bf16.mxu1 %v28839_v2  ;;  %v20868_v48 = vld [vmem:[%s28533_s2 + $0x410] ss:$12 sps:$4 sm:$0xff]   ;;  %v20869_v2 = vld [vmem:[%s28533_s2 + $0x3c0] ss:$12 sps:$4 sm:$0xff]  }
0x1042   :  { %12786 = vmatprep.subr.bf16.mxu0 %v20808_v34  ;;  %18549 = vmatprep.subr.bf16.mxu1 %v20809_v17  ;;  %v28842_v34 = vld [vmem:[#allocation14_spill] sm:$0xff] }
0x1043   :  { %v20871_v17 = vld [vmem:[%s28533_s2 + $0x3c4] ss:$12 sps:$4 sm:$0xff]  }
0x1044   :  { %12787 = vmatpush1.bf16.msra.mxu0 %v20806_v14  ;;  %v20872_v14 = vld [vmem:[%s28533_s2 + $0x428] ss:$12 sps:$4 sm:$0xff]  }
0x1045   :  { %18550 = vmatpush3.bf16.msra.mxu1 %v20810_v31  ;;  %12788 = vmatprep.subr.bf16.mxu0 %v20813_v7  ;;  %v28843_v31 = vld [vmem:[#allocation18_spill] sm:$0xff] }
0x1046   :  { %18551 = vmatprep.subr.bf16.mxu1 %v20814_v42  ;;  %v20880_v7 = vld [vmem:[%s28533_s2 + $0x408] ss:$12 sps:$4 sm:$0xff]   ;;  %v20882_v42 = vld [vmem:[%s28533_s2 + $0x40c] ss:$12 sps:$4 sm:$0xff]  }
0x1048   :  { %12789 = vmatpush1.bf16.msra.mxu0 %v20811_v40  ;;  %v20883_v40 = vld [vmem:[%s28533_s2 + $0x458] ss:$12 sps:$4 sm:$0xff]  }
0x1049   :  { %18552 = vmatpush3.bf16.msra.mxu1 %v20815_v27  ;;  %12790 = vmatprep.subr.bf16.mxu0 %v20818_v19  ;;  %v20886_v27 = vld [vmem:[%s28533_s2 + $0x424] ss:$12 sps:$4 sm:$0xff]   ;;  %v20884_v19 = vld [vmem:[%s28533_s2 + $0x420] ss:$12 sps:$4 sm:$0xff]  }
0x104a   :  { %18553 = vmatprep.subr.bf16.mxu1 %v20819_v1  ;;  %v20889_v1 = vld [vmem:[%s28533_s2 + $0x43c] ss:$12 sps:$4 sm:$0xff]  }
0x104c   :  { %12791 = vmatpush1.bf16.msra.mxu0 %v20816_v5  ;;  %v20887_v5 = vld [vmem:[%s28533_s2 + $0x438] ss:$12 sps:$4 sm:$0xff]  }
0x104d   :  { %18554 = vmatpush3.bf16.msra.mxu1 %v20820_v10  ;;  %12792 = vmatprep.subr.bf16.mxu0 %v20823_v33  ;;  %v20893_v10 = vld [vmem:[%s28533_s2 + $0x454] ss:$12 sps:$4 sm:$0xff]   ;;  %v20890_v33 = vld [vmem:[%s28533_s2 + $0x470] ss:$12 sps:$4 sm:$0xff]  }
0x104e   :  { %18555 = vmatprep.subr.bf16.mxu1 %v20824_v32  ;;  %v20894_v32 = vld [vmem:[%s28533_s2 + $0x468] ss:$12 sps:$4 sm:$0xff]  }
0x1050   :  { %12793 = vmatpush1.bf16.msra.mxu0 %v20821_v50  ;;  %v26660_v50 = vld [vmem:[%s28531_s3 + $0x484] ss:$12 sps:$4 sm:$0xff]  }
0x1051   :  { %18556 = vmatpush3.bf16.msra.mxu1 %v20825_v60  ;;  %12794 = vmatprep.subr.bf16.mxu0 %v20828_v55 }
0x1052   :  { %18557 = vmatprep.subr.bf16.mxu1 %v20829_v30 }
0x1054   :  { %12795 = vmatpush1.bf16.msra.mxu0 %v20826_v38 }
0x1055   :  { %18558 = vmatpush3.bf16.msra.mxu1 %v20830_v26  ;;  %12796 = vmatprep.subr.bf16.mxu0 %v20833_v59 }
0x1056   :  { %18559 = vmatprep.subr.bf16.mxu1 %v20834_v15  ;;  %v28844_v15 = vld [vmem:[#allocation9_spill] sm:$0xff] }
0x1058   :  { %12797 = vmatpush1.bf16.msra.mxu0 %v20831_v58  ;;  %v11589_v58 = vunpack.c.l.bf16 %v28844_v15 }
0x1059   :  { %18560 = vmatpush3.bf16.msra.mxu1 %v20835_v52  ;;  %12798 = vmatprep.subr.bf16.mxu0 %v20838_v46 }
0x105a   :  { %18561 = vmatprep.subr.bf16.mxu1 %v20839_v57  ;;  %v28845_v57 = vld [vmem:[#allocation17_spill] sm:$0xff] }
0x105c   :  { %12799 = vmatpush1.bf16.msra.mxu0 %v20836_v16  ;;  %v11590_v16 = vunpack.c.l.bf16 %v28845_v57 }
0x105d   :  { %18562 = vmatpush3.bf16.msra.mxu1 %v20840_v35  ;;  %12800 = vmatprep.subr.bf16.mxu0 %v20843_v28  ;;  %v28846_v35 = vld [vmem:[#allocation10_spill] sm:$0xff] }
0x105e   :  { %19282 = vmatprep.subr.bf16.mxu1 %v20865_v21  ;;  %v11591_v28 = vunpack.c.l.bf16 %v28846_v35 }
0x1060   :  { %13043 = vmatmul.mubr.bf16.vlgmr.msra.gmra.mrb[156].mxu1 %v28840_v53  ;;  %12801 = vmatpush1.bf16.msra.mxu0 %v20841_v13 }
0x1061   :  { %13050 = vmatprep.mubr.bf16.mxu1 %v25057_v49  ;;  %12802 = vmatprep.subr.bf16.mxu0 %v20846_v36 }
0x1062   :  { %19283 = vmatpush3.bf16.msra.mxu1 %v20865_v21 }
0x1063   :  { %19284 = vmatprep.subr.bf16.mxu1 %v20866_v54 }
0x1064   :  { %12803 = vmatpush1.bf16.msra.mxu0 %v20844_v39 }
0x1065   :  { %12804 = vmatprep.subr.bf16.mxu0 %v20849_v43 }
0x1066   :  { %19285 = vmatpush3.bf16.msra.mxu1 %v20866_v54 }
0x1067   :  { %19286 = vmatprep.subr.bf16.mxu1 %v20867_v24 }
0x1068   :  { %13051 = vmatmul.mubr.bf16.gmra.mrb[160].mxu1 %v25053_v56  ;;  %12805 = vmatpush1.bf16.msra.mxu0 %v20847_v22  ;;  %v11594_v22 = vunpack.c.h.bf16 %v28846_v35  ;;  %v26786_v35 = vld [vmem:[%s28531_s3 + $0x4fc] ss:$12 sps:$4 sm:$0xff]  }
0x1069   :  { %13058 = vmatprep.mubr.bf16.mxu1 %v25281_v37  ;;  %12806 = vmatprep.subr.bf16.mxu0 %v20852_v8 }
0x106a   :  { %19287 = vmatpush3.bf16.msra.mxu1 %v20867_v24 }
0x106b   :  { %19288 = vmatprep.subr.bf16.mxu1 %v20868_v48 }
0x106c   :  { %12807 = vmatpush1.bf16.msra.mxu0 %v20850_v63  ;;  %v11593_v63 = vunpack.c.h.bf16 %v28845_v57 }
0x106d   :  { %12808 = vmatprep.subr.bf16.mxu0 %v20855_v11 }
0x106e   :  { %19289 = vmatpush3.bf16.msra.mxu1 %v20868_v48 }
0x106f   :  { %19290 = vmatprep.subr.bf16.mxu1 %v20872_v14 }
0x1070   :  { %13059 = vmatmul.mubr.bf16.gmra.mrb[164].mxu1 %v25277_v12  ;;  %12809 = vmatpush1.bf16.msra.mxu0 %v20853_v61 }
0x1071   :  { %13066 = vmatprep.mubr.bf16.mxu1 %v25595_v4  ;;  %12810 = vmatprep.subr.bf16.mxu0 %v20858_v25 }
0x1072   :  { %19291 = vmatpush3.bf16.msra.mxu1 %v20872_v14 }
0x1074   :  { %12811 = vmatpush1.bf16.msra.mxu0 %v20856_v3 }
0x1075   :  { %12812 = vmatprep.subr.bf16.mxu0 %v20861_v41 }
0x1078   :  { %13067 = vmatmul.mubr.bf16.gmra.mrb[168].mxu1 %v28841_v9  ;;  %12813 = vmatpush1.bf16.msra.mxu0 %v20859_v0 }
0x1079   :  { %13074 = vmatprep.mubr.bf16.mxu1 %v28842_v34  ;;  %12814 = vmatprep.subr.bf16.mxu0 %v20864_v29 }
0x107c   :  { %12815 = vmatpush1.bf16.msra.mxu0 %v20862_v20 }
0x107d   :  { %12897 = vmatprep.subr.bf16.mxu0 %v20871_v17 }
0x107f   :  { %12817 = vmatmul.mubr.bf16.vlgmr.msra.gmra.mrb[164].mxu0 %v28840_v53  ;;  %v11592_v53 = vunpack.c.h.bf16 %v28844_v15  ;;  %v26769_v15 = vld [vmem:[%s28531_s3 + $0x4e4] ss:$12 sps:$4 sm:$0xff]  }
0x1080   :  { %13075 = vmatmul.mubr.bf16.gmra.mrb[172].mxu1 %v28843_v31  ;;  %12826 = vmatprep.mubr.bf16.mxu0 %v25057_v49  ;;  %v20875_v49 = vld [vmem:[%s28533_s2 + $0x3dc] ss:$12 sps:$4 sm:$0xff]  }
0x1081   :  { %13082 = vmatprep.mubr.bf16.mxu1 %v26133_v45  ;;  %12898 = vmatpush1.bf16.msra.mxu0 %v20869_v2 }
0x1082   :  { %12899 = vmatprep.subr.bf16.mxu0 %v20875_v49  ;;  %v26683_v49 = vld [vmem:[%s28531_s3 + $0x480] ss:$12 sps:$4 sm:$0xff]  }
0x1087   :  { %12827 = vmatmul.mubr.bf16.gmra.mrb[168].mxu0 %v25053_v56  ;;  %v20873_v56 = vld [vmem:[%s28533_s2 + $0x3d8] ss:$12 sps:$4 sm:$0xff]  }
0x1088   :  { %13083 = vmatmul.mubr.bf16.gmra.mrb[176].mxu1 %v26129_v47  ;;  %12836 = vmatprep.mubr.bf16.mxu0 %v25281_v37  ;;  %v20879_v37 = vld [vmem:[%s28533_s2 + $0x3f4] ss:$12 sps:$4 sm:$0xff]  }
0x1089   :  { %13090 = vmatprep.mubr.bf16.mxu1 %v26357_v6  ;;  %12900 = vmatpush1.bf16.msra.mxu0 %v20873_v56  ;;  %v26688_v56 = vld [vmem:[%s28531_s3 + $0x49c] ss:$12 sps:$4 sm:$0xff]  }
0x108a   :  { %12901 = vmatprep.subr.bf16.mxu0 %v20879_v37  ;;  %v26693_v37 = vld [vmem:[%s28531_s3 + $0x488] ss:$12 sps:$4 sm:$0xff]  }
0x108f   :  { %12837 = vmatmul.mubr.bf16.gmra.mrb[172].mxu0 %v25277_v12  ;;  %v20877_v12 = vld [vmem:[%s28533_s2 + $0x3f0] ss:$12 sps:$4 sm:$0xff]  }
0x1090   :  { %13091 = vmatmul.mubr.bf16.gmra.mrb[180].mxu1 %v26353_v62  ;;  %12846 = vmatprep.mubr.bf16.mxu0 %v25595_v4  ;;  %v20876_v4 = vld [vmem:[%s28533_s2 + $0x440] ss:$12 sps:$4 sm:$0xff]  }
0x1091   :  { %12902 = vmatpush1.bf16.msra.mxu0 %v20877_v12  ;;  %19292 = vmatprep.subr.bf16.mxu1 %v20876_v4  ;;  %v28848_v12 = vld [vmem:[#allocation24_spill] sm:$0xff] }
0x1092   :  { %12903 = vmatprep.subr.bf16.mxu0 %v20882_v42  ;;  %19293 = vmatpush3.bf16.msra.mxu1 %v20876_v4  ;;  %v26700_v4 = vld [vmem:[%s28531_s3 + $0x560] ss:$12 sps:$4 sm:$0xff]   ;;  %v26707_v42 = vld [vmem:[%s28531_s3 + $0x498] ss:$12 sps:$4 sm:$0xff]  }
0x1093   :  { %19294 = vmatprep.subr.bf16.mxu1 %v20883_v40 }
0x1095   :  { %12904 = vmatpush1.bf16.msra.mxu0 %v20880_v7  ;;  %v28849_v7 = vld [vmem:[#allocation11_spill] sm:$0xff] }
0x1096   :  { %12905 = vmatprep.subr.bf16.mxu0 %v20886_v27  ;;  %19295 = vmatpush3.bf16.msra.mxu1 %v20883_v40  ;;  %v26714_v40 = vld [vmem:[%s28531_s3 + $0x4b4] ss:$12 sps:$4 sm:$0xff]  }
0x1097   :  { %12847 = vmatmul.mubr.bf16.gmra.mrb[176].mxu0 %v28841_v9  ;;  %19296 = vmatprep.subr.bf16.mxu1 %v20890_v33 }
0x1098   :  { %12856 = vmatprep.mubr.bf16.mxu0 %v28842_v34 }
0x1099   :  { %12906 = vmatpush1.bf16.msra.mxu0 %v20884_v19  ;;  %v26720_v19 = vld [vmem:[%s28531_s3 + $0x4a0] ss:$12 sps:$4 sm:$0xff]  }
0x109a   :  { %12907 = vmatprep.subr.bf16.mxu0 %v20889_v1  ;;  %19297 = vmatpush3.bf16.msra.mxu1 %v20890_v33  ;;  %v26729_v33 = vld [vmem:[%s28531_s3 + $0x4b0] ss:$12 sps:$4 sm:$0xff]  }
0x109b   :  { %13742 = vmatprep.subr.bf16.mxu1 %v26660_v50 }
0x109d   :  { %12908 = vmatpush1.bf16.msra.mxu0 %v20887_v5 }
0x109e   :  { %12909 = vmatprep.subr.bf16.mxu0 %v20893_v10 }
0x109f   :  { %12857 = vmatmul.mubr.bf16.gmra.mrb[180].mxu0 %v28843_v31  ;;  %v28847_v31 = vld [vmem:[#allocation22_spill] sm:$0xff] }
0x10a0   :  { %12866 = vmatprep.mubr.bf16.mxu0 %v26133_v45  ;;  %v20891_v45 = vld [vmem:[%s28533_s2 + $0x450] ss:$12 sps:$4 sm:$0xff]  }
0x10a1   :  { %12910 = vmatpush1.bf16.msra.mxu0 %v20891_v45 }
0x10a7   :  { %12867 = vmatmul.mubr.bf16.gmra.mrb[184].mxu0 %v26129_v47  ;;  %v20896_v47 = vld [vmem:[%s28533_s2 + $0x46c] ss:$12 sps:$4 sm:$0xff]  }
0x10a8   :  { %12876 = vmatprep.mubr.bf16.mxu0 %v26357_v6  ;;  %12911 = vmatprep.subr.bf16.mxu0 %v20896_v47  ;;  %v26667_v6 = vld [vmem:[%s28531_s3 + $0x548] ss:$12 sps:$4 sm:$0xff]  }
0x10a9   :  { %12912 = vmatpush1.bf16.msra.mxu0 %v20894_v32  ;;  %v26735_v32 = vld [vmem:[%s28531_s3 + $0x4cc] ss:$12 sps:$4 sm:$0xff]  }
0x10aa   :  { %18627 = vmatprep.subr.bf16.mxu0 %v26667_v6 }
0x10af   :  { %12877 = vmatmul.mubr.bf16.gmra.mrb[188].mxu0 %v26353_v62 }
0x10f2   :  { %v18532_v60 = vpop.f32.mrb[156].mxu0 }
0x10f3   :  { %v18533_v55 = vpop.f32.mrb[157].mxu0 }
0x10f4   :  { %v18534_v30 = vadd.f32 %v18533_v55, %v18532_v60  ;;  %v18535_v38 = vpop.f32.mrb[158].mxu0  ;;  %v26743_v60 = vld [vmem:[%s28531_s3 + $0x578] ss:$12 sps:$4 sm:$0xff]  }
0x10f5   :  { %v18536_v26 = vpop.f32.mrb[159].mxu0  ;;  %v28850_v55 = vld [vmem:[#allocation7_spill] sm:$0xff] }
0x10f6   :  { %v18537_v59 = vadd.f32 %v18536_v26, %v18535_v38  ;;  %v28851_v38 = vld [vmem:[#allocation21_spill] sm:$0xff] }
0x10f7   :  { %v26757_v26 = vld [vmem:[%s28531_s3 + $0x4c8] ss:$12 sps:$4 sm:$0xff]  }
0x1112   :  { %v12152_v52 = vpop.f32.mrb[152].mxu1  ;;  %v12236_v46 = vpop.f32.mrb[160].mxu0 }
0x1113   :  { %v12243_v62 = vadd.f32 %v12152_v52, %v11589_v58  ;;  %v12237_v21 = vadd.f32 %v18534_v30, %v12236_v46  ;;  %v12154_v13 = vpop.f32.mrb[153].mxu1  ;;  %v19280_v36 = vpop.f32.mrb[161].mxu0  ;;  %v26750_v30 = vld [vmem:[%s28531_s3 + $0x4b8] ss:$12 sps:$4 sm:$0xff]  }
0x1114   :  { %v12244_v39 = vadd.f32 %v12154_v13, %v11590_v16  ;;  %v12156_v43 = vpop.f32.mrb[154].mxu1  ;;  %v12239_v8 = vpop.f32.mrb[162].mxu0  ;;  %v26779_v16 = vld [vmem:[%s28531_s3 + $0x4e0] ss:$12 sps:$4 sm:$0xff]   ;;  %v26800_v13 = vld [vmem:[%s28531_s3 + $0x5a8] ss:$12 sps:$4 sm:$0xff]  }
0x1115   :  { %21197 = vtanh.f32 %v12243_v62  ;;  %v12245_v11 = vadd.f32 %v12237_v21, %v11591_v28  ;;  %v12246_v61 = vadd.f32 %v12156_v43, %v11592_v53  ;;  %v12240_v25 = vadd.f32 %v18537_v59, %v12239_v8  ;;  %v12158_v3 = vpop.f32.mrb[155].mxu1  ;;  %v19281_v41 = vpop.f32.mrb[163].mxu0  ;;  %v26762_v59 = vld [vmem:[%s28531_s3 + $0x590] ss:$12 sps:$4 sm:$0xff]   ;;  %v26807_v36 = vld [vmem:[%s28531_s3 + $0x4f8] ss:$12 sps:$4 sm:$0xff]  }
0x1116   :  { %21199 = vtanh.f32 %v12244_v39  ;;  %v12247_v0 = vadd.f32 %v12158_v3, %v11593_v63  ;;  %v26793_v21 = vld [vmem:[%s28531_s3 + $0x4d0] ss:$12 sps:$4 sm:$0xff]   ;;  %v26814_v53 = vld [vmem:[%s28531_s3 + $0x514] ss:$12 sps:$4 sm:$0xff]  }
0x1117   :  { %21201 = vtanh.f32 %v12245_v11  ;;  %v12248_v54 = vadd.f32 %v12240_v25, %v11594_v22  ;;  %v26820_v43 = vld [vmem:[%s28531_s3 + $0x4e8] ss:$12 sps:$4 sm:$0xff]   ;;  %v26829_v11 = vld [vmem:[%s28531_s3 + $0x510] ss:$12 sps:$4 sm:$0xff]   ;;  %v26835_v25 = vld [vmem:[%s28531_s3 + $0x52c] ss:$12 sps:$4 sm:$0xff]  }
0x1118   :  { %21203 = vtanh.f32 %v12246_v61  ;;  %v26840_v3 = vld [vmem:[%s28531_s3 + $0x5c0] ss:$12 sps:$4 sm:$0xff]  }
0x1119   :  { %21205 = vtanh.f32 %v12248_v54  ;;  %v26855_v54 = vld [vmem:[%s28531_s3 + $0x5d8] ss:$12 sps:$4 sm:$0xff]  }
0x111a   :  { %21207 = vtanh.f32 %v12247_v0  ;;  %v26848_v0 = vld [vmem:[%s28531_s3 + $0x500] ss:$12 sps:$4 sm:$0xff]  }
0x111f   :  { %v21198_v29 = vpop.eup %21197 }
0x1120   :  { %v21200_v24 = vpop.eup %21199 }
0x1121   :  { %v21202_v9 = vpop.eup %21201 }
0x1122   :  { %v21204_v20 = vpop.eup %21203 }
0x1123   :  { %v21206_v48 = vpop.eup %21205  ;;  %v12255_v34 = vpack.c.bf16 %v21204_v20, %v21198_v29  ;;  %v26861_v29 = vld [vmem:[%s28531_s3 + $0x528] ss:$12 sps:$4 sm:$0xff]   ;;  %v26875_v20 = vld [vmem:[%s28531_s3 + $0x518] ss:$12 sps:$4 sm:$0xff]  }
0x1124   :  { %v21208_v17 = vpop.eup %21207  ;;  %v26676_v2 = vpack.c.bf16 %v21206_v48, %v21202_v9  ;;  %28852 = vst [vmem:[#allocation25_spill] sm:$0xff] %v26861_v29 }
0x1125   :  { %v12256_v14 = vpack.c.bf16 %v21208_v17, %v21200_v24  ;;  %v26868_v24 = vld [vmem:[%s28531_s3 + $0x544] ss:$12 sps:$4 sm:$0xff]  }
0x1126   :  { %28853 = vst [vmem:[#allocation8_spill] sm:$0xff] %v26868_v24 }
0x1127   :  { %12886 = vmatprep.mubr.bf16.mxu0 %v12256_v14  ;;  %13098 = vmatprep.mubr.bf16.mxu1 %v12256_v14 }
0x1128   :  { %12887 = vmatmul.mubr.bf16.gmra.mrb[192].mxu0 %v12255_v34  ;;  %13099 = vmatmul.mubr.bf16.gmra.mrb[184].mxu1 %v12255_v34  ;;  %v26882_v34 = vld [vmem:[%s28531_s3 + $0x5f0] ss:$12 sps:$4 sm:$0xff]  }
0x1129   :  { %19298 = vmatprep.mubr.bf16.mxu1 %v28847_v31  ;;  %12929 = vmatprep.mubr.bf16.mxu0 %v28772_v18  ;;  %28854 = vst [vmem:[#allocation13_spill] sm:$0xff] %v26882_v34 }
0x1130   :  { %12930 = vmatmul.mubr.bf16.vlgmr.msra.gmra.mrb[164].mxu0 %v28847_v31  ;;  %19299 = vmatmul.mubr.bf16.vlgmr.msra.gmra.mrb[188].mxu1 %v28848_v12  ;;  %v26890_v31 = vld [vmem:[%s28531_s3 + $0x540] ss:$12 sps:$4 sm:$0xff]  }
0x1131   :  { %13743 = vmatpush1.bf16.msra.mxu1 %v26683_v49  ;;  %19302 = vmatprep.mubr.bf16.mxu1 %v28849_v7  ;;  %28855 = vst [vmem:[#allocation15_spill] sm:$0xff] %v26890_v31 }
0x1132   :  { %13744 = vmatprep.subr.bf16.mxu1 %v26688_v56  ;;  %12939 = vmatprep.mubr.bf16.mxu0 %v28772_v18 }
0x1133   :  { %v18563_v27 = vpop.f32.mrb[156].mxu1  ;;  %18628 = vmatpush3.bf16.msra.mxu0 %v26693_v37 }
0x1134   :  { %v18564_v1 = vpop.f32.mrb[157].mxu1  ;;  %18629 = vmatprep.subr.bf16.mxu0 %v26700_v4 }
0x1135   :  { %13745 = vmatpush1.bf16.msra.mxu1 %v26707_v42  ;;  %v26724_v5 = vadd.f32 %v18564_v1, %v18563_v27  ;;  %v18566_v10 = vpop.f32.mrb[158].mxu1  ;;  %v26904_v1 = vld [vmem:[%s28531_s3 + $0x530] ss:$12 sps:$4 sm:$0xff]  }
0x1136   :  { %v18567_v45 = vpop.f32.mrb[159].mxu1  ;;  %13746 = vmatprep.subr.bf16.mxu1 %v26714_v40  ;;  %28857 = vst [vmem:[#allocation19_spill] sm:$0xff] %v26904_v1 }
0x1137   :  { %v26737_v47 = vadd.f32 %v18567_v45, %v18566_v10  ;;  %18630 = vmatpush3.bf16.msra.mxu0 %v26720_v19  ;;  %v26912_v10 = vld [vmem:[%s28531_s3 + $0x558] ss:$12 sps:$4 sm:$0xff]   ;;  %v26919_v45 = vld [vmem:[%s28531_s3 + $0x574] ss:$12 sps:$4 sm:$0xff]  }
0x1138   :  { %12940 = vmatmul.mubr.bf16.gmra.mrb[168].mxu0 %v28848_v12  ;;  %19303 = vmatmul.mubr.bf16.gmra.mrb[192].mxu1 %v28850_v55  ;;  %28858 = vst [vmem:[#allocation23_spill] sm:$0xff] %v26912_v10  ;;  %28859 = vst [vmem:[#allocation20_spill] sm:$0xff] %v26919_v45 }
0x1139   :  { %13747 = vmatpush1.bf16.msra.mxu1 %v26729_v33  ;;  %19306 = vmatprep.mubr.bf16.mxu1 %v28851_v38 }
0x113a   :  { %13748 = vmatprep.subr.bf16.mxu1 %v26735_v32  ;;  %12949 = vmatprep.mubr.bf16.mxu0 %v28772_v18 }
0x113b   :  { %v18569_v58 = vpop.f32.mrb[160].mxu1  ;;  %18631 = vmatprep.subr.bf16.mxu0 %v26743_v60 }
0x113c   :  { %v18570_v52 = vpop.f32.mrb[161].mxu1  ;;  %18632 = vmatpush3.bf16.msra.mxu0 %v26750_v30 }
0x113d   :  { %13749 = vmatpush1.bf16.msra.mxu1 %v26757_v26  ;;  %v26774_v46 = vadd.f32 %v18570_v52, %v18569_v58  ;;  %v18572_v57 = vpop.f32.mrb[162].mxu1  ;;  %18633 = vmatprep.subr.bf16.mxu0 %v26762_v59 }
0x113e   :  { %v18573_v62 = vpop.f32.mrb[163].mxu1  ;;  %13750 = vmatprep.subr.bf16.mxu1 %v26769_v15 }
0x113f   :  { %v26788_v28 = vadd.f32 %v18573_v62, %v18572_v57  ;;  %v26929_v57 = vld [vmem:[%s28531_s3 + $0x570] ss:$12 sps:$4 sm:$0xff]  }
0x1140   :  { %12950 = vmatmul.mubr.bf16.gmra.mrb[172].mxu0 %v28849_v7  ;;  %19307 = vmatmul.mubr.bf16.gmra.mrb[196].mxu1 %v26131_v51  ;;  %v26896_v7 = vld [vmem:[%s28531_s3 + $0x55c] ss:$12 sps:$4 sm:$0xff]   ;;  %28861 = vst [vmem:[#allocation14_spill] sm:$0xff] %v26929_v57 }
0x1141   :  { %13751 = vmatpush1.bf16.msra.mxu1 %v26779_v16  ;;  %19310 = vmatprep.mubr.bf16.mxu1 %v26355_v23  ;;  %28856 = vst [vmem:[#allocation16_spill] sm:$0xff] %v26896_v7 }
0x1142   :  { %13752 = vmatprep.subr.bf16.mxu1 %v26786_v35  ;;  %12959 = vmatprep.mubr.bf16.mxu0 %v28772_v18 }
0x1143   :  { %v18575_v39 = vpop.f32.mrb[164].mxu1  ;;  %18634 = vmatpush3.bf16.msra.mxu0 %v26793_v21 }
0x1144   :  { %v18576_v22 = vpop.f32.mrb[165].mxu1  ;;  %18635 = vmatprep.subr.bf16.mxu0 %v26800_v13 }
0x1145   :  { %13753 = vmatpush1.bf16.msra.mxu1 %v26807_v36  ;;  %v26824_v8 = vadd.f32 %v18576_v22, %v18575_v39  ;;  %v18578_v63 = vpop.f32.mrb[166].mxu1  ;;  %v26935_v39 = vld [vmem:[%s28531_s3 + $0x58c] ss:$12 sps:$4 sm:$0xff]  }
0x1146   :  { %v18579_v61 = vpop.f32.mrb[167].mxu1  ;;  %13754 = vmatprep.subr.bf16.mxu1 %v26814_v53  ;;  %28862 = vst [vmem:[#allocation18_spill] sm:$0xff] %v26935_v39 }
0x1147   :  { %v26842_v41 = vadd.f32 %v18579_v61, %v18578_v63  ;;  %18636 = vmatpush3.bf16.msra.mxu0 %v26820_v43  ;;  %v26944_v63 = vld [vmem:[%s28531_s3 + $0x588] ss:$12 sps:$4 sm:$0xff]   ;;  %v26951_v61 = vld [vmem:[%s28531_s3 + $0x5a4] ss:$12 sps:$4 sm:$0xff]  }
0x1148   :  { %12960 = vmatmul.mubr.bf16.gmra.mrb[176].mxu0 %v28850_v55  ;;  %19311 = vmatmul.mubr.bf16.gmra.mrb[200].mxu1 %v26676_v2  ;;  %28864 = vst [vmem:[#allocation17_spill] sm:$0xff] %v26944_v63  ;;  %28865 = vst [vmem:[#allocation10_spill] sm:$0xff] %v26951_v61 }
0x1149   :  { %13755 = vmatpush1.bf16.msra.mxu1 %v26829_v11  ;;  %12969 = vmatprep.mubr.bf16.mxu0 %v28772_v18 }
0x114a   :  { %13756 = vmatprep.subr.bf16.mxu1 %v26835_v25  ;;  %18637 = vmatprep.subr.bf16.mxu0 %v26840_v3 }
0x114b   :  { %v18581_v9 = vpop.f32.mrb[168].mxu1  ;;  %18638 = vmatpush3.bf16.msra.mxu0 %v26848_v0  ;;  %13774 = vmatprep.mubr.bf16.mxu1 %v28772_v18 }
0x114c   :  { %v18582_v48 = vpop.f32.mrb[169].mxu1  ;;  %18639 = vmatprep.subr.bf16.mxu0 %v26855_v54 }
0x114d   :  { %13757 = vmatpush1.bf16.msra.mxu1 %v26861_v29  ;;  %v26885_v17 = vadd.f32 %v18582_v48, %v18581_v9  ;;  %v18584_v14 = vpop.f32.mrb[170].mxu1 }
0x114e   :  { %v18585_v12 = vpop.f32.mrb[171].mxu1  ;;  %13758 = vmatprep.subr.bf16.mxu1 %v26868_v24 }
0x114f   :  { %v26898_v27 = vadd.f32 %v18585_v12, %v18584_v14  ;;  %18640 = vmatpush3.bf16.msra.mxu0 %v26875_v20  ;;  %v26959_v12 = vld [vmem:[%s28531_s3 + $0x5a0] ss:$12 sps:$4 sm:$0xff]  }
0x1150   :  { %12970 = vmatmul.mubr.bf16.gmra.mrb[180].mxu0 %v28851_v38  ;;  %18641 = vmatprep.subr.bf16.mxu0 %v26882_v34  ;;  %28867 = vst [vmem:[#allocation24_spill] sm:$0xff] %v26959_v12 }
0x1151   :  { %13759 = vmatpush1.bf16.msra.mxu1 %v26890_v31  ;;  %12979 = vmatprep.mubr.bf16.mxu0 %v28772_v18 }
0x1152   :  { %13760 = vmatprep.subr.bf16.mxu1 %v26896_v7 }
0x1153   :  { %v18587_v55 = vpop.f32.mrb[172].mxu1  ;;  %18642 = vmatpush3.bf16.msra.mxu0 %v26904_v1 }
0x1154   :  { %v18588_v38 = vpop.f32.mrb[173].mxu1  ;;  %19314 = vmatprep.subr.bf16.mxu0 %v28771_v44 }
0x1155   :  { %13761 = vmatpush1.bf16.msra.mxu1 %v26912_v10  ;;  %v26924_v58 = vadd.f32 %v18588_v38, %v18587_v55  ;;  %v18590_v52 = vpop.f32.mrb[174].mxu1  ;;  %v26965_v38 = vld [vmem:[%s28531_s3 + $0x5bc] ss:$12 sps:$4 sm:$0xff]  }
0x1156   :  { %v18591_v62 = vpop.f32.mrb[175].mxu1  ;;  %13762 = vmatprep.subr.bf16.mxu1 %v26919_v45  ;;  %28868 = vst [vmem:[#allocation11_spill] sm:$0xff] %v26965_v38 }
0x1157   :  { %28860 = vst [vmem:[#allocation12_spill] sm:$0xff] %v26924_v58  ;;  %v26937_v22 = vadd.f32 %v18591_v62, %v18590_v52  ;;  %v26974_v62 = vld [vmem:[%s28531_s3 + $0x5b8] ss:$12 sps:$4 sm:$0xff]  }
0x1158   :  { %12980 = vmatmul.mubr.bf16.gmra.mrb[184].mxu0 %v26131_v51  ;;  %28870 = vst [vmem:[#allocation21_spill] sm:$0xff] %v26974_v62  ;;  %v26995_v58 = vld [vmem:[%s28531_s3 + $0x5ec] ss:$12 sps:$4 sm:$0xff]  }
0x1159   :  { %28863 = vst [vmem:[#allocation9_spill] sm:$0xff] %v26937_v22  ;;  %13763 = vmatpush1.bf16.msra.mxu1 %v26929_v57  ;;  %12989 = vmatprep.mubr.bf16.mxu0 %v28772_v18  ;;  %v26989_v22 = vld [vmem:[%s28531_s3 + $0x5d0] ss:$12 sps:$4 sm:$0xff]   ;;  %28874 = vst [vmem:[#allocation29_spill] sm:$0xff] %v26995_v58 }
0x115a   :  { %13764 = vmatprep.subr.bf16.mxu1 %v26935_v39  ;;  %28873 = vst [vmem:[#allocation28_spill] sm:$0xff] %v26989_v22 }
0x115b   :  { %v18593_v9 = vpop.f32.mrb[176].mxu1 }
0x115c   :  { %v18594_v48 = vpop.f32.mrb[177].mxu1 }
0x115d   :  { %13765 = vmatpush1.bf16.msra.mxu1 %v26944_v63  ;;  %v26954_v51 = vadd.f32 %v18594_v48, %v18593_v9  ;;  %v18596_v14 = vpop.f32.mrb[178].mxu1  ;;  %v26981_v9 = vld [vmem:[%s28531_s3 + $0x5d4] ss:$12 sps:$4 sm:$0xff]  }
0x115e   :  { %v18597_v55 = vpop.f32.mrb[179].mxu1  ;;  %13766 = vmatprep.subr.bf16.mxu1 %v26951_v61  ;;  %28871 = vst [vmem:[#allocation26_spill] sm:$0xff] %v26981_v9 }
0x115f   :  { %28866 = vst [vmem:[#allocation22_spill] sm:$0xff] %v26954_v51  ;;  %v26967_v52 = vadd.f32 %v18597_v55, %v18596_v14 }
0x1160   :  { %12990 = vmatmul.mubr.bf16.gmra.mrb[188].mxu0 %v26355_v23 }
0x1161   :  { %28869 = vst [vmem:[#allocation7_spill] sm:$0xff] %v26967_v52  ;;  %13767 = vmatpush1.bf16.msra.mxu1 %v26959_v12  ;;  %12999 = vmatprep.mubr.bf16.mxu0 %v28772_v18 }
0x1162   :  { %13768 = vmatprep.subr.bf16.mxu1 %v26965_v38 }
0x1163   :  { %v18599_v48 = vpop.f32.mrb[180].mxu1 }
0x1164   :  { %v18600_v14 = vpop.f32.mrb[181].mxu1 }
0x1165   :  { %13769 = vmatpush1.bf16.msra.mxu1 %v26974_v62  ;;  %v26984_v23 = vadd.f32 %v18600_v14, %v18599_v48  ;;  %v18602_v55 = vpop.f32.mrb[182].mxu1  ;;  %v27004_v48 = vld [vmem:[%s28531_s3 + $0x5e8] ss:$12 sps:$4 sm:$0xff]   ;;  %v27011_v14 = vld [vmem:[%s28531_s3 + $0x604] ss:$12 sps:$4 sm:$0xff]  }
0x1166   :  { %v18603_v52 = vpop.f32.mrb[183].mxu1  ;;  %13770 = vmatprep.subr.bf16.mxu1 %v26981_v9  ;;  %28876 = vst [vmem:[#allocation31_spill] sm:$0xff] %v27004_v48  ;;  %28877 = vst [vmem:[#allocation32_spill] sm:$0xff] %v27011_v14 }
0x1167   :  { %28872 = vst [vmem:[#allocation27_spill] sm:$0xff] %v26984_v23  ;;  %v26997_v51 = vadd.f32 %v18603_v52, %v18602_v55  ;;  %v27022_v52 = vld [vmem:[%s28531_s3 + $0x608] ss:$12 sps:$4 sm:$0xff]   ;;  %v27042_v23 = vld [vmem:[%s28531_s3 + $0x620] ss:$12 sps:$4 sm:$0xff]  }
0x1168   :  { %13000 = vmatmul.mubr.bf16.gmra.mrb[192].mxu0 %v26676_v2  ;;  %v27017_v2 = vld [vmem:[%s28531_s3 + $0x600] ss:$12 sps:$4 sm:$0xff]   ;;  %28879 = vst [vmem:[#allocation34_spill] sm:$0xff] %v27022_v52  ;;  %v27028_v55 = vld [vmem:[%s28531_s3 + $0x61c] ss:$12 sps:$4 sm:$0xff]   ;;  %28882 = vst [vmem:[#allocation37_spill] sm:$0xff] %v27042_v23 }
0x1169   :  { %28875 = vst [vmem:[#allocation30_spill] sm:$0xff] %v26997_v51  ;;  %13771 = vmatpush1.bf16.msra.mxu1 %v26989_v22  ;;  %13860 = vmatprep.mubr.bf16.mxu0 %v28772_v18  ;;  %28878 = vst [vmem:[#allocation33_spill] sm:$0xff] %v27017_v2  ;;  %v27037_v51 = vld [vmem:[%s28531_s3 + $0x618] ss:$12 sps:$4 sm:$0xff]  }
0x116a   :  { %13772 = vmatprep.subr.bf16.mxu1 %v26995_v58  ;;  %28880 = vst [vmem:[#allocation35_spill] sm:$0xff] %v27028_v55  ;;  %28881 = vst [vmem:[#allocation36_spill] sm:$0xff] %v27037_v51 }
0x116d   :  { %13773 = vmatpush1.bf16.msra.mxu1 %v27004_v48 }
0x116e   :  { %13785 = vmatprep.subr.bf16.mxu1 %v27011_v14 }
0x1170   :  { %13775 = vmatmul.mubr.bf16.vlgmr.msra.gmra.mrb[204].mxu1 %v28772_v18  ;;  %13861 = vmatmul.mubr.bf16.vlgmr.msra.gmra.mrb[196].mxu0 %v28772_v18 }
0x1171   :  { %13786 = vmatpush1.bf16.msra.mxu1 %v27017_v2  ;;  %19315 = vmatpush3.bf16.msra.mxu0 %v27022_v52  ;;  %v27049_v2 = vld [vmem:[%s28531_s3 + $0x634] ss:$12 sps:$4 sm:$0xff]   ;;  %v27064_v52 = vld [vmem:[%s28531_s3 + $0x638] ss:$12 sps:$4 sm:$0xff]  }
0x1172   :  { %13787 = vmatprep.subr.bf16.mxu1 %v27028_v55  ;;  %19316 = vmatprep.subr.bf16.mxu0 %v28771_v44  ;;  %28883 = vst [vmem:[#allocation38_spill] sm:$0xff] %v27049_v2  ;;  %v27059_v55 = vld [vmem:[%s28531_s3 + $0x630] ss:$12 sps:$4 sm:$0xff]   ;;  %28885 = vst [vmem:[#allocation40_spill] sm:$0xff] %v27064_v52 }
0x1173   :  { %13817 = vmatprep.mubr.bf16.mxu1 %v28772_v18  ;;  %19330 = vmatprep.mubr.msk.bf16.mxu0 %vm21467_vm1, %v28771_v44  ;;  %28884 = vst [vmem:[#allocation39_spill] sm:$0xff] %v27059_v55 }
0x1175   :  { %13788 = vmatpush1.bf16.msra.mxu1 %v27037_v51  ;;  %19317 = vmatpush3.bf16.msra.mxu0 %v27042_v23  ;;  %v27071_v51 = vld [vmem:[%s28531_s3 + $0x64c] ss:$12 sps:$4 sm:$0xff]   ;;  %v27078_v23 = vld [vmem:[%s28531_s3 + $0x648] ss:$12 sps:$4 sm:$0xff]  }
0x1176   :  { %13789 = vmatprep.subr.bf16.mxu1 %v27049_v2  ;;  %19318 = vmatprep.subr.bf16.mxu0 %v28771_v44  ;;  %28886 = vst [vmem:[#allocation41_spill] sm:$0xff] %v27071_v51  ;;  %28887 = vst [vmem:[#allocation42_spill] sm:$0xff] %v27078_v23  ;;  %v27083_v2 = vld [vmem:[%s28531_s3 + $0x650] ss:$12 sps:$4 sm:$0xff]  }
0x1177   :  { %28888 = vst [vmem:[#allocation43_spill] sm:$0xff] %v27083_v2 }
0x1179   :  { %13790 = vmatpush1.bf16.msra.mxu1 %v27059_v55  ;;  %19319 = vmatpush3.bf16.msra.mxu0 %v27064_v52  ;;  %v27090_v55 = vld [vmem:[%s28531_s3 + $0x664] ss:$12 sps:$4 sm:$0xff]   ;;  %v27097_v52 = vld [vmem:[%s28531_s3 + $0x660] ss:$12 sps:$4 sm:$0xff]  }
0x117a   :  { %13791 = vmatprep.subr.bf16.mxu1 %v27071_v51  ;;  %19320 = vmatprep.subr.bf16.mxu0 %v28771_v44  ;;  %28889 = vst [vmem:[#allocation44_spill] sm:$0xff] %v27090_v55  ;;  %28890 = vst [vmem:[#allocation45_spill] sm:$0xff] %v27097_v52  ;;  %v27102_v51 = vld [vmem:[%s28531_s3 + $0x668] ss:$12 sps:$4 sm:$0xff]  }
0x117b   :  { %28891 = vst [vmem:[#allocation46_spill] sm:$0xff] %v27102_v51 }
0x117d   :  { %13792 = vmatpush1.bf16.msra.mxu1 %v27078_v23  ;;  %19321 = vmatpush3.bf16.msra.mxu0 %v27083_v2  ;;  %v27109_v23 = vld [vmem:[%s28531_s3 + $0x67c] ss:$12 sps:$4 sm:$0xff]   ;;  %v27116_v2 = vld [vmem:[%s28531_s3 + $0x678] ss:$12 sps:$4 sm:$0xff]  }
0x117e   :  { %13793 = vmatprep.subr.bf16.mxu1 %v27090_v55  ;;  %19322 = vmatprep.subr.bf16.mxu0 %v28771_v44  ;;  %28892 = vst [vmem:[#allocation47_spill] sm:$0xff] %v27109_v23  ;;  %28893 = vst [vmem:[#allocation48_spill] sm:$0xff] %v27116_v2  ;;  %v27121_v55 = vld [vmem:[%s28531_s3 + $0x680] ss:$12 sps:$4 sm:$0xff]  }
0x117f   :  { %28894 = vst [vmem:[#allocation49_spill] sm:$0xff] %v27121_v55 }
0x1181   :  { %13794 = vmatpush1.bf16.msra.mxu1 %v27097_v52  ;;  %19323 = vmatpush3.bf16.msra.mxu0 %v27102_v51  ;;  %v27128_v52 = vld [vmem:[%s28531_s3 + $0x694] ss:$12 sps:$4 sm:$0xff]   ;;  %v27135_v51 = vld [vmem:[%s28531_s3 + $0x690] ss:$12 sps:$4 sm:$0xff]  }
0x1182   :  { %13795 = vmatprep.subr.bf16.mxu1 %v27109_v23  ;;  %19324 = vmatprep.subr.bf16.mxu0 %v28771_v44  ;;  %28895 = vst [vmem:[#allocation50_spill] sm:$0xff] %v27128_v52  ;;  %v27140_v23 = vld [vmem:[%s28531_s3 + $0x698] ss:$12 sps:$4 sm:$0xff]  }
0x1185   :  { %13796 = vmatpush1.bf16.msra.mxu1 %v27116_v2  ;;  %19325 = vmatpush3.bf16.msra.mxu0 %v27121_v55  ;;  %v27147_v2 = vld [vmem:[%s28531_s3 + $0x6ac] ss:$12 sps:$4 sm:$0xff]   ;;  %v27154_v55 = vld [vmem:[%s28531_s3 + $0x6a8] ss:$12 sps:$4 sm:$0xff]  }
0x1186   :  { %13797 = vmatprep.subr.bf16.mxu1 %v27128_v52  ;;  %19326 = vmatprep.subr.bf16.mxu0 %v28771_v44  ;;  %v27159_v52 = vld [vmem:[%s28531_s3 + $0x6b0] ss:$12 sps:$4 sm:$0xff]  }
0x1189   :  { %13798 = vmatpush1.bf16.msra.mxu1 %v27135_v51  ;;  %19327 = vmatpush3.bf16.msra.mxu0 %v27140_v23 }
0x118a   :  { %13799 = vmatprep.subr.bf16.mxu1 %v27147_v2  ;;  %19328 = vmatprep.subr.bf16.mxu0 %v28771_v44 }
0x118d   :  { %13800 = vmatpush1.bf16.msra.mxu1 %v27154_v55  ;;  %19329 = vmatpush3.bf16.msra.mxu0 %v27159_v52 }
0x118e   :  { %13934 = vmatprep.subr.bf16.mxu1 %v26660_v50  ;;  %18658 = vmatprep.subr.bf16.mxu0 %v26667_v6 }
0x1190   :  { %13818 = vmatmul.mubr.bf16.vlgmr.msra.gmra.mrb[204].mxu1 %v28772_v18  ;;  %19331 = vmatmul.mubr.bf16.vlgmr.msra.gmra.mrb[200].mxu0 %v28772_v18 }
0x1191   :  { %13935 = vmatpush1.bf16.msra.mxu1 %v26683_v49  ;;  %18659 = vmatpush3.bf16.msra.mxu0 %v26693_v37 }
0x1192   :  { %13936 = vmatprep.subr.bf16.mxu1 %v26688_v56  ;;  %18660 = vmatprep.subr.bf16.mxu0 %v26700_v4 }
0x1195   :  { %13937 = vmatpush1.bf16.msra.mxu1 %v26707_v42  ;;  %18661 = vmatpush3.bf16.msra.mxu0 %v26720_v19 }
0x1196   :  { %13938 = vmatprep.subr.bf16.mxu1 %v26714_v40  ;;  %18662 = vmatprep.subr.bf16.mxu0 %v26743_v60 }
0x1199   :  { %13939 = vmatpush1.bf16.msra.mxu1 %v26729_v33  ;;  %18663 = vmatpush3.bf16.msra.mxu0 %v26750_v30 }
0x119a   :  { %13940 = vmatprep.subr.bf16.mxu1 %v26735_v32  ;;  %18664 = vmatprep.subr.bf16.mxu0 %v26762_v59 }
0x119d   :  { %13941 = vmatpush1.bf16.msra.mxu1 %v26757_v26  ;;  %18665 = vmatpush3.bf16.msra.mxu0 %v26793_v21 }
0x119e   :  { %13942 = vmatprep.subr.bf16.mxu1 %v26769_v15  ;;  %18666 = vmatprep.subr.bf16.mxu0 %v26800_v13 }
0x11a1   :  { %13943 = vmatpush1.bf16.msra.mxu1 %v26779_v16  ;;  %18667 = vmatpush3.bf16.msra.mxu0 %v26820_v43 }
0x11a2   :  { %13944 = vmatprep.subr.bf16.mxu1 %v26786_v35  ;;  %18668 = vmatprep.subr.bf16.mxu0 %v26840_v3 }
0x11a5   :  { %13945 = vmatpush1.bf16.msra.mxu1 %v26807_v36  ;;  %18669 = vmatpush3.bf16.msra.mxu0 %v26848_v0 }
0x11a6   :  { %13946 = vmatprep.subr.bf16.mxu1 %v26814_v53  ;;  %18670 = vmatprep.subr.bf16.mxu0 %v26855_v54 }
0x11a9   :  { %13947 = vmatpush1.bf16.msra.mxu1 %v26829_v11  ;;  %18671 = vmatpush3.bf16.msra.mxu0 %v26875_v20 }
0x11aa   :  { %13948 = vmatprep.subr.bf16.mxu1 %v26835_v25  ;;  %18672 = vmatprep.subr.bf16.mxu0 %v26882_v34 }
0x11ad   :  { %13949 = vmatpush1.bf16.msra.mxu1 %v26861_v29  ;;  %18673 = vmatpush3.bf16.msra.mxu0 %v26904_v1 }
0x11ae   :  { %13950 = vmatprep.subr.bf16.mxu1 %v26868_v24  ;;  %19334 = vmatprep.subr.bf16.mxu0 %v28771_v44 }
0x11b1   :  { %13951 = vmatpush1.bf16.msra.mxu1 %v26890_v31 }
0x11b2   :  { %13952 = vmatprep.subr.bf16.mxu1 %v26896_v7 }
0x11b5   :  { %13953 = vmatpush1.bf16.msra.mxu1 %v26912_v10 }
0x11b6   :  { %13954 = vmatprep.subr.bf16.mxu1 %v26919_v45  ;;  %v28898_v45 = vld [vmem:[#allocation5_spill] sm:$0xff] }
0x11b9   :  { %13955 = vmatpush1.bf16.msra.mxu1 %v26929_v57 }
0x11ba   :  { %13956 = vmatprep.subr.bf16.mxu1 %v26935_v39 }
0x11bd   :  { %13957 = vmatpush1.bf16.msra.mxu1 %v26944_v63 }
0x11be   :  { %13958 = vmatprep.subr.bf16.mxu1 %v26951_v61 }
0x11c1   :  { %13959 = vmatpush1.bf16.msra.mxu1 %v26959_v12  ;;  %v17597_v12 = vld [vmem:[%s28532_s4 + $0x6] sm:$0x7] }
0x11c2   :  { %13960 = vmatprep.subr.bf16.mxu1 %v26965_v38  ;;  %v27233_v10 = vrot.slane %v17597_v12, %v28898_v45 }
0x11c5   :  { %13961 = vmatpush1.bf16.msra.mxu1 %v26974_v62 }
0x11c6   :  { %13962 = vmatprep.subr.bf16.mxu1 %v26981_v9  ;;  %v28896_v9 = vld [vmem:[#allocation6_spill] sm:$0xff] }
0x11c9   :  { %13963 = vmatpush1.bf16.msra.mxu1 %v26989_v22  ;;  %v27225_v22 = vrot.slane %v17597_v12, %v28896_v9 }
0x11ca   :  { %13964 = vmatprep.subr.bf16.mxu1 %v26995_v58  ;;  %v28897_v58 = vld [vmem:[#allocation4_spill] sm:$0xff] }
0x11cb   :  { %v27228_v39 = vrot.slane %v17597_v12, %v28897_v58  ;;  %v13056_v9 = vadd.f32 %v26788_v28, %v27225_v22 }
0x11cd   :  { %13965 = vmatpush1.bf16.msra.mxu1 %v27004_v48 }
0x11ce   :  { %13977 = vmatprep.subr.bf16.mxu1 %v27011_v14  ;;  %v13053_v14 = vadd.f32 %v26774_v46, %v27225_v22  ;;  %v13048_v46 = vadd.f32 %v26737_v47, %v27225_v22  ;;  %v13069_v47 = vadd.f32 %v26885_v17, %v27225_v22  ;;  %v13064_v17 = vadd.f32 %v26842_v41, %v27225_v22 }
0x11fb   :  { %v18605_v50 = vpop.f32.mrb[184].mxu1 }
0x11fc   :  { %v18606_v6 = vpop.f32.mrb[185].mxu1 }
0x11fd   :  { %v27220_v61 = vadd.f32 %v18606_v6, %v18605_v50  ;;  %v18608_v38 = vpop.f32.mrb[186].mxu1  ;;  %v13045_v50 = vadd.f32 %v26724_v5, %v27225_v22 }
0x11fe   :  { %v18609_v62 = vpop.f32.mrb[187].mxu1 }
0x11ff   :  { %v27222_v63 = vadd.f32 %v18609_v62, %v18608_v38 }
0x1203   :  { %v12931_v48 = vpop.f32.mrb[164].mxu0  ;;  %v19300_v57 = vpop.f32.mrb[188].mxu1 }
0x1204   :  { %v13150_v6 = vadd.f32 %v19300_v57, %v13053_v14  ;;  %v12933_v38 = vpop.f32.mrb[165].mxu0  ;;  %v13141_v62 = vpop.f32.mrb[189].mxu1  ;;  %v19526_v24 = vadd.f32 %v12931_v48, %v27228_v39 }
0x1205   :  { %v13142_v7 = vadd.f32 %v13141_v62, %v13045_v50  ;;  %v12935_v58 = vpop.f32.mrb[166].mxu0  ;;  %v19301_v31 = vpop.f32.mrb[190].mxu1  ;;  %v19527_v5 = vadd.f32 %v12933_v38, %v27233_v10 }
0x1206   :  { %v19528_v45 = vadd.f32 %v12935_v58, %v27228_v39  ;;  %v13153_v12 = vadd.f32 %v19301_v31, %v13056_v9  ;;  %v12937_v1 = vpop.f32.mrb[167].mxu0  ;;  %v13144_v29 = vpop.f32.mrb[191].mxu1  ;;  %v13061_v9 = vadd.f32 %v26824_v8, %v27225_v22 }
0x1207   :  { %v19529_v57 = vadd.f32 %v12937_v1, %v27233_v10  ;;  %v13145_v14 = vadd.f32 %v13144_v29, %v13048_v46 }
0x1208   :  { %v27245_v34 = vpack.c.bf16 %v19528_v45, %v19526_v24  ;;  %v27247_v28 = vpack.c.bf16 %v13153_v12, %v13150_v6  ;;  %v13072_v6 = vadd.f32 %v26898_v27, %v27225_v22 }
0x1209   :  { %v27249_v50 = vpack.c.bf16 %v19529_v57, %v19527_v5  ;;  %v27251_v62 = vpack.c.bf16 %v13145_v14, %v13142_v7 }
0x120a   :  { %28899 = vst [vmem:[#allocation6_spill] sm:$0xff] %v27247_v28 }
0x120b   :  { %v12941_v48 = vpop.f32.mrb[168].mxu0  ;;  %v19304_v31 = vpop.f32.mrb[192].mxu1 }
0x120c   :  { %v19530_v38 = vadd.f32 %v12941_v48, %v27228_v39  ;;  %v13166_v1 = vadd.f32 %v19304_v31, %v13069_v47  ;;  %v12943_v29 = vpop.f32.mrb[169].mxu0  ;;  %v13157_v24 = vpop.f32.mrb[193].mxu1 }
0x120d   :  { %v19531_v58 = vadd.f32 %v12943_v29, %v27233_v10  ;;  %v13158_v7 = vadd.f32 %v13157_v24, %v13061_v9  ;;  %v12945_v46 = vpop.f32.mrb[170].mxu0  ;;  %v19305_v45 = vpop.f32.mrb[194].mxu1  ;;  %v28903_v29 = vld [vmem:[#allocation22_spill] sm:$0xff] }
0x120e   :  { %v19532_v12 = vadd.f32 %v12945_v46, %v27228_v39  ;;  %v13169_v5 = vadd.f32 %v19305_v45, %v13072_v6  ;;  %v12947_v8 = vpop.f32.mrb[171].mxu0  ;;  %v13160_v57 = vpop.f32.mrb[195].mxu1  ;;  %v13085_v24 = vadd.f32 %v28903_v29, %v27225_v22  ;;  %v28904_v6 = vld [vmem:[#allocation12_spill] sm:$0xff] }
0x120f   :  { %v19533_v14 = vadd.f32 %v12947_v8, %v27233_v10  ;;  %v13161_v47 = vadd.f32 %v13160_v57, %v13064_v17  ;;  %v13077_v46 = vadd.f32 %v28904_v6, %v27225_v22 }
0x1210   :  { %v27265_v48 = vpack.c.bf16 %v19532_v12, %v19530_v38  ;;  %v27267_v31 = vpack.c.bf16 %v13169_v5, %v13166_v1  ;;  %v28905_v1 = vld [vmem:[#allocation7_spill] sm:$0xff] }
0x1211   :  { %v27269_v27 = vpack.c.bf16 %v19533_v14, %v19531_v58  ;;  %v27271_v9 = vpack.c.bf16 %v13161_v47, %v13158_v7  ;;  %v13088_v12 = vadd.f32 %v28905_v1, %v27225_v22  ;;  %v28906_v14 = vld [vmem:[#allocation9_spill] sm:$0xff] }
0x1212   :  { %28900 = vst [vmem:[#allocation4_spill] sm:$0xff] %v27267_v31  ;;  %v13080_v47 = vadd.f32 %v28906_v14, %v27225_v22 }
0x1213   :  { %28901 = vst [vmem:[#allocation5_spill] sm:$0xff] %v27269_v27  ;;  %28902 = vst [vmem:[#allocation51_spill] sm:$0xff] %v27271_v9  ;;  %v12951_v41 = vpop.f32.mrb[172].mxu0  ;;  %v19308_v28 = vpop.f32.mrb[196].mxu1 }
0x1214   :  { %v19534_v45 = vadd.f32 %v12951_v41, %v27228_v39  ;;  %v13182_v8 = vadd.f32 %v19308_v28, %v13085_v24  ;;  %v12953_v17 = vpop.f32.mrb[173].mxu0  ;;  %v13173_v38 = vpop.f32.mrb[197].mxu1 }
0x1215   :  { %v19535_v58 = vadd.f32 %v12953_v17, %v27233_v10  ;;  %v13174_v7 = vadd.f32 %v13173_v38, %v13077_v46  ;;  %v12955_v5 = vpop.f32.mrb[174].mxu0  ;;  %v19309_v57 = vpop.f32.mrb[198].mxu1  ;;  %v13101_v17 = vadd.f32 %v27220_v61, %v27225_v22  ;;  %v28910_v61 = vld [vmem:[#allocation30_spill] sm:$0xff] }
0x1216   :  { %v19536_v29 = vadd.f32 %v12955_v5, %v27228_v39  ;;  %v13185_v31 = vadd.f32 %v19309_v57, %v13088_v12  ;;  %v12957_v6 = vpop.f32.mrb[175].mxu0  ;;  %v13176_v9 = vpop.f32.mrb[199].mxu1  ;;  %v28909_v12 = vld [vmem:[#allocation27_spill] sm:$0xff] }
0x1217   :  { %v19537_v28 = vadd.f32 %v12957_v6, %v27233_v10  ;;  %v13177_v24 = vadd.f32 %v13176_v9, %v13080_v47  ;;  %v13093_v5 = vadd.f32 %v28909_v12, %v27225_v22 }
0x1218   :  { %v27285_v41 = vpack.c.bf16 %v19536_v29, %v19534_v45  ;;  %v27287_v27 = vpack.c.bf16 %v13185_v31, %v13182_v8  ;;  %v13104_v31 = vadd.f32 %v27222_v63, %v27225_v22  ;;  %v13096_v29 = vadd.f32 %v28910_v61, %v27225_v22 }
0x1219   :  { %v27289_v1 = vpack.c.bf16 %v19537_v28, %v19535_v58  ;;  %v27291_v46 = vpack.c.bf16 %v13177_v24, %v13174_v7 }
0x121a   :  { %28907 = vst [vmem:[#allocation22_spill] sm:$0xff] %v27287_v27 }
0x121b   :  { %28908 = vst [vmem:[#allocation12_spill] sm:$0xff] %v27291_v46  ;;  %v12961_v38 = vpop.f32.mrb[176].mxu0  ;;  %v19312_v14 = vpop.f32.mrb[200].mxu1 }
0x121c   :  { %v19538_v57 = vadd.f32 %v12961_v38, %v27228_v39  ;;  %v13198_v6 = vadd.f32 %v19312_v14, %v13101_v17  ;;  %v12963_v9 = vpop.f32.mrb[177].mxu0  ;;  %v13189_v45 = vpop.f32.mrb[201].mxu1 }
0x121d   :  { %v19539_v8 = vadd.f32 %v12963_v9, %v27233_v10  ;;  %v13190_v58 = vadd.f32 %v13189_v45, %v13093_v5  ;;  %v12965_v7 = vpop.f32.mrb[178].mxu0  ;;  %v19313_v47 = vpop.f32.mrb[202].mxu1 }
0x121e   :  { %v19540_v28 = vadd.f32 %v12965_v7, %v27228_v39  ;;  %v13201_v24 = vadd.f32 %v19313_v47, %v13104_v31  ;;  %v12967_v12 = vpop.f32.mrb[179].mxu0  ;;  %v13192_v27 = vpop.f32.mrb[203].mxu1 }
0x121f   :  { %v19541_v17 = vadd.f32 %v12967_v12, %v27233_v10  ;;  %v13193_v38 = vadd.f32 %v13192_v27, %v13096_v29 }
0x1220   :  { %v27305_v14 = vpack.c.bf16 %v19540_v28, %v19538_v57  ;;  %v27307_v46 = vpack.c.bf16 %v13201_v24, %v13198_v6 }
0x1221   :  { %v27309_v63 = vpack.c.bf16 %v19541_v17, %v19539_v8  ;;  %v27311_v5 = vpack.c.bf16 %v13193_v38, %v13190_v58 }
0x1222   :  { %28911 = vst [vmem:[#allocation7_spill] sm:$0xff] %v27305_v14  ;;  %28912 = vst [vmem:[#allocation9_spill] sm:$0xff] %v27307_v46 }
0x1223   :  { %28913 = vst [vmem:[#allocation27_spill] sm:$0xff] %v27309_v63  ;;  %28914 = vst [vmem:[#allocation30_spill] sm:$0xff] %v27311_v5  ;;  %v12971_v9 = vpop.f32.mrb[180].mxu0  ;;  %v14118_v63 = vunpack.c.l.bf16 %v27289_v1 }
0x1224   :  { %v19542_v45 = vadd.f32 %v12971_v9, %v27228_v39  ;;  %v12973_v22 = vpop.f32.mrb[181].mxu0 }
0x1225   :  { %v19543_v7 = vadd.f32 %v12973_v22, %v27233_v10  ;;  %v12975_v31 = vpop.f32.mrb[182].mxu0 }
0x1226   :  { %v19544_v47 = vadd.f32 %v12975_v31, %v27228_v39  ;;  %v12977_v61 = vpop.f32.mrb[183].mxu0 }
0x1227   :  { %v19545_v27 = vadd.f32 %v12977_v61, %v27233_v10 }
0x1228   :  { %v27317_v57 = vpack.c.bf16 %v19544_v47, %v19542_v45 }
0x1229   :  { %v27319_v6 = vpack.c.bf16 %v19545_v27, %v19543_v7 }
0x122a   :  { %28915 = vst [vmem:[#allocation52_spill] sm:$0xff] %v27317_v57 }
0x122b   :  { %28916 = vst [vmem:[#allocation53_spill] sm:$0xff] %v27319_v6  ;;  %v12981_v8 = vpop.f32.mrb[184].mxu0 }
0x122c   :  { %v19546_v58 = vadd.f32 %v12981_v8, %v27228_v39  ;;  %v12983_v29 = vpop.f32.mrb[185].mxu0 }
0x122d   :  { %v19547_v28 = vadd.f32 %v12983_v29, %v27233_v10  ;;  %v12985_v24 = vpop.f32.mrb[186].mxu0 }
0x122e   :  { %v19548_v12 = vadd.f32 %v12985_v24, %v27228_v39  ;;  %v12987_v17 = vpop.f32.mrb[187].mxu0 }
0x122f   :  { %v19549_v38 = vadd.f32 %v12987_v17, %v27233_v10 }
0x1230   :  { %v27325_v9 = vpack.c.bf16 %v19548_v12, %v19546_v58 }
0x1231   :  { %v27327_v22 = vpack.c.bf16 %v19549_v38, %v19547_v28 }
0x1232   :  { %28917 = vst [vmem:[#allocation54_spill] sm:$0xff] %v27325_v9  ;;  %v13256_v9 = vunpack.c.l.bf16 %v27249_v50 }
0x1233   :  { %28918 = vst [vmem:[#allocation55_spill] sm:$0xff] %v27327_v22  ;;  %v12991_v45 = vpop.f32.mrb[188].mxu0 }
0x1234   :  { %v19550_v7 = vadd.f32 %v12991_v45, %v27228_v39  ;;  %v12993_v31 = vpop.f32.mrb[189].mxu0 }
0x1235   :  { %v19551_v47 = vadd.f32 %v12993_v31, %v27233_v10  ;;  %v12995_v61 = vpop.f32.mrb[190].mxu0 }
0x1236   :  { %v19552_v27 = vadd.f32 %v12995_v61, %v27228_v39  ;;  %v12997_v8 = vpop.f32.mrb[191].mxu0 }
0x1237   :  { %v19553_v29 = vadd.f32 %v12997_v8, %v27233_v10 }
0x1238   :  { %v27333_v24 = vpack.c.bf16 %v19552_v27, %v19550_v7 }
0x1239   :  { %v27335_v46 = vpack.c.bf16 %v19553_v29, %v19551_v47 }
0x123a   :  { %28919 = vst [vmem:[#allocation56_spill] sm:$0xff] %v27333_v24 }
0x123b   :  { %28920 = vst [vmem:[#allocation57_spill] sm:$0xff] %v27335_v46  ;;  %v13001_v58 = vpop.f32.mrb[192].mxu0 }
0x123c   :  { %v19554_v28 = vadd.f32 %v13001_v58, %v27228_v39  ;;  %v13003_v12 = vpop.f32.mrb[193].mxu0  ;;  %v13255_v58 = vunpack.c.l.bf16 %v27245_v34 }
0x123d   :  { %v19555_v17 = vadd.f32 %v13003_v12, %v27233_v10  ;;  %v13005_v38 = vpop.f32.mrb[194].mxu0 }
0x123e   :  { %v19556_v45 = vadd.f32 %v13005_v38, %v27228_v39  ;;  %v13007_v31 = vpop.f32.mrb[195].mxu0  ;;  %v13257_v38 = vunpack.c.l.bf16 %v27251_v62 }
0x123f   :  { %v19557_v5 = vadd.f32 %v13007_v31, %v27233_v10 }
0x1240   :  { %v27341_v61 = vpack.c.bf16 %v19556_v45, %v19554_v28 }
0x1241   :  { %v27343_v22 = vpack.c.bf16 %v19557_v5, %v19555_v17  ;;  %v13258_v5 = vunpack.c.h.bf16 %v27245_v34 }
0x1242   :  { %28921 = vst [vmem:[#allocation58_spill] sm:$0xff] %v27341_v61 }
0x1243   :  { %28922 = vst [vmem:[#allocation59_spill] sm:$0xff] %v27343_v22  ;;  %v18643_v7 = vpop.f32.mrb[196].mxu0 }
0x1244   :  { %v18644_v27 = vpop.f32.mrb[197].mxu0 }
0x1245   :  { %v18645_v47 = vadd.f32 %v18644_v27, %v18643_v7  ;;  %v18646_v8 = vpop.f32.mrb[198].mxu0  ;;  %v13260_v7 = vunpack.c.h.bf16 %v27251_v62 }
0x1246   :  { %v18647_v29 = vpop.f32.mrb[199].mxu0 }
0x1247   :  { %v18648_v46 = vadd.f32 %v18647_v29, %v18646_v8  ;;  %v13259_v8 = vunpack.c.h.bf16 %v27249_v50 }
0x1263   :  { %v13819_v24 = vpop.f32.mrb[204].mxu1  ;;  %v13903_v12 = vpop.f32.mrb[200].mxu0 }
0x1264   :  { %v13910_v39 = vadd.f32 %v13819_v24, %v13255_v58  ;;  %v13904_v10 = vadd.f32 %v18645_v47, %v13903_v12  ;;  %v13821_v28 = vpop.f32.mrb[205].mxu1  ;;  %v19332_v45 = vpop.f32.mrb[201].mxu0 }
0x1265   :  { %v13911_v17 = vadd.f32 %v13821_v28, %v13256_v9  ;;  %v13823_v31 = vpop.f32.mrb[206].mxu1  ;;  %v13906_v27 = vpop.f32.mrb[202].mxu0 }
0x1266   :  { %21209 = vtanh.f32 %v13910_v39  ;;  %v13912_v29 = vadd.f32 %v13904_v10, %v13257_v38  ;;  %v13913_v22 = vadd.f32 %v13823_v31, %v13258_v5  ;;  %v13907_v61 = vadd.f32 %v18648_v46, %v13906_v27  ;;  %v13825_v6 = vpop.f32.mrb[207].mxu1  ;;  %v19333_v24 = vpop.f32.mrb[203].mxu0  ;;  %v28923_v46 = vld [vmem:[#allocation33_spill] sm:$0xff]  ;;  %v28928_v5 = vld [vmem:[#allocation38_spill] sm:$0xff]  ;;  %v28930_v31 = vld [vmem:[#allocation40_spill] sm:$0xff] }
0x1267   :  { %21211 = vtanh.f32 %v13911_v17  ;;  %v13914_v58 = vadd.f32 %v13825_v6, %v13259_v8  ;;  %v28924_v6 = vld [vmem:[#allocation34_spill] sm:$0xff]  ;;  %v28927_v10 = vld [vmem:[#allocation37_spill] sm:$0xff]  ;;  %v28929_v17 = vld [vmem:[#allocation39_spill] sm:$0xff] }
0x1268   :  { %21213 = vtanh.f32 %v13912_v29  ;;  %v13915_v47 = vadd.f32 %v13907_v61, %v13260_v7  ;;  %v28926_v61 = vld [vmem:[#allocation36_spill] sm:$0xff]  ;;  %v28931_v7 = vld [vmem:[#allocation41_spill] sm:$0xff]  ;;  %v28932_v27 = vld [vmem:[#allocation42_spill] sm:$0xff] }
0x1269   :  { %21215 = vtanh.f32 %v13913_v22  ;;  %v28925_v22 = vld [vmem:[#allocation35_spill] sm:$0xff]  ;;  %v28934_v29 = vld [vmem:[#allocation44_spill] sm:$0xff]  ;;  %v28935_v24 = vld [vmem:[#allocation45_spill] sm:$0xff] }
0x126a   :  { %21217 = vtanh.f32 %v13915_v47  ;;  %v28933_v8 = vld [vmem:[#allocation43_spill] sm:$0xff] }
0x126b   :  { %21219 = vtanh.f32 %v13914_v58  ;;  %v28936_v58 = vld [vmem:[#allocation46_spill] sm:$0xff]  ;;  %v28937_v47 = vld [vmem:[#allocation47_spill] sm:$0xff] }
0x1270   :  { %v21210_v34 = vpop.eup %21209 }
0x1271   :  { %v21212_v9 = vpop.eup %21211 }
0x1272   :  { %v21214_v12 = vpop.eup %21213 }
0x1273   :  { %v21216_v62 = vpop.eup %21215 }
0x1274   :  { %v21218_v28 = vpop.eup %21217  ;;  %v13931_v45 = vpack.c.bf16 %v21216_v62, %v21210_v34  ;;  %v28938_v34 = vld [vmem:[#allocation48_spill] sm:$0xff] }
0x1275   :  { %v21220_v50 = vpop.eup %21219  ;;  %v13933_v39 = vpack.c.bf16 %v21218_v28, %v21214_v12  ;;  %v28940_v12 = vld [vmem:[#allocation50_spill] sm:$0xff] }
0x1276   :  { %v13932_v38 = vpack.c.bf16 %v21220_v50, %v21212_v9  ;;  %v28939_v9 = vld [vmem:[#allocation49_spill] sm:$0xff]  ;;  %v27387_v62 = vld [vmem:[%s28531_s3 + $0x484] ss:$12 sps:$4 sm:$0xff]  }
0x1277   :  { %v27393_v28 = vld [vmem:[%s28531_s3 + $0x548] ss:$12 sps:$4 sm:$0xff]  }
0x1278   :  { %13966 = vmatprep.mubr.bf16.mxu1 %v13932_v38  ;;  %14052 = vmatprep.mubr.bf16.mxu0 %v13932_v38 }
0x1279   :  { %13967 = vmatmul.mubr.bf16.vlgmr.msra.gmra.mrb[208].mxu1 %v13931_v45  ;;  %14053 = vmatmul.mubr.bf16.vlgmr.msra.gmra.mrb[204].mxu0 %v13931_v45 }
0x127a   :  { %13978 = vmatpush1.bf16.msra.mxu1 %v28923_v46  ;;  %19335 = vmatpush3.bf16.msra.mxu0 %v28924_v6 }
0x127b   :  { %13979 = vmatprep.subr.bf16.mxu1 %v28925_v22  ;;  %19336 = vmatprep.subr.bf16.mxu0 %v28771_v44 }
0x127c   :  { %14009 = vmatprep.mubr.bf16.mxu1 %v28772_v18  ;;  %19350 = vmatprep.mubr.msk.bf16.mxu0 %vm21467_vm1, %v28771_v44 }
0x127e   :  { %13980 = vmatpush1.bf16.msra.mxu1 %v28926_v61  ;;  %19337 = vmatpush3.bf16.msra.mxu0 %v28927_v10 }
0x127f   :  { %13981 = vmatprep.subr.bf16.mxu1 %v28928_v5  ;;  %19338 = vmatprep.subr.bf16.mxu0 %v28771_v44 }
0x1282   :  { %13982 = vmatpush1.bf16.msra.mxu1 %v28929_v17  ;;  %19339 = vmatpush3.bf16.msra.mxu0 %v28930_v31 }
0x1283   :  { %13983 = vmatprep.subr.bf16.mxu1 %v28931_v7  ;;  %19340 = vmatprep.subr.bf16.mxu0 %v28771_v44 }
0x1286   :  { %13984 = vmatpush1.bf16.msra.mxu1 %v28932_v27  ;;  %19341 = vmatpush3.bf16.msra.mxu0 %v28933_v8 }
0x1287   :  { %13985 = vmatprep.subr.bf16.mxu1 %v28934_v29  ;;  %19342 = vmatprep.subr.bf16.mxu0 %v28771_v44 }
0x128a   :  { %13986 = vmatpush1.bf16.msra.mxu1 %v28935_v24  ;;  %19343 = vmatpush3.bf16.msra.mxu0 %v28936_v58 }
0x128b   :  { %13987 = vmatprep.subr.bf16.mxu1 %v28937_v47  ;;  %19344 = vmatprep.subr.bf16.mxu0 %v28771_v44 }
0x128e   :  { %13988 = vmatpush1.bf16.msra.mxu1 %v28938_v34  ;;  %19345 = vmatpush3.bf16.msra.mxu0 %v28939_v9 }
0x128f   :  { %13989 = vmatprep.subr.bf16.mxu1 %v28940_v12  ;;  %19346 = vmatprep.subr.bf16.mxu0 %v28771_v44 }
0x1292   :  { %13990 = vmatpush1.bf16.msra.mxu1 %v27135_v51  ;;  %19347 = vmatpush3.bf16.msra.mxu0 %v27140_v23 }
0x1293   :  { %13991 = vmatprep.subr.bf16.mxu1 %v27147_v2  ;;  %19348 = vmatprep.subr.bf16.mxu0 %v28771_v44 }
0x1296   :  { %13992 = vmatpush1.bf16.msra.mxu1 %v27154_v55  ;;  %19349 = vmatpush3.bf16.msra.mxu0 %v27159_v52 }
0x1297   :  { %14126 = vmatprep.subr.bf16.mxu0 %v27387_v62  ;;  %18689 = vmatprep.subr.bf16.mxu1 %v27393_v28 }
0x1299   :  { %14010 = vmatmul.mubr.bf16.vlgmr.msra.gmra.mrb[208].mxu1 %v13933_v39  ;;  %19351 = vmatmul.mubr.bf16.vlgmr.msra.gmra.mrb[208].mxu0 %v13933_v39  ;;  %v28961_v39 = vld [vmem:[#allocation5_spill] sm:$0xff] }
0x129a   :  { %14127 = vmatpush1.bf16.msra.mxu0 %v26683_v49  ;;  %18690 = vmatpush3.bf16.msra.mxu1 %v26693_v37  ;;  %v28941_v49 = vld [vmem:[#allocation13_spill] sm:$0xff]  ;;  %v28943_v37 = vld [vmem:[#allocation19_spill] sm:$0xff]  ;;  %v13926_v38 = vunpack.c.l.bf16 %v28961_v39 }
0x129b   :  { %14128 = vmatprep.subr.bf16.mxu0 %v26688_v56  ;;  %18691 = vmatprep.subr.bf16.mxu1 %v26700_v4  ;;  %v28942_v56 = vld [vmem:[#allocation25_spill] sm:$0xff]  ;;  %v28944_v4 = vld [vmem:[#allocation8_spill] sm:$0xff] }
0x129e   :  { %14129 = vmatpush1.bf16.msra.mxu0 %v26707_v42  ;;  %18692 = vmatpush3.bf16.msra.mxu1 %v26720_v19  ;;  %v28945_v42 = vld [vmem:[#allocation15_spill] sm:$0xff] }
0x129f   :  { %14130 = vmatprep.subr.bf16.mxu0 %v26714_v40  ;;  %18693 = vmatprep.subr.bf16.mxu1 %v26743_v60  ;;  %v28946_v40 = vld [vmem:[#allocation16_spill] sm:$0xff]  ;;  %v28947_v19 = vld [vmem:[#allocation23_spill] sm:$0xff]  ;;  %v28950_v60 = vld [vmem:[#allocation18_spill] sm:$0xff] }
0x12a2   :  { %14131 = vmatpush1.bf16.msra.mxu0 %v26729_v33  ;;  %18694 = vmatpush3.bf16.msra.mxu1 %v26750_v30  ;;  %v28948_v33 = vld [vmem:[#allocation20_spill] sm:$0xff]  ;;  %v28951_v30 = vld [vmem:[#allocation17_spill] sm:$0xff] }
0x12a3   :  { %14132 = vmatprep.subr.bf16.mxu0 %v26735_v32  ;;  %18695 = vmatprep.subr.bf16.mxu1 %v26762_v59  ;;  %v28949_v32 = vld [vmem:[#allocation14_spill] sm:$0xff]  ;;  %v28953_v59 = vld [vmem:[#allocation24_spill] sm:$0xff] }
0x12a6   :  { %14133 = vmatpush1.bf16.msra.mxu0 %v26757_v26  ;;  %18696 = vmatpush3.bf16.msra.mxu1 %v26793_v21  ;;  %v28952_v26 = vld [vmem:[#allocation10_spill] sm:$0xff]  ;;  %v28957_v21 = vld [vmem:[#allocation28_spill] sm:$0xff] }
0x12a7   :  { %14134 = vmatprep.subr.bf16.mxu0 %v26769_v15  ;;  %18697 = vmatprep.subr.bf16.mxu1 %v26800_v13  ;;  %v28954_v15 = vld [vmem:[#allocation11_spill] sm:$0xff]  ;;  %v28958_v13 = vld [vmem:[#allocation29_spill] sm:$0xff] }
0x12aa   :  { %14135 = vmatpush1.bf16.msra.mxu0 %v26779_v16  ;;  %18698 = vmatpush3.bf16.msra.mxu1 %v26820_v43  ;;  %v28955_v16 = vld [vmem:[#allocation21_spill] sm:$0xff] }
0x12ab   :  { %14136 = vmatprep.subr.bf16.mxu0 %v26786_v35  ;;  %18699 = vmatprep.subr.bf16.mxu1 %v26840_v3  ;;  %v28956_v35 = vld [vmem:[#allocation26_spill] sm:$0xff] }
0x12ae   :  { %14137 = vmatpush1.bf16.msra.mxu0 %v26807_v36  ;;  %18700 = vmatpush3.bf16.msra.mxu1 %v26848_v0  ;;  %v28959_v36 = vld [vmem:[#allocation31_spill] sm:$0xff] }
0x12af   :  { %14138 = vmatprep.subr.bf16.mxu0 %v26814_v53  ;;  %18701 = vmatprep.subr.bf16.mxu1 %v26855_v54  ;;  %v28960_v53 = vld [vmem:[#allocation32_spill] sm:$0xff] }
0x12b2   :  { %14139 = vmatpush1.bf16.msra.mxu0 %v26829_v11  ;;  %18702 = vmatpush3.bf16.msra.mxu1 %v26875_v20  ;;  %v13925_v20 = vunpack.c.l.bf16 %v27265_v48 }
0x12b3   :  { %14140 = vmatprep.subr.bf16.mxu0 %v26835_v25  ;;  %18703 = vmatprep.subr.bf16.mxu1 %v28941_v49 }
0x12b6   :  { %14141 = vmatpush1.bf16.msra.mxu0 %v28942_v56  ;;  %18704 = vmatpush3.bf16.msra.mxu1 %v28943_v37  ;;  %v28962_v56 = vld [vmem:[#allocation6_spill] sm:$0xff] }
0x12b7   :  { %14142 = vmatprep.subr.bf16.mxu0 %v28944_v4  ;;  %19354 = vmatprep.subr.bf16.mxu1 %v28771_v44  ;;  %v13927_v37 = vunpack.c.l.bf16 %v28962_v56 }
0x12ba   :  { %14143 = vmatpush1.bf16.msra.mxu0 %v28945_v42 }
0x12bb   :  { %14144 = vmatprep.subr.bf16.mxu0 %v28946_v40 }
0x12be   :  { %14145 = vmatpush1.bf16.msra.mxu0 %v28947_v19  ;;  %v13928_v19 = vunpack.c.h.bf16 %v27265_v48 }
0x12bf   :  { %14146 = vmatprep.subr.bf16.mxu0 %v28948_v33 }
0x12c2   :  { %14147 = vmatpush1.bf16.msra.mxu0 %v28949_v32 }
0x12c3   :  { %14148 = vmatprep.subr.bf16.mxu0 %v28950_v60  ;;  %v13930_v60 = vunpack.c.h.bf16 %v28962_v56  ;;  %v27656_v56 = vld [vmem:[%s28531_s3 + $0x528] ss:$12 sps:$4 sm:$0xff]  }
0x12c4   :  { %28978 = vst [vmem:[#allocation48_spill] sm:$0xff] %v27656_v56 }
0x12c6   :  { %14149 = vmatpush1.bf16.msra.mxu0 %v28951_v30 }
0x12c7   :  { %14150 = vmatprep.subr.bf16.mxu0 %v28952_v26  ;;  %v13929_v26 = vunpack.c.h.bf16 %v28961_v39  ;;  %v27638_v39 = vld [vmem:[%s28531_s3 + $0x518] ss:$12 sps:$4 sm:$0xff]  }
0x12c8   :  { %28975 = vst [vmem:[#allocation45_spill] sm:$0xff] %v27638_v39 }
0x12ca   :  { %14151 = vmatpush1.bf16.msra.mxu0 %v28953_v59 }
0x12cb   :  { %14152 = vmatprep.subr.bf16.mxu0 %v28954_v15 }
0x12ce   :  { %14153 = vmatpush1.bf16.msra.mxu0 %v28955_v16 }
0x12cf   :  { %14154 = vmatprep.subr.bf16.mxu0 %v28956_v35 }
0x12d2   :  { %14155 = vmatpush1.bf16.msra.mxu0 %v28957_v21 }
0x12d3   :  { %14156 = vmatprep.subr.bf16.mxu0 %v28958_v13 }
0x12d6   :  { %14157 = vmatpush1.bf16.msra.mxu0 %v28959_v36 }
0x12d7   :  { %14169 = vmatprep.subr.bf16.mxu0 %v28960_v53 }
0x134c   :  { %v18674_v43 = vpop.f32.mrb[204].mxu0 }
0x134d   :  { %v18675_v11 = vpop.f32.mrb[205].mxu0 }
0x134e   :  { %v18676_v25 = vadd.f32 %v18675_v11, %v18674_v43  ;;  %v18677_v3 = vpop.f32.mrb[206].mxu0 }
0x134f   :  { %v18678_v0 = vpop.f32.mrb[207].mxu0 }
0x1350   :  { %v18679_v54 = vadd.f32 %v18678_v0, %v18677_v3 }
0x136c   :  { %v14011_v45 = vpop.f32.mrb[208].mxu1  ;;  %v14095_v50 = vpop.f32.mrb[208].mxu0 }
0x136d   :  { %v14102_v49 = vadd.f32 %v14011_v45, %v13925_v20  ;;  %v14096_v4 = vadd.f32 %v18676_v25, %v14095_v50  ;;  %v14013_v42 = vpop.f32.mrb[209].mxu1  ;;  %v19352_v40 = vpop.f32.mrb[209].mxu0  ;;  %v27632_v50 = vld [vmem:[%s28531_s3 + $0x510] ss:$12 sps:$4 sm:$0xff]  }
0x136e   :  { %v14103_v33 = vadd.f32 %v14013_v42, %v13926_v38  ;;  %v14015_v32 = vpop.f32.mrb[210].mxu1  ;;  %v14098_v30 = vpop.f32.mrb[210].mxu0  ;;  %28974 = vst [vmem:[#allocation44_spill] sm:$0xff] %v27632_v50  ;;  %v27644_v38 = vld [vmem:[%s28531_s3 + $0x52c] ss:$12 sps:$4 sm:$0xff]  }
0x136f   :  { %21221 = vtanh.f32 %v14102_v49  ;;  %v14104_v59 = vadd.f32 %v14096_v4, %v13927_v37  ;;  %v14105_v15 = vadd.f32 %v14015_v32, %v13928_v19  ;;  %v14099_v16 = vadd.f32 %v18679_v54, %v14098_v30  ;;  %v14017_v35 = vpop.f32.mrb[211].mxu1  ;;  %v19353_v21 = vpop.f32.mrb[211].mxu0  ;;  %v27626_v54 = vld [vmem:[%s28531_s3 + $0x5d8] ss:$12 sps:$4 sm:$0xff]   ;;  %28976 = vst [vmem:[#allocation46_spill] sm:$0xff] %v27644_v38 }
0x1370   :  { %21223 = vtanh.f32 %v14103_v33  ;;  %v14106_v13 = vadd.f32 %v14017_v35, %v13929_v26  ;;  %28973 = vst [vmem:[#allocation43_spill] sm:$0xff] %v27626_v54  ;;  %v27650_v49 = vld [vmem:[%s28531_s3 + $0x5f0] ss:$12 sps:$4 sm:$0xff]   ;;  %v27675_v42 = vld [vmem:[%s28531_s3 + $0x540] ss:$12 sps:$4 sm:$0xff]  }
0x1371   :  { %21225 = vtanh.f32 %v14104_v59  ;;  %v14107_v36 = vadd.f32 %v14099_v16, %v13930_v60  ;;  %28977 = vst [vmem:[#allocation47_spill] sm:$0xff] %v27650_v49  ;;  %v27662_v37 = vld [vmem:[%s28531_s3 + $0x530] ss:$12 sps:$4 sm:$0xff]   ;;  %28981 = vst [vmem:[#allocation13_spill] sm:$0xff] %v27675_v42  ;;  %v27687_v19 = vld [vmem:[%s28531_s3 + $0x558] ss:$12 sps:$4 sm:$0xff]  }
0x1372   :  { %21227 = vtanh.f32 %v14105_v15  ;;  %28979 = vst [vmem:[#allocation49_spill] sm:$0xff] %v27662_v37  ;;  %v27668_v4 = vld [vmem:[%s28531_s3 + $0x544] ss:$12 sps:$4 sm:$0xff]   ;;  %v27681_v40 = vld [vmem:[%s28531_s3 + $0x55c] ss:$12 sps:$4 sm:$0xff]   ;;  %28983 = vst [vmem:[#allocation19_spill] sm:$0xff] %v27687_v19 }
0x1373   :  { %21229 = vtanh.f32 %v14107_v36  ;;  %28980 = vst [vmem:[#allocation50_spill] sm:$0xff] %v27668_v4  ;;  %28982 = vst [vmem:[#allocation25_spill] sm:$0xff] %v27681_v40  ;;  %v27693_v33 = vld [vmem:[%s28531_s3 + $0x574] ss:$12 sps:$4 sm:$0xff]   ;;  %v27699_v32 = vld [vmem:[%s28531_s3 + $0x570] ss:$12 sps:$4 sm:$0xff]  }
0x1374   :  { %21231 = vtanh.f32 %v14106_v13  ;;  %28984 = vst [vmem:[#allocation8_spill] sm:$0xff] %v27693_v33  ;;  %28985 = vst [vmem:[#allocation15_spill] sm:$0xff] %v27699_v32  ;;  %v27705_v60 = vld [vmem:[%s28531_s3 + $0x58c] ss:$12 sps:$4 sm:$0xff]   ;;  %v27711_v30 = vld [vmem:[%s28531_s3 + $0x588] ss:$12 sps:$4 sm:$0xff]  }
0x1375   :  { %28986 = vst [vmem:[#allocation16_spill] sm:$0xff] %v27705_v60  ;;  %28987 = vst [vmem:[#allocation23_spill] sm:$0xff] %v27711_v30  ;;  %v27717_v26 = vld [vmem:[%s28531_s3 + $0x5a4] ss:$12 sps:$4 sm:$0xff]   ;;  %v27723_v59 = vld [vmem:[%s28531_s3 + $0x5a0] ss:$12 sps:$4 sm:$0xff]  }
0x1376   :  { %28988 = vst [vmem:[#allocation20_spill] sm:$0xff] %v27717_v26  ;;  %28989 = vst [vmem:[#allocation14_spill] sm:$0xff] %v27723_v59  ;;  %v27729_v15 = vld [vmem:[%s28531_s3 + $0x5bc] ss:$12 sps:$4 sm:$0xff]   ;;  %v27735_v16 = vld [vmem:[%s28531_s3 + $0x5b8] ss:$12 sps:$4 sm:$0xff]  }
0x1377   :  { %28990 = vst [vmem:[#allocation18_spill] sm:$0xff] %v27729_v15  ;;  %28991 = vst [vmem:[#allocation17_spill] sm:$0xff] %v27735_v16  ;;  %v27741_v35 = vld [vmem:[%s28531_s3 + $0x5d4] ss:$12 sps:$4 sm:$0xff]   ;;  %v27747_v21 = vld [vmem:[%s28531_s3 + $0x5d0] ss:$12 sps:$4 sm:$0xff]  }
0x1378   :  { %28992 = vst [vmem:[#allocation10_spill] sm:$0xff] %v27741_v35  ;;  %28993 = vst [vmem:[#allocation24_spill] sm:$0xff] %v27747_v21  ;;  %v27753_v13 = vld [vmem:[%s28531_s3 + $0x5ec] ss:$12 sps:$4 sm:$0xff]   ;;  %v27759_v36 = vld [vmem:[%s28531_s3 + $0x5e8] ss:$12 sps:$4 sm:$0xff]  }
0x1379   :  { %v21222_v48 = vpop.eup %21221  ;;  %28994 = vst [vmem:[#allocation11_spill] sm:$0xff] %v27753_v13  ;;  %28995 = vst [vmem:[#allocation21_spill] sm:$0xff] %v27759_v36 }
0x137a   :  { %v21224_v53 = vpop.eup %21223 }
0x137b   :  { %v21226_v43 = vpop.eup %21225 }
0x137c   :  { %v21228_v11 = vpop.eup %21227 }
0x137d   :  { %v21230_v25 = vpop.eup %21229  ;;  %v14123_v3 = vpack.c.bf16 %v21228_v11, %v21222_v48  ;;  %v27765_v48 = vld [vmem:[%s28531_s3 + $0x604] ss:$12 sps:$4 sm:$0xff]  }
0x137e   :  { %v21232_v0 = vpop.eup %21231  ;;  %v14125_v20 = vpack.c.bf16 %v21230_v25, %v21226_v43  ;;  %28996 = vst [vmem:[#allocation26_spill] sm:$0xff] %v27765_v48 }
0x137f   :  { %v14124_v45 = vpack.c.bf16 %v21232_v0, %v21224_v53 }
0x1381   :  { %14158 = vmatprep.mubr.bf16.mxu0 %v14124_v45  ;;  %14244 = vmatprep.mubr.bf16.mxu1 %v14124_v45 }
0x1382   :  { %14159 = vmatmul.mubr.bf16.vlgmr.msra.gmra.mrb[212].mxu0 %v14123_v3  ;;  %14245 = vmatmul.mubr.bf16.vlgmr.msra.gmra.mrb[212].mxu1 %v14123_v3 }
0x1383   :  { %14170 = vmatpush1.bf16.msra.mxu0 %v28923_v46  ;;  %19355 = vmatpush3.bf16.msra.mxu1 %v28924_v6  ;;  %v27518_v46 = vld [vmem:[%s28531_s3 + $0x4a0] ss:$12 sps:$4 sm:$0xff]  }
0x1384   :  { %14171 = vmatprep.subr.bf16.mxu0 %v28925_v22  ;;  %19356 = vmatprep.subr.bf16.mxu1 %v28771_v44  ;;  %v27524_v6 = vld [vmem:[%s28531_s3 + $0x4b4] ss:$12 sps:$4 sm:$0xff]   ;;  %v27530_v22 = vld [vmem:[%s28531_s3 + $0x578] ss:$12 sps:$4 sm:$0xff]  }
0x1385   :  { %14201 = vmatprep.mubr.bf16.mxu0 %v28772_v18  ;;  %19370 = vmatprep.mubr.msk.bf16.mxu1 %vm21467_vm1, %v28771_v44 }
0x1387   :  { %14172 = vmatpush1.bf16.msra.mxu0 %v28926_v61  ;;  %19357 = vmatpush3.bf16.msra.mxu1 %v28927_v10  ;;  %v27536_v61 = vld [vmem:[%s28531_s3 + $0x4b0] ss:$12 sps:$4 sm:$0xff]   ;;  %v27542_v10 = vld [vmem:[%s28531_s3 + $0x4b8] ss:$12 sps:$4 sm:$0xff]  }
0x1388   :  { %14173 = vmatprep.subr.bf16.mxu0 %v28928_v5  ;;  %19358 = vmatprep.subr.bf16.mxu1 %v28771_v44  ;;  %v27548_v5 = vld [vmem:[%s28531_s3 + $0x4cc] ss:$12 sps:$4 sm:$0xff]  }
0x138b   :  { %14174 = vmatpush1.bf16.msra.mxu0 %v28929_v17  ;;  %19359 = vmatpush3.bf16.msra.mxu1 %v28930_v31  ;;  %v27554_v17 = vld [vmem:[%s28531_s3 + $0x590] ss:$12 sps:$4 sm:$0xff]   ;;  %v27560_v31 = vld [vmem:[%s28531_s3 + $0x4c8] ss:$12 sps:$4 sm:$0xff]  }
0x138c   :  { %14175 = vmatprep.subr.bf16.mxu0 %v28931_v7  ;;  %19360 = vmatprep.subr.bf16.mxu1 %v28771_v44  ;;  %v27566_v7 = vld [vmem:[%s28531_s3 + $0x4d0] ss:$12 sps:$4 sm:$0xff]  }
0x138d   :  { %28963 = vst [vmem:[#allocation33_spill] sm:$0xff] %v27566_v7 }
0x138f   :  { %14176 = vmatpush1.bf16.msra.mxu0 %v28932_v27  ;;  %19361 = vmatpush3.bf16.msra.mxu1 %v28933_v8  ;;  %v27572_v27 = vld [vmem:[%s28531_s3 + $0x4e4] ss:$12 sps:$4 sm:$0xff]   ;;  %v27578_v8 = vld [vmem:[%s28531_s3 + $0x5a8] ss:$12 sps:$4 sm:$0xff]  }
0x1390   :  { %14177 = vmatprep.subr.bf16.mxu0 %v28934_v29  ;;  %19362 = vmatprep.subr.bf16.mxu1 %v28771_v44  ;;  %28964 = vst [vmem:[#allocation34_spill] sm:$0xff] %v27572_v27  ;;  %28965 = vst [vmem:[#allocation35_spill] sm:$0xff] %v27578_v8  ;;  %v27584_v29 = vld [vmem:[%s28531_s3 + $0x4e0] ss:$12 sps:$4 sm:$0xff]  }
0x1391   :  { %28966 = vst [vmem:[#allocation36_spill] sm:$0xff] %v27584_v29 }
0x1393   :  { %14178 = vmatpush1.bf16.msra.mxu0 %v28935_v24  ;;  %19363 = vmatpush3.bf16.msra.mxu1 %v28936_v58  ;;  %v27590_v24 = vld [vmem:[%s28531_s3 + $0x4e8] ss:$12 sps:$4 sm:$0xff]  }
0x1394   :  { %14179 = vmatprep.subr.bf16.mxu0 %v28937_v47  ;;  %19364 = vmatprep.subr.bf16.mxu1 %v28771_v44  ;;  %28967 = vst [vmem:[#allocation37_spill] sm:$0xff] %v27590_v24  ;;  %v27596_v58 = vld [vmem:[%s28531_s3 + $0x4fc] ss:$12 sps:$4 sm:$0xff]   ;;  %v27602_v47 = vld [vmem:[%s28531_s3 + $0x5c0] ss:$12 sps:$4 sm:$0xff]  }
0x1395   :  { %28968 = vst [vmem:[#allocation38_spill] sm:$0xff] %v27596_v58  ;;  %28969 = vst [vmem:[#allocation39_spill] sm:$0xff] %v27602_v47 }
0x1397   :  { %14180 = vmatpush1.bf16.msra.mxu0 %v28938_v34  ;;  %19365 = vmatpush3.bf16.msra.mxu1 %v28939_v9  ;;  %v27608_v34 = vld [vmem:[%s28531_s3 + $0x4f8] ss:$12 sps:$4 sm:$0xff]   ;;  %v27614_v9 = vld [vmem:[%s28531_s3 + $0x500] ss:$12 sps:$4 sm:$0xff]  }
0x1398   :  { %14181 = vmatprep.subr.bf16.mxu0 %v28940_v12  ;;  %19366 = vmatprep.subr.bf16.mxu1 %v28771_v44  ;;  %28970 = vst [vmem:[#allocation40_spill] sm:$0xff] %v27608_v34  ;;  %28971 = vst [vmem:[#allocation41_spill] sm:$0xff] %v27614_v9  ;;  %v27620_v12 = vld [vmem:[%s28531_s3 + $0x514] ss:$12 sps:$4 sm:$0xff]  }
0x1399   :  { %28972 = vst [vmem:[#allocation42_spill] sm:$0xff] %v27620_v12 }
0x139b   :  { %14182 = vmatpush1.bf16.msra.mxu0 %v27135_v51  ;;  %19367 = vmatpush3.bf16.msra.mxu1 %v27140_v23  ;;  %v27488_v51 = vld [vmem:[%s28531_s3 + $0x480] ss:$12 sps:$4 sm:$0xff]   ;;  %v27494_v23 = vld [vmem:[%s28531_s3 + $0x488] ss:$12 sps:$4 sm:$0xff]  }
0x139c   :  { %14183 = vmatprep.subr.bf16.mxu0 %v27147_v2  ;;  %19368 = vmatprep.subr.bf16.mxu1 %v28771_v44  ;;  %v27500_v2 = vld [vmem:[%s28531_s3 + $0x49c] ss:$12 sps:$4 sm:$0xff]  }
0x139f   :  { %14184 = vmatpush1.bf16.msra.mxu0 %v27154_v55  ;;  %19369 = vmatpush3.bf16.msra.mxu1 %v27159_v52  ;;  %v27506_v52 = vld [vmem:[%s28531_s3 + $0x560] ss:$12 sps:$4 sm:$0xff]   ;;  %v27512_v55 = vld [vmem:[%s28531_s3 + $0x498] ss:$12 sps:$4 sm:$0xff]  }
0x13a0   :  { %14318 = vmatprep.subr.bf16.mxu1 %v27387_v62  ;;  %18720 = vmatprep.subr.bf16.mxu0 %v27393_v28 }
0x13a2   :  { %14202 = vmatmul.mubr.bf16.vlgmr.msra.gmra.mrb[212].mxu0 %v14125_v20  ;;  %19371 = vmatmul.mubr.bf16.vlgmr.msra.gmra.mrb[216].mxu1 %v14125_v20  ;;  %v14117_v20 = vunpack.c.l.bf16 %v27285_v41 }
0x13a3   :  { %14319 = vmatpush1.bf16.msra.mxu1 %v27488_v51  ;;  %18721 = vmatpush3.bf16.msra.mxu0 %v27494_v23 }
0x13a4   :  { %14320 = vmatprep.subr.bf16.mxu1 %v27500_v2  ;;  %18722 = vmatprep.subr.bf16.mxu0 %v27506_v52 }
0x13a7   :  { %14321 = vmatpush1.bf16.msra.mxu1 %v27512_v55  ;;  %18723 = vmatpush3.bf16.msra.mxu0 %v27518_v46 }
0x13a8   :  { %14322 = vmatprep.subr.bf16.mxu1 %v27524_v6  ;;  %18724 = vmatprep.subr.bf16.mxu0 %v27530_v22 }
0x13ab   :  { %14323 = vmatpush1.bf16.msra.mxu1 %v27536_v61  ;;  %18725 = vmatpush3.bf16.msra.mxu0 %v27542_v10 }
0x13ac   :  { %14324 = vmatprep.subr.bf16.mxu1 %v27548_v5  ;;  %18726 = vmatprep.subr.bf16.mxu0 %v27554_v17 }
0x13af   :  { %14325 = vmatpush1.bf16.msra.mxu1 %v27560_v31  ;;  %18727 = vmatpush3.bf16.msra.mxu0 %v27566_v7 }
0x13b0   :  { %14326 = vmatprep.subr.bf16.mxu1 %v27572_v27  ;;  %18728 = vmatprep.subr.bf16.mxu0 %v27578_v8 }
0x13b3   :  { %14327 = vmatpush1.bf16.msra.mxu1 %v27584_v29  ;;  %18729 = vmatpush3.bf16.msra.mxu0 %v27590_v24 }
0x13b4   :  { %14328 = vmatprep.subr.bf16.mxu1 %v27596_v58  ;;  %18730 = vmatprep.subr.bf16.mxu0 %v27602_v47 }
0x13b7   :  { %14329 = vmatpush1.bf16.msra.mxu1 %v27608_v34  ;;  %18731 = vmatpush3.bf16.msra.mxu0 %v27614_v9 }
0x13b8   :  { %14330 = vmatprep.subr.bf16.mxu1 %v27620_v12  ;;  %18732 = vmatprep.subr.bf16.mxu0 %v27626_v54 }
0x13bb   :  { %14331 = vmatpush1.bf16.msra.mxu1 %v27632_v50  ;;  %18733 = vmatpush3.bf16.msra.mxu0 %v27638_v39 }
0x13bc   :  { %14332 = vmatprep.subr.bf16.mxu1 %v27644_v38  ;;  %18734 = vmatprep.subr.bf16.mxu0 %v27650_v49 }
0x13bf   :  { %14333 = vmatpush1.bf16.msra.mxu1 %v27656_v56  ;;  %18735 = vmatpush3.bf16.msra.mxu0 %v27662_v37 }
0x13c0   :  { %14334 = vmatprep.subr.bf16.mxu1 %v27668_v4  ;;  %19374 = vmatprep.subr.bf16.mxu0 %v28771_v44 }
0x13c3   :  { %14335 = vmatpush1.bf16.msra.mxu1 %v27675_v42 }
0x13c4   :  { %14336 = vmatprep.subr.bf16.mxu1 %v27681_v40 }
0x13c7   :  { %14337 = vmatpush1.bf16.msra.mxu1 %v27687_v19 }
0x13c8   :  { %14338 = vmatprep.subr.bf16.mxu1 %v27693_v33 }
0x13cb   :  { %14339 = vmatpush1.bf16.msra.mxu1 %v27699_v32 }
0x13cc   :  { %14340 = vmatprep.subr.bf16.mxu1 %v27705_v60 }
0x13cf   :  { %14341 = vmatpush1.bf16.msra.mxu1 %v27711_v30 }
0x13d0   :  { %14342 = vmatprep.subr.bf16.mxu1 %v27717_v26 }
0x13d3   :  { %14343 = vmatpush1.bf16.msra.mxu1 %v27723_v59 }
0x13d4   :  { %14344 = vmatprep.subr.bf16.mxu1 %v27729_v15 }
0x13d7   :  { %14345 = vmatpush1.bf16.msra.mxu1 %v27735_v16 }
0x13d8   :  { %14346 = vmatprep.subr.bf16.mxu1 %v27741_v35 }
0x13db   :  { %14347 = vmatpush1.bf16.msra.mxu1 %v27747_v21 }
0x13dc   :  { %14348 = vmatprep.subr.bf16.mxu1 %v27753_v13 }
0x13df   :  { %14349 = vmatpush1.bf16.msra.mxu1 %v27759_v36  ;;  %v28997_v36 = vld [vmem:[#allocation51_spill] sm:$0xff] }
0x13e0   :  { %14361 = vmatprep.subr.bf16.mxu1 %v27765_v48  ;;  %v14119_v13 = vunpack.c.l.bf16 %v28997_v36  ;;  %v14120_v48 = vunpack.c.h.bf16 %v27285_v41 }
0x1455   :  { %v18705_v53 = vpop.f32.mrb[212].mxu1 }
0x1456   :  { %v18706_v43 = vpop.f32.mrb[213].mxu1 }
0x1457   :  { %v18707_v11 = vadd.f32 %v18706_v43, %v18705_v53  ;;  %v18708_v25 = vpop.f32.mrb[214].mxu1  ;;  %v14122_v53 = vunpack.c.h.bf16 %v28997_v36 }
0x1458   :  { %v18709_v3 = vpop.f32.mrb[215].mxu1 }
0x1459   :  { %v18710_v0 = vadd.f32 %v18709_v3, %v18708_v25  ;;  %v14121_v25 = vunpack.c.h.bf16 %v27289_v1 }
0x1475   :  { %v14203_v45 = vpop.f32.mrb[212].mxu0  ;;  %v14287_v57 = vpop.f32.mrb[216].mxu1 }
0x1476   :  { %v14294_v14 = vadd.f32 %v14203_v45, %v14117_v20  ;;  %v14288_v21 = vadd.f32 %v18707_v11, %v14287_v57  ;;  %v14205_v35 = vpop.f32.mrb[213].mxu0  ;;  %v19372_v16 = vpop.f32.mrb[217].mxu1 }
0x1477   :  { %v14295_v15 = vadd.f32 %v14205_v35, %v14118_v63  ;;  %v14207_v59 = vpop.f32.mrb[214].mxu0  ;;  %v14290_v43 = vpop.f32.mrb[218].mxu1 }
0x1478   :  { %21233 = vtanh.f32 %v14294_v14  ;;  %v14296_v3 = vadd.f32 %v14288_v21, %v14119_v13  ;;  %v14297_v26 = vadd.f32 %v14207_v59, %v14120_v48  ;;  %v14291_v30 = vadd.f32 %v18710_v0, %v14290_v43  ;;  %v14209_v60 = vpop.f32.mrb[215].mxu0  ;;  %v19373_v20 = vpop.f32.mrb[219].mxu1  ;;  %v27807_v21 = vld [vmem:[%s28531_s3 + $0x620] ss:$12 sps:$4 sm:$0xff]   ;;  %v27820_v48 = vld [vmem:[%s28531_s3 + $0x630] ss:$12 sps:$4 sm:$0xff]  }
0x1479   :  { %21235 = vtanh.f32 %v14295_v15  ;;  %v14298_v45 = vadd.f32 %v14209_v60, %v14121_v25  ;;  %v27779_v60 = vld [vmem:[%s28531_s3 + $0x600] ss:$12 sps:$4 sm:$0xff]   ;;  %v27801_v15 = vld [vmem:[%s28531_s3 + $0x618] ss:$12 sps:$4 sm:$0xff]   ;;  %v27839_v43 = vld [vmem:[%s28531_s3 + $0x648] ss:$12 sps:$4 sm:$0xff]  }
0x147a   :  { %21237 = vtanh.f32 %v14296_v3  ;;  %v14299_v57 = vadd.f32 %v14291_v30, %v14122_v53  ;;  %v27785_v30 = vld [vmem:[%s28531_s3 + $0x608] ss:$12 sps:$4 sm:$0xff]   ;;  %v27826_v0 = vld [vmem:[%s28531_s3 + $0x638] ss:$12 sps:$4 sm:$0xff]   ;;  %v27845_v25 = vld [vmem:[%s28531_s3 + $0x650] ss:$12 sps:$4 sm:$0xff]  }
0x147b   :  { %21239 = vtanh.f32 %v14297_v26  ;;  %v27791_v26 = vld [vmem:[%s28531_s3 + $0x61c] ss:$12 sps:$4 sm:$0xff]   ;;  %v27813_v13 = vld [vmem:[%s28531_s3 + $0x634] ss:$12 sps:$4 sm:$0xff]   ;;  %v27832_v53 = vld [vmem:[%s28531_s3 + $0x64c] ss:$12 sps:$4 sm:$0xff]  }
0x147c   :  { %21241 = vtanh.f32 %v14299_v57  ;;  %v27851_v3 = vld [vmem:[%s28531_s3 + $0x664] ss:$12 sps:$4 sm:$0xff]   ;;  %v27858_v20 = vld [vmem:[%s28531_s3 + $0x660] ss:$12 sps:$4 sm:$0xff]   ;;  %v27870_v57 = vld [vmem:[%s28531_s3 + $0x67c] ss:$12 sps:$4 sm:$0xff]  }
0x147d   :  { %21243 = vtanh.f32 %v14298_v45  ;;  %v27864_v45 = vld [vmem:[%s28531_s3 + $0x668] ss:$12 sps:$4 sm:$0xff]  }
0x1482   :  { %v21234_v41 = vpop.eup %21233 }
0x1483   :  { %v21236_v63 = vpop.eup %21235 }
0x1484   :  { %v21238_v16 = vpop.eup %21237 }
0x1485   :  { %v21240_v35 = vpop.eup %21239 }
0x1486   :  { %v21242_v36 = vpop.eup %21241  ;;  %v14315_v11 = vpack.c.bf16 %v21240_v35, %v21234_v41  ;;  %v27877_v41 = vld [vmem:[%s28531_s3 + $0x678] ss:$12 sps:$4 sm:$0xff]   ;;  %v27896_v35 = vld [vmem:[%s28531_s3 + $0x690] ss:$12 sps:$4 sm:$0xff]  }
0x1487   :  { %v21244_v1 = vpop.eup %21243  ;;  %v27774_v14 = vpack.c.bf16 %v21242_v36, %v21238_v16  ;;  %v27889_v16 = vld [vmem:[%s28531_s3 + $0x694] ss:$12 sps:$4 sm:$0xff]   ;;  %v27902_v36 = vld [vmem:[%s28531_s3 + $0x698] ss:$12 sps:$4 sm:$0xff]  }
0x1488   :  { %v14316_v59 = vpack.c.bf16 %v21244_v1, %v21236_v63  ;;  %v27883_v63 = vld [vmem:[%s28531_s3 + $0x680] ss:$12 sps:$4 sm:$0xff]   ;;  %v27915_v1 = vld [vmem:[%s28531_s3 + $0x6a8] ss:$12 sps:$4 sm:$0xff]  }
0x148a   :  { %14350 = vmatprep.mubr.bf16.mxu1 %v14316_v59  ;;  %14436 = vmatprep.mubr.bf16.mxu0 %v14316_v59  ;;  %v27921_v59 = vld [vmem:[%s28531_s3 + $0x6b0] ss:$12 sps:$4 sm:$0xff]  }
0x148b   :  { %14351 = vmatmul.mubr.bf16.vlgmr.msra.gmra.mrb[220].mxu1 %v14315_v11  ;;  %14437 = vmatmul.mubr.bf16.vlgmr.msra.gmra.mrb[216].mxu0 %v14315_v11  ;;  %v27908_v11 = vld [vmem:[%s28531_s3 + $0x6ac] ss:$12 sps:$4 sm:$0xff]  }
0x148c   :  { %14362 = vmatpush1.bf16.msra.mxu1 %v27779_v60  ;;  %19375 = vmatpush3.bf16.msra.mxu0 %v27785_v30 }
0x148d   :  { %14363 = vmatprep.subr.bf16.mxu1 %v27791_v26  ;;  %19376 = vmatprep.subr.bf16.mxu0 %v28771_v44 }
0x148e   :  { %14393 = vmatprep.mubr.bf16.mxu1 %v28772_v18  ;;  %19390 = vmatprep.mubr.msk.bf16.mxu0 %vm21467_vm1, %v28771_v44 }
0x1490   :  { %14364 = vmatpush1.bf16.msra.mxu1 %v27801_v15  ;;  %19377 = vmatpush3.bf16.msra.mxu0 %v27807_v21 }
0x1491   :  { %14365 = vmatprep.subr.bf16.mxu1 %v27813_v13  ;;  %19378 = vmatprep.subr.bf16.mxu0 %v28771_v44 }
0x1494   :  { %14366 = vmatpush1.bf16.msra.mxu1 %v27820_v48  ;;  %19379 = vmatpush3.bf16.msra.mxu0 %v27826_v0 }
0x1495   :  { %14367 = vmatprep.subr.bf16.mxu1 %v27832_v53  ;;  %19380 = vmatprep.subr.bf16.mxu0 %v28771_v44 }
0x1498   :  { %14368 = vmatpush1.bf16.msra.mxu1 %v27839_v43  ;;  %19381 = vmatpush3.bf16.msra.mxu0 %v27845_v25 }
0x1499   :  { %14369 = vmatprep.subr.bf16.mxu1 %v27851_v3  ;;  %19382 = vmatprep.subr.bf16.mxu0 %v28771_v44 }
0x149c   :  { %14370 = vmatpush1.bf16.msra.mxu1 %v27858_v20  ;;  %19383 = vmatpush3.bf16.msra.mxu0 %v27864_v45 }
0x149d   :  { %14371 = vmatprep.subr.bf16.mxu1 %v27870_v57  ;;  %19384 = vmatprep.subr.bf16.mxu0 %v28771_v44 }
0x14a0   :  { %14372 = vmatpush1.bf16.msra.mxu1 %v27877_v41  ;;  %19385 = vmatpush3.bf16.msra.mxu0 %v27883_v63 }
0x14a1   :  { %14373 = vmatprep.subr.bf16.mxu1 %v27889_v16  ;;  %19386 = vmatprep.subr.bf16.mxu0 %v28771_v44 }
0x14a4   :  { %14374 = vmatpush1.bf16.msra.mxu1 %v27896_v35  ;;  %19387 = vmatpush3.bf16.msra.mxu0 %v27902_v36 }
0x14a5   :  { %14375 = vmatprep.subr.bf16.mxu1 %v27908_v11  ;;  %19388 = vmatprep.subr.bf16.mxu0 %v28771_v44 }
0x14a8   :  { %14376 = vmatpush1.bf16.msra.mxu1 %v27915_v1  ;;  %19389 = vmatpush3.bf16.msra.mxu0 %v27921_v59 }
0x14a9   :  { %14510 = vmatprep.subr.bf16.mxu0 %v27387_v62  ;;  %18751 = vmatprep.subr.bf16.mxu1 %v27393_v28 }
0x14ab   :  { %14394 = vmatmul.mubr.bf16.vlgmr.msra.gmra.mrb[220].mxu1 %v27774_v14  ;;  %19391 = vmatmul.mubr.bf16.vlgmr.msra.gmra.mrb[220].mxu0 %v27774_v14  ;;  %v28998_v14 = vld [vmem:[#allocation16_spill] sm:$0xff] }
0x14ac   :  { %14511 = vmatpush1.bf16.msra.mxu0 %v27488_v51  ;;  %18752 = vmatpush3.bf16.msra.mxu1 %v27494_v23 }
0x14ad   :  { %14512 = vmatprep.subr.bf16.mxu0 %v27500_v2  ;;  %18753 = vmatprep.subr.bf16.mxu1 %v27506_v52 }
0x14b0   :  { %14513 = vmatpush1.bf16.msra.mxu0 %v27512_v55  ;;  %18754 = vmatpush3.bf16.msra.mxu1 %v27518_v46 }
0x14b1   :  { %14514 = vmatprep.subr.bf16.mxu0 %v27524_v6  ;;  %18755 = vmatprep.subr.bf16.mxu1 %v27530_v22 }
0x14b4   :  { %14515 = vmatpush1.bf16.msra.mxu0 %v27536_v61  ;;  %18756 = vmatpush3.bf16.msra.mxu1 %v27542_v10 }
0x14b5   :  { %14516 = vmatprep.subr.bf16.mxu0 %v27548_v5  ;;  %18757 = vmatprep.subr.bf16.mxu1 %v27554_v17 }
0x14b8   :  { %14517 = vmatpush1.bf16.msra.mxu0 %v27560_v31  ;;  %18758 = vmatpush3.bf16.msra.mxu1 %v27566_v7 }
0x14b9   :  { %14518 = vmatprep.subr.bf16.mxu0 %v27572_v27  ;;  %18759 = vmatprep.subr.bf16.mxu1 %v27578_v8 }
0x14bc   :  { %14519 = vmatpush1.bf16.msra.mxu0 %v27584_v29  ;;  %18760 = vmatpush3.bf16.msra.mxu1 %v27590_v24 }
0x14bd   :  { %14520 = vmatprep.subr.bf16.mxu0 %v27596_v58  ;;  %18761 = vmatprep.subr.bf16.mxu1 %v27602_v47 }
0x14c0   :  { %14521 = vmatpush1.bf16.msra.mxu0 %v27608_v34  ;;  %18762 = vmatpush3.bf16.msra.mxu1 %v27614_v9  ;;  %v29010_v9 = vld [vmem:[#allocation27_spill] sm:$0xff] }
0x14c1   :  { %14522 = vmatprep.subr.bf16.mxu0 %v27620_v12  ;;  %18763 = vmatprep.subr.bf16.mxu1 %v27626_v54  ;;  %v29009_v54 = vld [vmem:[#allocation7_spill] sm:$0xff] }
0x14c4   :  { %14523 = vmatpush1.bf16.msra.mxu0 %v27632_v50  ;;  %18764 = vmatpush3.bf16.msra.mxu1 %v27638_v39 }
0x14c5   :  { %14524 = vmatprep.subr.bf16.mxu0 %v27644_v38  ;;  %18765 = vmatprep.subr.bf16.mxu1 %v27650_v49  ;;  %v28999_v49 = vld [vmem:[#allocation23_spill] sm:$0xff]  ;;  %v29003_v38 = vld [vmem:[#allocation17_spill] sm:$0xff] }
0x14c8   :  { %14525 = vmatpush1.bf16.msra.mxu0 %v27656_v56  ;;  %18766 = vmatpush3.bf16.msra.mxu1 %v27662_v37  ;;  %v29000_v56 = vld [vmem:[#allocation20_spill] sm:$0xff]  ;;  %v29001_v37 = vld [vmem:[#allocation14_spill] sm:$0xff] }
0x14c9   :  { %14526 = vmatprep.subr.bf16.mxu0 %v27668_v4  ;;  %19394 = vmatprep.subr.bf16.mxu1 %v28771_v44  ;;  %v29002_v4 = vld [vmem:[#allocation18_spill] sm:$0xff] }
0x14cc   :  { %14527 = vmatpush1.bf16.msra.mxu0 %v27675_v42  ;;  %v29004_v42 = vld [vmem:[#allocation10_spill] sm:$0xff] }
0x14cd   :  { %14528 = vmatprep.subr.bf16.mxu0 %v27681_v40  ;;  %v29005_v40 = vld [vmem:[#allocation24_spill] sm:$0xff] }
0x14d0   :  { %14529 = vmatpush1.bf16.msra.mxu0 %v27687_v19  ;;  %v29006_v19 = vld [vmem:[#allocation11_spill] sm:$0xff] }
0x14d1   :  { %14530 = vmatprep.subr.bf16.mxu0 %v27693_v33  ;;  %v29007_v33 = vld [vmem:[#allocation21_spill] sm:$0xff] }
0x14d4   :  { %14531 = vmatpush1.bf16.msra.mxu0 %v27699_v32  ;;  %v29008_v32 = vld [vmem:[#allocation26_spill] sm:$0xff] }
0x14d5   :  { %14532 = vmatprep.subr.bf16.mxu0 %v28998_v14 }
0x14d8   :  { %14533 = vmatpush1.bf16.msra.mxu0 %v28999_v49 }
0x14d9   :  { %14534 = vmatprep.subr.bf16.mxu0 %v29000_v56 }
0x14dc   :  { %14535 = vmatpush1.bf16.msra.mxu0 %v29001_v37 }
0x14dd   :  { %14536 = vmatprep.subr.bf16.mxu0 %v29002_v4  ;;  %v14309_v4 = vunpack.c.l.bf16 %v29009_v54 }
0x14e0   :  { %14537 = vmatpush1.bf16.msra.mxu0 %v29003_v38 }
0x14e1   :  { %14538 = vmatprep.subr.bf16.mxu0 %v29004_v42  ;;  %v14310_v42 = vunpack.c.l.bf16 %v29010_v9 }
0x14e4   :  { %14539 = vmatpush1.bf16.msra.mxu0 %v29005_v40  ;;  %v29011_v40 = vld [vmem:[#allocation4_spill] sm:$0xff] }
0x14e5   :  { %14540 = vmatprep.subr.bf16.mxu0 %v29006_v19  ;;  %v14311_v47 = vunpack.c.l.bf16 %v29011_v40 }
0x14e8   :  { %14541 = vmatpush1.bf16.msra.mxu0 %v29007_v33 }
0x14e9   :  { %14553 = vmatprep.subr.bf16.mxu0 %v29008_v32  ;;  %v14312_v32 = vunpack.c.h.bf16 %v29009_v54 }
0x155e   :  { %v18736_v14 = vpop.f32.mrb[216].mxu0 }
0x155f   :  { %v18737_v49 = vpop.f32.mrb[217].mxu0 }
0x1560   :  { %v18738_v39 = vadd.f32 %v18737_v49, %v18736_v14  ;;  %v18739_v56 = vpop.f32.mrb[218].mxu0  ;;  %v14314_v49 = vunpack.c.h.bf16 %v29011_v40 }
0x1561   :  { %v18740_v50 = vpop.f32.mrb[219].mxu0 }
0x1562   :  { %v18741_v37 = vadd.f32 %v18740_v50, %v18739_v56  ;;  %v14313_v50 = vunpack.c.h.bf16 %v29010_v9 }
0x157e   :  { %v14395_v12 = vpop.f32.mrb[220].mxu1  ;;  %v14479_v38 = vpop.f32.mrb[220].mxu0 }
0x157f   :  { %v14486_v34 = vadd.f32 %v14395_v12, %v14309_v4  ;;  %v14480_v19 = vadd.f32 %v18738_v39, %v14479_v38  ;;  %v14397_v58 = vpop.f32.mrb[221].mxu1  ;;  %v19392_v33 = vpop.f32.mrb[221].mxu0 }
0x1580   :  { %v14487_v24 = vadd.f32 %v14397_v58, %v14310_v42  ;;  %v14399_v29 = vpop.f32.mrb[222].mxu1  ;;  %v14482_v14 = vpop.f32.mrb[222].mxu0 }
0x1581   :  { %21245 = vtanh.f32 %v14486_v34  ;;  %v14488_v56 = vadd.f32 %v14480_v19, %v14311_v47  ;;  %v14489_v8 = vadd.f32 %v14399_v29, %v14312_v32  ;;  %v14483_v27 = vadd.f32 %v18741_v37, %v14482_v14  ;;  %v14401_v7 = vpop.f32.mrb[223].mxu1  ;;  %v19393_v12 = vpop.f32.mrb[223].mxu0  ;;  %v29017_v29 = vld [vmem:[#allocation38_spill] sm:$0xff]  ;;  %v29019_v37 = vld [vmem:[#allocation40_spill] sm:$0xff]  ;;  %v29020_v19 = vld [vmem:[#allocation41_spill] sm:$0xff] }
0x1582   :  { %21247 = vtanh.f32 %v14487_v24  ;;  %v14490_v4 = vadd.f32 %v14401_v7, %v14313_v50  ;;  %v29014_v7 = vld [vmem:[#allocation35_spill] sm:$0xff]  ;;  %v29021_v32 = vld [vmem:[#allocation42_spill] sm:$0xff]  ;;  %v29023_v14 = vld [vmem:[#allocation44_spill] sm:$0xff] }
0x1583   :  { %21249 = vtanh.f32 %v14488_v56  ;;  %v14491_v39 = vadd.f32 %v14483_v27, %v14314_v49  ;;  %v29015_v27 = vld [vmem:[#allocation36_spill] sm:$0xff]  ;;  %v29018_v24 = vld [vmem:[#allocation39_spill] sm:$0xff]  ;;  %v29024_v50 = vld [vmem:[#allocation45_spill] sm:$0xff] }
0x1584   :  { %21251 = vtanh.f32 %v14489_v8  ;;  %v29016_v8 = vld [vmem:[#allocation37_spill] sm:$0xff]  ;;  %v29022_v49 = vld [vmem:[#allocation43_spill] sm:$0xff]  ;;  %v29025_v56 = vld [vmem:[#allocation46_spill] sm:$0xff] }
0x1585   :  { %21253 = vtanh.f32 %v14491_v39  ;;  %v29026_v12 = vld [vmem:[#allocation47_spill] sm:$0xff]  ;;  %v29028_v39 = vld [vmem:[#allocation49_spill] sm:$0xff] }
0x1586   :  { %21255 = vtanh.f32 %v14490_v4  ;;  %v29027_v4 = vld [vmem:[#allocation48_spill] sm:$0xff] }
0x158b   :  { %v21246_v58 = vpop.eup %21245 }
0x158c   :  { %v21248_v54 = vpop.eup %21247 }
0x158d   :  { %v21250_v38 = vpop.eup %21249 }
0x158e   :  { %v21252_v42 = vpop.eup %21251 }
0x158f   :  { %v21254_v40 = vpop.eup %21253  ;;  %v14507_v33 = vpack.c.bf16 %v21252_v42, %v21246_v58  ;;  %v29029_v58 = vld [vmem:[#allocation50_spill] sm:$0xff]  ;;  %v29032_v42 = vld [vmem:[#allocation19_spill] sm:$0xff] }
0x1590   :  { %v21256_v9 = vpop.eup %21255  ;;  %v14509_v34 = vpack.c.bf16 %v21254_v40, %v21250_v38  ;;  %v29031_v38 = vld [vmem:[#allocation25_spill] sm:$0xff]  ;;  %v29033_v40 = vld [vmem:[#allocation8_spill] sm:$0xff] }
0x1591   :  { %v14508_v47 = vpack.c.bf16 %v21256_v9, %v21248_v54  ;;  %v29030_v54 = vld [vmem:[#allocation13_spill] sm:$0xff]  ;;  %v29035_v9 = vld [vmem:[#allocation16_spill] sm:$0xff] }
0x1593   :  { %14542 = vmatprep.mubr.bf16.mxu0 %v14508_v47  ;;  %14628 = vmatprep.mubr.bf16.mxu1 %v14508_v47  ;;  %v29037_v47 = vld [vmem:[#allocation20_spill] sm:$0xff] }
0x1594   :  { %14543 = vmatmul.mubr.bf16.vlgmr.msra.gmra.mrb[224].mxu0 %v14507_v33  ;;  %14629 = vmatmul.mubr.bf16.vlgmr.msra.gmra.mrb[224].mxu1 %v14507_v33  ;;  %v29034_v33 = vld [vmem:[#allocation15_spill] sm:$0xff] }
0x1595   :  { %14554 = vmatpush1.bf16.msra.mxu0 %v27779_v60  ;;  %19395 = vmatpush3.bf16.msra.mxu1 %v27785_v30 }
0x1596   :  { %14555 = vmatprep.subr.bf16.mxu0 %v27791_v26  ;;  %19396 = vmatprep.subr.bf16.mxu1 %v28771_v44 }
0x1597   :  { %14585 = vmatprep.mubr.bf16.mxu0 %v28772_v18  ;;  %19410 = vmatprep.mubr.msk.bf16.mxu1 %vm21467_vm1, %v28771_v44 }
0x1599   :  { %14556 = vmatpush1.bf16.msra.mxu0 %v27801_v15  ;;  %19397 = vmatpush3.bf16.msra.mxu1 %v27807_v21 }
0x159a   :  { %14557 = vmatprep.subr.bf16.mxu0 %v27813_v13  ;;  %19398 = vmatprep.subr.bf16.mxu1 %v28771_v44 }
0x159d   :  { %14558 = vmatpush1.bf16.msra.mxu0 %v27820_v48  ;;  %19399 = vmatpush3.bf16.msra.mxu1 %v27826_v0 }
0x159e   :  { %14559 = vmatprep.subr.bf16.mxu0 %v27832_v53  ;;  %19400 = vmatprep.subr.bf16.mxu1 %v28771_v44 }
0x15a1   :  { %14560 = vmatpush1.bf16.msra.mxu0 %v27839_v43  ;;  %19401 = vmatpush3.bf16.msra.mxu1 %v27845_v25 }
0x15a2   :  { %14561 = vmatprep.subr.bf16.mxu0 %v27851_v3  ;;  %19402 = vmatprep.subr.bf16.mxu1 %v28771_v44 }
0x15a5   :  { %14562 = vmatpush1.bf16.msra.mxu0 %v27858_v20  ;;  %19403 = vmatpush3.bf16.msra.mxu1 %v27864_v45 }
0x15a6   :  { %14563 = vmatprep.subr.bf16.mxu0 %v27870_v57  ;;  %19404 = vmatprep.subr.bf16.mxu1 %v28771_v44 }
0x15a9   :  { %14564 = vmatpush1.bf16.msra.mxu0 %v27877_v41  ;;  %19405 = vmatpush3.bf16.msra.mxu1 %v27883_v63 }
0x15aa   :  { %14565 = vmatprep.subr.bf16.mxu0 %v27889_v16  ;;  %19406 = vmatprep.subr.bf16.mxu1 %v28771_v44 }
0x15ad   :  { %14566 = vmatpush1.bf16.msra.mxu0 %v27896_v35  ;;  %19407 = vmatpush3.bf16.msra.mxu1 %v27902_v36 }
0x15ae   :  { %14567 = vmatprep.subr.bf16.mxu0 %v27908_v11  ;;  %19408 = vmatprep.subr.bf16.mxu1 %v28771_v44 }
0x15b1   :  { %14568 = vmatpush1.bf16.msra.mxu0 %v27915_v1  ;;  %19409 = vmatpush3.bf16.msra.mxu1 %v27921_v59 }
0x15b2   :  { %14702 = vmatprep.subr.bf16.mxu1 %v27387_v62  ;;  %18782 = vmatprep.subr.bf16.mxu0 %v27393_v28  ;;  %v29012_v62 = vld [vmem:[#allocation33_spill] sm:$0xff]  ;;  %v29013_v28 = vld [vmem:[#allocation34_spill] sm:$0xff] }
0x15b4   :  { %14586 = vmatmul.mubr.bf16.vlgmr.msra.gmra.mrb[224].mxu0 %v14509_v34  ;;  %19411 = vmatmul.mubr.bf16.vlgmr.msra.gmra.mrb[228].mxu1 %v14509_v34  ;;  %v29036_v34 = vld [vmem:[#allocation23_spill] sm:$0xff] }
0x15b5   :  { %14703 = vmatpush1.bf16.msra.mxu1 %v27488_v51  ;;  %18783 = vmatpush3.bf16.msra.mxu0 %v27494_v23 }
0x15b6   :  { %14704 = vmatprep.subr.bf16.mxu1 %v27500_v2  ;;  %18784 = vmatprep.subr.bf16.mxu0 %v27506_v52 }
0x15b9   :  { %14705 = vmatpush1.bf16.msra.mxu1 %v27512_v55  ;;  %18785 = vmatpush3.bf16.msra.mxu0 %v27518_v46 }
0x15ba   :  { %14706 = vmatprep.subr.bf16.mxu1 %v27524_v6  ;;  %18786 = vmatprep.subr.bf16.mxu0 %v27530_v22 }
0x15bd   :  { %14707 = vmatpush1.bf16.msra.mxu1 %v27536_v61  ;;  %18787 = vmatpush3.bf16.msra.mxu0 %v27542_v10 }
0x15be   :  { %14708 = vmatprep.subr.bf16.mxu1 %v27548_v5  ;;  %18788 = vmatprep.subr.bf16.mxu0 %v27554_v17 }
0x15c1   :  { %14709 = vmatpush1.bf16.msra.mxu1 %v27560_v31  ;;  %18789 = vmatpush3.bf16.msra.mxu0 %v29012_v62 }
0x15c2   :  { %14710 = vmatprep.subr.bf16.mxu1 %v29013_v28  ;;  %18790 = vmatprep.subr.bf16.mxu0 %v29014_v7 }
0x15c5   :  { %14711 = vmatpush1.bf16.msra.mxu1 %v29015_v27  ;;  %18791 = vmatpush3.bf16.msra.mxu0 %v29016_v8 }
0x15c6   :  { %14712 = vmatprep.subr.bf16.mxu1 %v29017_v29  ;;  %18792 = vmatprep.subr.bf16.mxu0 %v29018_v24 }
0x15c9   :  { %14713 = vmatpush1.bf16.msra.mxu1 %v29019_v37  ;;  %18793 = vmatpush3.bf16.msra.mxu0 %v29020_v19 }
0x15ca   :  { %14714 = vmatprep.subr.bf16.mxu1 %v29021_v32  ;;  %18794 = vmatprep.subr.bf16.mxu0 %v29022_v49  ;;  %v29047_v49 = vld [vmem:[#allocation53_spill] sm:$0xff] }
0x15cd   :  { %14715 = vmatpush1.bf16.msra.mxu1 %v29023_v14  ;;  %18795 = vmatpush3.bf16.msra.mxu0 %v29024_v50  ;;  %v29046_v50 = vld [vmem:[#allocation52_spill] sm:$0xff] }
0x15ce   :  { %14716 = vmatprep.subr.bf16.mxu1 %v29025_v56  ;;  %18796 = vmatprep.subr.bf16.mxu0 %v29026_v12 }
0x15d1   :  { %14717 = vmatpush1.bf16.msra.mxu1 %v29027_v4  ;;  %18797 = vmatpush3.bf16.msra.mxu0 %v29028_v39  ;;  %v29038_v39 = vld [vmem:[#allocation14_spill] sm:$0xff]  ;;  %v29040_v4 = vld [vmem:[#allocation17_spill] sm:$0xff] }
0x15d2   :  { %14718 = vmatprep.subr.bf16.mxu1 %v29029_v58  ;;  %19414 = vmatprep.subr.bf16.mxu0 %v28771_v44  ;;  %v29039_v58 = vld [vmem:[#allocation18_spill] sm:$0xff] }
0x15d5   :  { %14719 = vmatpush1.bf16.msra.mxu1 %v29030_v54  ;;  %v29041_v54 = vld [vmem:[#allocation10_spill] sm:$0xff] }
0x15d6   :  { %14720 = vmatprep.subr.bf16.mxu1 %v29031_v38  ;;  %v29042_v38 = vld [vmem:[#allocation24_spill] sm:$0xff] }
0x15d9   :  { %14721 = vmatpush1.bf16.msra.mxu1 %v29032_v42  ;;  %v29043_v42 = vld [vmem:[#allocation11_spill] sm:$0xff] }
0x15da   :  { %14722 = vmatprep.subr.bf16.mxu1 %v29033_v40  ;;  %v29044_v40 = vld [vmem:[#allocation21_spill] sm:$0xff] }
0x15dd   :  { %14723 = vmatpush1.bf16.msra.mxu1 %v29034_v33  ;;  %v29045_v33 = vld [vmem:[#allocation26_spill] sm:$0xff] }
0x15de   :  { %14724 = vmatprep.subr.bf16.mxu1 %v29035_v9 }
0x15e1   :  { %14725 = vmatpush1.bf16.msra.mxu1 %v29036_v34 }
0x15e2   :  { %14726 = vmatprep.subr.bf16.mxu1 %v29037_v47 }
0x15e5   :  { %14727 = vmatpush1.bf16.msra.mxu1 %v29038_v39 }
0x15e6   :  { %14728 = vmatprep.subr.bf16.mxu1 %v29039_v58  ;;  %v14501_v58 = vunpack.c.l.bf16 %v29046_v50 }
0x15e9   :  { %14729 = vmatpush1.bf16.msra.mxu1 %v29040_v4 }
0x15ea   :  { %14730 = vmatprep.subr.bf16.mxu1 %v29041_v54  ;;  %v14502_v54 = vunpack.c.l.bf16 %v29047_v49 }
0x15ed   :  { %14731 = vmatpush1.bf16.msra.mxu1 %v29042_v38  ;;  %v29048_v38 = vld [vmem:[#allocation12_spill] sm:$0xff] }
0x15ee   :  { %14732 = vmatprep.subr.bf16.mxu1 %v29043_v42  ;;  %v14503_v19 = vunpack.c.l.bf16 %v29048_v38 }
0x15f1   :  { %14733 = vmatpush1.bf16.msra.mxu1 %v29044_v40 }
0x15f2   :  { %14745 = vmatprep.subr.bf16.mxu1 %v29045_v33  ;;  %v14504_v33 = vunpack.c.h.bf16 %v29046_v50 }
0x1667   :  { %v18767_v9 = vpop.f32.mrb[224].mxu1 }
0x1668   :  { %v18768_v34 = vpop.f32.mrb[225].mxu1 }
0x1669   :  { %v18769_v12 = vadd.f32 %v18768_v34, %v18767_v9  ;;  %v18770_v47 = vpop.f32.mrb[226].mxu1  ;;  %v14506_v9 = vunpack.c.h.bf16 %v29048_v38 }
0x166a   :  { %v18771_v56 = vpop.f32.mrb[227].mxu1 }
0x166b   :  { %v18772_v39 = vadd.f32 %v18771_v56, %v18770_v47  ;;  %v14505_v56 = vunpack.c.h.bf16 %v29047_v49 }
0x1687   :  { %v14587_v14 = vpop.f32.mrb[224].mxu0  ;;  %v14671_v4 = vpop.f32.mrb[228].mxu1 }
0x1688   :  { %v14678_v32 = vadd.f32 %v14587_v14, %v14501_v58  ;;  %v14672_v42 = vadd.f32 %v18769_v12, %v14671_v4  ;;  %v14589_v37 = vpop.f32.mrb[225].mxu0  ;;  %v19412_v40 = vpop.f32.mrb[229].mxu1 }
0x1689   :  { %v14679_v24 = vadd.f32 %v14589_v37, %v14502_v54  ;;  %v14591_v29 = vpop.f32.mrb[226].mxu0  ;;  %v14674_v34 = vpop.f32.mrb[230].mxu1 }
0x168a   :  { %21257 = vtanh.f32 %v14678_v32  ;;  %v14680_v47 = vadd.f32 %v14672_v42, %v14503_v19  ;;  %v14681_v8 = vadd.f32 %v14591_v29, %v14504_v33  ;;  %v14675_v27 = vadd.f32 %v18772_v39, %v14674_v34  ;;  %v14593_v7 = vpop.f32.mrb[227].mxu0  ;;  %v19413_v14 = vpop.f32.mrb[231].mxu1  ;;  %v29065_v29 = vld [vmem:[#allocation13_spill] sm:$0xff]  ;;  %v29067_v39 = vld [vmem:[#allocation19_spill] sm:$0xff]  ;;  %v29068_v42 = vld [vmem:[#allocation8_spill] sm:$0xff] }
0x168b   :  { %21259 = vtanh.f32 %v14679_v24  ;;  %v14682_v58 = vadd.f32 %v14593_v7, %v14505_v56  ;;  %v28107_v7 = vld [vmem:[%s28531_s3 + $0x484] ss:$12 sps:$4 sm:$0xff]   ;;  %v29066_v24 = vld [vmem:[#allocation25_spill] sm:$0xff]  ;;  %v29069_v33 = vld [vmem:[#allocation15_spill] sm:$0xff] }
0x168c   :  { %21261 = vtanh.f32 %v14680_v47  ;;  %v14683_v12 = vadd.f32 %v14675_v27, %v14506_v9  ;;  %v28113_v27 = vld [vmem:[%s28531_s3 + $0x548] ss:$12 sps:$4 sm:$0xff]   ;;  %v29070_v9 = vld [vmem:[#allocation16_spill] sm:$0xff]  ;;  %v29071_v34 = vld [vmem:[#allocation23_spill] sm:$0xff] }
0x168d   :  { %21263 = vtanh.f32 %v14681_v8  ;;  %v29064_v8 = vld [vmem:[#allocation50_spill] sm:$0xff]  ;;  %v29072_v56 = vld [vmem:[#allocation20_spill] sm:$0xff] }
0x168e   :  { %21265 = vtanh.f32 %v14683_v12  ;;  %v29073_v47 = vld [vmem:[#allocation14_spill] sm:$0xff] }
0x168f   :  { %21267 = vtanh.f32 %v14682_v58  ;;  %v29074_v14 = vld [vmem:[#allocation18_spill] sm:$0xff]  ;;  %v29075_v58 = vld [vmem:[#allocation17_spill] sm:$0xff] }
0x1690   :  { %v29076_v12 = vld [vmem:[#allocation10_spill] sm:$0xff] }
0x1694   :  { %v21258_v37 = vpop.eup %21257 }
0x1695   :  { %v21260_v50 = vpop.eup %21259 }
0x1696   :  { %v21262_v4 = vpop.eup %21261 }
0x1697   :  { %v21264_v54 = vpop.eup %21263 }
0x1698   :  { %v21266_v38 = vpop.eup %21265  ;;  %v14699_v40 = vpack.c.bf16 %v21264_v54, %v21258_v37  ;;  %v29077_v37 = vld [vmem:[#allocation24_spill] sm:$0xff]  ;;  %v29080_v54 = vld [vmem:[#allocation26_spill] sm:$0xff] }
0x1699   :  { %v21268_v49 = vpop.eup %21267  ;;  %v14701_v32 = vpack.c.bf16 %v21266_v38, %v21262_v4  ;;  %v29079_v4 = vld [vmem:[#allocation21_spill] sm:$0xff] }
0x169a   :  { %v14700_v19 = vpack.c.bf16 %v21268_v49, %v21260_v50  ;;  %v29078_v50 = vld [vmem:[#allocation11_spill] sm:$0xff] }
0x169c   :  { %14734 = vmatprep.mubr.bf16.mxu1 %v14700_v19  ;;  %14820 = vmatprep.mubr.bf16.mxu0 %v14700_v19 }
0x169d   :  { %14735 = vmatmul.mubr.bf16.vlgmr.msra.gmra.mrb[232].mxu1 %v14699_v40  ;;  %14821 = vmatmul.mubr.bf16.vlgmr.msra.gmra.mrb[228].mxu0 %v14699_v40 }
0x169e   :  { %14746 = vmatpush1.bf16.msra.mxu1 %v27779_v60  ;;  %19415 = vmatpush3.bf16.msra.mxu0 %v27785_v30 }
0x169f   :  { %14747 = vmatprep.subr.bf16.mxu1 %v27791_v26  ;;  %19416 = vmatprep.subr.bf16.mxu0 %v28771_v44 }
0x16a0   :  { %14777 = vmatprep.mubr.bf16.mxu1 %v28772_v18  ;;  %19430 = vmatprep.mubr.msk.bf16.mxu0 %vm21467_vm1, %v28771_v44 }
0x16a2   :  { %14748 = vmatpush1.bf16.msra.mxu1 %v27801_v15  ;;  %19417 = vmatpush3.bf16.msra.mxu0 %v27807_v21 }
0x16a3   :  { %14749 = vmatprep.subr.bf16.mxu1 %v27813_v13  ;;  %19418 = vmatprep.subr.bf16.mxu0 %v28771_v44 }
0x16a6   :  { %14750 = vmatpush1.bf16.msra.mxu1 %v27820_v48  ;;  %19419 = vmatpush3.bf16.msra.mxu0 %v27826_v0 }
0x16a7   :  { %14751 = vmatprep.subr.bf16.mxu1 %v27832_v53  ;;  %19420 = vmatprep.subr.bf16.mxu0 %v28771_v44 }
0x16aa   :  { %14752 = vmatpush1.bf16.msra.mxu1 %v27839_v43  ;;  %19421 = vmatpush3.bf16.msra.mxu0 %v27845_v25 }
0x16ab   :  { %14753 = vmatprep.subr.bf16.mxu1 %v27851_v3  ;;  %19422 = vmatprep.subr.bf16.mxu0 %v28771_v44 }
0x16ae   :  { %14754 = vmatpush1.bf16.msra.mxu1 %v27858_v20  ;;  %19423 = vmatpush3.bf16.msra.mxu0 %v27864_v45 }
0x16af   :  { %14755 = vmatprep.subr.bf16.mxu1 %v27870_v57  ;;  %19424 = vmatprep.subr.bf16.mxu0 %v28771_v44 }
0x16b2   :  { %14756 = vmatpush1.bf16.msra.mxu1 %v27877_v41  ;;  %19425 = vmatpush3.bf16.msra.mxu0 %v27883_v63 }
0x16b3   :  { %14757 = vmatprep.subr.bf16.mxu1 %v27889_v16  ;;  %19426 = vmatprep.subr.bf16.mxu0 %v28771_v44 }
0x16b6   :  { %14758 = vmatpush1.bf16.msra.mxu1 %v27896_v35  ;;  %19427 = vmatpush3.bf16.msra.mxu0 %v27902_v36 }
0x16b7   :  { %14759 = vmatprep.subr.bf16.mxu1 %v27908_v11  ;;  %19428 = vmatprep.subr.bf16.mxu0 %v28771_v44 }
0x16ba   :  { %14760 = vmatpush1.bf16.msra.mxu1 %v27915_v1  ;;  %19429 = vmatpush3.bf16.msra.mxu0 %v27921_v59 }
0x16bb   :  { %14894 = vmatprep.subr.bf16.mxu0 %v28107_v7  ;;  %18813 = vmatprep.subr.bf16.mxu1 %v28113_v27 }
0x16bd   :  { %14778 = vmatmul.mubr.bf16.vlgmr.msra.gmra.mrb[232].mxu1 %v14701_v32  ;;  %19431 = vmatmul.mubr.bf16.vlgmr.msra.gmra.mrb[232].mxu0 %v14701_v32 }
0x16be   :  { %14895 = vmatpush1.bf16.msra.mxu0 %v27488_v51  ;;  %18814 = vmatpush3.bf16.msra.mxu1 %v27494_v23  ;;  %v29049_v51 = vld [vmem:[#allocation35_spill] sm:$0xff]  ;;  %v29050_v23 = vld [vmem:[#allocation36_spill] sm:$0xff] }
0x16bf   :  { %14896 = vmatprep.subr.bf16.mxu0 %v27500_v2  ;;  %18815 = vmatprep.subr.bf16.mxu1 %v27506_v52  ;;  %v29051_v2 = vld [vmem:[#allocation37_spill] sm:$0xff]  ;;  %v29052_v52 = vld [vmem:[#allocation38_spill] sm:$0xff] }
0x16c2   :  { %14897 = vmatpush1.bf16.msra.mxu0 %v27512_v55  ;;  %18816 = vmatpush3.bf16.msra.mxu1 %v27518_v46  ;;  %v29053_v55 = vld [vmem:[#allocation39_spill] sm:$0xff]  ;;  %v29054_v46 = vld [vmem:[#allocation40_spill] sm:$0xff] }
0x16c3   :  { %14898 = vmatprep.subr.bf16.mxu0 %v27524_v6  ;;  %18817 = vmatprep.subr.bf16.mxu1 %v27530_v22  ;;  %v29055_v6 = vld [vmem:[#allocation41_spill] sm:$0xff]  ;;  %v29056_v22 = vld [vmem:[#allocation42_spill] sm:$0xff] }
0x16c6   :  { %14899 = vmatpush1.bf16.msra.mxu0 %v27536_v61  ;;  %18818 = vmatpush3.bf16.msra.mxu1 %v27542_v10  ;;  %v29057_v61 = vld [vmem:[#allocation43_spill] sm:$0xff]  ;;  %v29058_v10 = vld [vmem:[#allocation44_spill] sm:$0xff] }
0x16c7   :  { %14900 = vmatprep.subr.bf16.mxu0 %v27548_v5  ;;  %18819 = vmatprep.subr.bf16.mxu1 %v27554_v17  ;;  %v29059_v5 = vld [vmem:[#allocation45_spill] sm:$0xff]  ;;  %v29060_v17 = vld [vmem:[#allocation46_spill] sm:$0xff] }
0x16ca   :  { %14901 = vmatpush1.bf16.msra.mxu0 %v27560_v31  ;;  %18820 = vmatpush3.bf16.msra.mxu1 %v29012_v62  ;;  %v29061_v31 = vld [vmem:[#allocation47_spill] sm:$0xff]  ;;  %v29062_v62 = vld [vmem:[#allocation48_spill] sm:$0xff] }
0x16cb   :  { %14902 = vmatprep.subr.bf16.mxu0 %v29013_v28  ;;  %18821 = vmatprep.subr.bf16.mxu1 %v29049_v51  ;;  %v29063_v28 = vld [vmem:[#allocation49_spill] sm:$0xff] }
0x16ce   :  { %14903 = vmatpush1.bf16.msra.mxu0 %v29050_v23  ;;  %18822 = vmatpush3.bf16.msra.mxu1 %v29051_v2  ;;  %v29081_v23 = vld [vmem:[#allocation54_spill] sm:$0xff] }
0x16cf   :  { %14904 = vmatprep.subr.bf16.mxu0 %v29052_v52  ;;  %18823 = vmatprep.subr.bf16.mxu1 %v29053_v55  ;;  %v14693_v2 = vunpack.c.l.bf16 %v29081_v23 }
0x16d2   :  { %14905 = vmatpush1.bf16.msra.mxu0 %v29054_v46  ;;  %18824 = vmatpush3.bf16.msra.mxu1 %v29055_v6  ;;  %v29082_v46 = vld [vmem:[#allocation55_spill] sm:$0xff] }
0x16d3   :  { %14906 = vmatprep.subr.bf16.mxu0 %v29056_v22  ;;  %18825 = vmatprep.subr.bf16.mxu1 %v29057_v61  ;;  %v14694_v6 = vunpack.c.l.bf16 %v29082_v46  ;;  %v29083_v61 = vld [vmem:[#allocation22_spill] sm:$0xff] }
0x16d6   :  { %14907 = vmatpush1.bf16.msra.mxu0 %v29058_v10  ;;  %18826 = vmatpush3.bf16.msra.mxu1 %v29059_v5  ;;  %v14695_v10 = vunpack.c.l.bf16 %v29083_v61 }
0x16d7   :  { %14908 = vmatprep.subr.bf16.mxu0 %v29060_v17  ;;  %18827 = vmatprep.subr.bf16.mxu1 %v29061_v31 }
0x16da   :  { %14909 = vmatpush1.bf16.msra.mxu0 %v29062_v62  ;;  %18828 = vmatpush3.bf16.msra.mxu1 %v29063_v28  ;;  %v14696_v62 = vunpack.c.h.bf16 %v29081_v23  ;;  %v21423_v23 = vld [vmem:[%s28531_s3 + $0x528] ss:$12 sps:$4 sm:$0xff]  }
0x16db   :  { %14910 = vmatprep.subr.bf16.mxu0 %v29064_v8  ;;  %19434 = vmatprep.subr.bf16.mxu1 %v28771_v44 }
0x16de   :  { %14911 = vmatpush1.bf16.msra.mxu0 %v29065_v29  ;;  %v14698_v29 = vunpack.c.h.bf16 %v29083_v61  ;;  %v21430_v61 = vld [vmem:[%s28531_s3 + $0x570] ss:$12 sps:$4 sm:$0xff]  }
0x16df   :  { %14912 = vmatprep.subr.bf16.mxu0 %v29066_v24 }
0x16e2   :  { %14913 = vmatpush1.bf16.msra.mxu0 %v29067_v39  ;;  %v14697_v39 = vunpack.c.h.bf16 %v29082_v46  ;;  %v21427_v46 = vld [vmem:[%s28531_s3 + $0x55c] ss:$12 sps:$4 sm:$0xff]  }
0x16e3   :  { %14914 = vmatprep.subr.bf16.mxu0 %v29068_v42 }
0x16e6   :  { %14915 = vmatpush1.bf16.msra.mxu0 %v29069_v33 }
0x16e7   :  { %14916 = vmatprep.subr.bf16.mxu0 %v29070_v9 }
0x16ea   :  { %14917 = vmatpush1.bf16.msra.mxu0 %v29071_v34 }
0x16eb   :  { %14918 = vmatprep.subr.bf16.mxu0 %v29072_v56 }
0x16ee   :  { %14919 = vmatpush1.bf16.msra.mxu0 %v29073_v47 }
0x16ef   :  { %14920 = vmatprep.subr.bf16.mxu0 %v29074_v14 }
0x16f2   :  { %14921 = vmatpush1.bf16.msra.mxu0 %v29075_v58 }
0x16f3   :  { %14922 = vmatprep.subr.bf16.mxu0 %v29076_v12 }
0x16f6   :  { %14923 = vmatpush1.bf16.msra.mxu0 %v29077_v37 }
0x16f7   :  { %14924 = vmatprep.subr.bf16.mxu0 %v29078_v50 }
0x16fa   :  { %14925 = vmatpush1.bf16.msra.mxu0 %v29079_v4 }
0x16fb   :  { %14937 = vmatprep.subr.bf16.mxu0 %v29080_v54 }
0x1770   :  { %v18798_v38 = vpop.f32.mrb[228].mxu0 }
0x1771   :  { %v18799_v40 = vpop.f32.mrb[229].mxu0 }
0x1772   :  { %v18800_v49 = vadd.f32 %v18799_v40, %v18798_v38  ;;  %v18801_v32 = vpop.f32.mrb[230].mxu0 }
0x1773   :  { %v18802_v19 = vpop.f32.mrb[231].mxu0 }
0x1774   :  { %v18803_v51 = vadd.f32 %v18802_v19, %v18801_v32  ;;  %v21420_v32 = vld [vmem:[%s28531_s3 + $0x518] ss:$12 sps:$4 sm:$0xff]  }
0x1775   :  { %v21421_v19 = vld [vmem:[%s28531_s3 + $0x52c] ss:$12 sps:$4 sm:$0xff]  }
0x1790   :  { %v14779_v52 = vpop.f32.mrb[232].mxu1  ;;  %v14863_v55 = vpop.f32.mrb[232].mxu0 }
0x1791   :  { %v14870_v22 = vadd.f32 %v14779_v52, %v14693_v2  ;;  %v14864_v5 = vadd.f32 %v18800_v49, %v14863_v55  ;;  %v14781_v17 = vpop.f32.mrb[233].mxu1  ;;  %v19432_v31 = vpop.f32.mrb[233].mxu0  ;;  %v21424_v2 = vld [vmem:[%s28531_s3 + $0x530] ss:$12 sps:$4 sm:$0xff]   ;;  %v21426_v55 = vld [vmem:[%s28531_s3 + $0x540] ss:$12 sps:$4 sm:$0xff]  }
0x1792   :  { %v14871_v28 = vadd.f32 %v14781_v17, %v14694_v6  ;;  %v14783_v8 = vpop.f32.mrb[234].mxu1  ;;  %v14866_v24 = vpop.f32.mrb[234].mxu0  ;;  %v21425_v52 = vld [vmem:[%s28531_s3 + $0x544] ss:$12 sps:$4 sm:$0xff]   ;;  %v21434_v31 = vld [vmem:[%s28531_s3 + $0x5a0] ss:$12 sps:$4 sm:$0xff]  }
0x1793   :  { %21269 = vtanh.f32 %v14870_v22  ;;  %v14872_v42 = vadd.f32 %v14864_v5, %v14695_v10  ;;  %v14873_v33 = vadd.f32 %v14783_v8, %v14696_v62  ;;  %v14867_v9 = vadd.f32 %v18803_v51, %v14866_v24  ;;  %v14785_v34 = vpop.f32.mrb[235].mxu1  ;;  %v19433_v56 = vpop.f32.mrb[235].mxu0  ;;  %v21422_v51 = vld [vmem:[%s28531_s3 + $0x5f0] ss:$12 sps:$4 sm:$0xff]   ;;  %v21428_v6 = vld [vmem:[%s28531_s3 + $0x558] ss:$12 sps:$4 sm:$0xff]  }
0x1794   :  { %21271 = vtanh.f32 %v14871_v28  ;;  %v14874_v47 = vadd.f32 %v14785_v34, %v14697_v39  ;;  %v21429_v22 = vld [vmem:[%s28531_s3 + $0x574] ss:$12 sps:$4 sm:$0xff]   ;;  %v21431_v10 = vld [vmem:[%s28531_s3 + $0x58c] ss:$12 sps:$4 sm:$0xff]   ;;  %v21433_v17 = vld [vmem:[%s28531_s3 + $0x5a4] ss:$12 sps:$4 sm:$0xff]  }
0x1795   :  { %21273 = vtanh.f32 %v14872_v42  ;;  %v14875_v14 = vadd.f32 %v14867_v9, %v14698_v29  ;;  %v21432_v5 = vld [vmem:[%s28531_s3 + $0x588] ss:$12 sps:$4 sm:$0xff]   ;;  %v21436_v28 = vld [vmem:[%s28531_s3 + $0x5b8] ss:$12 sps:$4 sm:$0xff]   ;;  %v21438_v29 = vld [vmem:[%s28531_s3 + $0x5d0] ss:$12 sps:$4 sm:$0xff]  }
0x1796   :  { %21275 = vtanh.f32 %v14873_v33  ;;  %v21435_v62 = vld [vmem:[%s28531_s3 + $0x5bc] ss:$12 sps:$4 sm:$0xff]   ;;  %v21437_v8 = vld [vmem:[%s28531_s3 + $0x5d4] ss:$12 sps:$4 sm:$0xff]   ;;  %v21439_v24 = vld [vmem:[%s28531_s3 + $0x5ec] ss:$12 sps:$4 sm:$0xff]  }
0x1797   :  { %21277 = vtanh.f32 %v14875_v14  ;;  %v21440_v39 = vld [vmem:[%s28531_s3 + $0x5e8] ss:$12 sps:$4 sm:$0xff]   ;;  %v21441_v42 = vld [vmem:[%s28531_s3 + $0x604] ss:$12 sps:$4 sm:$0xff]  }
0x1798   :  { %21279 = vtanh.f32 %v14874_v47 }
0x179d   :  { %v21270_v58 = vpop.eup %21269 }
0x179e   :  { %v21272_v12 = vpop.eup %21271 }
0x179f   :  { %v21274_v37 = vpop.eup %21273 }
0x17a0   :  { %v21276_v50 = vpop.eup %21275 }
0x17a1   :  { %v21278_v4 = vpop.eup %21277  ;;  %v14891_v54 = vpack.c.bf16 %v21276_v50, %v21270_v58  ;;  %v29084_v58 = vld [vmem:[#allocation56_spill] sm:$0xff] }
0x17a2   :  { %v21280_v38 = vpop.eup %21279  ;;  %v14893_v40 = vpack.c.bf16 %v21278_v4, %v21274_v37  ;;  %v29085_v4 = vld [vmem:[#allocation57_spill] sm:$0xff] }
0x17a3   :  { %v14892_v49 = vpack.c.bf16 %v21280_v38, %v21272_v12  ;;  %v14885_v12 = vunpack.c.l.bf16 %v29084_v58 }
0x17a5   :  { %14926 = vmatprep.mubr.bf16.mxu0 %v14892_v49  ;;  %15012 = vmatprep.mubr.bf16.mxu1 %v14892_v49 }
0x17a6   :  { %14927 = vmatmul.mubr.bf16.vlgmr.msra.gmra.mrb[236].mxu0 %v14891_v54  ;;  %15013 = vmatmul.mubr.bf16.vlgmr.msra.gmra.mrb[236].mxu1 %v14891_v54  ;;  %v14886_v54 = vunpack.c.l.bf16 %v29085_v4 }
0x17a7   :  { %14938 = vmatpush1.bf16.msra.mxu0 %v27779_v60  ;;  %19435 = vmatpush3.bf16.msra.mxu1 %v27785_v30  ;;  %v21395_v60 = vld [vmem:[%s28531_s3 + $0x480] ss:$12 sps:$4 sm:$0xff]   ;;  %v21396_v30 = vld [vmem:[%s28531_s3 + $0x488] ss:$12 sps:$4 sm:$0xff]  }
0x17a8   :  { %14939 = vmatprep.subr.bf16.mxu0 %v27791_v26  ;;  %19436 = vmatprep.subr.bf16.mxu1 %v28771_v44  ;;  %v21397_v26 = vld [vmem:[%s28531_s3 + $0x49c] ss:$12 sps:$4 sm:$0xff]  }
0x17a9   :  { %14969 = vmatprep.mubr.bf16.mxu0 %v28772_v18  ;;  %19450 = vmatprep.mubr.msk.bf16.mxu1 %vm21467_vm1, %v28771_v44 }
0x17ab   :  { %14940 = vmatpush1.bf16.msra.mxu0 %v27801_v15  ;;  %19437 = vmatpush3.bf16.msra.mxu1 %v27807_v21  ;;  %v21398_v15 = vld [vmem:[%s28531_s3 + $0x560] ss:$12 sps:$4 sm:$0xff]   ;;  %v21399_v21 = vld [vmem:[%s28531_s3 + $0x498] ss:$12 sps:$4 sm:$0xff]  }
0x17ac   :  { %14941 = vmatprep.subr.bf16.mxu0 %v27813_v13  ;;  %19438 = vmatprep.subr.bf16.mxu1 %v28771_v44  ;;  %v21400_v13 = vld [vmem:[%s28531_s3 + $0x4a0] ss:$12 sps:$4 sm:$0xff]  }
0x17af   :  { %14942 = vmatpush1.bf16.msra.mxu0 %v27820_v48  ;;  %19439 = vmatpush3.bf16.msra.mxu1 %v27826_v0  ;;  %v21401_v48 = vld [vmem:[%s28531_s3 + $0x4b4] ss:$12 sps:$4 sm:$0xff]   ;;  %v21402_v0 = vld [vmem:[%s28531_s3 + $0x578] ss:$12 sps:$4 sm:$0xff]  }
0x17b0   :  { %14943 = vmatprep.subr.bf16.mxu0 %v27832_v53  ;;  %19440 = vmatprep.subr.bf16.mxu1 %v28771_v44  ;;  %v21403_v53 = vld [vmem:[%s28531_s3 + $0x4b0] ss:$12 sps:$4 sm:$0xff]  }
0x17b3   :  { %14944 = vmatpush1.bf16.msra.mxu0 %v27839_v43  ;;  %19441 = vmatpush3.bf16.msra.mxu1 %v27845_v25  ;;  %v21404_v43 = vld [vmem:[%s28531_s3 + $0x4b8] ss:$12 sps:$4 sm:$0xff]  }
0x17b4   :  { %14945 = vmatprep.subr.bf16.mxu0 %v27851_v3  ;;  %19442 = vmatprep.subr.bf16.mxu1 %v28771_v44  ;;  %v21405_v25 = vld [vmem:[%s28531_s3 + $0x4cc] ss:$12 sps:$4 sm:$0xff]   ;;  %v21406_v3 = vld [vmem:[%s28531_s3 + $0x590] ss:$12 sps:$4 sm:$0xff]  }
0x17b7   :  { %14946 = vmatpush1.bf16.msra.mxu0 %v27858_v20  ;;  %19443 = vmatpush3.bf16.msra.mxu1 %v27864_v45  ;;  %v21407_v20 = vld [vmem:[%s28531_s3 + $0x4c8] ss:$12 sps:$4 sm:$0xff]   ;;  %v21408_v45 = vld [vmem:[%s28531_s3 + $0x4d0] ss:$12 sps:$4 sm:$0xff]  }
0x17b8   :  { %14947 = vmatprep.subr.bf16.mxu0 %v27870_v57  ;;  %19444 = vmatprep.subr.bf16.mxu1 %v28771_v44  ;;  %v21409_v57 = vld [vmem:[%s28531_s3 + $0x4e4] ss:$12 sps:$4 sm:$0xff]  }
0x17bb   :  { %14948 = vmatpush1.bf16.msra.mxu0 %v27877_v41  ;;  %19445 = vmatpush3.bf16.msra.mxu1 %v27883_v63  ;;  %v21410_v41 = vld [vmem:[%s28531_s3 + $0x5a8] ss:$12 sps:$4 sm:$0xff]   ;;  %v21411_v63 = vld [vmem:[%s28531_s3 + $0x4e0] ss:$12 sps:$4 sm:$0xff]  }
0x17bc   :  { %14949 = vmatprep.subr.bf16.mxu0 %v27889_v16  ;;  %19446 = vmatprep.subr.bf16.mxu1 %v28771_v44  ;;  %v21412_v16 = vld [vmem:[%s28531_s3 + $0x4e8] ss:$12 sps:$4 sm:$0xff]  }
0x17bf   :  { %14950 = vmatpush1.bf16.msra.mxu0 %v27896_v35  ;;  %19447 = vmatpush3.bf16.msra.mxu1 %v27902_v36  ;;  %v21413_v35 = vld [vmem:[%s28531_s3 + $0x4fc] ss:$12 sps:$4 sm:$0xff]   ;;  %v21414_v36 = vld [vmem:[%s28531_s3 + $0x5c0] ss:$12 sps:$4 sm:$0xff]  }
0x17c0   :  { %14951 = vmatprep.subr.bf16.mxu0 %v27908_v11  ;;  %19448 = vmatprep.subr.bf16.mxu1 %v28771_v44  ;;  %v21415_v11 = vld [vmem:[%s28531_s3 + $0x4f8] ss:$12 sps:$4 sm:$0xff]  }
0x17c3   :  { %14952 = vmatpush1.bf16.msra.mxu0 %v27915_v1  ;;  %19449 = vmatpush3.bf16.msra.mxu1 %v27921_v59  ;;  %v21416_v1 = vld [vmem:[%s28531_s3 + $0x500] ss:$12 sps:$4 sm:$0xff]  }
0x17c4   :  { %15086 = vmatprep.subr.bf16.mxu1 %v28107_v7  ;;  %18844 = vmatprep.subr.bf16.mxu0 %v28113_v27  ;;  %v21417_v59 = vld [vmem:[%s28531_s3 + $0x514] ss:$12 sps:$4 sm:$0xff]   ;;  %v21418_v7 = vld [vmem:[%s28531_s3 + $0x5d8] ss:$12 sps:$4 sm:$0xff]   ;;  %v21419_v27 = vld [vmem:[%s28531_s3 + $0x510] ss:$12 sps:$4 sm:$0xff]  }
0x17c6   :  { %14970 = vmatmul.mubr.bf16.vlgmr.msra.gmra.mrb[236].mxu0 %v14893_v40  ;;  %19451 = vmatmul.mubr.bf16.vlgmr.msra.gmra.mrb[240].mxu1 %v14893_v40  ;;  %v29086_v40 = vld [vmem:[#allocation30_spill] sm:$0xff] }
0x17c7   :  { %15087 = vmatpush1.bf16.msra.mxu1 %v21395_v60  ;;  %18845 = vmatpush3.bf16.msra.mxu0 %v21396_v30  ;;  %v14887_v49 = vunpack.c.l.bf16 %v29086_v40 }
0x17c8   :  { %15088 = vmatprep.subr.bf16.mxu1 %v21397_v26  ;;  %18846 = vmatprep.subr.bf16.mxu0 %v21398_v15  ;;  %v14888_v15 = vunpack.c.h.bf16 %v29084_v58  ;;  %v20999_v58 = vld [vmem:[%s28534_s5 + $0x50] sm:$0xff]  }
0x17cb   :  { %15089 = vmatpush1.bf16.msra.mxu1 %v21399_v21  ;;  %18847 = vmatpush3.bf16.msra.mxu0 %v21400_v13 }
0x17cc   :  { %15090 = vmatprep.subr.bf16.mxu1 %v21401_v48  ;;  %18848 = vmatprep.subr.bf16.mxu0 %v21402_v0  ;;  %v14890_v48 = vunpack.c.h.bf16 %v29086_v40  ;;  %v21006_v40 = vld [vmem:[%s28534_s5 + $0x20] sm:$0xff]  }
0x17cf   :  { %15091 = vmatpush1.bf16.msra.mxu1 %v21403_v53  ;;  %18849 = vmatpush3.bf16.msra.mxu0 %v21404_v43  ;;  %v14889_v53 = vunpack.c.h.bf16 %v29085_v4  ;;  %v21003_v4 = vld [vmem:[%s28534_s5 + $0x18] sm:$0xff]  }
0x17d0   :  { %15092 = vmatprep.subr.bf16.mxu1 %v21405_v25  ;;  %18850 = vmatprep.subr.bf16.mxu0 %v21406_v3 }
0x17d3   :  { %15093 = vmatpush1.bf16.msra.mxu1 %v21407_v20  ;;  %18851 = vmatpush3.bf16.msra.mxu0 %v21408_v45 }
0x17d4   :  { %15094 = vmatprep.subr.bf16.mxu1 %v21409_v57  ;;  %18852 = vmatprep.subr.bf16.mxu0 %v21410_v41 }
0x17d7   :  { %15095 = vmatpush1.bf16.msra.mxu1 %v21411_v63  ;;  %18853 = vmatpush3.bf16.msra.mxu0 %v21412_v16 }
0x17d8   :  { %15096 = vmatprep.subr.bf16.mxu1 %v21413_v35  ;;  %18854 = vmatprep.subr.bf16.mxu0 %v21414_v36 }
0x17db   :  { %15097 = vmatpush1.bf16.msra.mxu1 %v21415_v11  ;;  %18855 = vmatpush3.bf16.msra.mxu0 %v21416_v1 }
0x17dc   :  { %15098 = vmatprep.subr.bf16.mxu1 %v21417_v59  ;;  %18856 = vmatprep.subr.bf16.mxu0 %v21418_v7 }
0x17df   :  { %15099 = vmatpush1.bf16.msra.mxu1 %v21419_v27  ;;  %18857 = vmatpush3.bf16.msra.mxu0 %v21420_v32  ;;  %v21442_v32 = vld [vmem:[%s28531_s3 + $0x600] ss:$12 sps:$4 sm:$0xff]  }
0x17e0   :  { %15100 = vmatprep.subr.bf16.mxu1 %v21421_v19  ;;  %18858 = vmatprep.subr.bf16.mxu0 %v21422_v51  ;;  %v21443_v19 = vld [vmem:[%s28531_s3 + $0x608] ss:$12 sps:$4 sm:$0xff]  }
0x17e1   :  { %v21444_v51 = vld [vmem:[%s28531_s3 + $0x61c] ss:$12 sps:$4 sm:$0xff]  }
0x17e3   :  { %15101 = vmatpush1.bf16.msra.mxu1 %v21423_v23  ;;  %18859 = vmatpush3.bf16.msra.mxu0 %v21424_v2  ;;  %v21445_v23 = vld [vmem:[%s28531_s3 + $0x618] ss:$12 sps:$4 sm:$0xff]   ;;  %v21446_v2 = vld [vmem:[%s28531_s3 + $0x620] ss:$12 sps:$4 sm:$0xff]  }
0x17e4   :  { %15102 = vmatprep.subr.bf16.mxu1 %v21425_v52  ;;  %19454 = vmatprep.subr.bf16.mxu0 %v28771_v44  ;;  %v21447_v52 = vld [vmem:[%s28531_s3 + $0x634] ss:$12 sps:$4 sm:$0xff]  }
0x17e7   :  { %15103 = vmatpush1.bf16.msra.mxu1 %v21426_v55  ;;  %v21449_v55 = vld [vmem:[%s28531_s3 + $0x638] ss:$12 sps:$4 sm:$0xff]  }
0x17e8   :  { %15104 = vmatprep.subr.bf16.mxu1 %v21427_v46  ;;  %v21450_v46 = vld [vmem:[%s28531_s3 + $0x64c] ss:$12 sps:$4 sm:$0xff]  }
0x17eb   :  { %15105 = vmatpush1.bf16.msra.mxu1 %v21428_v6  ;;  %v21451_v6 = vld [vmem:[%s28531_s3 + $0x648] ss:$12 sps:$4 sm:$0xff]  }
0x17ec   :  { %15106 = vmatprep.subr.bf16.mxu1 %v21429_v22  ;;  %v21452_v22 = vld [vmem:[%s28531_s3 + $0x650] ss:$12 sps:$4 sm:$0xff]  }
0x17ef   :  { %15107 = vmatpush1.bf16.msra.mxu1 %v21430_v61  ;;  %v21453_v61 = vld [vmem:[%s28531_s3 + $0x664] ss:$12 sps:$4 sm:$0xff]  }
0x17f0   :  { %15108 = vmatprep.subr.bf16.mxu1 %v21431_v10  ;;  %v21454_v10 = vld [vmem:[%s28531_s3 + $0x660] ss:$12 sps:$4 sm:$0xff]  }
0x17f3   :  { %15109 = vmatpush1.bf16.msra.mxu1 %v21432_v5  ;;  %v21455_v5 = vld [vmem:[%s28531_s3 + $0x668] ss:$12 sps:$4 sm:$0xff]  }
0x17f4   :  { %15110 = vmatprep.subr.bf16.mxu1 %v21433_v17  ;;  %v21456_v17 = vld [vmem:[%s28531_s3 + $0x67c] ss:$12 sps:$4 sm:$0xff]  }
0x17f7   :  { %15111 = vmatpush1.bf16.msra.mxu1 %v21434_v31  ;;  %v21457_v31 = vld [vmem:[%s28531_s3 + $0x678] ss:$12 sps:$4 sm:$0xff]  }
0x17f8   :  { %15112 = vmatprep.subr.bf16.mxu1 %v21435_v62  ;;  %v21458_v62 = vld [vmem:[%s28531_s3 + $0x680] ss:$12 sps:$4 sm:$0xff]  }
0x17fb   :  { %15113 = vmatpush1.bf16.msra.mxu1 %v21436_v28  ;;  %v21459_v28 = vld [vmem:[%s28531_s3 + $0x694] ss:$12 sps:$4 sm:$0xff]  }
0x17fc   :  { %15114 = vmatprep.subr.bf16.mxu1 %v21437_v8  ;;  %v21460_v8 = vld [vmem:[%s28531_s3 + $0x690] ss:$12 sps:$4 sm:$0xff]  }
0x17ff   :  { %15115 = vmatpush1.bf16.msra.mxu1 %v21438_v29  ;;  %v21461_v29 = vld [vmem:[%s28531_s3 + $0x698] ss:$12 sps:$4 sm:$0xff]  }
0x1800   :  { %15116 = vmatprep.subr.bf16.mxu1 %v21439_v24  ;;  %v21462_v24 = vld [vmem:[%s28531_s3 + $0x6ac] ss:$12 sps:$4 sm:$0xff]  }
0x1803   :  { %15117 = vmatpush1.bf16.msra.mxu1 %v21440_v39  ;;  %v21463_v39 = vld [vmem:[%s28531_s3 + $0x6a8] ss:$12 sps:$4 sm:$0xff]  }
0x1804   :  { %15129 = vmatprep.subr.bf16.mxu1 %v21441_v42  ;;  %v21464_v42 = vld [vmem:[%s28531_s3 + $0x6b0] ss:$12 sps:$4 sm:$0xff]  }
0x1879   :  { %v18829_v33 = vpop.f32.mrb[236].mxu1 }
0x187a   :  { %v18830_v9 = vpop.f32.mrb[237].mxu1 }
0x187b   :  { %v18831_v34 = vadd.f32 %v18830_v9, %v18829_v33  ;;  %v18832_v56 = vpop.f32.mrb[238].mxu1  ;;  %v20993_v33 = vld [vmem:[%s28534_s5 + $0x40] sm:$0xff]  }
0x187c   :  { %v18833_v47 = vpop.f32.mrb[239].mxu1  ;;  %v20994_v9 = vld [vmem:[%s28534_s5] sm:$0xff]  }
0x187d   :  { %v18834_v14 = vadd.f32 %v18833_v47, %v18832_v56  ;;  %v20996_v56 = vld [vmem:[%s28534_s5 + $0x48] sm:$0xff]  }
0x187e   :  { %v20997_v47 = vld [vmem:[%s28534_s5 + $0x8] sm:$0xff]  }
0x1899   :  { %v14971_v37 = vpop.f32.mrb[236].mxu0  ;;  %v15055_v50 = vpop.f32.mrb[240].mxu1 }
0x189a   :  { %v15062_v38 = vadd.f32 %v14971_v37, %v14885_v12  ;;  %v15056_v60 = vadd.f32 %v18831_v34, %v15055_v50  ;;  %v14973_v30 = vpop.f32.mrb[237].mxu0  ;;  %v19452_v26 = vpop.f32.mrb[241].mxu1  ;;  %v20995_v34 = vld [vmem:[%s28534_s5 + $0x80] sm:$0xff]   ;;  %v21000_v12 = vld [vmem:[%s28534_s5 + $0x10] sm:$0xff]   ;;  %v21002_v50 = vld [vmem:[%s28534_s5 + $0x58] sm:$0xff]  }
0x189b   :  { %v15063_v21 = vadd.f32 %v14973_v30, %v14886_v54  ;;  %v14975_v13 = vpop.f32.mrb[238].mxu0  ;;  %v15058_v0 = vpop.f32.mrb[242].mxu1  ;;  %v21001_v37 = vld [vmem:[%s28534_s5 + $0x90] sm:$0xff]   ;;  %v21004_v54 = vld [vmem:[%s28534_s5 + $0x98] sm:$0xff]   ;;  %v21009_v30 = vld [vmem:[%s28534_s5 + $0x28] sm:$0xff]  }
0x189c   :  { %21281 = vtanh.f32 %v15062_v38  ;;  %v15064_v43 = vadd.f32 %v15056_v60, %v14887_v49  ;;  %v15065_v25 = vadd.f32 %v14975_v13, %v14888_v15  ;;  %v15059_v3 = vadd.f32 %v18834_v14, %v15058_v0  ;;  %v14977_v20 = vpop.f32.mrb[239].mxu0  ;;  %v19453_v45 = vpop.f32.mrb[243].mxu1  ;;  %v20998_v14 = vld [vmem:[%s28534_s5 + $0x88] sm:$0xff]   ;;  %v21005_v38 = vld [vmem:[%s28534_s5 + $0x60] sm:$0xff]   ;;  %v21011_v15 = vld [vmem:[%s28534_s5 + $0x70] sm:$0xff]  }
0x189d   :  { %21283 = vtanh.f32 %v15063_v21  ;;  %v15066_v57 = vadd.f32 %v14977_v20, %v14889_v53  ;;  %v21007_v49 = vld [vmem:[%s28534_s5 + $0xa0] sm:$0xff]   ;;  %v21008_v60 = vld [vmem:[%s28534_s5 + $0x68] sm:$0xff]   ;;  %v21012_v21 = vld [vmem:[%s28534_s5 + $0x30] sm:$0xff]  }
0x189e   :  { %21285 = vtanh.f32 %v15064_v43  ;;  %v15067_v41 = vadd.f32 %v15059_v3, %v14890_v48  ;;  %v21010_v26 = vld [vmem:[%s28534_s5 + $0xa8] sm:$0xff]   ;;  %v21013_v13 = vld [vmem:[%s28534_s5 + $0xb0] sm:$0xff]   ;;  %v21014_v48 = vld [vmem:[%s28534_s5 + $0x78] sm:$0xff]  }
0x189f   :  { %21287 = vtanh.f32 %v15065_v25  ;;  %v21015_v0 = vld [vmem:[%s28534_s5 + $0x38] sm:$0xff]  }
0x18a0   :  { %21289 = vtanh.f32 %v15067_v41  ;;  %v21016_v53 = vld [vmem:[%s28534_s5 + $0xb8] sm:$0xff]   ;;  %v29087_v41 = vld [vmem:[#allocation58_spill] sm:$0xff] }
0x18a1   :  { %21291 = vtanh.f32 %v15066_v57 }
0x18a6   :  { %v21282_v63 = vpop.eup %21281 }
0x18a7   :  { %v21284_v16 = vpop.eup %21283 }
0x18a8   :  { %v21286_v35 = vpop.eup %21285 }
0x18a9   :  { %v21288_v36 = vpop.eup %21287 }
0x18aa   :  { %v21290_v11 = vpop.eup %21289  ;;  %v15083_v1 = vpack.c.bf16 %v21288_v36, %v21282_v63  ;;  %v15077_v63 = vunpack.c.l.bf16 %v29087_v41  ;;  %v29088_v36 = vld [vmem:[#allocation59_spill] sm:$0xff] }
0x18ab   :  { %v21292_v59 = vpop.eup %21291  ;;  %v15085_v7 = vpack.c.bf16 %v21290_v11, %v21286_v35  ;;  %v15078_v11 = vunpack.c.l.bf16 %v29088_v36 }
0x18ac   :  { %v15084_v27 = vpack.c.bf16 %v21292_v59, %v21284_v16  ;;  %v29089_v59 = vld [vmem:[#allocation9_spill] sm:$0xff] }
0x18ae   :  { %15118 = vmatprep.mubr.bf16.mxu1 %v15084_v27  ;;  %15204 = vmatprep.mubr.bf16.mxu0 %v15084_v27 }
0x18af   :  { %15119 = vmatmul.mubr.bf16.vlgmr.msra.gmra.mrb[244].mxu1 %v15083_v1  ;;  %15205 = vmatmul.mubr.bf16.vlgmr.msra.gmra.mrb[240].mxu0 %v15083_v1 }
0x18b0   :  { %15130 = vmatpush1.bf16.msra.mxu1 %v21442_v32  ;;  %19455 = vmatpush3.bf16.msra.mxu0 %v21443_v19  ;;  %v15080_v19 = vunpack.c.h.bf16 %v29087_v41 }
0x18b1   :  { %15131 = vmatprep.subr.bf16.mxu1 %v21444_v51  ;;  %19456 = vmatprep.subr.bf16.mxu0 %v28771_v44 }
0x18b2   :  { %15161 = vmatprep.mubr.bf16.mxu1 %v28772_v18  ;;  %19470 = vmatprep.mubr.msk.bf16.mxu0 %vm21467_vm1, %v28771_v44  ;;  %v21448_v18 = vld [vmem:[%s28531_s3 + $0x630] ss:$12 sps:$4 sm:$0xff]  }
0x18b4   :  { %15132 = vmatpush1.bf16.msra.mxu1 %v21445_v23  ;;  %19457 = vmatpush3.bf16.msra.mxu0 %v21446_v2  ;;  %v15082_v2 = vunpack.c.h.bf16 %v29089_v59 }
0x18b5   :  { %15133 = vmatprep.subr.bf16.mxu1 %v21447_v52  ;;  %19458 = vmatprep.subr.bf16.mxu0 %v28771_v44 }
0x18b8   :  { %15134 = vmatpush1.bf16.msra.mxu1 %v21448_v18  ;;  %19459 = vmatpush3.bf16.msra.mxu0 %v21449_v55  ;;  %v15081_v18 = vunpack.c.h.bf16 %v29088_v36 }
0x18b9   :  { %15135 = vmatprep.subr.bf16.mxu1 %v21450_v46  ;;  %19460 = vmatprep.subr.bf16.mxu0 %v28771_v44 }
0x18bc   :  { %15136 = vmatpush1.bf16.msra.mxu1 %v21451_v6  ;;  %19461 = vmatpush3.bf16.msra.mxu0 %v21452_v22 }
0x18bd   :  { %15137 = vmatprep.subr.bf16.mxu1 %v21453_v61  ;;  %19462 = vmatprep.subr.bf16.mxu0 %v28771_v44 }
0x18c0   :  { %15138 = vmatpush1.bf16.msra.mxu1 %v21454_v10  ;;  %19463 = vmatpush3.bf16.msra.mxu0 %v21455_v5 }
0x18c1   :  { %15139 = vmatprep.subr.bf16.mxu1 %v21456_v17  ;;  %19464 = vmatprep.subr.bf16.mxu0 %v28771_v44 }
0x18c4   :  { %15140 = vmatpush1.bf16.msra.mxu1 %v21457_v31  ;;  %19465 = vmatpush3.bf16.msra.mxu0 %v21458_v62 }
0x18c5   :  { %15141 = vmatprep.subr.bf16.mxu1 %v21459_v28  ;;  %19466 = vmatprep.subr.bf16.mxu0 %v28771_v44 }
0x18c8   :  { %15142 = vmatpush1.bf16.msra.mxu1 %v21460_v8  ;;  %19467 = vmatpush3.bf16.msra.mxu0 %v21461_v29 }
0x18c9   :  { %15143 = vmatprep.subr.bf16.mxu1 %v21462_v24  ;;  %19468 = vmatprep.subr.bf16.mxu0 %v28771_v44 }
0x18cc   :  { %15144 = vmatpush1.bf16.msra.mxu1 %v21463_v39  ;;  %19469 = vmatpush3.bf16.msra.mxu0 %v21464_v42 }
0x18cd   :  { %19474 = vmatprep.subr.bf16.mxu1 %v28771_v44  ;;  %18875 = vmatprep.subr.bf16.mxu0 %v20993_v33 }
0x18cf   :  { %15162 = vmatmul.mubr.bf16.vlgmr.msra.gmra.mrb[244].mxu1 %v15085_v7  ;;  %19471 = vmatmul.mubr.bf16.vlgmr.msra.gmra.mrb[244].mxu0 %v15085_v7  ;;  %v15079_v7 = vunpack.c.l.bf16 %v29089_v59 }
0x18d0   :  { %19490 = vmatprep.mubr.msk.bf16.mxu1 %vm21467_vm1, %v28771_v44  ;;  %18876 = vmatpush3.bf16.msra.mxu0 %v20994_v9 }
0x18d1   :  { %19475 = vmatpush3.bf16.msra.mxu1 %v20995_v34  ;;  %18877 = vmatprep.subr.bf16.mxu0 %v20996_v56 }
0x18d2   :  { %19476 = vmatprep.subr.bf16.mxu1 %v28771_v44 }
0x18d4   :  { %18878 = vmatpush3.bf16.msra.mxu0 %v20997_v47  ;;  %v17934_v47 = vld [vmem:[%s28535_s6] ss:$0 sm:$0xff] }
0x18d5   :  { %19477 = vmatpush3.bf16.msra.mxu1 %v20998_v14  ;;  %18879 = vmatprep.subr.bf16.mxu0 %v20999_v58 }
0x18d6   :  { %19478 = vmatprep.subr.bf16.mxu1 %v28771_v44 }
0x18d8   :  { %18880 = vmatpush3.bf16.msra.mxu0 %v21000_v12 }
0x18d9   :  { %19479 = vmatpush3.bf16.msra.mxu1 %v21001_v37  ;;  %18881 = vmatprep.subr.bf16.mxu0 %v21002_v50 }
0x18da   :  { %19480 = vmatprep.subr.bf16.mxu1 %v28771_v44 }
0x18dc   :  { %18882 = vmatpush3.bf16.msra.mxu0 %v21003_v4 }
0x18dd   :  { %19481 = vmatpush3.bf16.msra.mxu1 %v21004_v54  ;;  %18883 = vmatprep.subr.bf16.mxu0 %v21005_v38 }
0x18de   :  { %19482 = vmatprep.subr.bf16.mxu1 %v28771_v44 }
0x18e0   :  { %18884 = vmatpush3.bf16.msra.mxu0 %v21006_v40 }
0x18e1   :  { %19483 = vmatpush3.bf16.msra.mxu1 %v21007_v49  ;;  %18885 = vmatprep.subr.bf16.mxu0 %v21008_v60 }
0x18e2   :  { %19484 = vmatprep.subr.bf16.mxu1 %v28771_v44 }
0x18e4   :  { %18886 = vmatpush3.bf16.msra.mxu0 %v21009_v30 }
0x18e5   :  { %19485 = vmatpush3.bf16.msra.mxu1 %v21010_v26  ;;  %18887 = vmatprep.subr.bf16.mxu0 %v21011_v15 }
0x18e6   :  { %19486 = vmatprep.subr.bf16.mxu1 %v28771_v44 }
0x18e8   :  { %18888 = vmatpush3.bf16.msra.mxu0 %v21012_v21 }
0x18e9   :  { %19487 = vmatpush3.bf16.msra.mxu1 %v21013_v13  ;;  %18889 = vmatprep.subr.bf16.mxu0 %v21014_v48 }
0x18ea   :  { %19488 = vmatprep.subr.bf16.mxu1 %v28771_v44 }
0x18ec   :  { %18890 = vmatpush3.bf16.msra.mxu0 %v21015_v0 }
0x18ed   :  { %19489 = vmatpush3.bf16.msra.mxu1 %v21016_v53 }
0x1982   :  { %v18860_v43 = vpop.f32.mrb[240].mxu0 }
0x1983   :  { %v18861_v25 = vpop.f32.mrb[241].mxu0 }
0x1984   :  { %v18862_v3 = vadd.f32 %v18861_v25, %v18860_v43  ;;  %v18863_v20 = vpop.f32.mrb[242].mxu0 }
0x1985   :  { %v18864_v45 = vpop.f32.mrb[243].mxu0 }
0x1986   :  { %v18865_v57 = vadd.f32 %v18864_v45, %v18863_v20 }
0x19a2   :  { %v15163_v16 = vpop.f32.mrb[244].mxu1  ;;  %v15247_v35 = vpop.f32.mrb[244].mxu0 }
0x19a3   :  { %v15254_v1 = vadd.f32 %v15163_v16, %v15077_v63  ;;  %v15248_v27 = vadd.f32 %v18862_v3, %v15247_v35  ;;  %v15165_v32 = vpop.f32.mrb[245].mxu1  ;;  %v19472_v44 = vpop.f32.mrb[245].mxu0 }
0x19a4   :  { %v15255_v51 = vadd.f32 %v15165_v32, %v15078_v11  ;;  %v15167_v23 = vpop.f32.mrb[246].mxu1  ;;  %v15250_v52 = vpop.f32.mrb[246].mxu0 }
0x19a5   :  { %21293 = vtanh.f32 %v15254_v1  ;;  %v15256_v55 = vadd.f32 %v15248_v27, %v15079_v7  ;;  %v15257_v46 = vadd.f32 %v15167_v23, %v15080_v19  ;;  %v15251_v6 = vadd.f32 %v18865_v57, %v15250_v52  ;;  %v15169_v22 = vpop.f32.mrb[247].mxu1  ;;  %v19473_v61 = vpop.f32.mrb[247].mxu0 }
0x19a6   :  { %21295 = vtanh.f32 %v15255_v51  ;;  %v15258_v10 = vadd.f32 %v15169_v22, %v15081_v18 }
0x19a7   :  { %21297 = vtanh.f32 %v15256_v55  ;;  %v15259_v5 = vadd.f32 %v15251_v6, %v15082_v2 }
0x19a8   :  { %21299 = vtanh.f32 %v15257_v46 }
0x19a9   :  { %21301 = vtanh.f32 %v15259_v5 }
0x19aa   :  { %21303 = vtanh.f32 %v15258_v10 }
0x19af   :  { %v21294_v17 = vpop.eup %21293 }
0x19b0   :  { %v21296_v31 = vpop.eup %21295 }
0x19b1   :  { %v21298_v62 = vpop.eup %21297 }
0x19b2   :  { %v21300_v28 = vpop.eup %21299 }
0x19b3   :  { %v21302_v8 = vpop.eup %21301  ;;  %v15278_v29 = vpack.c.bf16 %v21300_v28, %v21294_v17 }
0x19b4   :  { %v21304_v24 = vpop.eup %21303  ;;  %v15280_v39 = vpack.c.bf16 %v21302_v8, %v21298_v62 }
0x19b5   :  { %v15279_v42 = vpack.c.bf16 %v21304_v24, %v21296_v31 }
0x19b6   :  { %19491 = vmatmul.mubr.bf16.vlgmr.msra.gmra.mrb[248].mxu1 %v15280_v39 }
0x19b7   :  { %15512 = vmatprep.mubr.bf16.mxu0 %v15279_v42 }
0x19b8   :  { %15513 = vmatmul.mubr.bf16.vlgmr.msra.gmra.mrb[248].mxu0 %v15278_v29 }
0x1a89   :  { %v15555_v33 = vpop.f32.mrb[248].mxu1 }
0x1a8a   :  { %v19492_v9 = vpop.f32.mrb[249].mxu1 }
0x1a8b   :  { %v18891_v34 = vpop.f32.mrb[248].mxu0  ;;  %v15558_v56 = vpop.f32.mrb[250].mxu1 }
0x1a8c   :  { %v18892_v14 = vpop.f32.mrb[249].mxu0  ;;  %v19493_v58 = vpop.f32.mrb[251].mxu1 }
0x1a8d   :  { %v18893_v12 = vadd.f32 %v18892_v14, %v18891_v34  ;;  %v18894_v37 = vpop.f32.mrb[250].mxu0 }
0x1a8e   :  { %v18895_v50 = vpop.f32.mrb[251].mxu0 }
0x1a8f   :  { %v15515_v4 = vadd.f32 %v18893_v12, %v17934_v47  ;;  %v18896_v54 = vadd.f32 %v18895_v50, %v18894_v37 }
0x1a91   :  { %v15556_v38 = vadd.f32 %v15555_v33, %v15515_v4  ;;  %v15518_v40 = vadd.f32 %v18896_v54, %v17934_v47 }
0x1a93   :  { %15562 = vst [vmem:[%s28536_s7] sm:$0xff] %v15556_v38  ;;  %v15559_v49 = vadd.f32 %v15558_v56, %v15518_v40 }
0x1a95   :  { %15563 = vst [vmem:[%s28536_s7 + $0x8] sm:$0xff] %v15559_v49 }

</bundles_post_ra>
